<compile_context>
chip_gen: v7x
topology: tpu7x:2x2x1
jax: 0.10.0
libtpu: 0.0.40
codegen_flags: <defaults>
</compile_context>

<pallas_src>
import functools

import numpy as np
import jax
import jax.numpy as jnp
from jax import lax
from jax.experimental import pallas as pl
from jax.experimental.pallas import tpu as pltpu

BN_EPS = 1e-5
LANE = 128                       # TPU lane width; pad channel dims to this
DEFAULT_TM = 512                 # rows of the M (= N*Ho*Wo) axis per grid step
VMEM_LIMIT = 32 * 1024 * 1024    # safe scoped-VMEM ceiling on v5e/v6e/v7x
ACT_DTYPE = jnp.bfloat16         # activation storage dtype between kernels

LAYER_CFG = (('layer1', 16, 1), ('layer2', 32, 2), ('layer3', 64, 2))


def _round_up(x, m):
    return (x + m - 1) // m * m


# --------------------------- Pallas kernels ---------------------------------

def _dense_bn_kernel(*refs, relu, has_res):
    """y = (x_bf16 @ w_bf16)[f32] * scale + bias [+ res] [relu]; epilogue in f32."""
    if has_res:
        x_ref, w_ref, s_ref, b_ref, r_ref, o_ref = refs
    else:
        x_ref, w_ref, s_ref, b_ref, o_ref = refs
        r_ref = None
    # bf16 MXU inputs, f32 accumulation (native path on v5e/v6e/v7x).
    y = jnp.dot(x_ref[...], w_ref[...], preferred_element_type=jnp.float32)
    y = y * s_ref[...] + b_ref[...]            # f32 VPU epilogue
    if r_ref is not None:
        y = y + r_ref[...].astype(jnp.float32)
    if relu:
        y = jnp.maximum(y, 0.0)
    o_ref[...] = y.astype(o_ref.dtype)


def _pool_fc_kernel(x_ref, w_ref, b_ref, o_ref, *, inv_hw):
    """Global average pool over the HW axis followed by the classifier matmul."""
    pooled = jnp.sum(x_ref[...].astype(jnp.float32), axis=1) * inv_hw   # (N, C), f32
    y = jnp.dot(pooled, w_ref[...], preferred_element_type=jnp.float32) + b_ref[...]
    o_ref[...] = y.astype(o_ref.dtype)


def dense_bn_pallas(x2d, w2d, scale, bias, relu, res2d=None, *,
                    tm=DEFAULT_TM, out_dtype=ACT_DTYPE):
    """(M,K)bf16 @ (K,Cp)bf16 * scale + bias (+res) (+relu) -> (Mp,Cp) out_dtype.

    Tiled over M with a real grid (auto double-buffered pipeline, megacore
    parallel).  Cp is already padded to a multiple of 128 (lane-dense stores).
    """
    M, K = x2d.shape
    Cp = w2d.shape[1]

    tm_eff = min(tm, _round_up(M, 16))
    Mp = _round_up(M, tm_eff)
    if Mp != M:
        x2d = jnp.pad(x2d, ((0, Mp - M), (0, 0)))
        if res2d is not None:
            res2d = jnp.pad(res2d, ((0, Mp - M), (0, 0)))
    grid = (Mp // tm_eff,)

    args = [x2d, w2d, scale, bias]
    in_specs = [
        pl.BlockSpec((tm_eff, K), lambda i: (i, 0)),     # patches tile (bf16)
        pl.BlockSpec((K, Cp), lambda i: (0, 0)),         # weights, resident
        pl.BlockSpec((1, Cp), lambda i: (0, 0)),         # bn scale, resident
        pl.BlockSpec((1, Cp), lambda i: (0, 0)),         # bn bias, resident
    ]
    if res2d is not None:
        args.append(res2d)
        in_specs.append(pl.BlockSpec((tm_eff, Cp), lambda i: (i, 0)))

    kern = functools.partial(_dense_bn_kernel, relu=relu, has_res=res2d is not None)

    out_bytes = 2 if out_dtype == jnp.bfloat16 else 4
    bytes_accessed = (x2d.size * 2 + w2d.size * 2 + scale.size * 4 + bias.size * 4
                      + (res2d.size * 2 if res2d is not None else 0)
                      + Mp * Cp * out_bytes)
    return pl.pallas_call(
        kern,
        grid=grid,
        in_specs=in_specs,
        out_specs=pl.BlockSpec((tm_eff, Cp), lambda i: (i, 0)),
        out_shape=jax.ShapeDtypeStruct((Mp, Cp), out_dtype),
        compiler_params=pltpu.CompilerParams(
            dimension_semantics=("parallel",),
            vmem_limit_bytes=VMEM_LIMIT),
        cost_estimate=pl.CostEstimate(
            flops=2 * Mp * K * Cp, transcendentals=0,
            bytes_accessed=int(bytes_accessed)),
    )(*args)


def pool_fc_pallas(x3d, w_t_p, b_p, num_classes):
    N, HW, C = x3d.shape
    ncp = w_t_p.shape[1]                                  # classes padded to 128
    kern = functools.partial(_pool_fc_kernel, inv_hw=1.0 / HW)
    out = pl.pallas_call(
        kern,
        grid=(1,),
        in_specs=[pl.BlockSpec((N, HW, C), lambda i: (0, 0, 0)),
                  pl.BlockSpec((C, ncp), lambda i: (0, 0)),
                  pl.BlockSpec((1, ncp), lambda i: (0, 0))],
        out_specs=pl.BlockSpec((N, ncp), lambda i: (0, 0)),
        out_shape=jax.ShapeDtypeStruct((N, ncp), jnp.float32),
        compiler_params=pltpu.CompilerParams(
            dimension_semantics=("arbitrary",),
            vmem_limit_bytes=VMEM_LIMIT),
        cost_estimate=pl.CostEstimate(
            flops=2 * N * C * ncp + N * HW * C, transcendentals=0,
            bytes_accessed=int(x3d.size * 2 + w_t_p.size * 4 + b_p.size * 4 + N * ncp * 4)),
    )(x3d, w_t_p, b_p)
    return out[:, :num_classes]


# --------------------------- JAX glue (im2col, model wiring) ----------------

def im2col(x, k, stride, pad):
    """x: (N,H,W,C) NHWC -> bf16 patches (N*Ho*Wo, k*k*C), row order (n, ho, wo)."""
    N, H, W, C = x.shape
    Ho = (H + 2 * pad - k) // stride + 1
    Wo = (W + 2 * pad - k) // stride + 1
    x = x.astype(jnp.bfloat16)                            # no-op for bf16 activations
    xp = jnp.pad(x, ((0, 0), (pad, pad), (pad, pad), (0, 0)))
    cols = []
    for kh in range(k):
        for kw in range(k):
            cols.append(xp[:, kh:kh + stride * (Ho - 1) + 1:stride,
                            kw:kw + stride * (Wo - 1) + 1:stride, :])
    patches = jnp.stack(cols, axis=3)                     # (N,Ho,Wo,k*k,C)
    return patches.reshape(N * Ho * Wo, k * k * C), (N, Ho, Wo)


def conv_bn(x, p, stride, relu, residual=None):
    """Conv(kxk, stride, pad=(k-1)//2, bias=False) + folded BN [+res] [+relu]."""
    k, _, cin, cout = p['w'].shape
    pad = (k - 1) // 2
    x2d, (N, Ho, Wo) = im2col(x, k, stride, pad)
    M = N * Ho * Wo
    cp = p['w2d'].shape[1]                                # cout padded to 128 lanes
    res2d = None
    if residual is not None:
        res2d = residual.astype(ACT_DTYPE).reshape(M, cout)
        if cp != cout:
            res2d = jnp.pad(res2d, ((0, 0), (0, cp - cout)))
    out2d = dense_bn_pallas(x2d, p['w2d'], p['scale_p'], p['bias_p'], relu, res2d)
    return out2d[:M, :cout].reshape(N, Ho, Wo, cout)      # bf16 activation, padding off


def residual_block(x, blk, stride):
    h = conv_bn(x, blk['c1'], stride=stride, relu=True)
    sc = conv_bn(x, blk['sc'], stride=stride, relu=False) if 'sc' in blk else x
    # second conv of the "left" branch: BN, then += shortcut, then final ReLU
    return conv_bn(h, blk['c2'], stride=1, relu=True, residual=sc)


@jax.jit
def resnet20_forward(x_nchw, params):
    x = jnp.transpose(x_nchw, (0, 2, 3, 1))               # NCHW -> NHWC
    out = conv_bn(x, params['conv1'], stride=1, relu=True)
    for name, _, stride0 in LAYER_CFG:
        for bi, blk in enumerate(params[name]):
            out = residual_block(out, blk, stride0 if bi == 0 else 1)
    N, H, W, C = out.shape                                # (N, 8, 8, 64)
    out3d = out.reshape(N, H * W, C)                      # avg_pool2d(., 8) == global mean
    num_classes = params['fc_w_t'].shape[1]
    return pool_fc_pallas(out3d, params['fc_w_t_p'], params['fc_b_p'], num_classes)


# --------------------------- deterministic parameter init -------------------

def make_conv_bn(key, cin, cout, k):
    kw_, kg, kb, km, kv = jax.random.split(key, 5)
    fan_in = k * k * cin
    w = jax.random.normal(kw_, (k, k, cin, cout), jnp.float32) * np.sqrt(2.0 / fan_in)
    gamma = 1.0 + 0.1 * jax.random.normal(kg, (cout,), jnp.float32)
    beta = 0.1 * jax.random.normal(kb, (cout,), jnp.float32)
    mean = 0.1 * jax.random.normal(km, (cout,), jnp.float32)
    var = jax.random.uniform(kv, (cout,), jnp.float32, 0.5, 1.5)
    scale = gamma / jnp.sqrt(var + BN_EPS)                # eval-mode BN folding
    bias = beta - mean * scale

    cp = _round_up(cout, LANE)                            # lane-dense kernel path
    w2d = jnp.pad(w.reshape(k * k * cin, cout).astype(jnp.bfloat16),
                  ((0, 0), (0, cp - cout)))
    scale_p = jnp.pad(scale.reshape(1, cout), ((0, 0), (0, cp - cout)))
    bias_p = jnp.pad(bias.reshape(1, cout), ((0, 0), (0, cp - cout)))
    return {'w': w,                                       # f32 HWIO (reference + shapes)
            'scale': scale.reshape(1, cout), 'bias': bias.reshape(1, cout),
            'w2d': w2d, 'scale_p': scale_p, 'bias_p': bias_p}


def init_params(key, num_classes=10):
    keys = jax.random.split(key, 64)
    ki = iter(keys)
    params = {'conv1': make_conv_bn(next(ki), 3, 16, 3)}
    inch = 16
    for name, ch, stride0 in LAYER_CFG:
        blocks = []
        for s in [stride0, 1, 1]:
            blk = {'c1': make_conv_bn(next(ki), inch, ch, 3),
                   'c2': make_conv_bn(next(ki), ch, ch, 3)}
            if s != 1 or inch != ch:
                blk['sc'] = make_conv_bn(next(ki), inch, ch, 1)  # 1x1 projection shortcut
            blocks.append(blk)
            inch = ch
        params[name] = blocks
    kf1, kf2 = jax.random.split(next(ki))
    fc_w = jax.random.normal(kf1, (num_classes, 64), jnp.float32) * np.sqrt(1.0 / 64)
    fc_b = 0.1 * jax.random.normal(kf2, (num_classes,), jnp.float32)
    ncp = _round_up(num_classes, LANE)
    params['fc_w_t'] = fc_w.T                             # (64, num_classes)
    params['fc_b'] = fc_b.reshape(1, num_classes)
    params['fc_w_t_p'] = jnp.pad(fc_w.T, ((0, 0), (0, ncp - num_classes)))
    params['fc_b_p'] = jnp.pad(fc_b.reshape(1, num_classes), ((0, 0), (0, ncp - num_classes)))
    return params


# --------------------------- pure-JAX reference (for verification) ----------
# Uses the same arithmetic as the kernel path (bf16 MXU inputs, f32 accumulation,
# f32 BN/residual/ReLU, bf16 activation storage between layers) so the check
# isolates Pallas wiring correctness.

def ref_conv_bn(x, p, stride, relu, residual=None):
    k = p['w'].shape[0]
    pad = (k - 1) // 2
    y = lax.conv_general_dilated(
        x.astype(jnp.bfloat16), p['w'].astype(jnp.bfloat16),
        window_strides=(stride, stride),
        padding=[(pad, pad), (pad, pad)],
        dimension_numbers=('NHWC', 'HWIO', 'NHWC'),
        preferred_element_type=jnp.float32)
    y = y * p['scale'].reshape(1, 1, 1, -1) + p['bias'].reshape(1, 1, 1, -1)
    if residual is not None:
        y = y + residual.astype(jnp.float32)
    if relu:
        y = jnp.maximum(y, 0.0)
    return y.astype(ACT_DTYPE)                            # bf16 activation storage


def ref_forward(x_nchw, params):
    x = jnp.transpose(x_nchw, (0, 2, 3, 1))
    out = ref_conv_bn(x, params['conv1'], 1, True)
    for name, _, stride0 in LAYER_CFG:
        for bi, blk in enumerate(params[name]):
            s = stride0 if bi == 0 else 1
            h = ref_conv_bn(out, blk['c1'], s, True)
            sc = ref_conv_bn(out, blk['sc'], s, False) if 'sc' in blk else out
            out = ref_conv_bn(h, blk['c2'], 1, True, residual=sc)
    pooled = jnp.mean(out.astype(jnp.float32), axis=(1, 2))
    return pooled @ params['fc_w_t'] + params['fc_b']


# --------------------------- main --------------------------------------------

if __name__ == "__main__":
    key = jax.random.PRNGKey(0)
    kp, kx = jax.random.split(key)
    params = init_params(kp, num_classes=10)

    # CIFAR-style input (NCHW, like PyTorch): 3 channels, 32x32 is required so that
    # avg_pool2d(out, 8) after two stride-2 stages is exactly a global pool.
    x = jax.random.normal(kx, (2, 3, 32, 32), jnp.float32)

    logits = jax.block_until_ready(resnet20_forward(x, params))
    ref = jax.block_until_ready(ref_forward(x, params))

    assert logits.shape == (2, 10), logits.shape
    if not np.allclose(np.asarray(logits), np.asarray(ref), atol=3e-2, rtol=3e-2):
        raise AssertionError(
            f"Pallas output mismatch vs reference, max|d|="
            f"{float(np.max(np.abs(np.asarray(logits) - np.asarray(ref))))}")
    print("KERNEL_OK")
</pallas_src>

<mosaic_0001>
module attributes {stable_mosaic.version = 11 : i64} {
  func.func @_dense_bn_kernel(%arg0: i32, %arg1: memref<512x27xbf16, #tpu.memory_space<vmem>>, %arg2: memref<27x128xbf16, #tpu.memory_space<vmem>>, %arg3: memref<1x128xf32, #tpu.memory_space<vmem>>, %arg4: memref<1x128xf32, #tpu.memory_space<vmem>>, %arg5: memref<512x128xbf16, #tpu.memory_space<vmem>>) attributes {dimension_semantics = [#tpu.dimension_semantics<parallel>], iteration_bounds = array<i64: 4>, scalar_prefetch = 0 : i64, scratch_operands = 0 : i64, tpu.core_type = #tpu.core_type<tc>, window_params = [{transform_indices = @transform_0, window_bounds = array<i64: 512, 27>}, {pipeline_mode = #tpu.pipeline_mode<synchronous>, transform_indices = @transform_1, window_bounds = array<i64: 27, 128>}, {pipeline_mode = #tpu.pipeline_mode<synchronous>, transform_indices = @transform_2, window_bounds = array<i64: 1, 128>}, {pipeline_mode = #tpu.pipeline_mode<synchronous>, transform_indices = @transform_3, window_bounds = array<i64: 1, 128>}, {transform_indices = @transform_4, window_bounds = array<i64: 512, 128>}]} {
    %c0 = arith.constant 0 : index
    %c0_0 = arith.constant 0 : index
    %0 = vector.load %arg1[%c0, %c0_0] : memref<512x27xbf16, #tpu.memory_space<vmem>>, vector<512x27xbf16>
    %c0_1 = arith.constant 0 : index
    %c0_2 = arith.constant 0 : index
    %1 = vector.load %arg2[%c0_1, %c0_2] : memref<27x128xbf16, #tpu.memory_space<vmem>>, vector<27x128xbf16>
    %cst = arith.constant dense<0.000000e+00> : vector<512x128xf32>
    %2 = tpu.matmul %0, %1, %cst {dimension_numbers = #tpu.dot_dimension_numbers<[1], [0], [0], [1], [0, 0, 1, 1], [], []>} : vector<512x27xbf16>, vector<27x128xbf16>, vector<512x128xf32> -> vector<512x128xf32>
    %c0_3 = arith.constant 0 : index
    %c0_4 = arith.constant 0 : index
    %3 = vector.load %arg3[%c0_3, %c0_4] : memref<1x128xf32, #tpu.memory_space<vmem>>, vector<1x128xf32>
    %4 = vector.broadcast %3 : vector<1x128xf32> to vector<512x128xf32>
    %5 = arith.mulf %2, %4 : vector<512x128xf32>
    %c0_5 = arith.constant 0 : index
    %c0_6 = arith.constant 0 : index
    %6 = vector.load %arg4[%c0_5, %c0_6] : memref<1x128xf32, #tpu.memory_space<vmem>>, vector<1x128xf32>
    %7 = vector.broadcast %6 : vector<1x128xf32> to vector<512x128xf32>
    %8 = arith.addf %5, %7 : vector<512x128xf32>
    %cst_7 = arith.constant 0.000000e+00 : f32
    %9 = vector.broadcast %cst_7 : f32 to vector<512x128xf32>
    %10 = arith.maximumf %8, %9 : vector<512x128xf32>
    %11 = arith.truncf %10 : vector<512x128xf32> to vector<512x128xbf16>
    %c0_8 = arith.constant 0 : index
    %c0_9 = arith.constant 0 : index
    %12 = vector.load %arg5[%c0_8, %c0_9] : memref<512x128xbf16, #tpu.memory_space<vmem>>, vector<512x128xbf16>
    tpu.vector_store %arg5[%c0_8, %c0_9], %11 {strides = array<i32>} : memref<512x128xbf16, #tpu.memory_space<vmem>>, vector<512x128xbf16>,
    return
  }
  func.func @transform_0(%arg0: i32) -> (i32, i32) {
    %c0_i32 = arith.constant 0 : i32
    %c0_i32_0 = arith.constant 0 : i32
    return %arg0, %c0_i32 : i32, i32
  }
  func.func @transform_1(%arg0: i32) -> (i32, i32) {
    %c0_i32 = arith.constant 0 : i32
    %c0_i32_0 = arith.constant 0 : i32
    %c0_i32_1 = arith.constant 0 : i32
    return %c0_i32, %c0_i32_0 : i32, i32
  }
  func.func @transform_2(%arg0: i32) -> (i32, i32) {
    %c0_i32 = arith.constant 0 : i32
    %c0_i32_0 = arith.constant 0 : i32
    %c0_i32_1 = arith.constant 0 : i32
    return %c0_i32, %c0_i32_0 : i32, i32
  }
  func.func @transform_3(%arg0: i32) -> (i32, i32) {
    %c0_i32 = arith.constant 0 : i32
    %c0_i32_0 = arith.constant 0 : i32
    %c0_i32_1 = arith.constant 0 : i32
    return %c0_i32, %c0_i32_0 : i32, i32
  }
  func.func @transform_4(%arg0: i32) -> (i32, i32) {
    %c0_i32 = arith.constant 0 : i32
    %c0_i32_0 = arith.constant 0 : i32
    return %arg0, %c0_i32 : i32, i32
  }
}

module attributes {stable_mosaic.version = 11 : i64} {
  func.func @_dense_bn_kernel(%arg0: i32, %arg1: memref<512x144xbf16, #tpu.memory_space<vmem>>, %arg2: memref<144x128xbf16, #tpu.memory_space<vmem>>, %arg3: memref<1x128xf32, #tpu.memory_space<vmem>>, %arg4: memref<1x128xf32, #tpu.memory_space<vmem>>, %arg5: memref<512x128xbf16, #tpu.memory_space<vmem>>) attributes {dimension_semantics = [#tpu.dimension_semantics<parallel>], iteration_bounds = array<i64: 4>, scalar_prefetch = 0 : i64, scratch_operands = 0 : i64, tpu.core_type = #tpu.core_type<tc>, window_params = [{transform_indices = @transform_0, window_bounds = array<i64: 512, 144>}, {pipeline_mode = #tpu.pipeline_mode<synchronous>, transform_indices = @transform_1, window_bounds = array<i64: 144, 128>}, {pipeline_mode = #tpu.pipeline_mode<synchronous>, transform_indices = @transform_2, window_bounds = array<i64: 1, 128>}, {pipeline_mode = #tpu.pipeline_mode<synchronous>, transform_indices = @transform_3, window_bounds = array<i64: 1, 128>}, {transform_indices = @transform_4, window_bounds = array<i64: 512, 128>}]} {
    %c0 = arith.constant 0 : index
    %c0_0 = arith.constant 0 : index
    %0 = vector.load %arg1[%c0, %c0_0] : memref<512x144xbf16, #tpu.memory_space<vmem>>, vector<512x144xbf16>
    %c0_1 = arith.constant 0 : index
    %c0_2 = arith.constant 0 : index
    %1 = vector.load %arg2[%c0_1, %c0_2] : memref<144x128xbf16, #tpu.memory_space<vmem>>, vector<144x128xbf16>
    %cst = arith.constant dense<0.000000e+00> : vector<512x128xf32>
    %2 = tpu.matmul %0, %1, %cst {dimension_numbers = #tpu.dot_dimension_numbers<[1], [0], [0], [1], [0, 0, 1, 1], [], []>} : vector<512x144xbf16>, vector<144x128xbf16>, vector<512x128xf32> -> vector<512x128xf32>
    %c0_3 = arith.constant 0 : index
    %c0_4 = arith.constant 0 : index
    %3 = vector.load %arg3[%c0_3, %c0_4] : memref<1x128xf32, #tpu.memory_space<vmem>>, vector<1x128xf32>
    %4 = vector.broadcast %3 : vector<1x128xf32> to vector<512x128xf32>
    %5 = arith.mulf %2, %4 : vector<512x128xf32>
    %c0_5 = arith.constant 0 : index
    %c0_6 = arith.constant 0 : index
    %6 = vector.load %arg4[%c0_5, %c0_6] : memref<1x128xf32, #tpu.memory_space<vmem>>, vector<1x128xf32>
    %7 = vector.broadcast %6 : vector<1x128xf32> to vector<512x128xf32>
    %8 = arith.addf %5, %7 : vector<512x128xf32>
    %cst_7 = arith.constant 0.000000e+00 : f32
    %9 = vector.broadcast %cst_7 : f32 to vector<512x128xf32>
    %10 = arith.maximumf %8, %9 : vector<512x128xf32>
    %11 = arith.truncf %10 : vector<512x128xf32> to vector<512x128xbf16>
    %c0_8 = arith.constant 0 : index
    %c0_9 = arith.constant 0 : index
    %12 = vector.load %arg5[%c0_8, %c0_9] : memref<512x128xbf16, #tpu.memory_space<vmem>>, vector<512x128xbf16>
    tpu.vector_store %arg5[%c0_8, %c0_9], %11 {strides = array<i32>} : memref<512x128xbf16, #tpu.memory_space<vmem>>, vector<512x128xbf16>,
    return
  }
  func.func @transform_0(%arg0: i32) -> (i32, i32) {
    %c0_i32 = arith.constant 0 : i32
    %c0_i32_0 = arith.constant 0 : i32
    return %arg0, %c0_i32 : i32, i32
  }
  func.func @transform_1(%arg0: i32) -> (i32, i32) {
    %c0_i32 = arith.constant 0 : i32
    %c0_i32_0 = arith.constant 0 : i32
    %c0_i32_1 = arith.constant 0 : i32
    return %c0_i32, %c0_i32_0 : i32, i32
  }
  func.func @transform_2(%arg0: i32) -> (i32, i32) {
    %c0_i32 = arith.constant 0 : i32
    %c0_i32_0 = arith.constant 0 : i32
    %c0_i32_1 = arith.constant 0 : i32
    return %c0_i32, %c0_i32_0 : i32, i32
  }
  func.func @transform_3(%arg0: i32) -> (i32, i32) {
    %c0_i32 = arith.constant 0 : i32
    %c0_i32_0 = arith.constant 0 : i32
    %c0_i32_1 = arith.constant 0 : i32
    return %c0_i32, %c0_i32_0 : i32, i32
  }
  func.func @transform_4(%arg0: i32) -> (i32, i32) {
    %c0_i32 = arith.constant 0 : i32
    %c0_i32_0 = arith.constant 0 : i32
    return %arg0, %c0_i32 : i32, i32
  }
}

module attributes {stable_mosaic.version = 11 : i64} {
  func.func @_dense_bn_kernel(%arg0: i32, %arg1: memref<512x144xbf16, #tpu.memory_space<vmem>>, %arg2: memref<144x128xbf16, #tpu.memory_space<vmem>>, %arg3: memref<1x128xf32, #tpu.memory_space<vmem>>, %arg4: memref<1x128xf32, #tpu.memory_space<vmem>>, %arg5: memref<512x128xbf16, #tpu.memory_space<vmem>>, %arg6: memref<512x128xbf16, #tpu.memory_space<vmem>>) attributes {dimension_semantics = [#tpu.dimension_semantics<parallel>], iteration_bounds = array<i64: 4>, scalar_prefetch = 0 : i64, scratch_operands = 0 : i64, tpu.core_type = #tpu.core_type<tc>, window_params = [{transform_indices = @transform_0, window_bounds = array<i64: 512, 144>}, {pipeline_mode = #tpu.pipeline_mode<synchronous>, transform_indices = @transform_1, window_bounds = array<i64: 144, 128>}, {pipeline_mode = #tpu.pipeline_mode<synchronous>, transform_indices = @transform_2, window_bounds = array<i64: 1, 128>}, {pipeline_mode = #tpu.pipeline_mode<synchronous>, transform_indices = @transform_3, window_bounds = array<i64: 1, 128>}, {transform_indices = @transform_4, window_bounds = array<i64: 512, 128>}, {transform_indices = @transform_5, window_bounds = array<i64: 512, 128>}]} {
    %c0 = arith.constant 0 : index
    %c0_0 = arith.constant 0 : index
    %0 = vector.load %arg1[%c0, %c0_0] : memref<512x144xbf16, #tpu.memory_space<vmem>>, vector<512x144xbf16>
    %c0_1 = arith.constant 0 : index
    %c0_2 = arith.constant 0 : index
    %1 = vector.load %arg2[%c0_1, %c0_2] : memref<144x128xbf16, #tpu.memory_space<vmem>>, vector<144x128xbf16>
    %cst = arith.constant dense<0.000000e+00> : vector<512x128xf32>
    %2 = tpu.matmul %0, %1, %cst {dimension_numbers = #tpu.dot_dimension_numbers<[1], [0], [0], [1], [0, 0, 1, 1], [], []>} : vector<512x144xbf16>, vector<144x128xbf16>, vector<512x128xf32> -> vector<512x128xf32>
    %c0_3 = arith.constant 0 : index
    %c0_4 = arith.constant 0 : index
    %3 = vector.load %arg3[%c0_3, %c0_4] : memref<1x128xf32, #tpu.memory_space<vmem>>, vector<1x128xf32>
    %4 = vector.broadcast %3 : vector<1x128xf32> to vector<512x128xf32>
    %5 = arith.mulf %2, %4 : vector<512x128xf32>
    %c0_5 = arith.constant 0 : index
    %c0_6 = arith.constant 0 : index
    %6 = vector.load %arg4[%c0_5, %c0_6] : memref<1x128xf32, #tpu.memory_space<vmem>>, vector<1x128xf32>
    %7 = vector.broadcast %6 : vector<1x128xf32> to vector<512x128xf32>
    %8 = arith.addf %5, %7 : vector<512x128xf32>
    %c0_7 = arith.constant 0 : index
    %c0_8 = arith.constant 0 : index
    %9 = vector.load %arg5[%c0_7, %c0_8] : memref<512x128xbf16, #tpu.memory_space<vmem>>, vector<512x128xbf16>
    %10 = arith.extf %9 : vector<512x128xbf16> to vector<512x128xf32>
    %11 = arith.addf %8, %10 : vector<512x128xf32>
    %cst_9 = arith.constant 0.000000e+00 : f32
    %12 = vector.broadcast %cst_9 : f32 to vector<512x128xf32>
    %13 = arith.maximumf %11, %12 : vector<512x128xf32>
    %14 = arith.truncf %13 : vector<512x128xf32> to vector<512x128xbf16>
    %c0_10 = arith.constant 0 : index
    %c0_11 = arith.constant 0 : index
    %15 = vector.load %arg6[%c0_10, %c0_11] : memref<512x128xbf16, #tpu.memory_space<vmem>>, vector<512x128xbf16>
    tpu.vector_store %arg6[%c0_10, %c0_11], %14 {strides = array<i32>} : memref<512x128xbf16, #tpu.memory_space<vmem>>, vector<512x128xbf16>,
    return
  }
  func.func @transform_0(%arg0: i32) -> (i32, i32) {
    %c0_i32 = arith.constant 0 : i32
    %c0_i32_0 = arith.constant 0 : i32
    return %arg0, %c0_i32 : i32, i32
  }
  func.func @transform_1(%arg0: i32) -> (i32, i32) {
    %c0_i32 = arith.constant 0 : i32
    %c0_i32_0 = arith.constant 0 : i32
    %c0_i32_1 = arith.constant 0 : i32
    return %c0_i32, %c0_i32_0 : i32, i32
  }
  func.func @transform_2(%arg0: i32) -> (i32, i32) {
    %c0_i32 = arith.constant 0 : i32
    %c0_i32_0 = arith.constant 0 : i32
    %c0_i32_1 = arith.constant 0 : i32
    return %c0_i32, %c0_i32_0 : i32, i32
  }
  func.func @transform_3(%arg0: i32) -> (i32, i32) {
    %c0_i32 = arith.constant 0 : i32
    %c0_i32_0 = arith.constant 0 : i32
    %c0_i32_1 = arith.constant 0 : i32
    return %c0_i32, %c0_i32_0 : i32, i32
  }
  func.func @transform_4(%arg0: i32) -> (i32, i32) {
    %c0_i32 = arith.constant 0 : i32
    %c0_i32_0 = arith.constant 0 : i32
    return %arg0, %c0_i32 : i32, i32
  }
  func.func @transform_5(%arg0: i32) -> (i32, i32) {
    %c0_i32 = arith.constant 0 : i32
    %c0_i32_0 = arith.constant 0 : i32
    return %arg0, %c0_i32 : i32, i32
  }
}

module attributes {stable_mosaic.version = 11 : i64} {
  func.func @_dense_bn_kernel(%arg0: i32, %arg1: memref<512x16xbf16, #tpu.memory_space<vmem>>, %arg2: memref<16x128xbf16, #tpu.memory_space<vmem>>, %arg3: memref<1x128xf32, #tpu.memory_space<vmem>>, %arg4: memref<1x128xf32, #tpu.memory_space<vmem>>, %arg5: memref<512x128xbf16, #tpu.memory_space<vmem>>) attributes {dimension_semantics = [#tpu.dimension_semantics<parallel>], iteration_bounds = array<i64: 1>, scalar_prefetch = 0 : i64, scratch_operands = 0 : i64, tpu.core_type = #tpu.core_type<tc>, window_params = [{transform_indices = @transform_0, window_bounds = array<i64: 512, 16>}, {pipeline_mode = #tpu.pipeline_mode<synchronous>, transform_indices = @transform_1, window_bounds = array<i64: 16, 128>}, {pipeline_mode = #tpu.pipeline_mode<synchronous>, transform_indices = @transform_2, window_bounds = array<i64: 1, 128>}, {pipeline_mode = #tpu.pipeline_mode<synchronous>, transform_indices = @transform_3, window_bounds = array<i64: 1, 128>}, {transform_indices = @transform_4, window_bounds = array<i64: 512, 128>}]} {
    %c0 = arith.constant 0 : index
    %c0_0 = arith.constant 0 : index
    %0 = vector.load %arg1[%c0, %c0_0] : memref<512x16xbf16, #tpu.memory_space<vmem>>, vector<512x16xbf16>
    %c0_1 = arith.constant 0 : index
    %c0_2 = arith.constant 0 : index
    %1 = vector.load %arg2[%c0_1, %c0_2] : memref<16x128xbf16, #tpu.memory_space<vmem>>, vector<16x128xbf16>
    %cst = arith.constant dense<0.000000e+00> : vector<512x128xf32>
    %2 = tpu.matmul %0, %1, %cst {dimension_numbers = #tpu.dot_dimension_numbers<[1], [0], [0], [1], [0, 0, 1, 1], [], []>} : vector<512x16xbf16>, vector<16x128xbf16>, vector<512x128xf32> -> vector<512x128xf32>
    %c0_3 = arith.constant 0 : index
    %c0_4 = arith.constant 0 : index
    %3 = vector.load %arg3[%c0_3, %c0_4] : memref<1x128xf32, #tpu.memory_space<vmem>>, vector<1x128xf32>
    %4 = vector.broadcast %3 : vector<1x128xf32> to vector<512x128xf32>
    %5 = arith.mulf %2, %4 : vector<512x128xf32>
    %c0_5 = arith.constant 0 : index
    %c0_6 = arith.constant 0 : index
    %6 = vector.load %arg4[%c0_5, %c0_6] : memref<1x128xf32, #tpu.memory_space<vmem>>, vector<1x128xf32>
    %7 = vector.broadcast %6 : vector<1x128xf32> to vector<512x128xf32>
    %8 = arith.addf %5, %7 : vector<512x128xf32>
    %9 = arith.truncf %8 : vector<512x128xf32> to vector<512x128xbf16>
    %c0_7 = arith.constant 0 : index
    %c0_8 = arith.constant 0 : index
    %10 = vector.load %arg5[%c0_7, %c0_8] : memref<512x128xbf16, #tpu.memory_space<vmem>>, vector<512x128xbf16>
    tpu.vector_store %arg5[%c0_7, %c0_8], %9 {strides = array<i32>} : memref<512x128xbf16, #tpu.memory_space<vmem>>, vector<512x128xbf16>,
    return
  }
  func.func @transform_0(%arg0: i32) -> (i32, i32) {
    %c0_i32 = arith.constant 0 : i32
    %c0_i32_0 = arith.constant 0 : i32
    return %arg0, %c0_i32 : i32, i32
  }
  func.func @transform_1(%arg0: i32) -> (i32, i32) {
    %c0_i32 = arith.constant 0 : i32
    %c0_i32_0 = arith.constant 0 : i32
    %c0_i32_1 = arith.constant 0 : i32
    return %c0_i32, %c0_i32_0 : i32, i32
  }
  func.func @transform_2(%arg0: i32) -> (i32, i32) {
    %c0_i32 = arith.constant 0 : i32
    %c0_i32_0 = arith.constant 0 : i32
    %c0_i32_1 = arith.constant 0 : i32
    return %c0_i32, %c0_i32_0 : i32, i32
  }
  func.func @transform_3(%arg0: i32) -> (i32, i32) {
    %c0_i32 = arith.constant 0 : i32
    %c0_i32_0 = arith.constant 0 : i32
    %c0_i32_1 = arith.constant 0 : i32
    return %c0_i32, %c0_i32_0 : i32, i32
  }
  func.func @transform_4(%arg0: i32) -> (i32, i32) {
    %c0_i32 = arith.constant 0 : i32
    %c0_i32_0 = arith.constant 0 : i32
    return %arg0, %c0_i32 : i32, i32
  }
}

module attributes {stable_mosaic.version = 11 : i64} {
  func.func @_dense_bn_kernel(%arg0: i32, %arg1: memref<512x144xbf16, #tpu.memory_space<vmem>>, %arg2: memref<144x128xbf16, #tpu.memory_space<vmem>>, %arg3: memref<1x128xf32, #tpu.memory_space<vmem>>, %arg4: memref<1x128xf32, #tpu.memory_space<vmem>>, %arg5: memref<512x128xbf16, #tpu.memory_space<vmem>>) attributes {dimension_semantics = [#tpu.dimension_semantics<parallel>], iteration_bounds = array<i64: 1>, scalar_prefetch = 0 : i64, scratch_operands = 0 : i64, tpu.core_type = #tpu.core_type<tc>, window_params = [{transform_indices = @transform_0, window_bounds = array<i64: 512, 144>}, {pipeline_mode = #tpu.pipeline_mode<synchronous>, transform_indices = @transform_1, window_bounds = array<i64: 144, 128>}, {pipeline_mode = #tpu.pipeline_mode<synchronous>, transform_indices = @transform_2, window_bounds = array<i64: 1, 128>}, {pipeline_mode = #tpu.pipeline_mode<synchronous>, transform_indices = @transform_3, window_bounds = array<i64: 1, 128>}, {transform_indices = @transform_4, window_bounds = array<i64: 512, 128>}]} {
    %c0 = arith.constant 0 : index
    %c0_0 = arith.constant 0 : index
    %0 = vector.load %arg1[%c0, %c0_0] : memref<512x144xbf16, #tpu.memory_space<vmem>>, vector<512x144xbf16>
    %c0_1 = arith.constant 0 : index
    %c0_2 = arith.constant 0 : index
    %1 = vector.load %arg2[%c0_1, %c0_2] : memref<144x128xbf16, #tpu.memory_space<vmem>>, vector<144x128xbf16>
    %cst = arith.constant dense<0.000000e+00> : vector<512x128xf32>
    %2 = tpu.matmul %0, %1, %cst {dimension_numbers = #tpu.dot_dimension_numbers<[1], [0], [0], [1], [0, 0, 1, 1], [], []>} : vector<512x144xbf16>, vector<144x128xbf16>, vector<512x128xf32> -> vector<512x128xf32>
    %c0_3 = arith.constant 0 : index
    %c0_4 = arith.constant 0 : index
    %3 = vector.load %arg3[%c0_3, %c0_4] : memref<1x128xf32, #tpu.memory_space<vmem>>, vector<1x128xf32>
    %4 = vector.broadcast %3 : vector<1x128xf32> to vector<512x128xf32>
    %5 = arith.mulf %2, %4 : vector<512x128xf32>
    %c0_5 = arith.constant 0 : index
    %c0_6 = arith.constant 0 : index
    %6 = vector.load %arg4[%c0_5, %c0_6] : memref<1x128xf32, #tpu.memory_space<vmem>>, vector<1x128xf32>
    %7 = vector.broadcast %6 : vector<1x128xf32> to vector<512x128xf32>
    %8 = arith.addf %5, %7 : vector<512x128xf32>
    %cst_7 = arith.constant 0.000000e+00 : f32
    %9 = vector.broadcast %cst_7 : f32 to vector<512x128xf32>
    %10 = arith.maximumf %8, %9 : vector<512x128xf32>
    %11 = arith.truncf %10 : vector<512x128xf32> to vector<512x128xbf16>
    %c0_8 = arith.constant 0 : index
    %c0_9 = arith.constant 0 : index
    %12 = vector.load %arg5[%c0_8, %c0_9] : memref<512x128xbf16, #tpu.memory_space<vmem>>, vector<512x128xbf16>
    tpu.vector_store %arg5[%c0_8, %c0_9], %11 {strides = array<i32>} : memref<512x128xbf16, #tpu.memory_space<vmem>>, vector<512x128xbf16>,
    return
  }
  func.func @transform_0(%arg0: i32) -> (i32, i32) {
    %c0_i32 = arith.constant 0 : i32
    %c0_i32_0 = arith.constant 0 : i32
    return %arg0, %c0_i32 : i32, i32
  }
  func.func @transform_1(%arg0: i32) -> (i32, i32) {
    %c0_i32 = arith.constant 0 : i32
    %c0_i32_0 = arith.constant 0 : i32
    %c0_i32_1 = arith.constant 0 : i32
    return %c0_i32, %c0_i32_0 : i32, i32
  }
  func.func @transform_2(%arg0: i32) -> (i32, i32) {
    %c0_i32 = arith.constant 0 : i32
    %c0_i32_0 = arith.constant 0 : i32
    %c0_i32_1 = arith.constant 0 : i32
    return %c0_i32, %c0_i32_0 : i32, i32
  }
  func.func @transform_3(%arg0: i32) -> (i32, i32) {
    %c0_i32 = arith.constant 0 : i32
    %c0_i32_0 = arith.constant 0 : i32
    %c0_i32_1 = arith.constant 0 : i32
    return %c0_i32, %c0_i32_0 : i32, i32
  }
  func.func @transform_4(%arg0: i32) -> (i32, i32) {
    %c0_i32 = arith.constant 0 : i32
    %c0_i32_0 = arith.constant 0 : i32
    return %arg0, %c0_i32 : i32, i32
  }
}

module attributes {stable_mosaic.version = 11 : i64} {
  func.func @_dense_bn_kernel(%arg0: i32, %arg1: memref<512x288xbf16, #tpu.memory_space<vmem>>, %arg2: memref<288x128xbf16, #tpu.memory_space<vmem>>, %arg3: memref<1x128xf32, #tpu.memory_space<vmem>>, %arg4: memref<1x128xf32, #tpu.memory_space<vmem>>, %arg5: memref<512x128xbf16, #tpu.memory_space<vmem>>, %arg6: memref<512x128xbf16, #tpu.memory_space<vmem>>) attributes {dimension_semantics = [#tpu.dimension_semantics<parallel>], iteration_bounds = array<i64: 1>, scalar_prefetch = 0 : i64, scratch_operands = 0 : i64, tpu.core_type = #tpu.core_type<tc>, window_params = [{transform_indices = @transform_0, window_bounds = array<i64: 512, 288>}, {pipeline_mode = #tpu.pipeline_mode<synchronous>, transform_indices = @transform_1, window_bounds = array<i64: 288, 128>}, {pipeline_mode = #tpu.pipeline_mode<synchronous>, transform_indices = @transform_2, window_bounds = array<i64: 1, 128>}, {pipeline_mode = #tpu.pipeline_mode<synchronous>, transform_indices = @transform_3, window_bounds = array<i64: 1, 128>}, {transform_indices = @transform_4, window_bounds = array<i64: 512, 128>}, {transform_indices = @transform_5, window_bounds = array<i64: 512, 128>}]} {
    %c0 = arith.constant 0 : index
    %c0_0 = arith.constant 0 : index
    %0 = vector.load %arg1[%c0, %c0_0] : memref<512x288xbf16, #tpu.memory_space<vmem>>, vector<512x288xbf16>
    %c0_1 = arith.constant 0 : index
    %c0_2 = arith.constant 0 : index
    %1 = vector.load %arg2[%c0_1, %c0_2] : memref<288x128xbf16, #tpu.memory_space<vmem>>, vector<288x128xbf16>
    %cst = arith.constant dense<0.000000e+00> : vector<512x128xf32>
    %2 = tpu.matmul %0, %1, %cst {dimension_numbers = #tpu.dot_dimension_numbers<[1], [0], [0], [1], [0, 0, 1, 1], [], []>} : vector<512x288xbf16>, vector<288x128xbf16>, vector<512x128xf32> -> vector<512x128xf32>
    %c0_3 = arith.constant 0 : index
    %c0_4 = arith.constant 0 : index
    %3 = vector.load %arg3[%c0_3, %c0_4] : memref<1x128xf32, #tpu.memory_space<vmem>>, vector<1x128xf32>
    %4 = vector.broadcast %3 : vector<1x128xf32> to vector<512x128xf32>
    %5 = arith.mulf %2, %4 : vector<512x128xf32>
    %c0_5 = arith.constant 0 : index
    %c0_6 = arith.constant 0 : index
    %6 = vector.load %arg4[%c0_5, %c0_6] : memref<1x128xf32, #tpu.memory_space<vmem>>, vector<1x128xf32>
    %7 = vector.broadcast %6 : vector<1x128xf32> to vector<512x128xf32>
    %8 = arith.addf %5, %7 : vector<512x128xf32>
    %c0_7 = arith.constant 0 : index
    %c0_8 = arith.constant 0 : index
    %9 = vector.load %arg5[%c0_7, %c0_8] : memref<512x128xbf16, #tpu.memory_space<vmem>>, vector<512x128xbf16>
    %10 = arith.extf %9 : vector<512x128xbf16> to vector<512x128xf32>
    %11 = arith.addf %8, %10 : vector<512x128xf32>
    %cst_9 = arith.constant 0.000000e+00 : f32
    %12 = vector.broadcast %cst_9 : f32 to vector<512x128xf32>
    %13 = arith.maximumf %11, %12 : vector<512x128xf32>
    %14 = arith.truncf %13 : vector<512x128xf32> to vector<512x128xbf16>
    %c0_10 = arith.constant 0 : index
    %c0_11 = arith.constant 0 : index
    %15 = vector.load %arg6[%c0_10, %c0_11] : memref<512x128xbf16, #tpu.memory_space<vmem>>, vector<512x128xbf16>
    tpu.vector_store %arg6[%c0_10, %c0_11], %14 {strides = array<i32>} : memref<512x128xbf16, #tpu.memory_space<vmem>>, vector<512x128xbf16>,
    return
  }
  func.func @transform_0(%arg0: i32) -> (i32, i32) {
    %c0_i32 = arith.constant 0 : i32
    %c0_i32_0 = arith.constant 0 : i32
    return %arg0, %c0_i32 : i32, i32
  }
  func.func @transform_1(%arg0: i32) -> (i32, i32) {
    %c0_i32 = arith.constant 0 : i32
    %c0_i32_0 = arith.constant 0 : i32
    %c0_i32_1 = arith.constant 0 : i32
    return %c0_i32, %c0_i32_0 : i32, i32
  }
  func.func @transform_2(%arg0: i32) -> (i32, i32) {
    %c0_i32 = arith.constant 0 : i32
    %c0_i32_0 = arith.constant 0 : i32
    %c0_i32_1 = arith.constant 0 : i32
    return %c0_i32, %c0_i32_0 : i32, i32
  }
  func.func @transform_3(%arg0: i32) -> (i32, i32) {
    %c0_i32 = arith.constant 0 : i32
    %c0_i32_0 = arith.constant 0 : i32
    %c0_i32_1 = arith.constant 0 : i32
    return %c0_i32, %c0_i32_0 : i32, i32
  }
  func.func @transform_4(%arg0: i32) -> (i32, i32) {
    %c0_i32 = arith.constant 0 : i32
    %c0_i32_0 = arith.constant 0 : i32
    return %arg0, %c0_i32 : i32, i32
  }
  func.func @transform_5(%arg0: i32) -> (i32, i32) {
    %c0_i32 = arith.constant 0 : i32
    %c0_i32_0 = arith.constant 0 : i32
    return %arg0, %c0_i32 : i32, i32
  }
}

module attributes {stable_mosaic.version = 11 : i64} {
  func.func @_dense_bn_kernel(%arg0: i32, %arg1: memref<512x288xbf16, #tpu.memory_space<vmem>>, %arg2: memref<288x128xbf16, #tpu.memory_space<vmem>>, %arg3: memref<1x128xf32, #tpu.memory_space<vmem>>, %arg4: memref<1x128xf32, #tpu.memory_space<vmem>>, %arg5: memref<512x128xbf16, #tpu.memory_space<vmem>>) attributes {dimension_semantics = [#tpu.dimension_semantics<parallel>], iteration_bounds = array<i64: 1>, scalar_prefetch = 0 : i64, scratch_operands = 0 : i64, tpu.core_type = #tpu.core_type<tc>, window_params = [{transform_indices = @transform_0, window_bounds = array<i64: 512, 288>}, {pipeline_mode = #tpu.pipeline_mode<synchronous>, transform_indices = @transform_1, window_bounds = array<i64: 288, 128>}, {pipeline_mode = #tpu.pipeline_mode<synchronous>, transform_indices = @transform_2, window_bounds = array<i64: 1, 128>}, {pipeline_mode = #tpu.pipeline_mode<synchronous>, transform_indices = @transform_3, window_bounds = array<i64: 1, 128>}, {transform_indices = @transform_4, window_bounds = array<i64: 512, 128>}]} {
    %c0 = arith.constant 0 : index
    %c0_0 = arith.constant 0 : index
    %0 = vector.load %arg1[%c0, %c0_0] : memref<512x288xbf16, #tpu.memory_space<vmem>>, vector<512x288xbf16>
    %c0_1 = arith.constant 0 : index
    %c0_2 = arith.constant 0 : index
    %1 = vector.load %arg2[%c0_1, %c0_2] : memref<288x128xbf16, #tpu.memory_space<vmem>>, vector<288x128xbf16>
    %cst = arith.constant dense<0.000000e+00> : vector<512x128xf32>
    %2 = tpu.matmul %0, %1, %cst {dimension_numbers = #tpu.dot_dimension_numbers<[1], [0], [0], [1], [0, 0, 1, 1], [], []>} : vector<512x288xbf16>, vector<288x128xbf16>, vector<512x128xf32> -> vector<512x128xf32>
    %c0_3 = arith.constant 0 : index
    %c0_4 = arith.constant 0 : index
    %3 = vector.load %arg3[%c0_3, %c0_4] : memref<1x128xf32, #tpu.memory_space<vmem>>, vector<1x128xf32>
    %4 = vector.broadcast %3 : vector<1x128xf32> to vector<512x128xf32>
    %5 = arith.mulf %2, %4 : vector<512x128xf32>
    %c0_5 = arith.constant 0 : index
    %c0_6 = arith.constant 0 : index
    %6 = vector.load %arg4[%c0_5, %c0_6] : memref<1x128xf32, #tpu.memory_space<vmem>>, vector<1x128xf32>
    %7 = vector.broadcast %6 : vector<1x128xf32> to vector<512x128xf32>
    %8 = arith.addf %5, %7 : vector<512x128xf32>
    %cst_7 = arith.constant 0.000000e+00 : f32
    %9 = vector.broadcast %cst_7 : f32 to vector<512x128xf32>
    %10 = arith.maximumf %8, %9 : vector<512x128xf32>
    %11 = arith.truncf %10 : vector<512x128xf32> to vector<512x128xbf16>
    %c0_8 = arith.constant 0 : index
    %c0_9 = arith.constant 0 : index
    %12 = vector.load %arg5[%c0_8, %c0_9] : memref<512x128xbf16, #tpu.memory_space<vmem>>, vector<512x128xbf16>
    tpu.vector_store %arg5[%c0_8, %c0_9], %11 {strides = array<i32>} : memref<512x128xbf16, #tpu.memory_space<vmem>>, vector<512x128xbf16>,
    return
  }
  func.func @transform_0(%arg0: i32) -> (i32, i32) {
    %c0_i32 = arith.constant 0 : i32
    %c0_i32_0 = arith.constant 0 : i32
    return %arg0, %c0_i32 : i32, i32
  }
  func.func @transform_1(%arg0: i32) -> (i32, i32) {
    %c0_i32 = arith.constant 0 : i32
    %c0_i32_0 = arith.constant 0 : i32
    %c0_i32_1 = arith.constant 0 : i32
    return %c0_i32, %c0_i32_0 : i32, i32
  }
  func.func @transform_2(%arg0: i32) -> (i32, i32) {
    %c0_i32 = arith.constant 0 : i32
    %c0_i32_0 = arith.constant 0 : i32
    %c0_i32_1 = arith.constant 0 : i32
    return %c0_i32, %c0_i32_0 : i32, i32
  }
  func.func @transform_3(%arg0: i32) -> (i32, i32) {
    %c0_i32 = arith.constant 0 : i32
    %c0_i32_0 = arith.constant 0 : i32
    %c0_i32_1 = arith.constant 0 : i32
    return %c0_i32, %c0_i32_0 : i32, i32
  }
  func.func @transform_4(%arg0: i32) -> (i32, i32) {
    %c0_i32 = arith.constant 0 : i32
    %c0_i32_0 = arith.constant 0 : i32
    return %arg0, %c0_i32 : i32, i32
  }
}

module attributes {stable_mosaic.version = 11 : i64} {
  func.func @_dense_bn_kernel(%arg0: i32, %arg1: memref<128x32xbf16, #tpu.memory_space<vmem>>, %arg2: memref<32x128xbf16, #tpu.memory_space<vmem>>, %arg3: memref<1x128xf32, #tpu.memory_space<vmem>>, %arg4: memref<1x128xf32, #tpu.memory_space<vmem>>, %arg5: memref<128x128xbf16, #tpu.memory_space<vmem>>) attributes {dimension_semantics = [#tpu.dimension_semantics<parallel>], iteration_bounds = array<i64: 1>, scalar_prefetch = 0 : i64, scratch_operands = 0 : i64, tpu.core_type = #tpu.core_type<tc>, window_params = [{transform_indices = @transform_0, window_bounds = array<i64: 128, 32>}, {pipeline_mode = #tpu.pipeline_mode<synchronous>, transform_indices = @transform_1, window_bounds = array<i64: 32, 128>}, {pipeline_mode = #tpu.pipeline_mode<synchronous>, transform_indices = @transform_2, window_bounds = array<i64: 1, 128>}, {pipeline_mode = #tpu.pipeline_mode<synchronous>, transform_indices = @transform_3, window_bounds = array<i64: 1, 128>}, {transform_indices = @transform_4, window_bounds = array<i64: 128, 128>}]} {
    %c0 = arith.constant 0 : index
    %c0_0 = arith.constant 0 : index
    %0 = vector.load %arg1[%c0, %c0_0] : memref<128x32xbf16, #tpu.memory_space<vmem>>, vector<128x32xbf16>
    %c0_1 = arith.constant 0 : index
    %c0_2 = arith.constant 0 : index
    %1 = vector.load %arg2[%c0_1, %c0_2] : memref<32x128xbf16, #tpu.memory_space<vmem>>, vector<32x128xbf16>
    %cst = arith.constant dense<0.000000e+00> : vector<128x128xf32>
    %2 = tpu.matmul %0, %1, %cst {dimension_numbers = #tpu.dot_dimension_numbers<[1], [0], [0], [1], [0, 0, 1, 1], [], []>} : vector<128x32xbf16>, vector<32x128xbf16>, vector<128x128xf32> -> vector<128x128xf32>
    %c0_3 = arith.constant 0 : index
    %c0_4 = arith.constant 0 : index
    %3 = vector.load %arg3[%c0_3, %c0_4] : memref<1x128xf32, #tpu.memory_space<vmem>>, vector<1x128xf32>
    %4 = vector.broadcast %3 : vector<1x128xf32> to vector<128x128xf32>
    %5 = arith.mulf %2, %4 : vector<128x128xf32>
    %c0_5 = arith.constant 0 : index
    %c0_6 = arith.constant 0 : index
    %6 = vector.load %arg4[%c0_5, %c0_6] : memref<1x128xf32, #tpu.memory_space<vmem>>, vector<1x128xf32>
    %7 = vector.broadcast %6 : vector<1x128xf32> to vector<128x128xf32>
    %8 = arith.addf %5, %7 : vector<128x128xf32>
    %9 = arith.truncf %8 : vector<128x128xf32> to vector<128x128xbf16>
    %c0_7 = arith.constant 0 : index
    %c0_8 = arith.constant 0 : index
    %10 = vector.load %arg5[%c0_7, %c0_8] : memref<128x128xbf16, #tpu.memory_space<vmem>>, vector<128x128xbf16>
    tpu.vector_store %arg5[%c0_7, %c0_8], %9 {strides = array<i32>} : memref<128x128xbf16, #tpu.memory_space<vmem>>, vector<128x128xbf16>,
    return
  }
  func.func @transform_0(%arg0: i32) -> (i32, i32) {
    %c0_i32 = arith.constant 0 : i32
    %c0_i32_0 = arith.constant 0 : i32
    return %arg0, %c0_i32 : i32, i32
  }
  func.func @transform_1(%arg0: i32) -> (i32, i32) {
    %c0_i32 = arith.constant 0 : i32
    %c0_i32_0 = arith.constant 0 : i32
    %c0_i32_1 = arith.constant 0 : i32
    return %c0_i32, %c0_i32_0 : i32, i32
  }
  func.func @transform_2(%arg0: i32) -> (i32, i32) {
    %c0_i32 = arith.constant 0 : i32
    %c0_i32_0 = arith.constant 0 : i32
    %c0_i32_1 = arith.constant 0 : i32
    return %c0_i32, %c0_i32_0 : i32, i32
  }
  func.func @transform_3(%arg0: i32) -> (i32, i32) {
    %c0_i32 = arith.constant 0 : i32
    %c0_i32_0 = arith.constant 0 : i32
    %c0_i32_1 = arith.constant 0 : i32
    return %c0_i32, %c0_i32_0 : i32, i32
  }
  func.func @transform_4(%arg0: i32) -> (i32, i32) {
    %c0_i32 = arith.constant 0 : i32
    %c0_i32_0 = arith.constant 0 : i32
    return %arg0, %c0_i32 : i32, i32
  }
}

module attributes {stable_mosaic.version = 11 : i64} {
  func.func @_dense_bn_kernel(%arg0: i32, %arg1: memref<128x288xbf16, #tpu.memory_space<vmem>>, %arg2: memref<288x128xbf16, #tpu.memory_space<vmem>>, %arg3: memref<1x128xf32, #tpu.memory_space<vmem>>, %arg4: memref<1x128xf32, #tpu.memory_space<vmem>>, %arg5: memref<128x128xbf16, #tpu.memory_space<vmem>>) attributes {dimension_semantics = [#tpu.dimension_semantics<parallel>], iteration_bounds = array<i64: 1>, scalar_prefetch = 0 : i64, scratch_operands = 0 : i64, tpu.core_type = #tpu.core_type<tc>, window_params = [{transform_indices = @transform_0, window_bounds = array<i64: 128, 288>}, {pipeline_mode = #tpu.pipeline_mode<synchronous>, transform_indices = @transform_1, window_bounds = array<i64: 288, 128>}, {pipeline_mode = #tpu.pipeline_mode<synchronous>, transform_indices = @transform_2, window_bounds = array<i64: 1, 128>}, {pipeline_mode = #tpu.pipeline_mode<synchronous>, transform_indices = @transform_3, window_bounds = array<i64: 1, 128>}, {transform_indices = @transform_4, window_bounds = array<i64: 128, 128>}]} {
    %c0 = arith.constant 0 : index
    %c0_0 = arith.constant 0 : index
    %0 = vector.load %arg1[%c0, %c0_0] : memref<128x288xbf16, #tpu.memory_space<vmem>>, vector<128x288xbf16>
    %c0_1 = arith.constant 0 : index
    %c0_2 = arith.constant 0 : index
    %1 = vector.load %arg2[%c0_1, %c0_2] : memref<288x128xbf16, #tpu.memory_space<vmem>>, vector<288x128xbf16>
    %cst = arith.constant dense<0.000000e+00> : vector<128x128xf32>
    %2 = tpu.matmul %0, %1, %cst {dimension_numbers = #tpu.dot_dimension_numbers<[1], [0], [0], [1], [0, 0, 1, 1], [], []>} : vector<128x288xbf16>, vector<288x128xbf16>, vector<128x128xf32> -> vector<128x128xf32>
    %c0_3 = arith.constant 0 : index
    %c0_4 = arith.constant 0 : index
    %3 = vector.load %arg3[%c0_3, %c0_4] : memref<1x128xf32, #tpu.memory_space<vmem>>, vector<1x128xf32>
    %4 = vector.broadcast %3 : vector<1x128xf32> to vector<128x128xf32>
    %5 = arith.mulf %2, %4 : vector<128x128xf32>
    %c0_5 = arith.constant 0 : index
    %c0_6 = arith.constant 0 : index
    %6 = vector.load %arg4[%c0_5, %c0_6] : memref<1x128xf32, #tpu.memory_space<vmem>>, vector<1x128xf32>
    %7 = vector.broadcast %6 : vector<1x128xf32> to vector<128x128xf32>
    %8 = arith.addf %5, %7 : vector<128x128xf32>
    %cst_7 = arith.constant 0.000000e+00 : f32
    %9 = vector.broadcast %cst_7 : f32 to vector<128x128xf32>
    %10 = arith.maximumf %8, %9 : vector<128x128xf32>
    %11 = arith.truncf %10 : vector<128x128xf32> to vector<128x128xbf16>
    %c0_8 = arith.constant 0 : index
    %c0_9 = arith.constant 0 : index
    %12 = vector.load %arg5[%c0_8, %c0_9] : memref<128x128xbf16, #tpu.memory_space<vmem>>, vector<128x128xbf16>
    tpu.vector_store %arg5[%c0_8, %c0_9], %11 {strides = array<i32>} : memref<128x128xbf16, #tpu.memory_space<vmem>>, vector<128x128xbf16>,
    return
  }
  func.func @transform_0(%arg0: i32) -> (i32, i32) {
    %c0_i32 = arith.constant 0 : i32
    %c0_i32_0 = arith.constant 0 : i32
    return %arg0, %c0_i32 : i32, i32
  }
  func.func @transform_1(%arg0: i32) -> (i32, i32) {
    %c0_i32 = arith.constant 0 : i32
    %c0_i32_0 = arith.constant 0 : i32
    %c0_i32_1 = arith.constant 0 : i32
    return %c0_i32, %c0_i32_0 : i32, i32
  }
  func.func @transform_2(%arg0: i32) -> (i32, i32) {
    %c0_i32 = arith.constant 0 : i32
    %c0_i32_0 = arith.constant 0 : i32
    %c0_i32_1 = arith.constant 0 : i32
    return %c0_i32, %c0_i32_0 : i32, i32
  }
  func.func @transform_3(%arg0: i32) -> (i32, i32) {
    %c0_i32 = arith.constant 0 : i32
    %c0_i32_0 = arith.constant 0 : i32
    %c0_i32_1 = arith.constant 0 : i32
    return %c0_i32, %c0_i32_0 : i32, i32
  }
  func.func @transform_4(%arg0: i32) -> (i32, i32) {
    %c0_i32 = arith.constant 0 : i32
    %c0_i32_0 = arith.constant 0 : i32
    return %arg0, %c0_i32 : i32, i32
  }
}

module attributes {stable_mosaic.version = 11 : i64} {
  func.func @_dense_bn_kernel(%arg0: i32, %arg1: memref<128x576xbf16, #tpu.memory_space<vmem>>, %arg2: memref<576x128xbf16, #tpu.memory_space<vmem>>, %arg3: memref<1x128xf32, #tpu.memory_space<vmem>>, %arg4: memref<1x128xf32, #tpu.memory_space<vmem>>, %arg5: memref<128x128xbf16, #tpu.memory_space<vmem>>, %arg6: memref<128x128xbf16, #tpu.memory_space<vmem>>) attributes {dimension_semantics = [#tpu.dimension_semantics<parallel>], iteration_bounds = array<i64: 1>, scalar_prefetch = 0 : i64, scratch_operands = 0 : i64, tpu.core_type = #tpu.core_type<tc>, window_params = [{transform_indices = @transform_0, window_bounds = array<i64: 128, 576>}, {pipeline_mode = #tpu.pipeline_mode<synchronous>, transform_indices = @transform_1, window_bounds = array<i64: 576, 128>}, {pipeline_mode = #tpu.pipeline_mode<synchronous>, transform_indices = @transform_2, window_bounds = array<i64: 1, 128>}, {pipeline_mode = #tpu.pipeline_mode<synchronous>, transform_indices = @transform_3, window_bounds = array<i64: 1, 128>}, {transform_indices = @transform_4, window_bounds = array<i64: 128, 128>}, {transform_indices = @transform_5, window_bounds = array<i64: 128, 128>}]} {
    %c0 = arith.constant 0 : index
    %c0_0 = arith.constant 0 : index
    %0 = vector.load %arg1[%c0, %c0_0] : memref<128x576xbf16, #tpu.memory_space<vmem>>, vector<128x576xbf16>
    %c0_1 = arith.constant 0 : index
    %c0_2 = arith.constant 0 : index
    %1 = vector.load %arg2[%c0_1, %c0_2] : memref<576x128xbf16, #tpu.memory_space<vmem>>, vector<576x128xbf16>
    %cst = arith.constant dense<0.000000e+00> : vector<128x128xf32>
    %2 = tpu.matmul %0, %1, %cst {dimension_numbers = #tpu.dot_dimension_numbers<[1], [0], [0], [1], [0, 0, 1, 1], [], []>} : vector<128x576xbf16>, vector<576x128xbf16>, vector<128x128xf32> -> vector<128x128xf32>
    %c0_3 = arith.constant 0 : index
    %c0_4 = arith.constant 0 : index
    %3 = vector.load %arg3[%c0_3, %c0_4] : memref<1x128xf32, #tpu.memory_space<vmem>>, vector<1x128xf32>
    %4 = vector.broadcast %3 : vector<1x128xf32> to vector<128x128xf32>
    %5 = arith.mulf %2, %4 : vector<128x128xf32>
    %c0_5 = arith.constant 0 : index
    %c0_6 = arith.constant 0 : index
    %6 = vector.load %arg4[%c0_5, %c0_6] : memref<1x128xf32, #tpu.memory_space<vmem>>, vector<1x128xf32>
    %7 = vector.broadcast %6 : vector<1x128xf32> to vector<128x128xf32>
    %8 = arith.addf %5, %7 : vector<128x128xf32>
    %c0_7 = arith.constant 0 : index
    %c0_8 = arith.constant 0 : index
    %9 = vector.load %arg5[%c0_7, %c0_8] : memref<128x128xbf16, #tpu.memory_space<vmem>>, vector<128x128xbf16>
    %10 = arith.extf %9 : vector<128x128xbf16> to vector<128x128xf32>
    %11 = arith.addf %8, %10 : vector<128x128xf32>
    %cst_9 = arith.constant 0.000000e+00 : f32
    %12 = vector.broadcast %cst_9 : f32 to vector<128x128xf32>
    %13 = arith.maximumf %11, %12 : vector<128x128xf32>
    %14 = arith.truncf %13 : vector<128x128xf32> to vector<128x128xbf16>
    %c0_10 = arith.constant 0 : index
    %c0_11 = arith.constant 0 : index
    %15 = vector.load %arg6[%c0_10, %c0_11] : memref<128x128xbf16, #tpu.memory_space<vmem>>, vector<128x128xbf16>
    tpu.vector_store %arg6[%c0_10, %c0_11], %14 {strides = array<i32>} : memref<128x128xbf16, #tpu.memory_space<vmem>>, vector<128x128xbf16>,
    return
  }
  func.func @transform_0(%arg0: i32) -> (i32, i32) {
    %c0_i32 = arith.constant 0 : i32
    %c0_i32_0 = arith.constant 0 : i32
    return %arg0, %c0_i32 : i32, i32
  }
  func.func @transform_1(%arg0: i32) -> (i32, i32) {
    %c0_i32 = arith.constant 0 : i32
    %c0_i32_0 = arith.constant 0 : i32
    %c0_i32_1 = arith.constant 0 : i32
    return %c0_i32, %c0_i32_0 : i32, i32
  }
  func.func @transform_2(%arg0: i32) -> (i32, i32) {
    %c0_i32 = arith.constant 0 : i32
    %c0_i32_0 = arith.constant 0 : i32
    %c0_i32_1 = arith.constant 0 : i32
    return %c0_i32, %c0_i32_0 : i32, i32
  }
  func.func @transform_3(%arg0: i32) -> (i32, i32) {
    %c0_i32 = arith.constant 0 : i32
    %c0_i32_0 = arith.constant 0 : i32
    %c0_i32_1 = arith.constant 0 : i32
    return %c0_i32, %c0_i32_0 : i32, i32
  }
  func.func @transform_4(%arg0: i32) -> (i32, i32) {
    %c0_i32 = arith.constant 0 : i32
    %c0_i32_0 = arith.constant 0 : i32
    return %arg0, %c0_i32 : i32, i32
  }
  func.func @transform_5(%arg0: i32) -> (i32, i32) {
    %c0_i32 = arith.constant 0 : i32
    %c0_i32_0 = arith.constant 0 : i32
    return %arg0, %c0_i32 : i32, i32
  }
}

module attributes {stable_mosaic.version = 11 : i64} {
  func.func @_dense_bn_kernel(%arg0: i32, %arg1: memref<128x576xbf16, #tpu.memory_space<vmem>>, %arg2: memref<576x128xbf16, #tpu.memory_space<vmem>>, %arg3: memref<1x128xf32, #tpu.memory_space<vmem>>, %arg4: memref<1x128xf32, #tpu.memory_space<vmem>>, %arg5: memref<128x128xbf16, #tpu.memory_space<vmem>>) attributes {dimension_semantics = [#tpu.dimension_semantics<parallel>], iteration_bounds = array<i64: 1>, scalar_prefetch = 0 : i64, scratch_operands = 0 : i64, tpu.core_type = #tpu.core_type<tc>, window_params = [{transform_indices = @transform_0, window_bounds = array<i64: 128, 576>}, {pipeline_mode = #tpu.pipeline_mode<synchronous>, transform_indices = @transform_1, window_bounds = array<i64: 576, 128>}, {pipeline_mode = #tpu.pipeline_mode<synchronous>, transform_indices = @transform_2, window_bounds = array<i64: 1, 128>}, {pipeline_mode = #tpu.pipeline_mode<synchronous>, transform_indices = @transform_3, window_bounds = array<i64: 1, 128>}, {transform_indices = @transform_4, window_bounds = array<i64: 128, 128>}]} {
    %c0 = arith.constant 0 : index
    %c0_0 = arith.constant 0 : index
    %0 = vector.load %arg1[%c0, %c0_0] : memref<128x576xbf16, #tpu.memory_space<vmem>>, vector<128x576xbf16>
    %c0_1 = arith.constant 0 : index
    %c0_2 = arith.constant 0 : index
    %1 = vector.load %arg2[%c0_1, %c0_2] : memref<576x128xbf16, #tpu.memory_space<vmem>>, vector<576x128xbf16>
    %cst = arith.constant dense<0.000000e+00> : vector<128x128xf32>
    %2 = tpu.matmul %0, %1, %cst {dimension_numbers = #tpu.dot_dimension_numbers<[1], [0], [0], [1], [0, 0, 1, 1], [], []>} : vector<128x576xbf16>, vector<576x128xbf16>, vector<128x128xf32> -> vector<128x128xf32>
    %c0_3 = arith.constant 0 : index
    %c0_4 = arith.constant 0 : index
    %3 = vector.load %arg3[%c0_3, %c0_4] : memref<1x128xf32, #tpu.memory_space<vmem>>, vector<1x128xf32>
    %4 = vector.broadcast %3 : vector<1x128xf32> to vector<128x128xf32>
    %5 = arith.mulf %2, %4 : vector<128x128xf32>
    %c0_5 = arith.constant 0 : index
    %c0_6 = arith.constant 0 : index
    %6 = vector.load %arg4[%c0_5, %c0_6] : memref<1x128xf32, #tpu.memory_space<vmem>>, vector<1x128xf32>
    %7 = vector.broadcast %6 : vector<1x128xf32> to vector<128x128xf32>
    %8 = arith.addf %5, %7 : vector<128x128xf32>
    %cst_7 = arith.constant 0.000000e+00 : f32
    %9 = vector.broadcast %cst_7 : f32 to vector<128x128xf32>
    %10 = arith.maximumf %8, %9 : vector<128x128xf32>
    %11 = arith.truncf %10 : vector<128x128xf32> to vector<128x128xbf16>
    %c0_8 = arith.constant 0 : index
    %c0_9 = arith.constant 0 : index
    %12 = vector.load %arg5[%c0_8, %c0_9] : memref<128x128xbf16, #tpu.memory_space<vmem>>, vector<128x128xbf16>
    tpu.vector_store %arg5[%c0_8, %c0_9], %11 {strides = array<i32>} : memref<128x128xbf16, #tpu.memory_space<vmem>>, vector<128x128xbf16>,
    return
  }
  func.func @transform_0(%arg0: i32) -> (i32, i32) {
    %c0_i32 = arith.constant 0 : i32
    %c0_i32_0 = arith.constant 0 : i32
    return %arg0, %c0_i32 : i32, i32
  }
  func.func @transform_1(%arg0: i32) -> (i32, i32) {
    %c0_i32 = arith.constant 0 : i32
    %c0_i32_0 = arith.constant 0 : i32
    %c0_i32_1 = arith.constant 0 : i32
    return %c0_i32, %c0_i32_0 : i32, i32
  }
  func.func @transform_2(%arg0: i32) -> (i32, i32) {
    %c0_i32 = arith.constant 0 : i32
    %c0_i32_0 = arith.constant 0 : i32
    %c0_i32_1 = arith.constant 0 : i32
    return %c0_i32, %c0_i32_0 : i32, i32
  }
  func.func @transform_3(%arg0: i32) -> (i32, i32) {
    %c0_i32 = arith.constant 0 : i32
    %c0_i32_0 = arith.constant 0 : i32
    %c0_i32_1 = arith.constant 0 : i32
    return %c0_i32, %c0_i32_0 : i32, i32
  }
  func.func @transform_4(%arg0: i32) -> (i32, i32) {
    %c0_i32 = arith.constant 0 : i32
    %c0_i32_0 = arith.constant 0 : i32
    return %arg0, %c0_i32 : i32, i32
  }
}

module attributes {stable_mosaic.version = 11 : i64} {
  func.func @_pool_fc_kernel(%arg0: i32, %arg1: memref<2x64x64xbf16, #tpu.memory_space<vmem>>, %arg2: memref<64x128xf32, #tpu.memory_space<vmem>>, %arg3: memref<1x128xf32, #tpu.memory_space<vmem>>, %arg4: memref<2x128xf32, #tpu.memory_space<vmem>>) attributes {dimension_semantics = [#tpu.dimension_semantics<arbitrary>], iteration_bounds = array<i64: 1>, scalar_prefetch = 0 : i64, scratch_operands = 0 : i64, tpu.core_type = #tpu.core_type<tc>, window_params = [{pipeline_mode = #tpu.pipeline_mode<synchronous>, transform_indices = @transform_0, window_bounds = array<i64: 2, 64, 64>}, {pipeline_mode = #tpu.pipeline_mode<synchronous>, transform_indices = @transform_1, window_bounds = array<i64: 64, 128>}, {pipeline_mode = #tpu.pipeline_mode<synchronous>, transform_indices = @transform_2, window_bounds = array<i64: 1, 128>}, {pipeline_mode = #tpu.pipeline_mode<synchronous>, transform_indices = @transform_3, window_bounds = array<i64: 2, 128>}]} {
    %c0 = arith.constant 0 : index
    %c0_0 = arith.constant 0 : index
    %c0_1 = arith.constant 0 : index
    %0 = vector.load %arg1[%c0, %c0_0, %c0_1] : memref<2x64x64xbf16, #tpu.memory_space<vmem>>, vector<2x64x64xbf16>
    %1 = arith.extf %0 : vector<2x64x64xbf16> to vector<2x64x64xf32>
    %cst = arith.constant dense<0.000000e+00> : vector<2x64xf32>
    %2 = vector.multi_reduction <add>, %1, %cst [1] : vector<2x64x64xf32> to vector<2x64xf32>
    %cst_2 = arith.constant 1.562500e-02 : f32
    %3 = vector.broadcast %cst_2 : f32 to vector<2x64xf32>
    %4 = arith.mulf %2, %3 : vector<2x64xf32>
    %c0_3 = arith.constant 0 : index
    %c0_4 = arith.constant 0 : index
    %5 = vector.load %arg2[%c0_3, %c0_4] : memref<64x128xf32, #tpu.memory_space<vmem>>, vector<64x128xf32>
    %cst_5 = arith.constant dense<0.000000e+00> : vector<2x128xf32>
    %6 = tpu.matmul %4, %5, %cst_5 {dimension_numbers = #tpu.dot_dimension_numbers<[1], [0], [0], [1], [0, 0, 1, 1], [], []>} : vector<2x64xf32>, vector<64x128xf32>, vector<2x128xf32> -> vector<2x128xf32>
    %c0_6 = arith.constant 0 : index
    %c0_7 = arith.constant 0 : index
    %7 = vector.load %arg3[%c0_6, %c0_7] : memref<1x128xf32, #tpu.memory_space<vmem>>, vector<1x128xf32>
    %8 = vector.broadcast %7 : vector<1x128xf32> to vector<2x128xf32>
    %9 = arith.addf %6, %8 : vector<2x128xf32>
    %c0_8 = arith.constant 0 : index
    %c0_9 = arith.constant 0 : index
    %10 = vector.load %arg4[%c0_8, %c0_9] : memref<2x128xf32, #tpu.memory_space<vmem>>, vector<2x128xf32>
    tpu.vector_store %arg4[%c0_8, %c0_9], %9 {strides = array<i32>} : memref<2x128xf32, #tpu.memory_space<vmem>>, vector<2x128xf32>,
    return
  }
  func.func @transform_0(%arg0: i32) -> (i32, i32, i32) {
    %c0_i32 = arith.constant 0 : i32
    %c0_i32_0 = arith.constant 0 : i32
    %c0_i32_1 = arith.constant 0 : i32
    %c0_i32_2 = arith.constant 0 : i32
    return %c0_i32, %c0_i32_0, %c0_i32_1 : i32, i32, i32
  }
  func.func @transform_1(%arg0: i32) -> (i32, i32) {
    %c0_i32 = arith.constant 0 : i32
    %c0_i32_0 = arith.constant 0 : i32
    %c0_i32_1 = arith.constant 0 : i32
    return %c0_i32, %c0_i32_0 : i32, i32
  }
  func.func @transform_2(%arg0: i32) -> (i32, i32) {
    %c0_i32 = arith.constant 0 : i32
    %c0_i32_0 = arith.constant 0 : i32
    %c0_i32_1 = arith.constant 0 : i32
    return %c0_i32, %c0_i32_0 : i32, i32
  }
  func.func @transform_3(%arg0: i32) -> (i32, i32) {
    %c0_i32 = arith.constant 0 : i32
    %c0_i32_0 = arith.constant 0 : i32
    %c0_i32_1 = arith.constant 0 : i32
    return %c0_i32, %c0_i32_0 : i32, i32
  }
}

</mosaic_0001>

<bundles_post_ra>
// kernel: resnet20_forward.22
= control target key start
LH: loop header
LB: loop body
LE: loop exit
PB: predicated region body
PF: predicated region fallthrough
CT: control target
= control target key end

     0   :  { %s1997_s15 = smov 0   ;;  %s2265_s0 = inlined_call_operand.vmem [shape: bf16[2048,27], index: 0, kind: input, shape index: {}]   ;;  %s2266_s1 = inlined_call_operand.vmem [shape: bf16[27,128], index: 1, kind: input, shape index: {}]   ;;  %s2267_s2 = inlined_call_operand.vmem [shape: f32[1,128], index: 2, kind: input, shape index: {}]   ;;  %s2268_s3 = inlined_call_operand.vmem [shape: f32[1,128], index: 3, kind: input, shape index: {}]   ;;  %s2269_s4 = inlined_call_operand.vmem [shape: bf16[2048,128], index: 4, kind: output, shape index: {}]  }
   0x1 LB: > { %s1416_s16 = sadd.s32 4294967295, %s1969_s15   ;;  %p1420_p0 = scmp.ge.s32.totalorder %s1969_s15, 1  ;;  %s1969_s15 = sphi %s1997_s15, %s14_s15  }
   0x2   : > { %p163_p1 = scmp.lt.s32.totalorder %s1969_s15, 5 }
   0x4   : > { %p164_p2 = pnand %p1420_p0, %p163_p1 }
   0x5   : > { %v1929_v0 = vld [vmem:[%s2266_s1] sm:$0xff] (!%p164_p2)   ;;  %vm538_vm0 = vcmask (!%p164_p2), 1044480   ;;  %v1930_v1 = vld [vmem:[%s2266_s1 + $0x8] sm:$0x3f] (!%p164_p2)   ;;  %vm539_vm1 = vcmask (!%p164_p2), 1045504   ;;  %s1421_s21 = sshll.u32 (!%p164_p2), %s1416_s16, 6 }
   0x6   : > { %167 = sbr.rel (%p164_p2) target bundleno = 300 (0x12c), region = 36  ;;  %1848 = vmatprep.subr.bf16.mxu0 (!%p164_p2), %v1929_v0  ;;  %1916 = vmatprep.subr.bf16.mxu1 (!%p164_p2), %v1929_v0  ;;  %v1971_v2 = vmov (!%p164_p2), 65535   ;;  %p190_p3 = scmp.lt.s32.totalorder (!%p164_p2), %s1421_s21, 255  ;;  %vm441_vm2 = vcmask (!%p164_p2), 220160   ;;  %v2088_v38 = vld [vmem:[%s2267_s2] ss:$0 sm:$0xff] (!%p164_p2) }
   0x7   : > { %1849 = vmatpush3.bf16.msra.mxu0 (!%p164_p2), %v1929_v0  ;;  %1918 = vmatpush3.bf16.msra.mxu1 (!%p164_p2), %v1929_v0  ;;  %v540_v3 = vsel (!%p164_p2), %vm538_vm0, 4294967295, %v1971_v2  ;;  %v2093_v40 = vld [vmem:[%s2268_s3] ss:$0 sm:$0xff] (!%p164_p2) }
   0x8   : > { %v541_v4 = vsel (!%p164_p2), %vm539_vm1, %v540_v3, 0 }
   0x9   : > { %v543_v5 = vand.u32 (!%p164_p2), %v1930_v1, %v541_v4 }
   0xb   : > { %1850 = vmatprep.subr.bf16.mxu0 (!%p164_p2), %v543_v5  ;;  %1917 = vmatprep.subr.bf16.mxu1 (!%p164_p2), %v543_v5 }
   0xc   : > { %1851 = vmatpush3.bf16.msra.mxu0 (!%p164_p2), %v543_v5  ;;  %1919 = vmatpush3.bf16.msra.mxu1 (!%p164_p2), %v543_v5 }
   0xd   : > { %s2271_s21 = smov (!%p190_p3, %s1421_s21), 255 }
   0xe   : > { %s1422_s22 = sshll.u32 %s2271_s21, 2 }
   0xf   : > { %s2019_s25 = scalar_lea.vmem %s2265_s0, %s1422_s22  ;;  %s2116_s6 = scalar_lea.vmem %s2269_s4, %s1422_s22 }
  0x10   : > { %v1931_v6 = vld [vmem:[%s2019_s25] sm:$0xff]   ;;  %v1933_v8 = vld [vmem:[%s2019_s25 + $0x8] sm:$0xff]   ;;  %v1935_v10 = vld [vmem:[%s2019_s25 + $0x10] sm:$0xff]  }
  0x11   : > { %v1932_v7 = vld [vmem:[%s2019_s25 + $0x80] sm:$0xff]   ;;  %1852 = vmatprep.mubr.msk.bf16.mxu0 %vm441_vm2, %v1931_v6  ;;  %v1934_v9 = vld [vmem:[%s2019_s25 + $0x88] sm:$0xff]   ;;  %v1936_v11 = vld [vmem:[%s2019_s25 + $0x90] sm:$0xff]  }
  0x12   : > { %1884 = vmatprep.mubr.msk.bf16.mxu1 %vm441_vm2, %v1932_v7  ;;  %1853 = vmatmul.mubr.msk.bf16.vlgmr.msra.gmra.mrb[0].mxu0 %vm441_vm2, %v1933_v8  ;;  %v1937_v12 = vld [vmem:[%s2019_s25 + $0x18] sm:$0xff]   ;;  %v1939_v14 = vld [vmem:[%s2019_s25 + $0x20] sm:$0xff]   ;;  %v1941_v16 = vld [vmem:[%s2019_s25 + $0x28] sm:$0xff]  }
  0x13   : > { %1885 = vmatmul.mubr.msk.bf16.vlgmr.msra.gmra.mrb[0].mxu1 %vm441_vm2, %v1934_v9  ;;  %1856 = vmatprep.mubr.msk.bf16.mxu0 %vm441_vm2, %v1935_v10  ;;  %v1938_v13 = vld [vmem:[%s2019_s25 + $0x98] sm:$0xff]   ;;  %v1940_v15 = vld [vmem:[%s2019_s25 + $0xa0] sm:$0xff]   ;;  %v1942_v17 = vld [vmem:[%s2019_s25 + $0xa8] sm:$0xff]  }
  0x14   : > { %1888 = vmatprep.mubr.msk.bf16.mxu1 %vm441_vm2, %v1936_v11  ;;  %v1943_v18 = vld [vmem:[%s2019_s25 + $0x30] sm:$0xff]   ;;  %v1945_v20 = vld [vmem:[%s2019_s25 + $0x38] sm:$0xff]   ;;  %v1947_v22 = vld [vmem:[%s2019_s25 + $0x40] sm:$0xff]  }
  0x15   : > { %v1944_v19 = vld [vmem:[%s2019_s25 + $0xb0] sm:$0xff]   ;;  %v1946_v21 = vld [vmem:[%s2019_s25 + $0xb8] sm:$0xff]   ;;  %v1948_v23 = vld [vmem:[%s2019_s25 + $0xc0] sm:$0xff]  }
  0x16   : > { %v1949_v24 = vld [vmem:[%s2019_s25 + $0x48] sm:$0xff]   ;;  %v1951_v26 = vld [vmem:[%s2019_s25 + $0x50] sm:$0xff]   ;;  %v1953_v28 = vld [vmem:[%s2019_s25 + $0x58] sm:$0xff]  }
  0x17   : > { %v1950_v25 = vld [vmem:[%s2019_s25 + $0xc8] sm:$0xff]   ;;  %v1952_v27 = vld [vmem:[%s2019_s25 + $0xd0] sm:$0xff]   ;;  %v1954_v29 = vld [vmem:[%s2019_s25 + $0xd8] sm:$0xff]  }
  0x18   : > { %v1955_v30 = vld [vmem:[%s2019_s25 + $0x60] sm:$0xff]   ;;  %v1957_v32 = vld [vmem:[%s2019_s25 + $0x68] sm:$0xff]   ;;  %v1959_v34 = vld [vmem:[%s2019_s25 + $0x70] sm:$0xff]  }
  0x19   : > { %v1956_v31 = vld [vmem:[%s2019_s25 + $0xe0] sm:$0xff]   ;;  %v1958_v33 = vld [vmem:[%s2019_s25 + $0xe8] sm:$0xff]   ;;  %v1960_v35 = vld [vmem:[%s2019_s25 + $0xf0] sm:$0xff]  }
  0x1a   : > { %1857 = vmatmul.mubr.msk.bf16.gmra.mrb[4].mxu0 %vm441_vm2, %v1937_v12  ;;  %v1961_v36 = vld [vmem:[%s2019_s25 + $0x78] sm:$0xff]  }
  0x1b   : > { %1889 = vmatmul.mubr.msk.bf16.gmra.mrb[4].mxu1 %vm441_vm2, %v1938_v13  ;;  %1860 = vmatprep.mubr.msk.bf16.mxu0 %vm441_vm2, %v1939_v14  ;;  %v1962_v37 = vld [vmem:[%s2019_s25 + $0xf8] sm:$0xff]  }
  0x1c   : > { %1892 = vmatprep.mubr.msk.bf16.mxu1 %vm441_vm2, %v1940_v15 }
  0x22   : > { %1861 = vmatmul.mubr.msk.bf16.gmra.mrb[8].mxu0 %vm441_vm2, %v1941_v16 }
  0x23   : > { %1893 = vmatmul.mubr.msk.bf16.gmra.mrb[8].mxu1 %vm441_vm2, %v1942_v17  ;;  %1864 = vmatprep.mubr.msk.bf16.mxu0 %vm441_vm2, %v1943_v18 }
  0x24   : > { %1896 = vmatprep.mubr.msk.bf16.mxu1 %vm441_vm2, %v1944_v19 }
  0x2a   : > { %1865 = vmatmul.mubr.msk.bf16.gmra.mrb[12].mxu0 %vm441_vm2, %v1945_v20 }
  0x2b   : > { %1897 = vmatmul.mubr.msk.bf16.gmra.mrb[12].mxu1 %vm441_vm2, %v1946_v21  ;;  %1868 = vmatprep.mubr.msk.bf16.mxu0 %vm441_vm2, %v1947_v22 }
  0x2c   : > { %1900 = vmatprep.mubr.msk.bf16.mxu1 %vm441_vm2, %v1948_v23 }
  0x32   : > { %1869 = vmatmul.mubr.msk.bf16.gmra.mrb[16].mxu0 %vm441_vm2, %v1949_v24 }
  0x33   : > { %1901 = vmatmul.mubr.msk.bf16.gmra.mrb[16].mxu1 %vm441_vm2, %v1950_v25  ;;  %1872 = vmatprep.mubr.msk.bf16.mxu0 %vm441_vm2, %v1951_v26 }
  0x34   : > { %1904 = vmatprep.mubr.msk.bf16.mxu1 %vm441_vm2, %v1952_v27 }
  0x3a   : > { %1873 = vmatmul.mubr.msk.bf16.gmra.mrb[20].mxu0 %vm441_vm2, %v1953_v28 }
  0x3b   : > { %1905 = vmatmul.mubr.msk.bf16.gmra.mrb[20].mxu1 %vm441_vm2, %v1954_v29  ;;  %1876 = vmatprep.mubr.msk.bf16.mxu0 %vm441_vm2, %v1955_v30 }
  0x3c   : > { %1908 = vmatprep.mubr.msk.bf16.mxu1 %vm441_vm2, %v1956_v31 }
  0x42   : > { %1877 = vmatmul.mubr.msk.bf16.gmra.mrb[24].mxu0 %vm441_vm2, %v1957_v32 }
  0x43   : > { %1909 = vmatmul.mubr.msk.bf16.gmra.mrb[24].mxu1 %vm441_vm2, %v1958_v33  ;;  %1880 = vmatprep.mubr.msk.bf16.mxu0 %vm441_vm2, %v1959_v34 }
  0x44   : > { %1912 = vmatprep.mubr.msk.bf16.mxu1 %vm441_vm2, %v1960_v35 }
  0x4a   : > { %1881 = vmatmul.mubr.msk.bf16.gmra.mrb[28].mxu0 %vm441_vm2, %v1961_v36 }
  0x4b   : > { %1913 = vmatmul.mubr.msk.bf16.gmra.mrb[28].mxu1 %vm441_vm2, %v1962_v37 }
  0xe5   : > { %v1854_v39 = vpop.f32.mrb[0].mxu0 }
  0xe6   : > { %v843_v41 = vmul.f32 %v1854_v39, %v2088_v38  ;;  %v1886_v42 = vpop.f32.mrb[0].mxu1  ;;  %v579_v43 = vpop.f32.mrb[1].mxu0 }
  0xe7   : > { %v875_v44 = vmul.f32 %v1886_v42, %v2088_v38  ;;  %v841_v45 = vmul.f32 %v2088_v38, %v579_v43  ;;  %v707_v46 = vpop.f32.mrb[1].mxu1  ;;  %v1855_v47 = vpop.f32.mrb[2].mxu0 }
  0xe8   : > { %v914_v48 = vadd.f32 %v2093_v40, %v843_v41  ;;  %v873_v49 = vmul.f32 %v2088_v38, %v707_v46  ;;  %v844_v50 = vmul.f32 %v1855_v47, %v2088_v38  ;;  %v1887_v51 = vpop.f32.mrb[2].mxu1  ;;  %v582_v52 = vpop.f32.mrb[3].mxu0 }
  0xe9   : > { %v946_v53 = vadd.f32 %v2093_v40, %v875_v44  ;;  %v912_v54 = vadd.f32 %v2093_v40, %v841_v45  ;;  %v876_v55 = vmul.f32 %v1887_v51, %v2088_v38  ;;  %v842_v56 = vmul.f32 %v2088_v38, %v582_v52  ;;  %v710_v57 = vpop.f32.mrb[3].mxu1 }
  0xea   : > { %v944_v58 = vadd.f32 %v2093_v40, %v873_v49  ;;  %v915_v59 = vadd.f32 %v2093_v40, %v844_v50  ;;  %v874_v60 = vmul.f32 %v2088_v38, %v710_v57  ;;  %v978_v63 = vmax.f32 %v914_v48, 0.0 }
  0xeb   : > { %v947_v61 = vadd.f32 %v2093_v40, %v876_v55  ;;  %v913_v62 = vadd.f32 %v2093_v40, %v842_v56  ;;  %v1010_v2 = vmax.f32 %v946_v53, 0.0  ;;  %v976_v3 = vmax.f32 %v912_v54, 0.0 }
  0xec   : > { %v979_v0 = vmax.f32 %v915_v59, 0.0  ;;  %v945_v1 = vadd.f32 %v2093_v40, %v874_v60  ;;  %v1008_v7 = vmax.f32 %v944_v58, 0.0 }
  0xed   : > { %v1011_v4 = vmax.f32 %v947_v61, 0.0  ;;  %v977_v5 = vmax.f32 %v913_v62, 0.0  ;;  %v1858_v6 = vpop.f32.mrb[4].mxu0 }
  0xee   : > { %v1631_v8 = vpack.c.bf16 %v979_v0, %v978_v63  ;;  %v1009_v9 = vmax.f32 %v945_v1, 0.0  ;;  %v847_v10 = vmul.f32 %v1858_v6, %v2088_v38  ;;  %v1890_v11 = vpop.f32.mrb[4].mxu1  ;;  %v595_v12 = vpop.f32.mrb[5].mxu0 }
  0xef   : > { %v1711_v13 = vpack.c.bf16 %v1011_v4, %v1010_v2  ;;  %v1626_v14 = vpack.c.bf16 %v977_v5, %v976_v3  ;;  %v879_v15 = vmul.f32 %v1890_v11, %v2088_v38  ;;  %v845_v16 = vmul.f32 %v2088_v38, %v595_v12  ;;  %v723_v17 = vpop.f32.mrb[5].mxu1  ;;  %v1859_v18 = vpop.f32.mrb[6].mxu0 }
  0xf0   : > { %1783 = vst [vmem:[%s2116_s6 + $0x8] sm:$0xff] %v1631_v8   ;;  %v1706_v19 = vpack.c.bf16 %v1009_v9, %v1008_v7  ;;  %v918_v20 = vadd.f32 %v2093_v40, %v847_v10  ;;  %v877_v21 = vmul.f32 %v2088_v38, %v723_v17  ;;  %v848_v22 = vmul.f32 %v1859_v18, %v2088_v38  ;;  %v1891_v23 = vpop.f32.mrb[6].mxu1  ;;  %v598_v24 = vpop.f32.mrb[7].mxu0 }
  0xf1   : > { %1799 = vst [vmem:[%s2116_s6 + $0x88] sm:$0xff] %v1711_v13   ;;  %1627 = vst [vmem:[%s2116_s6] sm:$0xff] %v1626_v14   ;;  %v950_v25 = vadd.f32 %v2093_v40, %v879_v15  ;;  %v916_v26 = vadd.f32 %v2093_v40, %v845_v16  ;;  %v880_v27 = vmul.f32 %v1891_v23, %v2088_v38  ;;  %v726_v29 = vpop.f32.mrb[7].mxu1 }
  0xf2   : > { %v846_v28 = vmul.f32 %v2088_v38, %v598_v24  ;;  %1798 = vst [vmem:[%s2116_s6 + $0x80] sm:$0xff] %v1706_v19   ;;  %v948_v30 = vadd.f32 %v2093_v40, %v877_v21  ;;  %v919_v31 = vadd.f32 %v2093_v40, %v848_v22  ;;  %v878_v32 = vmul.f32 %v2088_v38, %v726_v29 }
  0xf3   : > { %v951_v33 = vadd.f32 %v2093_v40, %v880_v27  ;;  %v982_v35 = vmax.f32 %v918_v20, 0.0  ;;  %v1014_v39 = vmax.f32 %v950_v25, 0.0  ;;  %v980_v41 = vmax.f32 %v916_v26, 0.0 }
  0xf4   : > { %v917_v34 = vadd.f32 %v2093_v40, %v846_v28  ;;  %v983_v36 = vmax.f32 %v919_v31, 0.0  ;;  %v949_v37 = vadd.f32 %v2093_v40, %v878_v32  ;;  %v1012_v45 = vmax.f32 %v948_v30, 0.0 }
  0xf5   : > { %v1015_v42 = vmax.f32 %v951_v33, 0.0  ;;  %v1862_v44 = vpop.f32.mrb[8].mxu0 }
  0xf6   : > { %v981_v43 = vmax.f32 %v917_v34, 0.0  ;;  %v1641_v46 = vpack.c.bf16 %v983_v36, %v982_v35  ;;  %v1013_v47 = vmax.f32 %v949_v37, 0.0  ;;  %v851_v48 = vmul.f32 %v1862_v44, %v2088_v38  ;;  %v1894_v49 = vpop.f32.mrb[8].mxu1  ;;  %v611_v50 = vpop.f32.mrb[9].mxu0 }
  0xf7   : > { %v1721_v51 = vpack.c.bf16 %v1015_v42, %v1014_v39  ;;  %v883_v53 = vmul.f32 %v1894_v49, %v2088_v38  ;;  %v849_v54 = vmul.f32 %v2088_v38, %v611_v50  ;;  %v739_v55 = vpop.f32.mrb[9].mxu1  ;;  %v1863_v56 = vpop.f32.mrb[10].mxu0 }
  0xf8   : > { %v1636_v52 = vpack.c.bf16 %v981_v43, %v980_v41  ;;  %1785 = vst [vmem:[%s2116_s6 + $0x18] sm:$0xff] %v1641_v46   ;;  %v1716_v57 = vpack.c.bf16 %v1013_v47, %v1012_v45  ;;  %v922_v58 = vadd.f32 %v2093_v40, %v851_v48  ;;  %v881_v59 = vmul.f32 %v2088_v38, %v739_v55  ;;  %v1895_v61 = vpop.f32.mrb[10].mxu1  ;;  %v614_v62 = vpop.f32.mrb[11].mxu0 }
  0xf9   : > { %v852_v60 = vmul.f32 %v1863_v56, %v2088_v38  ;;  %1801 = vst [vmem:[%s2116_s6 + $0x98] sm:$0xff] %v1721_v51   ;;  %v954_v63 = vadd.f32 %v2093_v40, %v883_v53  ;;  %v920_v0 = vadd.f32 %v2093_v40, %v849_v54  ;;  %v884_v1 = vmul.f32 %v1895_v61, %v2088_v38  ;;  %v742_v3 = vpop.f32.mrb[11].mxu1 }
  0xfa   : > { %1784 = vst [vmem:[%s2116_s6 + $0x10] sm:$0xff] %v1636_v52   ;;  %v850_v2 = vmul.f32 %v2088_v38, %v614_v62  ;;  %1800 = vst [vmem:[%s2116_s6 + $0x90] sm:$0xff] %v1716_v57   ;;  %v952_v4 = vadd.f32 %v2093_v40, %v881_v59  ;;  %v882_v6 = vmul.f32 %v2088_v38, %v742_v3  ;;  %v986_v9 = vmax.f32 %v922_v58, 0.0 }
  0xfb   : > { %v923_v5 = vadd.f32 %v2093_v40, %v852_v60  ;;  %v955_v7 = vadd.f32 %v2093_v40, %v884_v1  ;;  %v1018_v12 = vmax.f32 %v954_v63, 0.0  ;;  %v984_v13 = vmax.f32 %v920_v0, 0.0 }
  0xfc   : > { %v921_v8 = vadd.f32 %v2093_v40, %v850_v2  ;;  %v953_v11 = vadd.f32 %v2093_v40, %v882_v6  ;;  %v1016_v17 = vmax.f32 %v952_v4, 0.0 }
  0xfd   : > { %v987_v10 = vmax.f32 %v923_v5, 0.0  ;;  %v1019_v14 = vmax.f32 %v955_v7, 0.0  ;;  %v1866_v16 = vpop.f32.mrb[12].mxu0 }
  0xfe   : > { %v985_v15 = vmax.f32 %v921_v8, 0.0  ;;  %v1017_v19 = vmax.f32 %v953_v11, 0.0  ;;  %v855_v20 = vmul.f32 %v1866_v16, %v2088_v38  ;;  %v1898_v21 = vpop.f32.mrb[12].mxu1  ;;  %v627_v22 = vpop.f32.mrb[13].mxu0 }
  0xff   : > { %v1651_v18 = vpack.c.bf16 %v987_v10, %v986_v9  ;;  %v1731_v23 = vpack.c.bf16 %v1019_v14, %v1018_v12  ;;  %v887_v25 = vmul.f32 %v1898_v21, %v2088_v38  ;;  %v853_v26 = vmul.f32 %v2088_v38, %v627_v22  ;;  %v755_v27 = vpop.f32.mrb[13].mxu1  ;;  %v1867_v28 = vpop.f32.mrb[14].mxu0 }
 0x100   : > { %v1646_v24 = vpack.c.bf16 %v985_v15, %v984_v13  ;;  %v1726_v29 = vpack.c.bf16 %v1017_v19, %v1016_v17  ;;  %v926_v30 = vadd.f32 %v2093_v40, %v855_v20  ;;  %v885_v31 = vmul.f32 %v2088_v38, %v755_v27  ;;  %v1899_v33 = vpop.f32.mrb[14].mxu1  ;;  %v630_v34 = vpop.f32.mrb[15].mxu0 }
 0x101   : > { %1787 = vst [vmem:[%s2116_s6 + $0x28] sm:$0xff] %v1651_v18   ;;  %v856_v32 = vmul.f32 %v1867_v28, %v2088_v38  ;;  %1803 = vst [vmem:[%s2116_s6 + $0xa8] sm:$0xff] %v1731_v23   ;;  %v958_v35 = vadd.f32 %v2093_v40, %v887_v25  ;;  %v924_v36 = vadd.f32 %v2093_v40, %v853_v26  ;;  %v758_v41 = vpop.f32.mrb[15].mxu1 }
 0x102   : > { %1786 = vst [vmem:[%s2116_s6 + $0x20] sm:$0xff] %v1646_v24   ;;  %v888_v37 = vmul.f32 %v1899_v33, %v2088_v38  ;;  %v854_v39 = vmul.f32 %v2088_v38, %v630_v34  ;;  %1802 = vst [vmem:[%s2116_s6 + $0xa0] sm:$0xff] %v1726_v29   ;;  %v956_v42 = vadd.f32 %v2093_v40, %v885_v31  ;;  %v990_v47 = vmax.f32 %v926_v30, 0.0 }
 0x103   : > { %v927_v43 = vadd.f32 %v2093_v40, %v856_v32  ;;  %v886_v44 = vmul.f32 %v2088_v38, %v758_v41  ;;  %v1022_v50 = vmax.f32 %v958_v35, 0.0  ;;  %v988_v51 = vmax.f32 %v924_v36, 0.0 }
 0x104   : > { %v959_v45 = vadd.f32 %v2093_v40, %v888_v37  ;;  %v925_v46 = vadd.f32 %v2093_v40, %v854_v39  ;;  %v1020_v55 = vmax.f32 %v956_v42, 0.0 }
 0x105   : > { %v991_v48 = vmax.f32 %v927_v43, 0.0  ;;  %v957_v49 = vadd.f32 %v2093_v40, %v886_v44  ;;  %v1870_v54 = vpop.f32.mrb[16].mxu0 }
 0x106   : > { %v1023_v52 = vmax.f32 %v959_v45, 0.0  ;;  %v989_v53 = vmax.f32 %v925_v46, 0.0  ;;  %v859_v58 = vmul.f32 %v1870_v54, %v2088_v38  ;;  %v1902_v59 = vpop.f32.mrb[16].mxu1  ;;  %v643_v60 = vpop.f32.mrb[17].mxu0 }
 0x107   : > { %v1661_v56 = vpack.c.bf16 %v991_v48, %v990_v47  ;;  %v1021_v57 = vmax.f32 %v957_v49, 0.0  ;;  %v891_v63 = vmul.f32 %v1902_v59, %v2088_v38  ;;  %v857_v0 = vmul.f32 %v2088_v38, %v643_v60  ;;  %v771_v1 = vpop.f32.mrb[17].mxu1  ;;  %v1871_v2 = vpop.f32.mrb[18].mxu0 }
 0x108   : > { %v1741_v61 = vpack.c.bf16 %v1023_v52, %v1022_v50  ;;  %v1656_v62 = vpack.c.bf16 %v989_v53, %v988_v51  ;;  %v930_v4 = vadd.f32 %v2093_v40, %v859_v58  ;;  %v889_v5 = vmul.f32 %v2088_v38, %v771_v1  ;;  %v1903_v7 = vpop.f32.mrb[18].mxu1  ;;  %v646_v8 = vpop.f32.mrb[19].mxu0 }
 0x109   : > { %1789 = vst [vmem:[%s2116_s6 + $0x38] sm:$0xff] %v1661_v56   ;;  %v1736_v3 = vpack.c.bf16 %v1021_v57, %v1020_v55  ;;  %v860_v6 = vmul.f32 %v1871_v2, %v2088_v38  ;;  %v962_v9 = vadd.f32 %v2093_v40, %v891_v63  ;;  %v928_v10 = vadd.f32 %v2093_v40, %v857_v0  ;;  %v774_v13 = vpop.f32.mrb[19].mxu1 }
 0x10a   : > { %1805 = vst [vmem:[%s2116_s6 + $0xb8] sm:$0xff] %v1741_v61   ;;  %1788 = vst [vmem:[%s2116_s6 + $0x30] sm:$0xff] %v1656_v62   ;;  %v892_v11 = vmul.f32 %v1903_v7, %v2088_v38  ;;  %v858_v12 = vmul.f32 %v2088_v38, %v646_v8  ;;  %v960_v14 = vadd.f32 %v2093_v40, %v889_v5  ;;  %v994_v19 = vmax.f32 %v930_v4, 0.0 }
 0x10b   : > { %1804 = vst [vmem:[%s2116_s6 + $0xb0] sm:$0xff] %v1736_v3   ;;  %v931_v15 = vadd.f32 %v2093_v40, %v860_v6  ;;  %v890_v16 = vmul.f32 %v2088_v38, %v774_v13  ;;  %v1026_v22 = vmax.f32 %v962_v9, 0.0  ;;  %v992_v23 = vmax.f32 %v928_v10, 0.0 }
 0x10c   : > { %v963_v17 = vadd.f32 %v2093_v40, %v892_v11  ;;  %v929_v18 = vadd.f32 %v2093_v40, %v858_v12  ;;  %v1024_v27 = vmax.f32 %v960_v14, 0.0 }
 0x10d   : > { %v995_v20 = vmax.f32 %v931_v15, 0.0  ;;  %v961_v21 = vadd.f32 %v2093_v40, %v890_v16  ;;  %v1874_v26 = vpop.f32.mrb[20].mxu0 }
 0x10e   : > { %v1027_v24 = vmax.f32 %v963_v17, 0.0  ;;  %v993_v25 = vmax.f32 %v929_v18, 0.0  ;;  %v863_v30 = vmul.f32 %v1874_v26, %v2088_v38  ;;  %v1906_v31 = vpop.f32.mrb[20].mxu1  ;;  %v659_v32 = vpop.f32.mrb[21].mxu0 }
 0x10f   : > { %v1671_v28 = vpack.c.bf16 %v995_v20, %v994_v19  ;;  %v1025_v29 = vmax.f32 %v961_v21, 0.0  ;;  %v895_v35 = vmul.f32 %v1906_v31, %v2088_v38  ;;  %v861_v36 = vmul.f32 %v2088_v38, %v659_v32  ;;  %v787_v37 = vpop.f32.mrb[21].mxu1  ;;  %v1875_v39 = vpop.f32.mrb[22].mxu0 }
 0x110   : > { %v1751_v33 = vpack.c.bf16 %v1027_v24, %v1026_v22  ;;  %v1666_v34 = vpack.c.bf16 %v993_v25, %v992_v23  ;;  %v934_v42 = vadd.f32 %v2093_v40, %v863_v30  ;;  %v893_v43 = vmul.f32 %v2088_v38, %v787_v37  ;;  %v1907_v45 = vpop.f32.mrb[22].mxu1  ;;  %v662_v46 = vpop.f32.mrb[23].mxu0 }
 0x111   : > { %1791 = vst [vmem:[%s2116_s6 + $0x48] sm:$0xff] %v1671_v28   ;;  %v1746_v41 = vpack.c.bf16 %v1025_v29, %v1024_v27  ;;  %v864_v44 = vmul.f32 %v1875_v39, %v2088_v38  ;;  %v966_v47 = vadd.f32 %v2093_v40, %v895_v35  ;;  %v932_v48 = vadd.f32 %v2093_v40, %v861_v36  ;;  %v790_v51 = vpop.f32.mrb[23].mxu1 }
 0x112   : > { %1807 = vst [vmem:[%s2116_s6 + $0xc8] sm:$0xff] %v1751_v33   ;;  %1790 = vst [vmem:[%s2116_s6 + $0x40] sm:$0xff] %v1666_v34   ;;  %v896_v49 = vmul.f32 %v1907_v45, %v2088_v38  ;;  %v862_v50 = vmul.f32 %v2088_v38, %v662_v46  ;;  %v964_v52 = vadd.f32 %v2093_v40, %v893_v43  ;;  %v998_v57 = vmax.f32 %v934_v42, 0.0 }
 0x113   : > { %1806 = vst [vmem:[%s2116_s6 + $0xc0] sm:$0xff] %v1746_v41   ;;  %v935_v53 = vadd.f32 %v2093_v40, %v864_v44  ;;  %v894_v54 = vmul.f32 %v2088_v38, %v790_v51  ;;  %v1030_v60 = vmax.f32 %v966_v47, 0.0  ;;  %v996_v61 = vmax.f32 %v932_v48, 0.0 }
 0x114   : > { %v967_v55 = vadd.f32 %v2093_v40, %v896_v49  ;;  %v933_v56 = vadd.f32 %v2093_v40, %v862_v50  ;;  %v1028_v1 = vmax.f32 %v964_v52, 0.0 }
 0x115   : > { %v999_v58 = vmax.f32 %v935_v53, 0.0  ;;  %v965_v59 = vadd.f32 %v2093_v40, %v894_v54  ;;  %v1878_v0 = vpop.f32.mrb[24].mxu0 }
 0x116   : > { %v1031_v62 = vmax.f32 %v967_v55, 0.0  ;;  %v997_v63 = vmax.f32 %v933_v56, 0.0  ;;  %v867_v4 = vmul.f32 %v1878_v0, %v2088_v38  ;;  %v1910_v5 = vpop.f32.mrb[24].mxu1  ;;  %v675_v6 = vpop.f32.mrb[25].mxu0 }
 0x117   : > { %v1681_v2 = vpack.c.bf16 %v999_v58, %v998_v57  ;;  %v1029_v3 = vmax.f32 %v965_v59, 0.0  ;;  %v899_v9 = vmul.f32 %v1910_v5, %v2088_v38  ;;  %v865_v10 = vmul.f32 %v2088_v38, %v675_v6  ;;  %v803_v11 = vpop.f32.mrb[25].mxu1  ;;  %v1879_v12 = vpop.f32.mrb[26].mxu0 }
 0x118   : > { %v1761_v7 = vpack.c.bf16 %v1031_v62, %v1030_v60  ;;  %v1676_v8 = vpack.c.bf16 %v997_v63, %v996_v61  ;;  %v938_v14 = vadd.f32 %v2093_v40, %v867_v4  ;;  %v897_v15 = vmul.f32 %v2088_v38, %v803_v11  ;;  %v1911_v17 = vpop.f32.mrb[26].mxu1  ;;  %v678_v18 = vpop.f32.mrb[27].mxu0 }
 0x119   : > { %1793 = vst [vmem:[%s2116_s6 + $0x58] sm:$0xff] %v1681_v2   ;;  %v1756_v13 = vpack.c.bf16 %v1029_v3, %v1028_v1  ;;  %v868_v16 = vmul.f32 %v1879_v12, %v2088_v38  ;;  %v970_v19 = vadd.f32 %v2093_v40, %v899_v9  ;;  %v936_v20 = vadd.f32 %v2093_v40, %v865_v10  ;;  %v806_v23 = vpop.f32.mrb[27].mxu1 }
 0x11a   : > { %1809 = vst [vmem:[%s2116_s6 + $0xd8] sm:$0xff] %v1761_v7   ;;  %1792 = vst [vmem:[%s2116_s6 + $0x50] sm:$0xff] %v1676_v8   ;;  %v900_v21 = vmul.f32 %v1911_v17, %v2088_v38  ;;  %v866_v22 = vmul.f32 %v2088_v38, %v678_v18  ;;  %v968_v24 = vadd.f32 %v2093_v40, %v897_v15  ;;  %v1002_v29 = vmax.f32 %v938_v14, 0.0 }
 0x11b   : > { %1808 = vst [vmem:[%s2116_s6 + $0xd0] sm:$0xff] %v1756_v13   ;;  %v939_v25 = vadd.f32 %v2093_v40, %v868_v16  ;;  %v898_v26 = vmul.f32 %v2088_v38, %v806_v23  ;;  %v1034_v32 = vmax.f32 %v970_v19, 0.0  ;;  %v1000_v33 = vmax.f32 %v936_v20, 0.0 }
 0x11c   : > { %v971_v27 = vadd.f32 %v2093_v40, %v900_v21  ;;  %v937_v28 = vadd.f32 %v2093_v40, %v866_v22  ;;  %v1032_v37 = vmax.f32 %v968_v24, 0.0 }
 0x11d   : > { %v1003_v30 = vmax.f32 %v939_v25, 0.0  ;;  %v969_v31 = vadd.f32 %v2093_v40, %v898_v26  ;;  %v1882_v36 = vpop.f32.mrb[28].mxu0 }
 0x11e   : > { %v1035_v34 = vmax.f32 %v971_v27, 0.0  ;;  %v1001_v35 = vmax.f32 %v937_v28, 0.0  ;;  %v871_v42 = vmul.f32 %v1882_v36, %v2088_v38  ;;  %v1914_v43 = vpop.f32.mrb[28].mxu1  ;;  %v691_v44 = vpop.f32.mrb[29].mxu0 }
 0x11f   : > { %v1691_v39 = vpack.c.bf16 %v1003_v30, %v1002_v29  ;;  %v1033_v41 = vmax.f32 %v969_v31, 0.0  ;;  %v903_v47 = vmul.f32 %v1914_v43, %v2088_v38  ;;  %v869_v48 = vmul.f32 %v2088_v38, %v691_v44  ;;  %v819_v49 = vpop.f32.mrb[29].mxu1  ;;  %v1883_v50 = vpop.f32.mrb[30].mxu0 }
 0x120   : > { %v1771_v45 = vpack.c.bf16 %v1035_v34, %v1034_v32  ;;  %v1686_v46 = vpack.c.bf16 %v1001_v35, %v1000_v33  ;;  %v942_v52 = vadd.f32 %v2093_v40, %v871_v42  ;;  %v901_v53 = vmul.f32 %v2088_v38, %v819_v49  ;;  %v1915_v55 = vpop.f32.mrb[30].mxu1  ;;  %v694_v56 = vpop.f32.mrb[31].mxu0 }
 0x121   : > { %1795 = vst [vmem:[%s2116_s6 + $0x68] sm:$0xff] %v1691_v39   ;;  %v1766_v51 = vpack.c.bf16 %v1033_v41, %v1032_v37  ;;  %v872_v54 = vmul.f32 %v1883_v50, %v2088_v38  ;;  %v974_v57 = vadd.f32 %v2093_v40, %v903_v47  ;;  %v940_v58 = vadd.f32 %v2093_v40, %v869_v48  ;;  %v822_v61 = vpop.f32.mrb[31].mxu1 }
 0x122   : > { %1811 = vst [vmem:[%s2116_s6 + $0xe8] sm:$0xff] %v1771_v45   ;;  %1794 = vst [vmem:[%s2116_s6 + $0x60] sm:$0xff] %v1686_v46   ;;  %v904_v59 = vmul.f32 %v1915_v55, %v2088_v38  ;;  %v870_v60 = vmul.f32 %v2088_v38, %v694_v56  ;;  %v972_v62 = vadd.f32 %v2093_v40, %v901_v53  ;;  %v1006_v3 = vmax.f32 %v942_v52, 0.0 }
 0x123   : > { %1810 = vst [vmem:[%s2116_s6 + $0xe0] sm:$0xff] %v1766_v51   ;;  %v943_v63 = vadd.f32 %v2093_v40, %v872_v54  ;;  %v902_v0 = vmul.f32 %v2088_v38, %v822_v61  ;;  %v1038_v6 = vmax.f32 %v974_v57, 0.0  ;;  %v1004_v7 = vmax.f32 %v940_v58, 0.0 }
 0x124   : > { %v975_v1 = vadd.f32 %v2093_v40, %v904_v59  ;;  %v941_v2 = vadd.f32 %v2093_v40, %v870_v60  ;;  %v1036_v10 = vmax.f32 %v972_v62, 0.0 }
 0x125   : > { %v1007_v4 = vmax.f32 %v943_v63, 0.0  ;;  %v973_v5 = vadd.f32 %v2093_v40, %v902_v0 }
 0x126   : > { %v1039_v8 = vmax.f32 %v975_v1, 0.0  ;;  %v1005_v9 = vmax.f32 %v941_v2, 0.0 }
 0x127   : > { %v1701_v11 = vpack.c.bf16 %v1007_v4, %v1006_v3  ;;  %v1037_v12 = vmax.f32 %v973_v5, 0.0 }
 0x128   : > { %v1781_v13 = vpack.c.bf16 %v1039_v8, %v1038_v6  ;;  %v1696_v38 = vpack.c.bf16 %v1005_v9, %v1004_v7 }
 0x129   : > { %1797 = vst [vmem:[%s2116_s6 + $0x78] sm:$0xff] %v1701_v11   ;;  %v1776_v14 = vpack.c.bf16 %v1037_v12, %v1036_v10 }
 0x12a   : > { %1813 = vst [vmem:[%s2116_s6 + $0xf8] sm:$0xff] %v1781_v13   ;;  %1796 = vst [vmem:[%s2116_s6 + $0x70] sm:$0xff] %v1696_v38  }
 0x12b   : > { %1812 = vst [vmem:[%s2116_s6 + $0xf0] sm:$0xff] %v1776_v14  }
 0x12c PF: > { %s14_s15 = sadd.s32 1, %s1969_s15  }
 0x12d   : > { %p11_p4 = scmp.ge.s32.totalorder %s14_s15, 6  }
 0x12f   :  { %13 = sbr.rel (!%p11_p4) target bundleno = 1 (0x1), region = 66 }

// kernel: resnet20_forward.23
= control target key start
LH: loop header
LB: loop body
LE: loop exit
PB: predicated region body
PF: predicated region fallthrough
CT: control target
= control target key end

     0   :  { %s2202_s15 = smov 0   ;;  %s2520_s0 = inlined_call_operand.vmem [shape: bf16[2048,144], index: 0, kind: input, shape index: {}]   ;;  %s2521_s1 = inlined_call_operand.vmem [shape: bf16[144,128], index: 1, kind: input, shape index: {}]   ;;  %s2522_s2 = inlined_call_operand.vmem [shape: f32[1,128], index: 2, kind: input, shape index: {}]   ;;  %s2523_s3 = inlined_call_operand.vmem [shape: f32[1,128], index: 3, kind: input, shape index: {}]   ;;  %s2524_s4 = inlined_call_operand.vmem [shape: bf16[2048,128], index: 4, kind: output, shape index: {}]  }
   0x1 LB: > { %s1597_s16 = sadd.s32 4294967295, %s2174_s15   ;;  %p1601_p0 = scmp.ge.s32.totalorder %s2174_s15, 1  ;;  %s2174_s15 = sphi %s2202_s15, %s14_s15  }
   0x2   : > { %p164_p1 = scmp.lt.s32.totalorder %s2174_s15, 5 }
   0x4   : > { %p165_p2 = pnand %p1601_p0, %p164_p1 }
   0x5   : > { %v2063_v0 = vld [vmem:[%s2521_s1] sm:$0xff] (!%p165_p2)   ;;  %v2176_v1 = vmov (!%p165_p2), 0   ;;  %s1602_s19 = sshll.u32 (!%p165_p2), %s1597_s16, 6  ;;  %v2064_v2 = vld [vmem:[%s2521_s1 + $0x8] sm:$0xff] (!%p165_p2)   ;;  %v2065_v3 = vld [vmem:[%s2521_s1 + $0x10] sm:$0xff] (!%p165_p2)   ;;  %vm629_vm0 = vcmask (!%p165_p2), 130048  }
   0x6   : > { %168 = sbr.rel (%p165_p2) target bundleno = 386 (0x182), region = 36  ;;  %726 = vmatprep.subr.bf16.mxu0 (!%p165_p2), %v2176_v1  ;;  %2036 = vmatprep.subr.bf16.mxu1 (!%p165_p2), %v2176_v1  ;;  %p192_p3 = scmp.lt.s32.totalorder (!%p165_p2), %s1602_s19, 255  ;;  %v2066_v4 = vld [vmem:[%s2521_s1 + $0x18] sm:$0xff] (!%p165_p2)   ;;  %v2067_v7 = vld [vmem:[%s2521_s1 + $0x20] sm:$0xff] (!%p165_p2)   ;;  %v2068_v8 = vld [vmem:[%s2521_s1 + $0x28] sm:$0xff] (!%p165_p2)  }
   0x7   : > { %727 = vmatpush1.bf16.msra.mxu0 (!%p165_p2), %v2063_v0  ;;  %2045 = vmatpush1.bf16.msra.mxu1 (!%p165_p2), %v2063_v0  ;;  %v2069_v9 = vld [vmem:[%s2521_s1 + $0x30] sm:$0xff] (!%p165_p2)   ;;  %v2070_v10 = vld [vmem:[%s2521_s1 + $0x38] sm:$0xff] (!%p165_p2)   ;;  %v2071_v11 = vld [vmem:[%s2521_s1 + $0x40] sm:$0xff] (!%p165_p2)  }
   0x8   : > { %728 = vmatprep.subr.bf16.mxu0 (!%p165_p2), %v2176_v1  ;;  %2037 = vmatprep.subr.bf16.mxu1 (!%p165_p2), %v2176_v1 }
   0xb   : > { %729 = vmatpush1.bf16.msra.mxu0 (!%p165_p2), %v2064_v2  ;;  %2046 = vmatpush1.bf16.msra.mxu1 (!%p165_p2), %v2064_v2 }
   0xc   : > { %730 = vmatprep.subr.bf16.mxu0 (!%p165_p2), %v2176_v1  ;;  %2038 = vmatprep.subr.bf16.mxu1 (!%p165_p2), %v2176_v1 }
   0xd   : > { %s2526_s19 = smov (!%p192_p3, %s1602_s19), 255 }
   0xe   : > { %s1780_s24 = sshll.u32 %s2526_s19, 3  ;;  %s1606_s20 = sshll.u32 %s2526_s19, 2 }
   0xf   : > { %s2225_s27 = scalar_lea.vmem %s2520_s0, %s1780_s24  ;;  %731 = vmatpush1.bf16.msra.mxu0 %v2065_v3  ;;  %2047 = vmatpush1.bf16.msra.mxu1 %v2065_v3  ;;  %s2363_s23 = scalar_lea.vmem %s2524_s4, %s1606_s20 }
  0x10   : > { %v2074_v5 = vld [vmem:[%s2225_s27 + $0x4] ss:$8 sps:$4 sm:$0xff]   ;;  %732 = vmatprep.subr.bf16.mxu0 %v2176_v1  ;;  %2039 = vmatprep.subr.bf16.mxu1 %v2176_v1  ;;  %v2072_v12 = vld [vmem:[%s2225_s27] ss:$8 sps:$4 sm:$0xff]   ;;  %v2078_v14 = vld [vmem:[%s2225_s27 + $0x14] ss:$8 sps:$4 sm:$0xff]  }
  0x11   : > { %v2077_v6 = vld [vmem:[%s2225_s27 + $0x104] ss:$8 sps:$4 sm:$0xff]   ;;  %1680 = vmatprep.mubr.msk.bf16.mxu0 %vm629_vm0, %v2074_v5  ;;  %v2075_v13 = vld [vmem:[%s2225_s27 + $0x100] ss:$8 sps:$4 sm:$0xff]   ;;  %v2080_v15 = vld [vmem:[%s2225_s27 + $0x114] ss:$8 sps:$4 sm:$0xff]  }
  0x12   : > { %1696 = vmatprep.mubr.msk.bf16.mxu1 %vm629_vm0, %v2077_v6  ;;  %v2082_v16 = vld [vmem:[%s2225_s27 + $0x10] ss:$8 sps:$4 sm:$0xff]   ;;  %v2084_v18 = vld [vmem:[%s2225_s27 + $0x24] ss:$8 sps:$4 sm:$0xff]   ;;  %v2088_v20 = vld [vmem:[%s2225_s27 + $0x20] ss:$8 sps:$4 sm:$0xff]  }
  0x13   : > { %733 = vmatpush1.bf16.msra.mxu0 %v2066_v4  ;;  %2048 = vmatpush1.bf16.msra.mxu1 %v2066_v4  ;;  %v2083_v17 = vld [vmem:[%s2225_s27 + $0x110] ss:$8 sps:$4 sm:$0xff]   ;;  %v2086_v19 = vld [vmem:[%s2225_s27 + $0x124] ss:$8 sps:$4 sm:$0xff]   ;;  %v2089_v21 = vld [vmem:[%s2225_s27 + $0x120] ss:$8 sps:$4 sm:$0xff]  }
  0x14   : > { %734 = vmatprep.subr.bf16.mxu0 %v2176_v1  ;;  %2040 = vmatprep.subr.bf16.mxu1 %v2176_v1  ;;  %v2090_v22 = vld [vmem:[%s2225_s27 + $0x34] ss:$8 sps:$4 sm:$0xff]   ;;  %v2094_v24 = vld [vmem:[%s2225_s27 + $0x30] ss:$8 sps:$4 sm:$0xff]   ;;  %v2096_v26 = vld [vmem:[%s2225_s27 + $0x44] ss:$8 sps:$4 sm:$0xff]  }
  0x15   : > { %v2092_v23 = vld [vmem:[%s2225_s27 + $0x134] ss:$8 sps:$4 sm:$0xff]   ;;  %v2095_v25 = vld [vmem:[%s2225_s27 + $0x130] ss:$8 sps:$4 sm:$0xff]   ;;  %v2098_v27 = vld [vmem:[%s2225_s27 + $0x144] ss:$8 sps:$4 sm:$0xff]  }
  0x16   : > { %v2100_v28 = vld [vmem:[%s2225_s27 + $0x40] ss:$8 sps:$4 sm:$0xff]   ;;  %v2102_v30 = vld [vmem:[%s2225_s27 + $0x54] ss:$8 sps:$4 sm:$0xff]   ;;  %v2106_v32 = vld [vmem:[%s2225_s27 + $0x50] ss:$8 sps:$4 sm:$0xff]  }
  0x17   : > { %735 = vmatpush1.bf16.msra.mxu0 %v2067_v7  ;;  %2049 = vmatpush1.bf16.msra.mxu1 %v2067_v7  ;;  %v2101_v29 = vld [vmem:[%s2225_s27 + $0x140] ss:$8 sps:$4 sm:$0xff]   ;;  %v2104_v31 = vld [vmem:[%s2225_s27 + $0x154] ss:$8 sps:$4 sm:$0xff]   ;;  %v2107_v33 = vld [vmem:[%s2225_s27 + $0x150] ss:$8 sps:$4 sm:$0xff]  }
  0x18   : > { %736 = vmatprep.subr.bf16.mxu0 %v2176_v1  ;;  %2041 = vmatprep.subr.bf16.mxu1 %v2176_v1  ;;  %v2108_v34 = vld [vmem:[%s2225_s27 + $0x64] ss:$8 sps:$4 sm:$0xff]   ;;  %v2112_v36 = vld [vmem:[%s2225_s27 + $0x60] ss:$8 sps:$4 sm:$0xff]   ;;  %v2114_v38 = vld [vmem:[%s2225_s27 + $0x74] ss:$8 sps:$4 sm:$0xff]  }
  0x19   : > { %v2110_v35 = vld [vmem:[%s2225_s27 + $0x164] ss:$8 sps:$4 sm:$0xff]   ;;  %v2113_v37 = vld [vmem:[%s2225_s27 + $0x160] ss:$8 sps:$4 sm:$0xff]   ;;  %v2116_v39 = vld [vmem:[%s2225_s27 + $0x174] ss:$8 sps:$4 sm:$0xff]  }
  0x1a   : > { %v2118_v40 = vld [vmem:[%s2225_s27 + $0x70] ss:$8 sps:$4 sm:$0xff]   ;;  %v2120_v42 = vld [vmem:[%s2225_s27 + $0x84] ss:$8 sps:$4 sm:$0xff]   ;;  %v2124_v44 = vld [vmem:[%s2225_s27 + $0x80] ss:$8 sps:$4 sm:$0xff]  }
  0x1b   : > { %737 = vmatpush1.bf16.msra.mxu0 %v2068_v8  ;;  %2050 = vmatpush1.bf16.msra.mxu1 %v2068_v8  ;;  %v2119_v41 = vld [vmem:[%s2225_s27 + $0x170] ss:$8 sps:$4 sm:$0xff]   ;;  %v2122_v43 = vld [vmem:[%s2225_s27 + $0x184] ss:$8 sps:$4 sm:$0xff]   ;;  %v2125_v45 = vld [vmem:[%s2225_s27 + $0x180] ss:$8 sps:$4 sm:$0xff]  }
  0x1c   : > { %738 = vmatprep.subr.bf16.mxu0 %v2176_v1  ;;  %2042 = vmatprep.subr.bf16.mxu1 %v2176_v1  ;;  %v2126_v46 = vld [vmem:[%s2225_s27 + $0x94] ss:$8 sps:$4 sm:$0xff]   ;;  %v2130_v48 = vld [vmem:[%s2225_s27 + $0x90] ss:$8 sps:$4 sm:$0xff]   ;;  %v2132_v50 = vld [vmem:[%s2225_s27 + $0xa4] ss:$8 sps:$4 sm:$0xff]  }
  0x1d   : > { %v2128_v47 = vld [vmem:[%s2225_s27 + $0x194] ss:$8 sps:$4 sm:$0xff]   ;;  %v2131_v49 = vld [vmem:[%s2225_s27 + $0x190] ss:$8 sps:$4 sm:$0xff]   ;;  %v2134_v51 = vld [vmem:[%s2225_s27 + $0x1a4] ss:$8 sps:$4 sm:$0xff]  }
  0x1e   : > { %v2136_v52 = vld [vmem:[%s2225_s27 + $0xa0] ss:$8 sps:$4 sm:$0xff]   ;;  %v2138_v54 = vld [vmem:[%s2225_s27 + $0xb4] ss:$8 sps:$4 sm:$0xff]   ;;  %v2142_v56 = vld [vmem:[%s2225_s27 + $0xb0] ss:$8 sps:$4 sm:$0xff]  }
  0x1f   : > { %739 = vmatpush1.bf16.msra.mxu0 %v2069_v9  ;;  %2051 = vmatpush1.bf16.msra.mxu1 %v2069_v9  ;;  %v2137_v53 = vld [vmem:[%s2225_s27 + $0x1a0] ss:$8 sps:$4 sm:$0xff]   ;;  %v2140_v55 = vld [vmem:[%s2225_s27 + $0x1b4] ss:$8 sps:$4 sm:$0xff]   ;;  %v2143_v57 = vld [vmem:[%s2225_s27 + $0x1b0] ss:$8 sps:$4 sm:$0xff]  }
  0x20   : > { %740 = vmatprep.subr.bf16.mxu0 %v2176_v1  ;;  %2043 = vmatprep.subr.bf16.mxu1 %v2176_v1  ;;  %v2144_v58 = vld [vmem:[%s2225_s27 + $0xc4] ss:$8 sps:$4 sm:$0xff]   ;;  %v2148_v60 = vld [vmem:[%s2225_s27 + $0xc0] ss:$8 sps:$4 sm:$0xff]   ;;  %v2150_v62 = vld [vmem:[%s2225_s27 + $0xd4] ss:$8 sps:$4 sm:$0xff]  }
  0x21   : > { %v2146_v59 = vld [vmem:[%s2225_s27 + $0x1c4] ss:$8 sps:$4 sm:$0xff]   ;;  %v2149_v61 = vld [vmem:[%s2225_s27 + $0x1c0] ss:$8 sps:$4 sm:$0xff]   ;;  %v2152_v63 = vld [vmem:[%s2225_s27 + $0x1d4] ss:$8 sps:$4 sm:$0xff]  }
  0x22   : > { %v2154_v0 = vld [vmem:[%s2225_s27 + $0xd0] ss:$8 sps:$4 sm:$0xff]   ;;  %v2156_v2 = vld [vmem:[%s2225_s27 + $0xe4] ss:$8 sps:$4 sm:$0xff]   ;;  %v2160_v4 = vld [vmem:[%s2225_s27 + $0xe0] ss:$8 sps:$4 sm:$0xff]  }
  0x23   : > { %741 = vmatpush1.bf16.msra.mxu0 %v2070_v10  ;;  %2052 = vmatpush1.bf16.msra.mxu1 %v2070_v10  ;;  %v2158_v3 = vld [vmem:[%s2225_s27 + $0x1e4] ss:$8 sps:$4 sm:$0xff]   ;;  %v2161_v5 = vld [vmem:[%s2225_s27 + $0x1e0] ss:$8 sps:$4 sm:$0xff]   ;;  %v2162_v6 = vld [vmem:[%s2225_s27 + $0xf4] ss:$8 sps:$4 sm:$0xff]  }
  0x24   : > { %742 = vmatprep.subr.bf16.mxu0 %v2176_v1  ;;  %2044 = vmatprep.subr.bf16.mxu1 %v2176_v1  ;;  %v2155_v1 = vld [vmem:[%s2225_s27 + $0x1d0] ss:$8 sps:$4 sm:$0xff]   ;;  %v2164_v7 = vld [vmem:[%s2225_s27 + $0x1f4] ss:$8 sps:$4 sm:$0xff]   ;;  %v2344_v10 = vld [vmem:[%s2522_s2] ss:$0 sm:$0xff] }
  0x25   : > { %v2166_v8 = vld [vmem:[%s2225_s27 + $0xf0] ss:$8 sps:$4 sm:$0xff]  }
  0x26   : > { %v2167_v9 = vld [vmem:[%s2225_s27 + $0x1f0] ss:$8 sps:$4 sm:$0xff]  }
  0x27   : > { %743 = vmatpush1.bf16.msra.mxu0 %v2071_v11  ;;  %2053 = vmatpush1.bf16.msra.mxu1 %v2071_v11 }
  0x2a   : > { %759 = vmatmul.mubr.bf16.vlgmr.msra.gmra.mrb[0].mxu0 %v2072_v12  ;;  %887 = vmatmul.mubr.bf16.vlgmr.msra.gmra.mrb[0].mxu1 %v2075_v13  ;;  %v2349_v12 = vld [vmem:[%s2523_s3] ss:$0 sm:$0xff] }
  0x2b   : > { %1681 = vmatprep.mubr.msk.bf16.mxu0 %vm629_vm0, %v2078_v14  ;;  %1697 = vmatprep.mubr.msk.bf16.mxu1 %vm629_vm0, %v2080_v15 }
  0x32   : > { %767 = vmatmul.mubr.bf16.gmra.mrb[4].mxu0 %v2082_v16  ;;  %895 = vmatmul.mubr.bf16.gmra.mrb[4].mxu1 %v2083_v17 }
  0x33   : > { %1682 = vmatprep.mubr.msk.bf16.mxu0 %vm629_vm0, %v2084_v18  ;;  %1698 = vmatprep.mubr.msk.bf16.mxu1 %vm629_vm0, %v2086_v19 }
  0x3a   : > { %775 = vmatmul.mubr.bf16.gmra.mrb[8].mxu0 %v2088_v20  ;;  %903 = vmatmul.mubr.bf16.gmra.mrb[8].mxu1 %v2089_v21 }
  0x3b   : > { %1683 = vmatprep.mubr.msk.bf16.mxu0 %vm629_vm0, %v2090_v22  ;;  %1699 = vmatprep.mubr.msk.bf16.mxu1 %vm629_vm0, %v2092_v23 }
  0x42   : > { %783 = vmatmul.mubr.bf16.gmra.mrb[12].mxu0 %v2094_v24  ;;  %911 = vmatmul.mubr.bf16.gmra.mrb[12].mxu1 %v2095_v25 }
  0x43   : > { %1684 = vmatprep.mubr.msk.bf16.mxu0 %vm629_vm0, %v2096_v26  ;;  %1700 = vmatprep.mubr.msk.bf16.mxu1 %vm629_vm0, %v2098_v27 }
  0x4a   : > { %791 = vmatmul.mubr.bf16.gmra.mrb[16].mxu0 %v2100_v28  ;;  %919 = vmatmul.mubr.bf16.gmra.mrb[16].mxu1 %v2101_v29 }
  0x4b   : > { %1685 = vmatprep.mubr.msk.bf16.mxu0 %vm629_vm0, %v2102_v30  ;;  %1701 = vmatprep.mubr.msk.bf16.mxu1 %vm629_vm0, %v2104_v31 }
  0x52   : > { %799 = vmatmul.mubr.bf16.gmra.mrb[20].mxu0 %v2106_v32  ;;  %927 = vmatmul.mubr.bf16.gmra.mrb[20].mxu1 %v2107_v33 }
  0x53   : > { %1686 = vmatprep.mubr.msk.bf16.mxu0 %vm629_vm0, %v2108_v34  ;;  %1702 = vmatprep.mubr.msk.bf16.mxu1 %vm629_vm0, %v2110_v35 }
  0x5a   : > { %807 = vmatmul.mubr.bf16.gmra.mrb[24].mxu0 %v2112_v36  ;;  %935 = vmatmul.mubr.bf16.gmra.mrb[24].mxu1 %v2113_v37 }
  0x5b   : > { %1687 = vmatprep.mubr.msk.bf16.mxu0 %vm629_vm0, %v2114_v38  ;;  %1703 = vmatprep.mubr.msk.bf16.mxu1 %vm629_vm0, %v2116_v39 }
  0x62   : > { %815 = vmatmul.mubr.bf16.gmra.mrb[28].mxu0 %v2118_v40  ;;  %943 = vmatmul.mubr.bf16.gmra.mrb[28].mxu1 %v2119_v41 }
  0x63   : > { %1688 = vmatprep.mubr.msk.bf16.mxu0 %vm629_vm0, %v2120_v42  ;;  %1704 = vmatprep.mubr.msk.bf16.mxu1 %vm629_vm0, %v2122_v43 }
  0x6a   : > { %823 = vmatmul.mubr.bf16.gmra.mrb[32].mxu0 %v2124_v44  ;;  %951 = vmatmul.mubr.bf16.gmra.mrb[32].mxu1 %v2125_v45 }
  0x6b   : > { %1689 = vmatprep.mubr.msk.bf16.mxu0 %vm629_vm0, %v2126_v46  ;;  %1705 = vmatprep.mubr.msk.bf16.mxu1 %vm629_vm0, %v2128_v47 }
  0x72   : > { %831 = vmatmul.mubr.bf16.gmra.mrb[36].mxu0 %v2130_v48  ;;  %959 = vmatmul.mubr.bf16.gmra.mrb[36].mxu1 %v2131_v49 }
  0x73   : > { %1690 = vmatprep.mubr.msk.bf16.mxu0 %vm629_vm0, %v2132_v50  ;;  %1706 = vmatprep.mubr.msk.bf16.mxu1 %vm629_vm0, %v2134_v51 }
  0x7a   : > { %839 = vmatmul.mubr.bf16.gmra.mrb[40].mxu0 %v2136_v52  ;;  %967 = vmatmul.mubr.bf16.gmra.mrb[40].mxu1 %v2137_v53 }
  0x7b   : > { %1691 = vmatprep.mubr.msk.bf16.mxu0 %vm629_vm0, %v2138_v54  ;;  %1707 = vmatprep.mubr.msk.bf16.mxu1 %vm629_vm0, %v2140_v55 }
  0x82   : > { %847 = vmatmul.mubr.bf16.gmra.mrb[44].mxu0 %v2142_v56  ;;  %975 = vmatmul.mubr.bf16.gmra.mrb[44].mxu1 %v2143_v57 }
  0x83   : > { %1692 = vmatprep.mubr.msk.bf16.mxu0 %vm629_vm0, %v2144_v58  ;;  %1708 = vmatprep.mubr.msk.bf16.mxu1 %vm629_vm0, %v2146_v59 }
  0x8a   : > { %855 = vmatmul.mubr.bf16.gmra.mrb[48].mxu0 %v2148_v60  ;;  %983 = vmatmul.mubr.bf16.gmra.mrb[48].mxu1 %v2149_v61 }
  0x8b   : > { %1693 = vmatprep.mubr.msk.bf16.mxu0 %vm629_vm0, %v2150_v62  ;;  %1709 = vmatprep.mubr.msk.bf16.mxu1 %vm629_vm0, %v2152_v63 }
  0x92   : > { %863 = vmatmul.mubr.bf16.gmra.mrb[52].mxu0 %v2154_v0  ;;  %991 = vmatmul.mubr.bf16.gmra.mrb[52].mxu1 %v2155_v1 }
  0x93   : > { %1694 = vmatprep.mubr.msk.bf16.mxu0 %vm629_vm0, %v2156_v2  ;;  %1710 = vmatprep.mubr.msk.bf16.mxu1 %vm629_vm0, %v2158_v3 }
  0x9a   : > { %871 = vmatmul.mubr.bf16.gmra.mrb[56].mxu0 %v2160_v4  ;;  %999 = vmatmul.mubr.bf16.gmra.mrb[56].mxu1 %v2161_v5 }
  0x9b   : > { %1695 = vmatprep.mubr.msk.bf16.mxu0 %vm629_vm0, %v2162_v6  ;;  %1711 = vmatprep.mubr.msk.bf16.mxu1 %vm629_vm0, %v2164_v7 }
  0xa2   : > { %879 = vmatmul.mubr.bf16.gmra.mrb[60].mxu0 %v2166_v8  ;;  %1007 = vmatmul.mubr.bf16.gmra.mrb[60].mxu1 %v2167_v9 }
  0xfd   : > { %v760_v11 = vpop.f32.mrb[0].mxu0  ;;  %v888_v13 = vpop.f32.mrb[0].mxu1 }
  0xfe   : > { %v1022_v14 = vmul.f32 %v2344_v10, %v760_v11  ;;  %v1054_v15 = vmul.f32 %v2344_v10, %v888_v13  ;;  %v762_v16 = vpop.f32.mrb[1].mxu0  ;;  %v890_v17 = vpop.f32.mrb[1].mxu1 }
  0xff   : > { %v763_v18 = vpop.f32.mrb[2].mxu0  ;;  %v891_v19 = vpop.f32.mrb[2].mxu1 }
 0x100   : > { %v1093_v20 = vadd.f32 %v2349_v12, %v1022_v14  ;;  %v1125_v21 = vadd.f32 %v2349_v12, %v1054_v15  ;;  %v1023_v22 = vmul.f32 %v2344_v10, %v763_v18  ;;  %v1055_v23 = vmul.f32 %v2344_v10, %v891_v19  ;;  %v765_v24 = vpop.f32.mrb[3].mxu0  ;;  %v893_v25 = vpop.f32.mrb[3].mxu1 }
 0x102   : > { %v1094_v26 = vadd.f32 %v2349_v12, %v1023_v22  ;;  %v1126_v27 = vadd.f32 %v2349_v12, %v1055_v23  ;;  %v1157_v28 = vmax.f32 %v1093_v20, 0.0  ;;  %v1189_v29 = vmax.f32 %v1125_v21, 0.0 }
 0x104   : > { %v1158_v30 = vmax.f32 %v1094_v26, 0.0  ;;  %v1190_v31 = vmax.f32 %v1126_v27, 0.0 }
 0x105   : > { %v768_v32 = vpop.f32.mrb[4].mxu0  ;;  %v896_v33 = vpop.f32.mrb[4].mxu1 }
 0x106   : > { %v1848_v34 = vpack.c.bf16 %v1158_v30, %v1157_v28  ;;  %v1928_v35 = vpack.c.bf16 %v1190_v31, %v1189_v29  ;;  %v1024_v36 = vmul.f32 %v2344_v10, %v768_v32  ;;  %v1056_v37 = vmul.f32 %v2344_v10, %v896_v33  ;;  %v770_v38 = vpop.f32.mrb[5].mxu0  ;;  %v898_v39 = vpop.f32.mrb[5].mxu1 }
 0x107   : > { %v771_v40 = vpop.f32.mrb[6].mxu0  ;;  %v899_v41 = vpop.f32.mrb[6].mxu1 }
 0x108   : > { %1849 = vst [vmem:[%s2363_s23] sm:$0xff] %v1848_v34   ;;  %2020 = vst [vmem:[%s2363_s23 + $0x80] sm:$0xff] %v1928_v35   ;;  %v1095_v42 = vadd.f32 %v2349_v12, %v1024_v36  ;;  %v1127_v43 = vadd.f32 %v2349_v12, %v1056_v37  ;;  %v1025_v44 = vmul.f32 %v2344_v10, %v771_v40  ;;  %v773_v46 = vpop.f32.mrb[7].mxu0  ;;  %v901_v47 = vpop.f32.mrb[7].mxu1 }
 0x109   : > { %v1057_v45 = vmul.f32 %v2344_v10, %v899_v41 }
 0x10a   : > { %v1096_v48 = vadd.f32 %v2349_v12, %v1025_v44  ;;  %v1159_v50 = vmax.f32 %v1095_v42, 0.0  ;;  %v1191_v51 = vmax.f32 %v1127_v43, 0.0 }
 0x10b   : > { %v1128_v49 = vadd.f32 %v2349_v12, %v1057_v45 }
 0x10c   : > { %v1160_v52 = vmax.f32 %v1096_v48, 0.0 }
 0x10d   : > { %v1192_v53 = vmax.f32 %v1128_v49, 0.0  ;;  %v776_v54 = vpop.f32.mrb[8].mxu0  ;;  %v904_v55 = vpop.f32.mrb[8].mxu1 }
 0x10e   : > { %v1853_v56 = vpack.c.bf16 %v1160_v52, %v1159_v50  ;;  %v1026_v58 = vmul.f32 %v2344_v10, %v776_v54  ;;  %v1058_v59 = vmul.f32 %v2344_v10, %v904_v55  ;;  %v778_v60 = vpop.f32.mrb[9].mxu0  ;;  %v906_v61 = vpop.f32.mrb[9].mxu1 }
 0x10f   : > { %v1933_v57 = vpack.c.bf16 %v1192_v53, %v1191_v51  ;;  %v779_v62 = vpop.f32.mrb[10].mxu0  ;;  %v907_v63 = vpop.f32.mrb[10].mxu1 }
 0x110   : > { %2005 = vst [vmem:[%s2363_s23 + $0x8] sm:$0xff] %v1853_v56   ;;  %v1097_v0 = vadd.f32 %v2349_v12, %v1026_v58  ;;  %v1129_v1 = vadd.f32 %v2349_v12, %v1058_v59  ;;  %v1027_v2 = vmul.f32 %v2344_v10, %v779_v62  ;;  %v1059_v3 = vmul.f32 %v2344_v10, %v907_v63  ;;  %v781_v4 = vpop.f32.mrb[11].mxu0  ;;  %v909_v5 = vpop.f32.mrb[11].mxu1 }
 0x111   : > { %2021 = vst [vmem:[%s2363_s23 + $0x88] sm:$0xff] %v1933_v57  }
 0x112   : > { %v1098_v6 = vadd.f32 %v2349_v12, %v1027_v2  ;;  %v1130_v7 = vadd.f32 %v2349_v12, %v1059_v3  ;;  %v1161_v8 = vmax.f32 %v1097_v0, 0.0  ;;  %v1193_v9 = vmax.f32 %v1129_v1, 0.0 }
 0x114   : > { %v1162_v11 = vmax.f32 %v1098_v6, 0.0  ;;  %v1194_v13 = vmax.f32 %v1130_v7, 0.0 }
 0x115   : > { %v784_v14 = vpop.f32.mrb[12].mxu0  ;;  %v912_v15 = vpop.f32.mrb[12].mxu1 }
 0x116   : > { %v1858_v16 = vpack.c.bf16 %v1162_v11, %v1161_v8  ;;  %v1938_v17 = vpack.c.bf16 %v1194_v13, %v1193_v9  ;;  %v1028_v18 = vmul.f32 %v2344_v10, %v784_v14  ;;  %v1060_v19 = vmul.f32 %v2344_v10, %v912_v15  ;;  %v786_v20 = vpop.f32.mrb[13].mxu0  ;;  %v914_v21 = vpop.f32.mrb[13].mxu1 }
 0x117   : > { %v787_v22 = vpop.f32.mrb[14].mxu0  ;;  %v915_v23 = vpop.f32.mrb[14].mxu1 }
 0x118   : > { %2006 = vst [vmem:[%s2363_s23 + $0x10] sm:$0xff] %v1858_v16   ;;  %2022 = vst [vmem:[%s2363_s23 + $0x90] sm:$0xff] %v1938_v17   ;;  %v1099_v24 = vadd.f32 %v2349_v12, %v1028_v18  ;;  %v1131_v25 = vadd.f32 %v2349_v12, %v1060_v19  ;;  %v1029_v26 = vmul.f32 %v2344_v10, %v787_v22  ;;  %v789_v28 = vpop.f32.mrb[15].mxu0  ;;  %v917_v29 = vpop.f32.mrb[15].mxu1 }
 0x119   : > { %v1061_v27 = vmul.f32 %v2344_v10, %v915_v23 }
 0x11a   : > { %v1100_v30 = vadd.f32 %v2349_v12, %v1029_v26  ;;  %v1163_v32 = vmax.f32 %v1099_v24, 0.0  ;;  %v1195_v33 = vmax.f32 %v1131_v25, 0.0 }
 0x11b   : > { %v1132_v31 = vadd.f32 %v2349_v12, %v1061_v27 }
 0x11c   : > { %v1164_v34 = vmax.f32 %v1100_v30, 0.0 }
 0x11d   : > { %v1196_v35 = vmax.f32 %v1132_v31, 0.0  ;;  %v792_v36 = vpop.f32.mrb[16].mxu0  ;;  %v920_v37 = vpop.f32.mrb[16].mxu1 }
 0x11e   : > { %v1863_v38 = vpack.c.bf16 %v1164_v34, %v1163_v32  ;;  %v1030_v40 = vmul.f32 %v2344_v10, %v792_v36  ;;  %v1062_v41 = vmul.f32 %v2344_v10, %v920_v37  ;;  %v794_v42 = vpop.f32.mrb[17].mxu0  ;;  %v922_v43 = vpop.f32.mrb[17].mxu1 }
 0x11f   : > { %v1943_v39 = vpack.c.bf16 %v1196_v35, %v1195_v33  ;;  %v795_v44 = vpop.f32.mrb[18].mxu0  ;;  %v923_v45 = vpop.f32.mrb[18].mxu1 }
 0x120   : > { %2007 = vst [vmem:[%s2363_s23 + $0x18] sm:$0xff] %v1863_v38   ;;  %v1101_v46 = vadd.f32 %v2349_v12, %v1030_v40  ;;  %v1133_v47 = vadd.f32 %v2349_v12, %v1062_v41  ;;  %v1031_v48 = vmul.f32 %v2344_v10, %v795_v44  ;;  %v1063_v49 = vmul.f32 %v2344_v10, %v923_v45  ;;  %v797_v50 = vpop.f32.mrb[19].mxu0  ;;  %v925_v51 = vpop.f32.mrb[19].mxu1 }
 0x121   : > { %2023 = vst [vmem:[%s2363_s23 + $0x98] sm:$0xff] %v1943_v39  }
 0x122   : > { %v1102_v52 = vadd.f32 %v2349_v12, %v1031_v48  ;;  %v1134_v53 = vadd.f32 %v2349_v12, %v1063_v49  ;;  %v1165_v54 = vmax.f32 %v1101_v46, 0.0  ;;  %v1197_v55 = vmax.f32 %v1133_v47, 0.0 }
 0x124   : > { %v1166_v56 = vmax.f32 %v1102_v52, 0.0  ;;  %v1198_v57 = vmax.f32 %v1134_v53, 0.0 }
 0x125   : > { %v800_v58 = vpop.f32.mrb[20].mxu0  ;;  %v928_v59 = vpop.f32.mrb[20].mxu1 }
 0x126   : > { %v1868_v60 = vpack.c.bf16 %v1166_v56, %v1165_v54  ;;  %v1948_v61 = vpack.c.bf16 %v1198_v57, %v1197_v55  ;;  %v1032_v62 = vmul.f32 %v2344_v10, %v800_v58  ;;  %v1064_v63 = vmul.f32 %v2344_v10, %v928_v59  ;;  %v802_v0 = vpop.f32.mrb[21].mxu0  ;;  %v930_v1 = vpop.f32.mrb[21].mxu1 }
 0x127   : > { %v803_v2 = vpop.f32.mrb[22].mxu0  ;;  %v931_v3 = vpop.f32.mrb[22].mxu1 }
 0x128   : > { %2008 = vst [vmem:[%s2363_s23 + $0x20] sm:$0xff] %v1868_v60   ;;  %2024 = vst [vmem:[%s2363_s23 + $0xa0] sm:$0xff] %v1948_v61   ;;  %v1103_v4 = vadd.f32 %v2349_v12, %v1032_v62  ;;  %v1135_v5 = vadd.f32 %v2349_v12, %v1064_v63  ;;  %v1033_v6 = vmul.f32 %v2344_v10, %v803_v2  ;;  %v805_v8 = vpop.f32.mrb[23].mxu0  ;;  %v933_v9 = vpop.f32.mrb[23].mxu1 }
 0x129   : > { %v1065_v7 = vmul.f32 %v2344_v10, %v931_v3 }
 0x12a   : > { %v1104_v11 = vadd.f32 %v2349_v12, %v1033_v6  ;;  %v1167_v14 = vmax.f32 %v1103_v4, 0.0  ;;  %v1199_v15 = vmax.f32 %v1135_v5, 0.0 }
 0x12b   : > { %v1136_v13 = vadd.f32 %v2349_v12, %v1065_v7 }
 0x12c   : > { %v1168_v16 = vmax.f32 %v1104_v11, 0.0 }
 0x12d   : > { %v1200_v17 = vmax.f32 %v1136_v13, 0.0  ;;  %v808_v18 = vpop.f32.mrb[24].mxu0  ;;  %v936_v19 = vpop.f32.mrb[24].mxu1 }
 0x12e   : > { %v1873_v20 = vpack.c.bf16 %v1168_v16, %v1167_v14  ;;  %v1034_v22 = vmul.f32 %v2344_v10, %v808_v18  ;;  %v1066_v23 = vmul.f32 %v2344_v10, %v936_v19  ;;  %v810_v24 = vpop.f32.mrb[25].mxu0  ;;  %v938_v25 = vpop.f32.mrb[25].mxu1 }
 0x12f   : > { %v1953_v21 = vpack.c.bf16 %v1200_v17, %v1199_v15  ;;  %v811_v26 = vpop.f32.mrb[26].mxu0  ;;  %v939_v27 = vpop.f32.mrb[26].mxu1 }
 0x130   : > { %2009 = vst [vmem:[%s2363_s23 + $0x28] sm:$0xff] %v1873_v20   ;;  %v1105_v28 = vadd.f32 %v2349_v12, %v1034_v22  ;;  %v1137_v29 = vadd.f32 %v2349_v12, %v1066_v23  ;;  %v1035_v30 = vmul.f32 %v2344_v10, %v811_v26  ;;  %v1067_v31 = vmul.f32 %v2344_v10, %v939_v27  ;;  %v813_v32 = vpop.f32.mrb[27].mxu0  ;;  %v941_v33 = vpop.f32.mrb[27].mxu1 }
 0x131   : > { %2025 = vst [vmem:[%s2363_s23 + $0xa8] sm:$0xff] %v1953_v21  }
 0x132   : > { %v1106_v34 = vadd.f32 %v2349_v12, %v1035_v30  ;;  %v1138_v35 = vadd.f32 %v2349_v12, %v1067_v31  ;;  %v1169_v36 = vmax.f32 %v1105_v28, 0.0  ;;  %v1201_v37 = vmax.f32 %v1137_v29, 0.0 }
 0x134   : > { %v1170_v38 = vmax.f32 %v1106_v34, 0.0  ;;  %v1202_v39 = vmax.f32 %v1138_v35, 0.0 }
 0x135   : > { %v816_v40 = vpop.f32.mrb[28].mxu0  ;;  %v944_v41 = vpop.f32.mrb[28].mxu1 }
 0x136   : > { %v1878_v42 = vpack.c.bf16 %v1170_v38, %v1169_v36  ;;  %v1958_v43 = vpack.c.bf16 %v1202_v39, %v1201_v37  ;;  %v1036_v44 = vmul.f32 %v2344_v10, %v816_v40  ;;  %v1068_v45 = vmul.f32 %v2344_v10, %v944_v41  ;;  %v818_v46 = vpop.f32.mrb[29].mxu0  ;;  %v946_v47 = vpop.f32.mrb[29].mxu1 }
 0x137   : > { %v819_v48 = vpop.f32.mrb[30].mxu0  ;;  %v947_v49 = vpop.f32.mrb[30].mxu1 }
 0x138   : > { %2010 = vst [vmem:[%s2363_s23 + $0x30] sm:$0xff] %v1878_v42   ;;  %2026 = vst [vmem:[%s2363_s23 + $0xb0] sm:$0xff] %v1958_v43   ;;  %v1107_v50 = vadd.f32 %v2349_v12, %v1036_v44  ;;  %v1139_v51 = vadd.f32 %v2349_v12, %v1068_v45  ;;  %v1037_v52 = vmul.f32 %v2344_v10, %v819_v48  ;;  %v821_v54 = vpop.f32.mrb[31].mxu0  ;;  %v949_v55 = vpop.f32.mrb[31].mxu1 }
 0x139   : > { %v1069_v53 = vmul.f32 %v2344_v10, %v947_v49 }
 0x13a   : > { %v1108_v56 = vadd.f32 %v2349_v12, %v1037_v52  ;;  %v1171_v58 = vmax.f32 %v1107_v50, 0.0  ;;  %v1203_v59 = vmax.f32 %v1139_v51, 0.0 }
 0x13b   : > { %v1140_v57 = vadd.f32 %v2349_v12, %v1069_v53 }
 0x13c   : > { %v1172_v60 = vmax.f32 %v1108_v56, 0.0 }
 0x13d   : > { %v1204_v61 = vmax.f32 %v1140_v57, 0.0  ;;  %v824_v62 = vpop.f32.mrb[32].mxu0  ;;  %v952_v63 = vpop.f32.mrb[32].mxu1 }
 0x13e   : > { %v1883_v0 = vpack.c.bf16 %v1172_v60, %v1171_v58  ;;  %v1038_v2 = vmul.f32 %v2344_v10, %v824_v62  ;;  %v1070_v3 = vmul.f32 %v2344_v10, %v952_v63  ;;  %v826_v4 = vpop.f32.mrb[33].mxu0  ;;  %v954_v5 = vpop.f32.mrb[33].mxu1 }
 0x13f   : > { %v1963_v1 = vpack.c.bf16 %v1204_v61, %v1203_v59  ;;  %v827_v6 = vpop.f32.mrb[34].mxu0  ;;  %v955_v7 = vpop.f32.mrb[34].mxu1 }
 0x140   : > { %2011 = vst [vmem:[%s2363_s23 + $0x38] sm:$0xff] %v1883_v0   ;;  %v1109_v8 = vadd.f32 %v2349_v12, %v1038_v2  ;;  %v1141_v9 = vadd.f32 %v2349_v12, %v1070_v3  ;;  %v1039_v11 = vmul.f32 %v2344_v10, %v827_v6  ;;  %v1071_v13 = vmul.f32 %v2344_v10, %v955_v7  ;;  %v829_v14 = vpop.f32.mrb[35].mxu0  ;;  %v957_v15 = vpop.f32.mrb[35].mxu1 }
 0x141   : > { %2027 = vst [vmem:[%s2363_s23 + $0xb8] sm:$0xff] %v1963_v1  }
 0x142   : > { %v1110_v16 = vadd.f32 %v2349_v12, %v1039_v11  ;;  %v1142_v17 = vadd.f32 %v2349_v12, %v1071_v13  ;;  %v1173_v18 = vmax.f32 %v1109_v8, 0.0  ;;  %v1205_v19 = vmax.f32 %v1141_v9, 0.0 }
 0x144   : > { %v1174_v20 = vmax.f32 %v1110_v16, 0.0  ;;  %v1206_v21 = vmax.f32 %v1142_v17, 0.0 }
 0x145   : > { %v832_v22 = vpop.f32.mrb[36].mxu0  ;;  %v960_v23 = vpop.f32.mrb[36].mxu1 }
 0x146   : > { %v1888_v24 = vpack.c.bf16 %v1174_v20, %v1173_v18  ;;  %v1968_v25 = vpack.c.bf16 %v1206_v21, %v1205_v19  ;;  %v1040_v26 = vmul.f32 %v2344_v10, %v832_v22  ;;  %v1072_v27 = vmul.f32 %v2344_v10, %v960_v23  ;;  %v834_v28 = vpop.f32.mrb[37].mxu0  ;;  %v962_v29 = vpop.f32.mrb[37].mxu1 }
 0x147   : > { %v835_v30 = vpop.f32.mrb[38].mxu0  ;;  %v963_v31 = vpop.f32.mrb[38].mxu1 }
 0x148   : > { %2012 = vst [vmem:[%s2363_s23 + $0x40] sm:$0xff] %v1888_v24   ;;  %2028 = vst [vmem:[%s2363_s23 + $0xc0] sm:$0xff] %v1968_v25   ;;  %v1111_v32 = vadd.f32 %v2349_v12, %v1040_v26  ;;  %v1143_v33 = vadd.f32 %v2349_v12, %v1072_v27  ;;  %v1041_v34 = vmul.f32 %v2344_v10, %v835_v30  ;;  %v837_v36 = vpop.f32.mrb[39].mxu0  ;;  %v965_v37 = vpop.f32.mrb[39].mxu1 }
 0x149   : > { %v1073_v35 = vmul.f32 %v2344_v10, %v963_v31 }
 0x14a   : > { %v1112_v38 = vadd.f32 %v2349_v12, %v1041_v34  ;;  %v1175_v40 = vmax.f32 %v1111_v32, 0.0  ;;  %v1207_v41 = vmax.f32 %v1143_v33, 0.0 }
 0x14b   : > { %v1144_v39 = vadd.f32 %v2349_v12, %v1073_v35 }
 0x14c   : > { %v1176_v42 = vmax.f32 %v1112_v38, 0.0 }
 0x14d   : > { %v1208_v43 = vmax.f32 %v1144_v39, 0.0  ;;  %v840_v44 = vpop.f32.mrb[40].mxu0  ;;  %v968_v45 = vpop.f32.mrb[40].mxu1 }
 0x14e   : > { %v1893_v46 = vpack.c.bf16 %v1176_v42, %v1175_v40  ;;  %v1042_v48 = vmul.f32 %v2344_v10, %v840_v44  ;;  %v1074_v49 = vmul.f32 %v2344_v10, %v968_v45  ;;  %v842_v50 = vpop.f32.mrb[41].mxu0  ;;  %v970_v51 = vpop.f32.mrb[41].mxu1 }
 0x14f   : > { %v1973_v47 = vpack.c.bf16 %v1208_v43, %v1207_v41  ;;  %v843_v52 = vpop.f32.mrb[42].mxu0  ;;  %v971_v53 = vpop.f32.mrb[42].mxu1 }
 0x150   : > { %2013 = vst [vmem:[%s2363_s23 + $0x48] sm:$0xff] %v1893_v46   ;;  %v1113_v54 = vadd.f32 %v2349_v12, %v1042_v48  ;;  %v1145_v55 = vadd.f32 %v2349_v12, %v1074_v49  ;;  %v1043_v56 = vmul.f32 %v2344_v10, %v843_v52  ;;  %v1075_v57 = vmul.f32 %v2344_v10, %v971_v53  ;;  %v845_v58 = vpop.f32.mrb[43].mxu0  ;;  %v973_v59 = vpop.f32.mrb[43].mxu1 }
 0x151   : > { %2029 = vst [vmem:[%s2363_s23 + $0xc8] sm:$0xff] %v1973_v47  }
 0x152   : > { %v1114_v60 = vadd.f32 %v2349_v12, %v1043_v56  ;;  %v1146_v61 = vadd.f32 %v2349_v12, %v1075_v57  ;;  %v1177_v62 = vmax.f32 %v1113_v54, 0.0  ;;  %v1209_v63 = vmax.f32 %v1145_v55, 0.0 }
 0x154   : > { %v1178_v0 = vmax.f32 %v1114_v60, 0.0  ;;  %v1210_v1 = vmax.f32 %v1146_v61, 0.0 }
 0x155   : > { %v848_v2 = vpop.f32.mrb[44].mxu0  ;;  %v976_v3 = vpop.f32.mrb[44].mxu1 }
 0x156   : > { %v1898_v4 = vpack.c.bf16 %v1178_v0, %v1177_v62  ;;  %v1978_v5 = vpack.c.bf16 %v1210_v1, %v1209_v63  ;;  %v1044_v6 = vmul.f32 %v2344_v10, %v848_v2  ;;  %v1076_v7 = vmul.f32 %v2344_v10, %v976_v3  ;;  %v850_v8 = vpop.f32.mrb[45].mxu0  ;;  %v978_v9 = vpop.f32.mrb[45].mxu1 }
 0x157   : > { %v851_v11 = vpop.f32.mrb[46].mxu0  ;;  %v979_v13 = vpop.f32.mrb[46].mxu1 }
 0x158   : > { %2014 = vst [vmem:[%s2363_s23 + $0x50] sm:$0xff] %v1898_v4   ;;  %2030 = vst [vmem:[%s2363_s23 + $0xd0] sm:$0xff] %v1978_v5   ;;  %v1115_v14 = vadd.f32 %v2349_v12, %v1044_v6  ;;  %v1147_v15 = vadd.f32 %v2349_v12, %v1076_v7  ;;  %v1045_v16 = vmul.f32 %v2344_v10, %v851_v11  ;;  %v853_v18 = vpop.f32.mrb[47].mxu0  ;;  %v981_v19 = vpop.f32.mrb[47].mxu1 }
 0x159   : > { %v1077_v17 = vmul.f32 %v2344_v10, %v979_v13 }
 0x15a   : > { %v1116_v20 = vadd.f32 %v2349_v12, %v1045_v16  ;;  %v1179_v22 = vmax.f32 %v1115_v14, 0.0  ;;  %v1211_v23 = vmax.f32 %v1147_v15, 0.0 }
 0x15b   : > { %v1148_v21 = vadd.f32 %v2349_v12, %v1077_v17 }
 0x15c   : > { %v1180_v24 = vmax.f32 %v1116_v20, 0.0 }
 0x15d   : > { %v1212_v25 = vmax.f32 %v1148_v21, 0.0  ;;  %v856_v26 = vpop.f32.mrb[48].mxu0  ;;  %v984_v27 = vpop.f32.mrb[48].mxu1 }
 0x15e   : > { %v1903_v28 = vpack.c.bf16 %v1180_v24, %v1179_v22  ;;  %v1046_v30 = vmul.f32 %v2344_v10, %v856_v26  ;;  %v1078_v31 = vmul.f32 %v2344_v10, %v984_v27  ;;  %v858_v32 = vpop.f32.mrb[49].mxu0  ;;  %v986_v33 = vpop.f32.mrb[49].mxu1 }
 0x15f   : > { %v1983_v29 = vpack.c.bf16 %v1212_v25, %v1211_v23  ;;  %v859_v34 = vpop.f32.mrb[50].mxu0  ;;  %v987_v35 = vpop.f32.mrb[50].mxu1 }
 0x160   : > { %2015 = vst [vmem:[%s2363_s23 + $0x58] sm:$0xff] %v1903_v28   ;;  %v1117_v36 = vadd.f32 %v2349_v12, %v1046_v30  ;;  %v1149_v37 = vadd.f32 %v2349_v12, %v1078_v31  ;;  %v1047_v38 = vmul.f32 %v2344_v10, %v859_v34  ;;  %v1079_v39 = vmul.f32 %v2344_v10, %v987_v35  ;;  %v861_v40 = vpop.f32.mrb[51].mxu0  ;;  %v989_v41 = vpop.f32.mrb[51].mxu1 }
 0x161   : > { %2031 = vst [vmem:[%s2363_s23 + $0xd8] sm:$0xff] %v1983_v29  }
 0x162   : > { %v1118_v42 = vadd.f32 %v2349_v12, %v1047_v38  ;;  %v1150_v43 = vadd.f32 %v2349_v12, %v1079_v39  ;;  %v1181_v44 = vmax.f32 %v1117_v36, 0.0  ;;  %v1213_v45 = vmax.f32 %v1149_v37, 0.0 }
 0x164   : > { %v1182_v46 = vmax.f32 %v1118_v42, 0.0  ;;  %v1214_v47 = vmax.f32 %v1150_v43, 0.0 }
 0x165   : > { %v864_v48 = vpop.f32.mrb[52].mxu0  ;;  %v992_v49 = vpop.f32.mrb[52].mxu1 }
 0x166   : > { %v1908_v50 = vpack.c.bf16 %v1182_v46, %v1181_v44  ;;  %v1988_v51 = vpack.c.bf16 %v1214_v47, %v1213_v45  ;;  %v1048_v52 = vmul.f32 %v2344_v10, %v864_v48  ;;  %v1080_v53 = vmul.f32 %v2344_v10, %v992_v49  ;;  %v866_v54 = vpop.f32.mrb[53].mxu0  ;;  %v994_v55 = vpop.f32.mrb[53].mxu1 }
 0x167   : > { %v867_v56 = vpop.f32.mrb[54].mxu0  ;;  %v995_v57 = vpop.f32.mrb[54].mxu1 }
 0x168   : > { %2016 = vst [vmem:[%s2363_s23 + $0x60] sm:$0xff] %v1908_v50   ;;  %2032 = vst [vmem:[%s2363_s23 + $0xe0] sm:$0xff] %v1988_v51   ;;  %v1119_v58 = vadd.f32 %v2349_v12, %v1048_v52  ;;  %v1151_v59 = vadd.f32 %v2349_v12, %v1080_v53  ;;  %v1049_v60 = vmul.f32 %v2344_v10, %v867_v56  ;;  %v869_v62 = vpop.f32.mrb[55].mxu0  ;;  %v997_v63 = vpop.f32.mrb[55].mxu1 }
 0x169   : > { %v1081_v61 = vmul.f32 %v2344_v10, %v995_v57 }
 0x16a   : > { %v1120_v0 = vadd.f32 %v2349_v12, %v1049_v60  ;;  %v1183_v2 = vmax.f32 %v1119_v58, 0.0  ;;  %v1215_v3 = vmax.f32 %v1151_v59, 0.0 }
 0x16b   : > { %v1152_v1 = vadd.f32 %v2349_v12, %v1081_v61 }
 0x16c   : > { %v1184_v4 = vmax.f32 %v1120_v0, 0.0 }
 0x16d   : > { %v1216_v5 = vmax.f32 %v1152_v1, 0.0  ;;  %v872_v6 = vpop.f32.mrb[56].mxu0  ;;  %v1000_v7 = vpop.f32.mrb[56].mxu1 }
 0x16e   : > { %v1913_v8 = vpack.c.bf16 %v1184_v4, %v1183_v2  ;;  %v1050_v11 = vmul.f32 %v2344_v10, %v872_v6  ;;  %v1082_v13 = vmul.f32 %v2344_v10, %v1000_v7  ;;  %v874_v14 = vpop.f32.mrb[57].mxu0  ;;  %v1002_v15 = vpop.f32.mrb[57].mxu1 }
 0x16f   : > { %v1993_v9 = vpack.c.bf16 %v1216_v5, %v1215_v3  ;;  %v875_v16 = vpop.f32.mrb[58].mxu0  ;;  %v1003_v17 = vpop.f32.mrb[58].mxu1 }
 0x170   : > { %2017 = vst [vmem:[%s2363_s23 + $0x68] sm:$0xff] %v1913_v8   ;;  %v1121_v18 = vadd.f32 %v2349_v12, %v1050_v11  ;;  %v1153_v19 = vadd.f32 %v2349_v12, %v1082_v13  ;;  %v1051_v20 = vmul.f32 %v2344_v10, %v875_v16  ;;  %v1083_v21 = vmul.f32 %v2344_v10, %v1003_v17  ;;  %v877_v22 = vpop.f32.mrb[59].mxu0  ;;  %v1005_v23 = vpop.f32.mrb[59].mxu1 }
 0x171   : > { %2033 = vst [vmem:[%s2363_s23 + $0xe8] sm:$0xff] %v1993_v9  }
 0x172   : > { %v1122_v24 = vadd.f32 %v2349_v12, %v1051_v20  ;;  %v1154_v25 = vadd.f32 %v2349_v12, %v1083_v21  ;;  %v1185_v26 = vmax.f32 %v1121_v18, 0.0  ;;  %v1217_v27 = vmax.f32 %v1153_v19, 0.0 }
 0x174   : > { %v1186_v28 = vmax.f32 %v1122_v24, 0.0  ;;  %v1218_v29 = vmax.f32 %v1154_v25, 0.0 }
 0x175   : > { %v880_v30 = vpop.f32.mrb[60].mxu0  ;;  %v1008_v31 = vpop.f32.mrb[60].mxu1 }
 0x176   : > { %v1918_v32 = vpack.c.bf16 %v1186_v28, %v1185_v26  ;;  %v1998_v33 = vpack.c.bf16 %v1218_v29, %v1217_v27  ;;  %v1052_v34 = vmul.f32 %v2344_v10, %v880_v30  ;;  %v1084_v35 = vmul.f32 %v2344_v10, %v1008_v31  ;;  %v882_v36 = vpop.f32.mrb[61].mxu0  ;;  %v1010_v37 = vpop.f32.mrb[61].mxu1 }
 0x177   : > { %v883_v38 = vpop.f32.mrb[62].mxu0  ;;  %v1011_v39 = vpop.f32.mrb[62].mxu1 }
 0x178   : > { %2018 = vst [vmem:[%s2363_s23 + $0x70] sm:$0xff] %v1918_v32   ;;  %2034 = vst [vmem:[%s2363_s23 + $0xf0] sm:$0xff] %v1998_v33   ;;  %v1123_v40 = vadd.f32 %v2349_v12, %v1052_v34  ;;  %v1155_v41 = vadd.f32 %v2349_v12, %v1084_v35  ;;  %v1053_v42 = vmul.f32 %v2344_v10, %v883_v38  ;;  %v885_v44 = vpop.f32.mrb[63].mxu0  ;;  %v1013_v45 = vpop.f32.mrb[63].mxu1 }
 0x179   : > { %v1085_v43 = vmul.f32 %v2344_v10, %v1011_v39 }
 0x17a   : > { %v1124_v46 = vadd.f32 %v2349_v12, %v1053_v42  ;;  %v1187_v48 = vmax.f32 %v1123_v40, 0.0  ;;  %v1219_v49 = vmax.f32 %v1155_v41, 0.0 }
 0x17b   : > { %v1156_v47 = vadd.f32 %v2349_v12, %v1085_v43 }
 0x17c   : > { %v1188_v50 = vmax.f32 %v1124_v46, 0.0 }
 0x17d   : > { %v1220_v51 = vmax.f32 %v1156_v47, 0.0 }
 0x17e   : > { %v1923_v52 = vpack.c.bf16 %v1188_v50, %v1187_v48 }
 0x17f   : > { %v2003_v53 = vpack.c.bf16 %v1220_v51, %v1219_v49 }
 0x180   : > { %2019 = vst [vmem:[%s2363_s23 + $0x78] sm:$0xff] %v1923_v52  }
 0x181   : > { %2035 = vst [vmem:[%s2363_s23 + $0xf8] sm:$0xff] %v2003_v53  }
 0x182 PF: > { %s14_s15 = sadd.s32 1, %s2174_s15  }
 0x183   : > { %p11_p4 = scmp.ge.s32.totalorder %s14_s15, 6  }
 0x185   :  { %13 = sbr.rel (!%p11_p4) target bundleno = 1 (0x1), region = 66 }

// kernel: resnet20_forward.24
= control target key start
LH: loop header
LB: loop body
LE: loop exit
PB: predicated region body
PF: predicated region fallthrough
CT: control target
= control target key end

     0   :  { %s2623_s18 = smov 0   ;;  %s2980_s0 = inlined_call_operand.vmem [shape: bf16[2048,144], index: 0, kind: input, shape index: {}]   ;;  %s2981_s1 = inlined_call_operand.vmem [shape: bf16[144,128], index: 1, kind: input, shape index: {}]   ;;  %s2982_s2 = inlined_call_operand.vmem [shape: f32[1,128], index: 2, kind: input, shape index: {}]   ;;  %s2983_s3 = inlined_call_operand.vmem [shape: f32[1,128], index: 3, kind: input, shape index: {}]   ;;  %s2984_s4 = inlined_call_operand.vmem [shape: bf16[2048,128], index: 4, kind: input, shape index: {}]   ;;  %s2985_s5 = inlined_call_operand.vmem [shape: bf16[2048,128], index: 5, kind: output, shape index: {}]  }
   0x1 LB: > { %s1850_s19 = sadd.s32 4294967295, %s2590_s18   ;;  %p1854_p0 = scmp.ge.s32.totalorder %s2590_s18, 1  ;;  %s2590_s18 = sphi %s2623_s18, %s15_s18  }
   0x2   : > { %p200_p1 = scmp.lt.s32.totalorder %s2590_s18, 5 }
   0x4   : > { %p201_p2 = pnand %p1854_p0, %p200_p1 }
   0x5   : > { %v2477_v0 = vld [vmem:[%s2981_s1] sm:$0xff] (!%p201_p2)   ;;  %v2592_v1 = vmov (!%p201_p2), 0   ;;  %s1855_s22 = sshll.u32 (!%p201_p2), %s1850_s19, 6  ;;  %v2478_v2 = vld [vmem:[%s2981_s1 + $0x8] sm:$0xff] (!%p201_p2)   ;;  %v2479_v3 = vld [vmem:[%s2981_s1 + $0x10] sm:$0xff] (!%p201_p2)   ;;  %vm678_vm0 = vcmask (!%p201_p2), 130048  }
   0x6   : > { %204 = sbr.rel (%p201_p2) target bundleno = 388 (0x184), region = 40  ;;  %775 = vmatprep.subr.bf16.mxu0 (!%p201_p2), %v2592_v1  ;;  %2450 = vmatprep.subr.bf16.mxu1 (!%p201_p2), %v2592_v1  ;;  %p235_p3 = scmp.lt.s32.totalorder (!%p201_p2), %s1855_s22, 255  ;;  %v2480_v4 = vld [vmem:[%s2981_s1 + $0x18] sm:$0xff] (!%p201_p2)   ;;  %v2481_v7 = vld [vmem:[%s2981_s1 + $0x20] sm:$0xff] (!%p201_p2)   ;;  %v2482_v8 = vld [vmem:[%s2981_s1 + $0x28] sm:$0xff] (!%p201_p2)  }
   0x7   : > { %776 = vmatpush1.bf16.msra.mxu0 (!%p201_p2), %v2477_v0  ;;  %2459 = vmatpush1.bf16.msra.mxu1 (!%p201_p2), %v2477_v0  ;;  %v2483_v9 = vld [vmem:[%s2981_s1 + $0x30] sm:$0xff] (!%p201_p2)   ;;  %v2484_v10 = vld [vmem:[%s2981_s1 + $0x38] sm:$0xff] (!%p201_p2)   ;;  %v2485_v11 = vld [vmem:[%s2981_s1 + $0x40] sm:$0xff] (!%p201_p2)  }
   0x8   : > { %777 = vmatprep.subr.bf16.mxu0 (!%p201_p2), %v2592_v1  ;;  %2451 = vmatprep.subr.bf16.mxu1 (!%p201_p2), %v2592_v1 }
   0xb   : > { %778 = vmatpush1.bf16.msra.mxu0 (!%p201_p2), %v2478_v2  ;;  %2460 = vmatpush1.bf16.msra.mxu1 (!%p201_p2), %v2478_v2 }
   0xc   : > { %779 = vmatprep.subr.bf16.mxu0 (!%p201_p2), %v2592_v1  ;;  %2452 = vmatprep.subr.bf16.mxu1 (!%p201_p2), %v2592_v1 }
   0xd   : > { %s2987_s22 = smov (!%p235_p3, %s1855_s22), 255 }
   0xe   : > { %s2035_s27 = sshll.u32 %s2987_s22, 3  ;;  %s1859_s19 = sshll.u32 %s2987_s22, 2 }
   0xf   : > { %s2646_s30 = scalar_lea.vmem %s2980_s0, %s2035_s27  ;;  %780 = vmatpush1.bf16.msra.mxu0 %v2479_v3  ;;  %2461 = vmatpush1.bf16.msra.mxu1 %v2479_v3  ;;  %s2768_s23 = scalar_lea.vmem %s2984_s4, %s1859_s19 }
  0x10   : > { %v2488_v5 = vld [vmem:[%s2646_s30 + $0x4] ss:$8 sps:$4 sm:$0xff]   ;;  %781 = vmatprep.subr.bf16.mxu0 %v2592_v1  ;;  %2453 = vmatprep.subr.bf16.mxu1 %v2592_v1  ;;  %v2486_v12 = vld [vmem:[%s2646_s30] ss:$8 sps:$4 sm:$0xff]   ;;  %v2492_v14 = vld [vmem:[%s2646_s30 + $0x14] ss:$8 sps:$4 sm:$0xff]  }
  0x11   : > { %v2491_v6 = vld [vmem:[%s2646_s30 + $0x104] ss:$8 sps:$4 sm:$0xff]   ;;  %1935 = vmatprep.mubr.msk.bf16.mxu0 %vm678_vm0, %v2488_v5  ;;  %v2489_v13 = vld [vmem:[%s2646_s30 + $0x100] ss:$8 sps:$4 sm:$0xff]   ;;  %v2494_v15 = vld [vmem:[%s2646_s30 + $0x114] ss:$8 sps:$4 sm:$0xff]  }
  0x12   : > { %1951 = vmatprep.mubr.msk.bf16.mxu1 %vm678_vm0, %v2491_v6  ;;  %v2496_v16 = vld [vmem:[%s2646_s30 + $0x10] ss:$8 sps:$4 sm:$0xff]   ;;  %v2498_v18 = vld [vmem:[%s2646_s30 + $0x24] ss:$8 sps:$4 sm:$0xff]   ;;  %v2502_v20 = vld [vmem:[%s2646_s30 + $0x20] ss:$8 sps:$4 sm:$0xff]  }
  0x13   : > { %782 = vmatpush1.bf16.msra.mxu0 %v2480_v4  ;;  %2462 = vmatpush1.bf16.msra.mxu1 %v2480_v4  ;;  %v2497_v17 = vld [vmem:[%s2646_s30 + $0x110] ss:$8 sps:$4 sm:$0xff]   ;;  %v2500_v19 = vld [vmem:[%s2646_s30 + $0x124] ss:$8 sps:$4 sm:$0xff]   ;;  %v2503_v21 = vld [vmem:[%s2646_s30 + $0x120] ss:$8 sps:$4 sm:$0xff]  }
  0x14   : > { %783 = vmatprep.subr.bf16.mxu0 %v2592_v1  ;;  %2454 = vmatprep.subr.bf16.mxu1 %v2592_v1  ;;  %v2504_v22 = vld [vmem:[%s2646_s30 + $0x34] ss:$8 sps:$4 sm:$0xff]   ;;  %v2508_v24 = vld [vmem:[%s2646_s30 + $0x30] ss:$8 sps:$4 sm:$0xff]   ;;  %v2510_v26 = vld [vmem:[%s2646_s30 + $0x44] ss:$8 sps:$4 sm:$0xff]  }
  0x15   : > { %v2506_v23 = vld [vmem:[%s2646_s30 + $0x134] ss:$8 sps:$4 sm:$0xff]   ;;  %v2509_v25 = vld [vmem:[%s2646_s30 + $0x130] ss:$8 sps:$4 sm:$0xff]   ;;  %v2512_v27 = vld [vmem:[%s2646_s30 + $0x144] ss:$8 sps:$4 sm:$0xff]  }
  0x16   : > { %v2514_v28 = vld [vmem:[%s2646_s30 + $0x40] ss:$8 sps:$4 sm:$0xff]   ;;  %v2516_v30 = vld [vmem:[%s2646_s30 + $0x54] ss:$8 sps:$4 sm:$0xff]   ;;  %v2520_v32 = vld [vmem:[%s2646_s30 + $0x50] ss:$8 sps:$4 sm:$0xff]  }
  0x17   : > { %784 = vmatpush1.bf16.msra.mxu0 %v2481_v7  ;;  %2463 = vmatpush1.bf16.msra.mxu1 %v2481_v7  ;;  %v2515_v29 = vld [vmem:[%s2646_s30 + $0x140] ss:$8 sps:$4 sm:$0xff]   ;;  %v2518_v31 = vld [vmem:[%s2646_s30 + $0x154] ss:$8 sps:$4 sm:$0xff]   ;;  %v2521_v33 = vld [vmem:[%s2646_s30 + $0x150] ss:$8 sps:$4 sm:$0xff]  }
  0x18   : > { %785 = vmatprep.subr.bf16.mxu0 %v2592_v1  ;;  %2455 = vmatprep.subr.bf16.mxu1 %v2592_v1  ;;  %v2522_v34 = vld [vmem:[%s2646_s30 + $0x64] ss:$8 sps:$4 sm:$0xff]   ;;  %v2526_v36 = vld [vmem:[%s2646_s30 + $0x60] ss:$8 sps:$4 sm:$0xff]   ;;  %v2528_v38 = vld [vmem:[%s2646_s30 + $0x74] ss:$8 sps:$4 sm:$0xff]  }
  0x19   : > { %v2524_v35 = vld [vmem:[%s2646_s30 + $0x164] ss:$8 sps:$4 sm:$0xff]   ;;  %v2527_v37 = vld [vmem:[%s2646_s30 + $0x160] ss:$8 sps:$4 sm:$0xff]   ;;  %v2530_v39 = vld [vmem:[%s2646_s30 + $0x174] ss:$8 sps:$4 sm:$0xff]  }
  0x1a   : > { %v2532_v40 = vld [vmem:[%s2646_s30 + $0x70] ss:$8 sps:$4 sm:$0xff]   ;;  %v2534_v42 = vld [vmem:[%s2646_s30 + $0x84] ss:$8 sps:$4 sm:$0xff]   ;;  %v2538_v44 = vld [vmem:[%s2646_s30 + $0x80] ss:$8 sps:$4 sm:$0xff]  }
  0x1b   : > { %786 = vmatpush1.bf16.msra.mxu0 %v2482_v8  ;;  %2464 = vmatpush1.bf16.msra.mxu1 %v2482_v8  ;;  %v2533_v41 = vld [vmem:[%s2646_s30 + $0x170] ss:$8 sps:$4 sm:$0xff]   ;;  %v2536_v43 = vld [vmem:[%s2646_s30 + $0x184] ss:$8 sps:$4 sm:$0xff]   ;;  %v2539_v45 = vld [vmem:[%s2646_s30 + $0x180] ss:$8 sps:$4 sm:$0xff]  }
  0x1c   : > { %787 = vmatprep.subr.bf16.mxu0 %v2592_v1  ;;  %2456 = vmatprep.subr.bf16.mxu1 %v2592_v1  ;;  %v2540_v46 = vld [vmem:[%s2646_s30 + $0x94] ss:$8 sps:$4 sm:$0xff]   ;;  %v2544_v48 = vld [vmem:[%s2646_s30 + $0x90] ss:$8 sps:$4 sm:$0xff]   ;;  %v2546_v50 = vld [vmem:[%s2646_s30 + $0xa4] ss:$8 sps:$4 sm:$0xff]  }
  0x1d   : > { %v2542_v47 = vld [vmem:[%s2646_s30 + $0x194] ss:$8 sps:$4 sm:$0xff]   ;;  %v2545_v49 = vld [vmem:[%s2646_s30 + $0x190] ss:$8 sps:$4 sm:$0xff]   ;;  %v2548_v51 = vld [vmem:[%s2646_s30 + $0x1a4] ss:$8 sps:$4 sm:$0xff]  }
  0x1e   : > { %v2550_v52 = vld [vmem:[%s2646_s30 + $0xa0] ss:$8 sps:$4 sm:$0xff]   ;;  %v2552_v54 = vld [vmem:[%s2646_s30 + $0xb4] ss:$8 sps:$4 sm:$0xff]   ;;  %v2556_v56 = vld [vmem:[%s2646_s30 + $0xb0] ss:$8 sps:$4 sm:$0xff]  }
  0x1f   : > { %788 = vmatpush1.bf16.msra.mxu0 %v2483_v9  ;;  %2465 = vmatpush1.bf16.msra.mxu1 %v2483_v9  ;;  %v2551_v53 = vld [vmem:[%s2646_s30 + $0x1a0] ss:$8 sps:$4 sm:$0xff]   ;;  %v2554_v55 = vld [vmem:[%s2646_s30 + $0x1b4] ss:$8 sps:$4 sm:$0xff]   ;;  %v2557_v57 = vld [vmem:[%s2646_s30 + $0x1b0] ss:$8 sps:$4 sm:$0xff]  }
  0x20   : > { %789 = vmatprep.subr.bf16.mxu0 %v2592_v1  ;;  %2457 = vmatprep.subr.bf16.mxu1 %v2592_v1  ;;  %v2558_v58 = vld [vmem:[%s2646_s30 + $0xc4] ss:$8 sps:$4 sm:$0xff]   ;;  %v2562_v60 = vld [vmem:[%s2646_s30 + $0xc0] ss:$8 sps:$4 sm:$0xff]   ;;  %v2564_v62 = vld [vmem:[%s2646_s30 + $0xd4] ss:$8 sps:$4 sm:$0xff]  }
  0x21   : > { %v2560_v59 = vld [vmem:[%s2646_s30 + $0x1c4] ss:$8 sps:$4 sm:$0xff]   ;;  %v2563_v61 = vld [vmem:[%s2646_s30 + $0x1c0] ss:$8 sps:$4 sm:$0xff]   ;;  %v2566_v63 = vld [vmem:[%s2646_s30 + $0x1d4] ss:$8 sps:$4 sm:$0xff]  }
  0x22   : > { %v2568_v0 = vld [vmem:[%s2646_s30 + $0xd0] ss:$8 sps:$4 sm:$0xff]   ;;  %v2570_v2 = vld [vmem:[%s2646_s30 + $0xe4] ss:$8 sps:$4 sm:$0xff]   ;;  %v2574_v4 = vld [vmem:[%s2646_s30 + $0xe0] ss:$8 sps:$4 sm:$0xff]  }
  0x23   : > { %790 = vmatpush1.bf16.msra.mxu0 %v2484_v10  ;;  %2466 = vmatpush1.bf16.msra.mxu1 %v2484_v10  ;;  %v2572_v3 = vld [vmem:[%s2646_s30 + $0x1e4] ss:$8 sps:$4 sm:$0xff]   ;;  %v2575_v5 = vld [vmem:[%s2646_s30 + $0x1e0] ss:$8 sps:$4 sm:$0xff]   ;;  %v2576_v6 = vld [vmem:[%s2646_s30 + $0xf4] ss:$8 sps:$4 sm:$0xff]  }
  0x24   : > { %791 = vmatprep.subr.bf16.mxu0 %v2592_v1  ;;  %2458 = vmatprep.subr.bf16.mxu1 %v2592_v1  ;;  %v2569_v1 = vld [vmem:[%s2646_s30 + $0x1d0] ss:$8 sps:$4 sm:$0xff]   ;;  %v2578_v7 = vld [vmem:[%s2646_s30 + $0x1f4] ss:$8 sps:$4 sm:$0xff]   ;;  %v2773_v10 = vld [vmem:[%s2982_s2] ss:$0 sm:$0xff] }
  0x25   : > { %v2580_v8 = vld [vmem:[%s2646_s30 + $0xf0] ss:$8 sps:$4 sm:$0xff]  }
  0x26   : > { %v2581_v9 = vld [vmem:[%s2646_s30 + $0x1f0] ss:$8 sps:$4 sm:$0xff]   ;;  %s2799_s30 = scalar_lea.vmem %s2985_s5, %s1859_s19 }
  0x27   : > { %792 = vmatpush1.bf16.msra.mxu0 %v2485_v11  ;;  %2467 = vmatpush1.bf16.msra.mxu1 %v2485_v11  ;;  %v2101_v11 = vld [vmem:[%s2768_s23] sm:$0xff]  }
  0x2a   : > { %808 = vmatmul.mubr.bf16.vlgmr.msra.gmra.mrb[0].mxu0 %v2486_v12  ;;  %936 = vmatmul.mubr.bf16.vlgmr.msra.gmra.mrb[0].mxu1 %v2489_v13  ;;  %v2403_v12 = vld [vmem:[%s2768_s23 + $0x80] sm:$0xff]  }
  0x2b   : > { %1936 = vmatprep.mubr.msk.bf16.mxu0 %vm678_vm0, %v2492_v14  ;;  %1952 = vmatprep.mubr.msk.bf16.mxu1 %vm678_vm0, %v2494_v15  ;;  %v2780_v14 = vld [vmem:[%s2983_s3] ss:$0 sm:$0xff] }
  0x32   : > { %816 = vmatmul.mubr.bf16.gmra.mrb[4].mxu0 %v2496_v16  ;;  %944 = vmatmul.mubr.bf16.gmra.mrb[4].mxu1 %v2497_v17  ;;  %v2102_v17 = vunpack.c.l.bf16 %v2101_v11 }
  0x33   : > { %1937 = vmatprep.mubr.msk.bf16.mxu0 %vm678_vm0, %v2498_v18  ;;  %1953 = vmatprep.mubr.msk.bf16.mxu1 %vm678_vm0, %v2500_v19  ;;  %v2166_v19 = vunpack.c.l.bf16 %v2403_v12 }
  0x3a   : > { %824 = vmatmul.mubr.bf16.gmra.mrb[8].mxu0 %v2502_v20  ;;  %952 = vmatmul.mubr.bf16.gmra.mrb[8].mxu1 %v2503_v21 }
  0x3b   : > { %1938 = vmatprep.mubr.msk.bf16.mxu0 %vm678_vm0, %v2504_v22  ;;  %1954 = vmatprep.mubr.msk.bf16.mxu1 %vm678_vm0, %v2506_v23  ;;  %v2103_v23 = vunpack.c.h.bf16 %v2101_v11 }
  0x42   : > { %832 = vmatmul.mubr.bf16.gmra.mrb[12].mxu0 %v2508_v24  ;;  %960 = vmatmul.mubr.bf16.gmra.mrb[12].mxu1 %v2509_v25  ;;  %v2167_v25 = vunpack.c.h.bf16 %v2403_v12 }
  0x43   : > { %1939 = vmatprep.mubr.msk.bf16.mxu0 %vm678_vm0, %v2510_v26  ;;  %1955 = vmatprep.mubr.msk.bf16.mxu1 %vm678_vm0, %v2512_v27 }
  0x4a   : > { %840 = vmatmul.mubr.bf16.gmra.mrb[16].mxu0 %v2514_v28  ;;  %968 = vmatmul.mubr.bf16.gmra.mrb[16].mxu1 %v2515_v29 }
  0x4b   : > { %1940 = vmatprep.mubr.msk.bf16.mxu0 %vm678_vm0, %v2516_v30  ;;  %1956 = vmatprep.mubr.msk.bf16.mxu1 %vm678_vm0, %v2518_v31 }
  0x52   : > { %848 = vmatmul.mubr.bf16.gmra.mrb[20].mxu0 %v2520_v32  ;;  %976 = vmatmul.mubr.bf16.gmra.mrb[20].mxu1 %v2521_v33 }
  0x53   : > { %1941 = vmatprep.mubr.msk.bf16.mxu0 %vm678_vm0, %v2522_v34  ;;  %1957 = vmatprep.mubr.msk.bf16.mxu1 %vm678_vm0, %v2524_v35 }
  0x5a   : > { %856 = vmatmul.mubr.bf16.gmra.mrb[24].mxu0 %v2526_v36  ;;  %984 = vmatmul.mubr.bf16.gmra.mrb[24].mxu1 %v2527_v37 }
  0x5b   : > { %1942 = vmatprep.mubr.msk.bf16.mxu0 %vm678_vm0, %v2528_v38  ;;  %1958 = vmatprep.mubr.msk.bf16.mxu1 %vm678_vm0, %v2530_v39  ;;  %v2388_v38 = vld [vmem:[%s2768_s23 + $0x8] sm:$0xff]  }
  0x5c   : > { %v2404_v39 = vld [vmem:[%s2768_s23 + $0x88] sm:$0xff]  }
  0x62   : > { %864 = vmatmul.mubr.bf16.gmra.mrb[28].mxu0 %v2532_v40  ;;  %992 = vmatmul.mubr.bf16.gmra.mrb[28].mxu1 %v2533_v41 }
  0x63   : > { %1943 = vmatprep.mubr.msk.bf16.mxu0 %vm678_vm0, %v2534_v42  ;;  %1959 = vmatprep.mubr.msk.bf16.mxu1 %vm678_vm0, %v2536_v43 }
  0x6a   : > { %872 = vmatmul.mubr.bf16.gmra.mrb[32].mxu0 %v2538_v44  ;;  %1000 = vmatmul.mubr.bf16.gmra.mrb[32].mxu1 %v2539_v45 }
  0x6b   : > { %1944 = vmatprep.mubr.msk.bf16.mxu0 %vm678_vm0, %v2540_v46  ;;  %1960 = vmatprep.mubr.msk.bf16.mxu1 %vm678_vm0, %v2542_v47 }
  0x72   : > { %880 = vmatmul.mubr.bf16.gmra.mrb[36].mxu0 %v2544_v48  ;;  %1008 = vmatmul.mubr.bf16.gmra.mrb[36].mxu1 %v2545_v49 }
  0x73   : > { %1945 = vmatprep.mubr.msk.bf16.mxu0 %vm678_vm0, %v2546_v50  ;;  %1961 = vmatprep.mubr.msk.bf16.mxu1 %vm678_vm0, %v2548_v51  ;;  %v2106_v50 = vunpack.c.l.bf16 %v2388_v38  ;;  %v2170_v51 = vunpack.c.l.bf16 %v2404_v39 }
  0x7a   : > { %888 = vmatmul.mubr.bf16.gmra.mrb[40].mxu0 %v2550_v52  ;;  %1016 = vmatmul.mubr.bf16.gmra.mrb[40].mxu1 %v2551_v53 }
  0x7b   : > { %1946 = vmatprep.mubr.msk.bf16.mxu0 %vm678_vm0, %v2552_v54  ;;  %1962 = vmatprep.mubr.msk.bf16.mxu1 %vm678_vm0, %v2554_v55 }
  0x82   : > { %896 = vmatmul.mubr.bf16.gmra.mrb[44].mxu0 %v2556_v56  ;;  %1024 = vmatmul.mubr.bf16.gmra.mrb[44].mxu1 %v2557_v57 }
  0x83   : > { %1947 = vmatprep.mubr.msk.bf16.mxu0 %vm678_vm0, %v2558_v58  ;;  %1963 = vmatprep.mubr.msk.bf16.mxu1 %vm678_vm0, %v2560_v59 }
  0x8a   : > { %904 = vmatmul.mubr.bf16.gmra.mrb[48].mxu0 %v2562_v60  ;;  %1032 = vmatmul.mubr.bf16.gmra.mrb[48].mxu1 %v2563_v61  ;;  %v2107_v61 = vunpack.c.h.bf16 %v2388_v38 }
  0x8b   : > { %1948 = vmatprep.mubr.msk.bf16.mxu0 %vm678_vm0, %v2564_v62  ;;  %1964 = vmatprep.mubr.msk.bf16.mxu1 %vm678_vm0, %v2566_v63  ;;  %v2171_v63 = vunpack.c.h.bf16 %v2404_v39 }
  0x92   : > { %912 = vmatmul.mubr.bf16.gmra.mrb[52].mxu0 %v2568_v0  ;;  %1040 = vmatmul.mubr.bf16.gmra.mrb[52].mxu1 %v2569_v1  ;;  %v2389_v0 = vld [vmem:[%s2768_s23 + $0x10] sm:$0xff]  }
  0x93   : > { %1949 = vmatprep.mubr.msk.bf16.mxu0 %vm678_vm0, %v2570_v2  ;;  %1965 = vmatprep.mubr.msk.bf16.mxu1 %vm678_vm0, %v2572_v3  ;;  %v2405_v1 = vld [vmem:[%s2768_s23 + $0x90] sm:$0xff]  }
  0x94   : > { %v2174_v12 = vunpack.c.l.bf16 %v2405_v1 }
  0x9a   : > { %920 = vmatmul.mubr.bf16.gmra.mrb[56].mxu0 %v2574_v4  ;;  %1048 = vmatmul.mubr.bf16.gmra.mrb[56].mxu1 %v2575_v5 }
  0x9b   : > { %1950 = vmatprep.mubr.msk.bf16.mxu0 %vm678_vm0, %v2576_v6  ;;  %1966 = vmatprep.mubr.msk.bf16.mxu1 %vm678_vm0, %v2578_v7 }
  0xa2   : > { %928 = vmatmul.mubr.bf16.gmra.mrb[60].mxu0 %v2580_v8  ;;  %1056 = vmatmul.mubr.bf16.gmra.mrb[60].mxu1 %v2581_v9  ;;  %v2110_v9 = vunpack.c.l.bf16 %v2389_v0 }
  0xfd   : > { %v809_v13 = vpop.f32.mrb[0].mxu0  ;;  %v937_v15 = vpop.f32.mrb[0].mxu1 }
  0xfe   : > { %v1071_v16 = vmul.f32 %v2773_v10, %v809_v13  ;;  %v1103_v18 = vmul.f32 %v2773_v10, %v937_v15  ;;  %v811_v20 = vpop.f32.mrb[1].mxu0  ;;  %v939_v21 = vpop.f32.mrb[1].mxu1 }
  0xff   : > { %v812_v22 = vpop.f32.mrb[2].mxu0  ;;  %v940_v24 = vpop.f32.mrb[2].mxu1 }
 0x100   : > { %v1142_v26 = vadd.f32 %v2780_v14, %v1071_v16  ;;  %v1174_v27 = vadd.f32 %v2780_v14, %v1103_v18  ;;  %v1072_v28 = vmul.f32 %v2773_v10, %v812_v22  ;;  %v1104_v29 = vmul.f32 %v2773_v10, %v940_v24  ;;  %v814_v30 = vpop.f32.mrb[3].mxu0  ;;  %v942_v31 = vpop.f32.mrb[3].mxu1 }
 0x101   : > { %v2111_v18 = vunpack.c.h.bf16 %v2389_v0 }
 0x102   : > { %v1334_v32 = vadd.f32 %v2102_v17, %v1142_v26  ;;  %v1366_v33 = vadd.f32 %v2166_v19, %v1174_v27  ;;  %v1143_v34 = vadd.f32 %v2780_v14, %v1072_v28  ;;  %v1175_v35 = vadd.f32 %v2780_v14, %v1104_v29 }
 0x103   : > { %v2175_v19 = vunpack.c.h.bf16 %v2405_v1 }
 0x104   : > { %v1335_v36 = vadd.f32 %v2103_v23, %v1143_v34  ;;  %v1367_v37 = vadd.f32 %v2167_v25, %v1175_v35  ;;  %v1398_v40 = vmax.f32 %v1334_v32, 0.0  ;;  %v1430_v41 = vmax.f32 %v1366_v33, 0.0 }
 0x105   : > { %v817_v42 = vpop.f32.mrb[4].mxu0  ;;  %v945_v43 = vpop.f32.mrb[4].mxu1 }
 0x106   : > { %v1399_v44 = vmax.f32 %v1335_v36, 0.0  ;;  %v1431_v45 = vmax.f32 %v1367_v37, 0.0  ;;  %v1073_v46 = vmul.f32 %v2773_v10, %v817_v42  ;;  %v1105_v47 = vmul.f32 %v2773_v10, %v945_v43  ;;  %v819_v48 = vpop.f32.mrb[5].mxu0  ;;  %v947_v49 = vpop.f32.mrb[5].mxu1 }
 0x107   : > { %v820_v52 = vpop.f32.mrb[6].mxu0  ;;  %v948_v53 = vpop.f32.mrb[6].mxu1 }
 0x108   : > { %v2231_v54 = vpack.c.bf16 %v1399_v44, %v1398_v40  ;;  %v2311_v55 = vpack.c.bf16 %v1431_v45, %v1430_v41  ;;  %v1144_v56 = vadd.f32 %v2780_v14, %v1073_v46  ;;  %v1176_v57 = vadd.f32 %v2780_v14, %v1105_v47  ;;  %v822_v58 = vpop.f32.mrb[7].mxu0  ;;  %v950_v59 = vpop.f32.mrb[7].mxu1  ;;  %v2390_v40 = vld [vmem:[%s2768_s23 + $0x18] sm:$0xff]  }
 0x109   : > { %v1074_v60 = vmul.f32 %v2773_v10, %v820_v52  ;;  %v1106_v62 = vmul.f32 %v2773_v10, %v948_v53  ;;  %v2406_v41 = vld [vmem:[%s2768_s23 + $0x98] sm:$0xff]   ;;  %v2114_v52 = vunpack.c.l.bf16 %v2390_v40 }
 0x10a   : > { %2232 = vst [vmem:[%s2799_s30] sm:$0xff] %v2231_v54   ;;  %2434 = vst [vmem:[%s2799_s30 + $0x80] sm:$0xff] %v2311_v55   ;;  %v1336_v2 = vadd.f32 %v2106_v50, %v1144_v56  ;;  %v1368_v3 = vadd.f32 %v2170_v51, %v1176_v57  ;;  %v2178_v53 = vunpack.c.l.bf16 %v2406_v41  ;;  %v2179_v1 = vunpack.c.h.bf16 %v2406_v41 }
 0x10b   : > { %v1145_v4 = vadd.f32 %v2780_v14, %v1074_v60  ;;  %v1177_v5 = vadd.f32 %v2780_v14, %v1106_v62 }
 0x10c   : > { %v1400_v20 = vmax.f32 %v1336_v2, 0.0  ;;  %v1432_v21 = vmax.f32 %v1368_v3, 0.0  ;;  %v2391_v2 = vld [vmem:[%s2768_s23 + $0x20] sm:$0xff]  }
 0x10d   : > { %v1337_v6 = vadd.f32 %v2107_v61, %v1145_v4  ;;  %v1369_v7 = vadd.f32 %v2171_v63, %v1177_v5  ;;  %v825_v8 = vpop.f32.mrb[8].mxu0  ;;  %v953_v11 = vpop.f32.mrb[8].mxu1  ;;  %v2115_v63 = vunpack.c.h.bf16 %v2390_v40  ;;  %v2407_v3 = vld [vmem:[%s2768_s23 + $0xa0] sm:$0xff]  }
 0x10e   : > { %v1075_v13 = vmul.f32 %v2773_v10, %v825_v8  ;;  %v1107_v15 = vmul.f32 %v2773_v10, %v953_v11  ;;  %v827_v16 = vpop.f32.mrb[9].mxu0  ;;  %v955_v17 = vpop.f32.mrb[9].mxu1 }
 0x10f   : > { %v1401_v22 = vmax.f32 %v1337_v6, 0.0  ;;  %v1433_v23 = vmax.f32 %v1369_v7, 0.0  ;;  %v828_v24 = vpop.f32.mrb[10].mxu0  ;;  %v956_v25 = vpop.f32.mrb[10].mxu1 }
 0x110   : > { %v1146_v26 = vadd.f32 %v2780_v14, %v1075_v13  ;;  %v1178_v27 = vadd.f32 %v2780_v14, %v1107_v15  ;;  %v1076_v28 = vmul.f32 %v2773_v10, %v828_v24  ;;  %v1108_v29 = vmul.f32 %v2773_v10, %v956_v25  ;;  %v830_v30 = vpop.f32.mrb[11].mxu0  ;;  %v958_v31 = vpop.f32.mrb[11].mxu1 }
 0x111   : > { %v2236_v32 = vpack.c.bf16 %v1401_v22, %v1400_v20  ;;  %v2316_v33 = vpack.c.bf16 %v1433_v23, %v1432_v21  ;;  %v2182_v15 = vunpack.c.l.bf16 %v2407_v3  ;;  %v2119_v20 = vunpack.c.h.bf16 %v2391_v2 }
 0x112   : > { %v1338_v34 = vadd.f32 %v2110_v9, %v1146_v26  ;;  %v1370_v35 = vadd.f32 %v2174_v12, %v1178_v27  ;;  %v1147_v36 = vadd.f32 %v2780_v14, %v1076_v28  ;;  %v1179_v37 = vadd.f32 %v2780_v14, %v1108_v29 }
 0x113   : > { %2419 = vst [vmem:[%s2799_s30 + $0x8] sm:$0xff] %v2236_v32   ;;  %2435 = vst [vmem:[%s2799_s30 + $0x88] sm:$0xff] %v2316_v33   ;;  %v2118_v12 = vunpack.c.l.bf16 %v2391_v2  ;;  %v2183_v21 = vunpack.c.h.bf16 %v2407_v3 }
 0x114   : > { %v1339_v38 = vadd.f32 %v2111_v18, %v1147_v36  ;;  %v1371_v39 = vadd.f32 %v2175_v19, %v1179_v37  ;;  %v1402_v42 = vmax.f32 %v1338_v34, 0.0  ;;  %v1434_v43 = vmax.f32 %v1370_v35, 0.0 }
 0x115   : > { %v833_v44 = vpop.f32.mrb[12].mxu0  ;;  %v961_v45 = vpop.f32.mrb[12].mxu1 }
 0x116   : > { %v1403_v46 = vmax.f32 %v1339_v38, 0.0  ;;  %v1435_v47 = vmax.f32 %v1371_v39, 0.0  ;;  %v1077_v48 = vmul.f32 %v2773_v10, %v833_v44  ;;  %v1109_v49 = vmul.f32 %v2773_v10, %v961_v45  ;;  %v835_v50 = vpop.f32.mrb[13].mxu0  ;;  %v963_v51 = vpop.f32.mrb[13].mxu1 }
 0x117   : > { %v836_v54 = vpop.f32.mrb[14].mxu0  ;;  %v964_v55 = vpop.f32.mrb[14].mxu1 }
 0x118   : > { %v2241_v56 = vpack.c.bf16 %v1403_v46, %v1402_v42  ;;  %v2321_v57 = vpack.c.bf16 %v1435_v47, %v1434_v43  ;;  %v1148_v58 = vadd.f32 %v2780_v14, %v1077_v48  ;;  %v1180_v59 = vadd.f32 %v2780_v14, %v1109_v49  ;;  %v838_v60 = vpop.f32.mrb[15].mxu0  ;;  %v966_v61 = vpop.f32.mrb[15].mxu1  ;;  %v2392_v42 = vld [vmem:[%s2768_s23 + $0x28] sm:$0xff]  }
 0x119   : > { %v1078_v62 = vmul.f32 %v2773_v10, %v836_v54  ;;  %v1110_v0 = vmul.f32 %v2773_v10, %v964_v55  ;;  %v2408_v43 = vld [vmem:[%s2768_s23 + $0xa8] sm:$0xff]   ;;  %v2122_v54 = vunpack.c.l.bf16 %v2392_v42 }
 0x11a   : > { %2420 = vst [vmem:[%s2799_s30 + $0x10] sm:$0xff] %v2241_v56   ;;  %2436 = vst [vmem:[%s2799_s30 + $0x90] sm:$0xff] %v2321_v57   ;;  %v1340_v4 = vadd.f32 %v2114_v52, %v1148_v58  ;;  %v1372_v5 = vadd.f32 %v2178_v53, %v1180_v59  ;;  %v2186_v55 = vunpack.c.l.bf16 %v2408_v43  ;;  %v2187_v3 = vunpack.c.h.bf16 %v2408_v43 }
 0x11b   : > { %v1149_v6 = vadd.f32 %v2780_v14, %v1078_v62  ;;  %v1181_v7 = vadd.f32 %v2780_v14, %v1110_v0 }
 0x11c   : > { %v1404_v22 = vmax.f32 %v1340_v4, 0.0  ;;  %v1436_v23 = vmax.f32 %v1372_v5, 0.0  ;;  %v2393_v4 = vld [vmem:[%s2768_s23 + $0x30] sm:$0xff]  }
 0x11d   : > { %v1341_v8 = vadd.f32 %v2115_v63, %v1149_v6  ;;  %v1373_v9 = vadd.f32 %v2179_v1, %v1181_v7  ;;  %v841_v11 = vpop.f32.mrb[16].mxu0  ;;  %v969_v13 = vpop.f32.mrb[16].mxu1  ;;  %v2123_v1 = vunpack.c.h.bf16 %v2392_v42  ;;  %v2409_v5 = vld [vmem:[%s2768_s23 + $0xb0] sm:$0xff]  }
 0x11e   : > { %v1079_v16 = vmul.f32 %v2773_v10, %v841_v11  ;;  %v1111_v17 = vmul.f32 %v2773_v10, %v969_v13  ;;  %v843_v18 = vpop.f32.mrb[17].mxu0  ;;  %v971_v19 = vpop.f32.mrb[17].mxu1 }
 0x11f   : > { %v1405_v24 = vmax.f32 %v1341_v8, 0.0  ;;  %v1437_v25 = vmax.f32 %v1373_v9, 0.0  ;;  %v844_v26 = vpop.f32.mrb[18].mxu0  ;;  %v972_v27 = vpop.f32.mrb[18].mxu1 }
 0x120   : > { %v1150_v28 = vadd.f32 %v2780_v14, %v1079_v16  ;;  %v1182_v29 = vadd.f32 %v2780_v14, %v1111_v17  ;;  %v1080_v30 = vmul.f32 %v2773_v10, %v844_v26  ;;  %v1112_v31 = vmul.f32 %v2773_v10, %v972_v27  ;;  %v846_v32 = vpop.f32.mrb[19].mxu0  ;;  %v974_v33 = vpop.f32.mrb[19].mxu1 }
 0x121   : > { %v2246_v34 = vpack.c.bf16 %v1405_v24, %v1404_v22  ;;  %v2326_v35 = vpack.c.bf16 %v1437_v25, %v1436_v23  ;;  %v2190_v17 = vunpack.c.l.bf16 %v2409_v5  ;;  %v2127_v22 = vunpack.c.h.bf16 %v2393_v4 }
 0x122   : > { %v1342_v36 = vadd.f32 %v2118_v12, %v1150_v28  ;;  %v1374_v37 = vadd.f32 %v2182_v15, %v1182_v29  ;;  %v1151_v38 = vadd.f32 %v2780_v14, %v1080_v30  ;;  %v1183_v39 = vadd.f32 %v2780_v14, %v1112_v31 }
 0x123   : > { %2421 = vst [vmem:[%s2799_s30 + $0x18] sm:$0xff] %v2246_v34   ;;  %2437 = vst [vmem:[%s2799_s30 + $0x98] sm:$0xff] %v2326_v35   ;;  %v2126_v15 = vunpack.c.l.bf16 %v2393_v4  ;;  %v2191_v23 = vunpack.c.h.bf16 %v2409_v5 }
 0x124   : > { %v1343_v40 = vadd.f32 %v2119_v20, %v1151_v38  ;;  %v1375_v41 = vadd.f32 %v2183_v21, %v1183_v39  ;;  %v1406_v44 = vmax.f32 %v1342_v36, 0.0  ;;  %v1438_v45 = vmax.f32 %v1374_v37, 0.0 }
 0x125   : > { %v849_v46 = vpop.f32.mrb[20].mxu0  ;;  %v977_v47 = vpop.f32.mrb[20].mxu1 }
 0x126   : > { %v1407_v48 = vmax.f32 %v1343_v40, 0.0  ;;  %v1439_v49 = vmax.f32 %v1375_v41, 0.0  ;;  %v1081_v50 = vmul.f32 %v2773_v10, %v849_v46  ;;  %v1113_v51 = vmul.f32 %v2773_v10, %v977_v47  ;;  %v851_v52 = vpop.f32.mrb[21].mxu0  ;;  %v979_v53 = vpop.f32.mrb[21].mxu1 }
 0x127   : > { %v852_v56 = vpop.f32.mrb[22].mxu0  ;;  %v980_v57 = vpop.f32.mrb[22].mxu1 }
 0x128   : > { %v2251_v58 = vpack.c.bf16 %v1407_v48, %v1406_v44  ;;  %v2331_v59 = vpack.c.bf16 %v1439_v49, %v1438_v45  ;;  %v1152_v60 = vadd.f32 %v2780_v14, %v1081_v50  ;;  %v1184_v61 = vadd.f32 %v2780_v14, %v1113_v51  ;;  %v854_v62 = vpop.f32.mrb[23].mxu0  ;;  %v982_v63 = vpop.f32.mrb[23].mxu1  ;;  %v2394_v44 = vld [vmem:[%s2768_s23 + $0x38] sm:$0xff]  }
 0x129   : > { %v1082_v0 = vmul.f32 %v2773_v10, %v852_v56  ;;  %v1114_v2 = vmul.f32 %v2773_v10, %v980_v57  ;;  %v2410_v45 = vld [vmem:[%s2768_s23 + $0xb8] sm:$0xff]   ;;  %v2130_v56 = vunpack.c.l.bf16 %v2394_v44 }
 0x12a   : > { %2422 = vst [vmem:[%s2799_s30 + $0x20] sm:$0xff] %v2251_v58   ;;  %2438 = vst [vmem:[%s2799_s30 + $0xa0] sm:$0xff] %v2331_v59   ;;  %v1344_v6 = vadd.f32 %v2122_v54, %v1152_v60  ;;  %v1376_v7 = vadd.f32 %v2186_v55, %v1184_v61  ;;  %v2194_v57 = vunpack.c.l.bf16 %v2410_v45  ;;  %v2195_v5 = vunpack.c.h.bf16 %v2410_v45 }
 0x12b   : > { %v1153_v8 = vadd.f32 %v2780_v14, %v1082_v0  ;;  %v1185_v9 = vadd.f32 %v2780_v14, %v1114_v2 }
 0x12c   : > { %v1408_v24 = vmax.f32 %v1344_v6, 0.0  ;;  %v1440_v25 = vmax.f32 %v1376_v7, 0.0  ;;  %v2395_v6 = vld [vmem:[%s2768_s23 + $0x40] sm:$0xff]  }
 0x12d   : > { %v1345_v11 = vadd.f32 %v2123_v1, %v1153_v8  ;;  %v1377_v12 = vadd.f32 %v2187_v3, %v1185_v9  ;;  %v857_v13 = vpop.f32.mrb[24].mxu0  ;;  %v985_v16 = vpop.f32.mrb[24].mxu1  ;;  %v2131_v3 = vunpack.c.h.bf16 %v2394_v44  ;;  %v2411_v7 = vld [vmem:[%s2768_s23 + $0xc0] sm:$0xff]  }
 0x12e   : > { %v1083_v18 = vmul.f32 %v2773_v10, %v857_v13  ;;  %v1115_v19 = vmul.f32 %v2773_v10, %v985_v16  ;;  %v859_v20 = vpop.f32.mrb[25].mxu0  ;;  %v987_v21 = vpop.f32.mrb[25].mxu1 }
 0x12f   : > { %v1409_v26 = vmax.f32 %v1345_v11, 0.0  ;;  %v1441_v27 = vmax.f32 %v1377_v12, 0.0  ;;  %v860_v28 = vpop.f32.mrb[26].mxu0  ;;  %v988_v29 = vpop.f32.mrb[26].mxu1 }
 0x130   : > { %v1154_v30 = vadd.f32 %v2780_v14, %v1083_v18  ;;  %v1186_v31 = vadd.f32 %v2780_v14, %v1115_v19  ;;  %v1084_v32 = vmul.f32 %v2773_v10, %v860_v28  ;;  %v1116_v33 = vmul.f32 %v2773_v10, %v988_v29  ;;  %v862_v34 = vpop.f32.mrb[27].mxu0  ;;  %v990_v35 = vpop.f32.mrb[27].mxu1 }
 0x131   : > { %v2256_v36 = vpack.c.bf16 %v1409_v26, %v1408_v24  ;;  %v2336_v37 = vpack.c.bf16 %v1441_v27, %v1440_v25  ;;  %v2198_v19 = vunpack.c.l.bf16 %v2411_v7  ;;  %v2135_v24 = vunpack.c.h.bf16 %v2395_v6 }
 0x132   : > { %v1346_v38 = vadd.f32 %v2126_v15, %v1154_v30  ;;  %v1378_v39 = vadd.f32 %v2190_v17, %v1186_v31  ;;  %v1155_v40 = vadd.f32 %v2780_v14, %v1084_v32  ;;  %v1187_v41 = vadd.f32 %v2780_v14, %v1116_v33 }
 0x133   : > { %2423 = vst [vmem:[%s2799_s30 + $0x28] sm:$0xff] %v2256_v36   ;;  %2439 = vst [vmem:[%s2799_s30 + $0xa8] sm:$0xff] %v2336_v37   ;;  %v2134_v17 = vunpack.c.l.bf16 %v2395_v6  ;;  %v2199_v25 = vunpack.c.h.bf16 %v2411_v7 }
 0x134   : > { %v1347_v42 = vadd.f32 %v2127_v22, %v1155_v40  ;;  %v1379_v43 = vadd.f32 %v2191_v23, %v1187_v41  ;;  %v1410_v46 = vmax.f32 %v1346_v38, 0.0  ;;  %v1442_v47 = vmax.f32 %v1378_v39, 0.0 }
 0x135   : > { %v865_v48 = vpop.f32.mrb[28].mxu0  ;;  %v993_v49 = vpop.f32.mrb[28].mxu1 }
 0x136   : > { %v1411_v50 = vmax.f32 %v1347_v42, 0.0  ;;  %v1443_v51 = vmax.f32 %v1379_v43, 0.0  ;;  %v1085_v52 = vmul.f32 %v2773_v10, %v865_v48  ;;  %v1117_v53 = vmul.f32 %v2773_v10, %v993_v49  ;;  %v867_v54 = vpop.f32.mrb[29].mxu0  ;;  %v995_v55 = vpop.f32.mrb[29].mxu1 }
 0x137   : > { %v868_v58 = vpop.f32.mrb[30].mxu0  ;;  %v996_v59 = vpop.f32.mrb[30].mxu1 }
 0x138   : > { %v2261_v60 = vpack.c.bf16 %v1411_v50, %v1410_v46  ;;  %v2341_v61 = vpack.c.bf16 %v1443_v51, %v1442_v47  ;;  %v1156_v62 = vadd.f32 %v2780_v14, %v1085_v52  ;;  %v1188_v63 = vadd.f32 %v2780_v14, %v1117_v53  ;;  %v870_v0 = vpop.f32.mrb[31].mxu0  ;;  %v998_v1 = vpop.f32.mrb[31].mxu1  ;;  %v2396_v46 = vld [vmem:[%s2768_s23 + $0x48] sm:$0xff]  }
 0x139   : > { %v1086_v2 = vmul.f32 %v2773_v10, %v868_v58  ;;  %v1118_v4 = vmul.f32 %v2773_v10, %v996_v59  ;;  %v2412_v47 = vld [vmem:[%s2768_s23 + $0xc8] sm:$0xff]   ;;  %v2138_v58 = vunpack.c.l.bf16 %v2396_v46 }
 0x13a   : > { %2424 = vst [vmem:[%s2799_s30 + $0x30] sm:$0xff] %v2261_v60   ;;  %2440 = vst [vmem:[%s2799_s30 + $0xb0] sm:$0xff] %v2341_v61   ;;  %v1348_v8 = vadd.f32 %v2130_v56, %v1156_v62  ;;  %v1380_v9 = vadd.f32 %v2194_v57, %v1188_v63  ;;  %v2202_v59 = vunpack.c.l.bf16 %v2412_v47  ;;  %v2203_v7 = vunpack.c.h.bf16 %v2412_v47 }
 0x13b   : > { %v1157_v11 = vadd.f32 %v2780_v14, %v1086_v2  ;;  %v1189_v12 = vadd.f32 %v2780_v14, %v1118_v4 }
 0x13c   : > { %v1412_v26 = vmax.f32 %v1348_v8, 0.0  ;;  %v1444_v27 = vmax.f32 %v1380_v9, 0.0  ;;  %v2397_v8 = vld [vmem:[%s2768_s23 + $0x50] sm:$0xff]  }
 0x13d   : > { %v1349_v13 = vadd.f32 %v2131_v3, %v1157_v11  ;;  %v1381_v15 = vadd.f32 %v2195_v5, %v1189_v12  ;;  %v873_v16 = vpop.f32.mrb[32].mxu0  ;;  %v1001_v18 = vpop.f32.mrb[32].mxu1  ;;  %v2139_v5 = vunpack.c.h.bf16 %v2396_v46  ;;  %v2413_v9 = vld [vmem:[%s2768_s23 + $0xd0] sm:$0xff]  }
 0x13e   : > { %v1087_v20 = vmul.f32 %v2773_v10, %v873_v16  ;;  %v1119_v21 = vmul.f32 %v2773_v10, %v1001_v18  ;;  %v875_v22 = vpop.f32.mrb[33].mxu0  ;;  %v1003_v23 = vpop.f32.mrb[33].mxu1 }
 0x13f   : > { %v1413_v28 = vmax.f32 %v1349_v13, 0.0  ;;  %v1445_v29 = vmax.f32 %v1381_v15, 0.0  ;;  %v876_v30 = vpop.f32.mrb[34].mxu0  ;;  %v1004_v31 = vpop.f32.mrb[34].mxu1 }
 0x140   : > { %v1158_v32 = vadd.f32 %v2780_v14, %v1087_v20  ;;  %v1190_v33 = vadd.f32 %v2780_v14, %v1119_v21  ;;  %v1088_v34 = vmul.f32 %v2773_v10, %v876_v30  ;;  %v1120_v35 = vmul.f32 %v2773_v10, %v1004_v31  ;;  %v878_v36 = vpop.f32.mrb[35].mxu0  ;;  %v1006_v37 = vpop.f32.mrb[35].mxu1 }
 0x141   : > { %v2266_v38 = vpack.c.bf16 %v1413_v28, %v1412_v26  ;;  %v2346_v39 = vpack.c.bf16 %v1445_v29, %v1444_v27  ;;  %v2206_v21 = vunpack.c.l.bf16 %v2413_v9  ;;  %v2143_v26 = vunpack.c.h.bf16 %v2397_v8 }
 0x142   : > { %v1350_v40 = vadd.f32 %v2134_v17, %v1158_v32  ;;  %v1382_v41 = vadd.f32 %v2198_v19, %v1190_v33  ;;  %v1159_v42 = vadd.f32 %v2780_v14, %v1088_v34  ;;  %v1191_v43 = vadd.f32 %v2780_v14, %v1120_v35 }
 0x143   : > { %2425 = vst [vmem:[%s2799_s30 + $0x38] sm:$0xff] %v2266_v38   ;;  %2441 = vst [vmem:[%s2799_s30 + $0xb8] sm:$0xff] %v2346_v39   ;;  %v2142_v19 = vunpack.c.l.bf16 %v2397_v8  ;;  %v2207_v27 = vunpack.c.h.bf16 %v2413_v9 }
 0x144   : > { %v1351_v44 = vadd.f32 %v2135_v24, %v1159_v42  ;;  %v1383_v45 = vadd.f32 %v2199_v25, %v1191_v43  ;;  %v1414_v48 = vmax.f32 %v1350_v40, 0.0  ;;  %v1446_v49 = vmax.f32 %v1382_v41, 0.0 }
 0x145   : > { %v881_v50 = vpop.f32.mrb[36].mxu0  ;;  %v1009_v51 = vpop.f32.mrb[36].mxu1 }
 0x146   : > { %v1415_v52 = vmax.f32 %v1351_v44, 0.0  ;;  %v1447_v53 = vmax.f32 %v1383_v45, 0.0  ;;  %v1089_v54 = vmul.f32 %v2773_v10, %v881_v50  ;;  %v1121_v55 = vmul.f32 %v2773_v10, %v1009_v51  ;;  %v883_v56 = vpop.f32.mrb[37].mxu0  ;;  %v1011_v57 = vpop.f32.mrb[37].mxu1 }
 0x147   : > { %v884_v60 = vpop.f32.mrb[38].mxu0  ;;  %v1012_v61 = vpop.f32.mrb[38].mxu1 }
 0x148   : > { %v2271_v62 = vpack.c.bf16 %v1415_v52, %v1414_v48  ;;  %v2351_v63 = vpack.c.bf16 %v1447_v53, %v1446_v49  ;;  %v1160_v0 = vadd.f32 %v2780_v14, %v1089_v54  ;;  %v1192_v1 = vadd.f32 %v2780_v14, %v1121_v55  ;;  %v886_v2 = vpop.f32.mrb[39].mxu0  ;;  %v1014_v3 = vpop.f32.mrb[39].mxu1  ;;  %v2398_v48 = vld [vmem:[%s2768_s23 + $0x58] sm:$0xff]  }
 0x149   : > { %v1090_v4 = vmul.f32 %v2773_v10, %v884_v60  ;;  %v1122_v6 = vmul.f32 %v2773_v10, %v1012_v61  ;;  %v2414_v49 = vld [vmem:[%s2768_s23 + $0xd8] sm:$0xff]   ;;  %v2146_v60 = vunpack.c.l.bf16 %v2398_v48 }
 0x14a   : > { %2426 = vst [vmem:[%s2799_s30 + $0x40] sm:$0xff] %v2271_v62   ;;  %2442 = vst [vmem:[%s2799_s30 + $0xc0] sm:$0xff] %v2351_v63   ;;  %v1352_v11 = vadd.f32 %v2138_v58, %v1160_v0  ;;  %v1384_v12 = vadd.f32 %v2202_v59, %v1192_v1  ;;  %v2210_v61 = vunpack.c.l.bf16 %v2414_v49  ;;  %v2211_v9 = vunpack.c.h.bf16 %v2414_v49 }
 0x14b   : > { %v1161_v13 = vadd.f32 %v2780_v14, %v1090_v4  ;;  %v1193_v15 = vadd.f32 %v2780_v14, %v1122_v6 }
 0x14c   : > { %v1416_v28 = vmax.f32 %v1352_v11, 0.0  ;;  %v1448_v29 = vmax.f32 %v1384_v12, 0.0  ;;  %v2399_v11 = vld [vmem:[%s2768_s23 + $0x60] sm:$0xff]  }
 0x14d   : > { %v1353_v16 = vadd.f32 %v2139_v5, %v1161_v13  ;;  %v1385_v17 = vadd.f32 %v2203_v7, %v1193_v15  ;;  %v889_v18 = vpop.f32.mrb[40].mxu0  ;;  %v1017_v20 = vpop.f32.mrb[40].mxu1  ;;  %v2147_v7 = vunpack.c.h.bf16 %v2398_v48  ;;  %v2415_v12 = vld [vmem:[%s2768_s23 + $0xe0] sm:$0xff]  }
 0x14e   : > { %v1091_v22 = vmul.f32 %v2773_v10, %v889_v18  ;;  %v1123_v23 = vmul.f32 %v2773_v10, %v1017_v20  ;;  %v891_v24 = vpop.f32.mrb[41].mxu0  ;;  %v1019_v25 = vpop.f32.mrb[41].mxu1 }
 0x14f   : > { %v1417_v30 = vmax.f32 %v1353_v16, 0.0  ;;  %v1449_v31 = vmax.f32 %v1385_v17, 0.0  ;;  %v892_v32 = vpop.f32.mrb[42].mxu0  ;;  %v1020_v33 = vpop.f32.mrb[42].mxu1 }
 0x150   : > { %v1162_v34 = vadd.f32 %v2780_v14, %v1091_v22  ;;  %v1194_v35 = vadd.f32 %v2780_v14, %v1123_v23  ;;  %v1092_v36 = vmul.f32 %v2773_v10, %v892_v32  ;;  %v1124_v37 = vmul.f32 %v2773_v10, %v1020_v33  ;;  %v894_v38 = vpop.f32.mrb[43].mxu0  ;;  %v1022_v39 = vpop.f32.mrb[43].mxu1 }
 0x151   : > { %v2276_v40 = vpack.c.bf16 %v1417_v30, %v1416_v28  ;;  %v2356_v41 = vpack.c.bf16 %v1449_v31, %v1448_v29  ;;  %v2214_v23 = vunpack.c.l.bf16 %v2415_v12  ;;  %v2151_v28 = vunpack.c.h.bf16 %v2399_v11 }
 0x152   : > { %v1354_v42 = vadd.f32 %v2142_v19, %v1162_v34  ;;  %v1386_v43 = vadd.f32 %v2206_v21, %v1194_v35  ;;  %v1163_v44 = vadd.f32 %v2780_v14, %v1092_v36  ;;  %v1195_v45 = vadd.f32 %v2780_v14, %v1124_v37 }
 0x153   : > { %2427 = vst [vmem:[%s2799_s30 + $0x48] sm:$0xff] %v2276_v40   ;;  %2443 = vst [vmem:[%s2799_s30 + $0xc8] sm:$0xff] %v2356_v41   ;;  %v2150_v21 = vunpack.c.l.bf16 %v2399_v11  ;;  %v2215_v29 = vunpack.c.h.bf16 %v2415_v12 }
 0x154   : > { %v1355_v46 = vadd.f32 %v2143_v26, %v1163_v44  ;;  %v1387_v47 = vadd.f32 %v2207_v27, %v1195_v45  ;;  %v1418_v50 = vmax.f32 %v1354_v42, 0.0  ;;  %v1450_v51 = vmax.f32 %v1386_v43, 0.0 }
 0x155   : > { %v897_v52 = vpop.f32.mrb[44].mxu0  ;;  %v1025_v53 = vpop.f32.mrb[44].mxu1 }
 0x156   : > { %v1419_v54 = vmax.f32 %v1355_v46, 0.0  ;;  %v1451_v55 = vmax.f32 %v1387_v47, 0.0  ;;  %v1093_v56 = vmul.f32 %v2773_v10, %v897_v52  ;;  %v1125_v57 = vmul.f32 %v2773_v10, %v1025_v53  ;;  %v899_v58 = vpop.f32.mrb[45].mxu0  ;;  %v1027_v59 = vpop.f32.mrb[45].mxu1 }
 0x157   : > { %v900_v62 = vpop.f32.mrb[46].mxu0  ;;  %v1028_v63 = vpop.f32.mrb[46].mxu1 }
 0x158   : > { %v2281_v0 = vpack.c.bf16 %v1419_v54, %v1418_v50  ;;  %v2361_v1 = vpack.c.bf16 %v1451_v55, %v1450_v51  ;;  %v1164_v2 = vadd.f32 %v2780_v14, %v1093_v56  ;;  %v1196_v3 = vadd.f32 %v2780_v14, %v1125_v57  ;;  %v902_v4 = vpop.f32.mrb[47].mxu0  ;;  %v1030_v5 = vpop.f32.mrb[47].mxu1  ;;  %v2400_v50 = vld [vmem:[%s2768_s23 + $0x68] sm:$0xff]  }
 0x159   : > { %v1094_v6 = vmul.f32 %v2773_v10, %v900_v62  ;;  %v1126_v8 = vmul.f32 %v2773_v10, %v1028_v63  ;;  %v2416_v51 = vld [vmem:[%s2768_s23 + $0xe8] sm:$0xff]   ;;  %v2154_v62 = vunpack.c.l.bf16 %v2400_v50 }
 0x15a   : > { %2428 = vst [vmem:[%s2799_s30 + $0x50] sm:$0xff] %v2281_v0   ;;  %2444 = vst [vmem:[%s2799_s30 + $0xd0] sm:$0xff] %v2361_v1   ;;  %v1356_v13 = vadd.f32 %v2146_v60, %v1164_v2  ;;  %v1388_v15 = vadd.f32 %v2210_v61, %v1196_v3  ;;  %v2218_v63 = vunpack.c.l.bf16 %v2416_v51  ;;  %v2219_v12 = vunpack.c.h.bf16 %v2416_v51 }
 0x15b   : > { %v1165_v16 = vadd.f32 %v2780_v14, %v1094_v6  ;;  %v1197_v17 = vadd.f32 %v2780_v14, %v1126_v8 }
 0x15c   : > { %v1420_v30 = vmax.f32 %v1356_v13, 0.0  ;;  %v1452_v31 = vmax.f32 %v1388_v15, 0.0  ;;  %v2401_v13 = vld [vmem:[%s2768_s23 + $0x70] sm:$0xff]  }
 0x15d   : > { %v1357_v18 = vadd.f32 %v2147_v7, %v1165_v16  ;;  %v1389_v19 = vadd.f32 %v2211_v9, %v1197_v17  ;;  %v905_v20 = vpop.f32.mrb[48].mxu0  ;;  %v1033_v22 = vpop.f32.mrb[48].mxu1  ;;  %v2155_v9 = vunpack.c.h.bf16 %v2400_v50  ;;  %v2417_v15 = vld [vmem:[%s2768_s23 + $0xf0] sm:$0xff]  }
 0x15e   : > { %v1095_v24 = vmul.f32 %v2773_v10, %v905_v20  ;;  %v1127_v25 = vmul.f32 %v2773_v10, %v1033_v22  ;;  %v907_v26 = vpop.f32.mrb[49].mxu0  ;;  %v1035_v27 = vpop.f32.mrb[49].mxu1 }
 0x15f   : > { %v1421_v32 = vmax.f32 %v1357_v18, 0.0  ;;  %v1453_v33 = vmax.f32 %v1389_v19, 0.0  ;;  %v908_v34 = vpop.f32.mrb[50].mxu0  ;;  %v1036_v35 = vpop.f32.mrb[50].mxu1 }
 0x160   : > { %v1166_v36 = vadd.f32 %v2780_v14, %v1095_v24  ;;  %v1198_v37 = vadd.f32 %v2780_v14, %v1127_v25  ;;  %v1096_v38 = vmul.f32 %v2773_v10, %v908_v34  ;;  %v1128_v39 = vmul.f32 %v2773_v10, %v1036_v35  ;;  %v910_v40 = vpop.f32.mrb[51].mxu0  ;;  %v1038_v41 = vpop.f32.mrb[51].mxu1 }
 0x161   : > { %v2286_v42 = vpack.c.bf16 %v1421_v32, %v1420_v30  ;;  %v2366_v43 = vpack.c.bf16 %v1453_v33, %v1452_v31  ;;  %v2222_v25 = vunpack.c.l.bf16 %v2417_v15  ;;  %v2159_v30 = vunpack.c.h.bf16 %v2401_v13 }
 0x162   : > { %v1358_v44 = vadd.f32 %v2150_v21, %v1166_v36  ;;  %v1390_v45 = vadd.f32 %v2214_v23, %v1198_v37  ;;  %v1167_v46 = vadd.f32 %v2780_v14, %v1096_v38  ;;  %v1199_v47 = vadd.f32 %v2780_v14, %v1128_v39 }
 0x163   : > { %2429 = vst [vmem:[%s2799_s30 + $0x58] sm:$0xff] %v2286_v42   ;;  %2445 = vst [vmem:[%s2799_s30 + $0xd8] sm:$0xff] %v2366_v43   ;;  %v2158_v23 = vunpack.c.l.bf16 %v2401_v13  ;;  %v2223_v31 = vunpack.c.h.bf16 %v2417_v15 }
 0x164   : > { %v1359_v48 = vadd.f32 %v2151_v28, %v1167_v46  ;;  %v1391_v49 = vadd.f32 %v2215_v29, %v1199_v47  ;;  %v1422_v52 = vmax.f32 %v1358_v44, 0.0  ;;  %v1454_v53 = vmax.f32 %v1390_v45, 0.0 }
 0x165   : > { %v913_v54 = vpop.f32.mrb[52].mxu0  ;;  %v1041_v55 = vpop.f32.mrb[52].mxu1 }
 0x166   : > { %v1423_v56 = vmax.f32 %v1359_v48, 0.0  ;;  %v1455_v57 = vmax.f32 %v1391_v49, 0.0  ;;  %v1097_v58 = vmul.f32 %v2773_v10, %v913_v54  ;;  %v1129_v59 = vmul.f32 %v2773_v10, %v1041_v55  ;;  %v915_v60 = vpop.f32.mrb[53].mxu0  ;;  %v1043_v61 = vpop.f32.mrb[53].mxu1 }
 0x167   : > { %v916_v0 = vpop.f32.mrb[54].mxu0  ;;  %v1044_v1 = vpop.f32.mrb[54].mxu1 }
 0x168   : > { %v2291_v2 = vpack.c.bf16 %v1423_v56, %v1422_v52  ;;  %v2371_v3 = vpack.c.bf16 %v1455_v57, %v1454_v53  ;;  %v1168_v4 = vadd.f32 %v2780_v14, %v1097_v58  ;;  %v1200_v5 = vadd.f32 %v2780_v14, %v1129_v59  ;;  %v918_v6 = vpop.f32.mrb[55].mxu0  ;;  %v1046_v7 = vpop.f32.mrb[55].mxu1  ;;  %v2402_v52 = vld [vmem:[%s2768_s23 + $0x78] sm:$0xff]   ;;  %v2582_v59 = vld [vmem:[%s2982_s2] ss:$0 sm:$0xff] }
 0x169   : > { %v1098_v8 = vmul.f32 %v2773_v10, %v916_v0  ;;  %v1130_v11 = vmul.f32 %v2773_v10, %v1044_v1  ;;  %v2418_v53 = vld [vmem:[%s2768_s23 + $0xf8] sm:$0xff]  }
 0x16a   : > { %2430 = vst [vmem:[%s2799_s30 + $0x60] sm:$0xff] %v2291_v2   ;;  %2446 = vst [vmem:[%s2799_s30 + $0xe0] sm:$0xff] %v2371_v3   ;;  %v1360_v16 = vadd.f32 %v2154_v62, %v1168_v4  ;;  %v1392_v17 = vadd.f32 %v2218_v63, %v1200_v5  ;;  %v2162_v63 = vunpack.c.l.bf16 %v2402_v52  ;;  %v2226_v0 = vunpack.c.l.bf16 %v2418_v53  ;;  %v2583_v5 = vld [vmem:[%s2983_s3] ss:$0 sm:$0xff] }
 0x16b   : > { %v1169_v18 = vadd.f32 %v2780_v14, %v1098_v8  ;;  %v1201_v19 = vadd.f32 %v2780_v14, %v1130_v11  ;;  %v2227_v15 = vunpack.c.h.bf16 %v2418_v53 }
 0x16c   : > { %v1424_v32 = vmax.f32 %v1360_v16, 0.0  ;;  %v1456_v33 = vmax.f32 %v1392_v17, 0.0 }
 0x16d   : > { %v1361_v20 = vadd.f32 %v2155_v9, %v1169_v18  ;;  %v1393_v21 = vadd.f32 %v2219_v12, %v1201_v19  ;;  %v921_v22 = vpop.f32.mrb[56].mxu0  ;;  %v1049_v24 = vpop.f32.mrb[56].mxu1  ;;  %v2163_v12 = vunpack.c.h.bf16 %v2402_v52 }
 0x16e   : > { %v1099_v26 = vmul.f32 %v2773_v10, %v921_v22  ;;  %v1131_v27 = vmul.f32 %v2773_v10, %v1049_v24  ;;  %v923_v28 = vpop.f32.mrb[57].mxu0  ;;  %v1051_v29 = vpop.f32.mrb[57].mxu1 }
 0x16f   : > { %v1425_v34 = vmax.f32 %v1361_v20, 0.0  ;;  %v1457_v35 = vmax.f32 %v1393_v21, 0.0  ;;  %v924_v36 = vpop.f32.mrb[58].mxu0  ;;  %v1052_v37 = vpop.f32.mrb[58].mxu1 }
 0x170   : > { %v1170_v38 = vadd.f32 %v2780_v14, %v1099_v26  ;;  %v1202_v39 = vadd.f32 %v2780_v14, %v1131_v27  ;;  %v1100_v40 = vmul.f32 %v2773_v10, %v924_v36  ;;  %v1132_v41 = vmul.f32 %v2773_v10, %v1052_v37  ;;  %v926_v42 = vpop.f32.mrb[59].mxu0  ;;  %v1054_v43 = vpop.f32.mrb[59].mxu1 }
 0x171   : > { %v2296_v44 = vpack.c.bf16 %v1425_v34, %v1424_v32  ;;  %v2376_v45 = vpack.c.bf16 %v1457_v35, %v1456_v33 }
 0x172   : > { %v1362_v46 = vadd.f32 %v2158_v23, %v1170_v38  ;;  %v1394_v47 = vadd.f32 %v2222_v25, %v1202_v39  ;;  %v1171_v48 = vadd.f32 %v2780_v14, %v1100_v40  ;;  %v1203_v49 = vadd.f32 %v2780_v14, %v1132_v41 }
 0x173   : > { %2431 = vst [vmem:[%s2799_s30 + $0x68] sm:$0xff] %v2296_v44   ;;  %2447 = vst [vmem:[%s2799_s30 + $0xe8] sm:$0xff] %v2376_v45  }
 0x174   : > { %v1363_v50 = vadd.f32 %v2159_v30, %v1171_v48  ;;  %v1395_v51 = vadd.f32 %v2223_v31, %v1203_v49  ;;  %v1426_v54 = vmax.f32 %v1362_v46, 0.0  ;;  %v1458_v55 = vmax.f32 %v1394_v47, 0.0 }
 0x175   : > { %v929_v56 = vpop.f32.mrb[60].mxu0  ;;  %v1057_v10 = vpop.f32.mrb[60].mxu1 }
 0x176   : > { %v1427_v57 = vmax.f32 %v1363_v50, 0.0  ;;  %v1459_v58 = vmax.f32 %v1395_v51, 0.0  ;;  %v1101_v60 = vmul.f32 %v2582_v59, %v929_v56  ;;  %v1133_v61 = vmul.f32 %v2582_v59, %v1057_v10  ;;  %v931_v62 = vpop.f32.mrb[61].mxu0  ;;  %v1059_v14 = vpop.f32.mrb[61].mxu1 }
 0x177   : > { %v932_v1 = vpop.f32.mrb[62].mxu0  ;;  %v1060_v2 = vpop.f32.mrb[62].mxu1 }
 0x178   : > { %v2301_v3 = vpack.c.bf16 %v1427_v57, %v1426_v54  ;;  %v2381_v4 = vpack.c.bf16 %v1459_v58, %v1458_v55  ;;  %v1172_v6 = vadd.f32 %v2583_v5, %v1101_v60  ;;  %v1204_v7 = vadd.f32 %v2583_v5, %v1133_v61  ;;  %v934_v8 = vpop.f32.mrb[63].mxu0  ;;  %v1062_v9 = vpop.f32.mrb[63].mxu1 }
 0x179   : > { %v1102_v11 = vmul.f32 %v2582_v59, %v932_v1  ;;  %v1134_v13 = vmul.f32 %v2582_v59, %v1060_v2 }
 0x17a   : > { %2432 = vst [vmem:[%s2799_s30 + $0x70] sm:$0xff] %v2301_v3   ;;  %2448 = vst [vmem:[%s2799_s30 + $0xf0] sm:$0xff] %v2381_v4   ;;  %v1364_v16 = vadd.f32 %v2162_v63, %v1172_v6  ;;  %v1396_v17 = vadd.f32 %v2226_v0, %v1204_v7 }
 0x17b   : > { %v1173_v18 = vadd.f32 %v2583_v5, %v1102_v11  ;;  %v1205_v19 = vadd.f32 %v2583_v5, %v1134_v13 }
 0x17c   : > { %v1428_v22 = vmax.f32 %v1364_v16, 0.0  ;;  %v1460_v23 = vmax.f32 %v1396_v17, 0.0 }
 0x17d   : > { %v1365_v20 = vadd.f32 %v2163_v12, %v1173_v18  ;;  %v1397_v21 = vadd.f32 %v2227_v15, %v1205_v19 }
 0x17f   : > { %v1429_v24 = vmax.f32 %v1365_v20, 0.0  ;;  %v1461_v25 = vmax.f32 %v1397_v21, 0.0 }
 0x181   : > { %v2306_v26 = vpack.c.bf16 %v1429_v24, %v1428_v22  ;;  %v2386_v27 = vpack.c.bf16 %v1461_v25, %v1460_v23 }
 0x183   : > { %2433 = vst [vmem:[%s2799_s30 + $0x78] sm:$0xff] %v2306_v26   ;;  %2449 = vst [vmem:[%s2799_s30 + $0xf8] sm:$0xff] %v2386_v27  }
 0x184 PF: > { %s15_s18 = sadd.s32 1, %s2590_s18  }
 0x185   : > { %p12_p4 = scmp.ge.s32.totalorder %s15_s18, 6  }
 0x187   :  { %14 = sbr.rel (!%p12_p4) target bundleno = 1 (0x1), region = 73 }

// kernel: resnet20_forward.30
= control target key start
LH: loop header
LB: loop body
LE: loop exit
PB: predicated region body
PF: predicated region fallthrough
CT: control target
= control target key end

     0   :  { %vm250_vm0 = vcmask 130048   ;;  %s2012_s1 = inlined_call_operand.vmem [shape: bf16[16,128], index: 1, kind: input, shape index: {}]   ;;  %s2013_s0 = inlined_call_operand.vmem [shape: bf16[512,16], index: 0, kind: input, shape index: {}]   ;;  %s2014_s2 = inlined_call_operand.vmem [shape: f32[1,128], index: 2, kind: input, shape index: {}]   ;;  %s2015_s3 = inlined_call_operand.vmem [shape: f32[1,128], index: 3, kind: input, shape index: {}]   ;;  %s2016_s4 = inlined_call_operand.vmem [shape: bf16[512,128], index: 4, kind: output, shape index: {}]  }
   0x1   :  { %v1589_v0 = vld [vmem:[%s2012_s1] sm:$0xff]   ;;  %v1592_v3 = vld [vmem:[%s2013_s0 + $0x8] sm:$0xff]   ;;  %v1594_v5 = vld [vmem:[%s2013_s0 + $0x10] sm:$0xff]  }
   0x2   :  { %v1590_v1 = vld [vmem:[%s2013_s0] sm:$0xff]   ;;  %1521 = vmatprep.subr.bf16.mxu0 %v1589_v0  ;;  %1587 = vmatprep.subr.bf16.mxu1 %v1589_v0  ;;  %v1593_v4 = vld [vmem:[%s2013_s0 + $0x88] sm:$0xff]   ;;  %v1595_v6 = vld [vmem:[%s2013_s0 + $0x90] sm:$0xff]  }
   0x3   :  { %v1591_v2 = vld [vmem:[%s2013_s0 + $0x80] sm:$0xff]   ;;  %1522 = vmatpush3.bf16.msra.mxu0 %v1589_v0  ;;  %1588 = vmatpush3.bf16.msra.mxu1 %v1589_v0  ;;  %v1596_v7 = vld [vmem:[%s2013_s0 + $0x18] sm:$0xff]   ;;  %v1600_v11 = vld [vmem:[%s2013_s0 + $0x28] sm:$0xff]  }
   0x4   :  { %1523 = vmatprep.mubr.msk.bf16.mxu0 %vm250_vm0, %v1590_v1  ;;  %1555 = vmatprep.mubr.msk.bf16.mxu1 %vm250_vm0, %v1591_v2  ;;  %v1597_v8 = vld [vmem:[%s2013_s0 + $0x98] sm:$0xff]   ;;  %v1598_v9 = vld [vmem:[%s2013_s0 + $0x20] sm:$0xff]   ;;  %v1601_v12 = vld [vmem:[%s2013_s0 + $0xa8] sm:$0xff]  }
   0x5   :  { %v1599_v10 = vld [vmem:[%s2013_s0 + $0xa0] sm:$0xff]   ;;  %v1602_v13 = vld [vmem:[%s2013_s0 + $0x30] sm:$0xff]   ;;  %v1604_v15 = vld [vmem:[%s2013_s0 + $0x38] sm:$0xff]  }
   0x6   :  { %1524 = vmatmul.mubr.msk.bf16.vlgmr.msra.gmra.mrb[0].mxu0 %vm250_vm0, %v1592_v3  ;;  %1556 = vmatmul.mubr.msk.bf16.vlgmr.msra.gmra.mrb[0].mxu1 %vm250_vm0, %v1593_v4  ;;  %v1603_v14 = vld [vmem:[%s2013_s0 + $0xb0] sm:$0xff]   ;;  %v1605_v16 = vld [vmem:[%s2013_s0 + $0xb8] sm:$0xff]   ;;  %v1606_v17 = vld [vmem:[%s2013_s0 + $0x40] sm:$0xff]  }
   0x7   :  { %1527 = vmatprep.mubr.msk.bf16.mxu0 %vm250_vm0, %v1594_v5  ;;  %1559 = vmatprep.mubr.msk.bf16.mxu1 %vm250_vm0, %v1595_v6  ;;  %v1607_v18 = vld [vmem:[%s2013_s0 + $0xc0] sm:$0xff]   ;;  %v1608_v19 = vld [vmem:[%s2013_s0 + $0x48] sm:$0xff]   ;;  %v1610_v21 = vld [vmem:[%s2013_s0 + $0x50] sm:$0xff]  }
   0x8   :  { %v1609_v20 = vld [vmem:[%s2013_s0 + $0xc8] sm:$0xff]   ;;  %v1611_v22 = vld [vmem:[%s2013_s0 + $0xd0] sm:$0xff]   ;;  %v1612_v23 = vld [vmem:[%s2013_s0 + $0x58] sm:$0xff]  }
   0x9   :  { %v1613_v24 = vld [vmem:[%s2013_s0 + $0xd8] sm:$0xff]   ;;  %v1614_v25 = vld [vmem:[%s2013_s0 + $0x60] sm:$0xff]   ;;  %v1616_v27 = vld [vmem:[%s2013_s0 + $0x68] sm:$0xff]  }
   0xa   :  { %v1615_v26 = vld [vmem:[%s2013_s0 + $0xe0] sm:$0xff]   ;;  %v1617_v28 = vld [vmem:[%s2013_s0 + $0xe8] sm:$0xff]   ;;  %v1618_v29 = vld [vmem:[%s2013_s0 + $0x70] sm:$0xff]  }
   0xb   :  { %v1619_v30 = vld [vmem:[%s2013_s0 + $0xf0] sm:$0xff]   ;;  %v1620_v31 = vld [vmem:[%s2013_s0 + $0x78] sm:$0xff]   ;;  %v1781_v33 = vld [vmem:[%s2014_s2] ss:$0 sm:$0xff] }
   0xc   :  { %v1621_v32 = vld [vmem:[%s2013_s0 + $0xf8] sm:$0xff]   ;;  %v1788_v40 = vld [vmem:[%s2015_s3] ss:$0 sm:$0xff] }
   0xe   :  { %1528 = vmatmul.mubr.msk.bf16.gmra.mrb[4].mxu0 %vm250_vm0, %v1596_v7  ;;  %1560 = vmatmul.mubr.msk.bf16.gmra.mrb[4].mxu1 %vm250_vm0, %v1597_v8 }
   0xf   :  { %1531 = vmatprep.mubr.msk.bf16.mxu0 %vm250_vm0, %v1598_v9  ;;  %1563 = vmatprep.mubr.msk.bf16.mxu1 %vm250_vm0, %v1599_v10 }
  0x16   :  { %1532 = vmatmul.mubr.msk.bf16.gmra.mrb[8].mxu0 %vm250_vm0, %v1600_v11  ;;  %1564 = vmatmul.mubr.msk.bf16.gmra.mrb[8].mxu1 %vm250_vm0, %v1601_v12 }
  0x17   :  { %1535 = vmatprep.mubr.msk.bf16.mxu0 %vm250_vm0, %v1602_v13  ;;  %1567 = vmatprep.mubr.msk.bf16.mxu1 %vm250_vm0, %v1603_v14 }
  0x1e   :  { %1536 = vmatmul.mubr.msk.bf16.gmra.mrb[12].mxu0 %vm250_vm0, %v1604_v15  ;;  %1568 = vmatmul.mubr.msk.bf16.gmra.mrb[12].mxu1 %vm250_vm0, %v1605_v16 }
  0x1f   :  { %1539 = vmatprep.mubr.msk.bf16.mxu0 %vm250_vm0, %v1606_v17  ;;  %1571 = vmatprep.mubr.msk.bf16.mxu1 %vm250_vm0, %v1607_v18 }
  0x26   :  { %1540 = vmatmul.mubr.msk.bf16.gmra.mrb[16].mxu0 %vm250_vm0, %v1608_v19  ;;  %1572 = vmatmul.mubr.msk.bf16.gmra.mrb[16].mxu1 %vm250_vm0, %v1609_v20 }
  0x27   :  { %1543 = vmatprep.mubr.msk.bf16.mxu0 %vm250_vm0, %v1610_v21  ;;  %1575 = vmatprep.mubr.msk.bf16.mxu1 %vm250_vm0, %v1611_v22 }
  0x2e   :  { %1544 = vmatmul.mubr.msk.bf16.gmra.mrb[20].mxu0 %vm250_vm0, %v1612_v23  ;;  %1576 = vmatmul.mubr.msk.bf16.gmra.mrb[20].mxu1 %vm250_vm0, %v1613_v24 }
  0x2f   :  { %1547 = vmatprep.mubr.msk.bf16.mxu0 %vm250_vm0, %v1614_v25  ;;  %1579 = vmatprep.mubr.msk.bf16.mxu1 %vm250_vm0, %v1615_v26 }
  0x36   :  { %1548 = vmatmul.mubr.msk.bf16.gmra.mrb[24].mxu0 %vm250_vm0, %v1616_v27  ;;  %1580 = vmatmul.mubr.msk.bf16.gmra.mrb[24].mxu1 %vm250_vm0, %v1617_v28 }
  0x37   :  { %1551 = vmatprep.mubr.msk.bf16.mxu0 %vm250_vm0, %v1618_v29  ;;  %1583 = vmatprep.mubr.msk.bf16.mxu1 %vm250_vm0, %v1619_v30 }
  0x3e   :  { %1552 = vmatmul.mubr.msk.bf16.gmra.mrb[28].mxu0 %vm250_vm0, %v1620_v31  ;;  %1584 = vmatmul.mubr.msk.bf16.gmra.mrb[28].mxu1 %vm250_vm0, %v1621_v32 }
  0xd9   :  { %v1525_v34 = vpop.f32.mrb[0].mxu0  ;;  %v1557_v35 = vpop.f32.mrb[0].mxu1 }
  0xda   :  { %v645_v36 = vmul.f32 %v1525_v34, %v1781_v33  ;;  %v677_v37 = vmul.f32 %v1557_v35, %v1781_v33  ;;  %v381_v38 = vpop.f32.mrb[1].mxu0  ;;  %v509_v39 = vpop.f32.mrb[1].mxu1 }
  0xdb   :  { %v643_v41 = vmul.f32 %v1781_v33, %v381_v38  ;;  %v675_v42 = vmul.f32 %v1781_v33, %v509_v39  ;;  %v1526_v43 = vpop.f32.mrb[2].mxu0  ;;  %v1558_v44 = vpop.f32.mrb[2].mxu1 }
  0xdc   :  { %v646_v45 = vmul.f32 %v1526_v43, %v1781_v33  ;;  %v678_v46 = vmul.f32 %v1558_v44, %v1781_v33  ;;  %v384_v47 = vpop.f32.mrb[3].mxu0  ;;  %v512_v48 = vpop.f32.mrb[3].mxu1  ;;  %v716_v51 = vadd.f32 %v1788_v40, %v645_v36  ;;  %v748_v52 = vadd.f32 %v1788_v40, %v677_v37 }
  0xdd   :  { %v644_v49 = vmul.f32 %v1781_v33, %v384_v47  ;;  %v676_v50 = vmul.f32 %v1781_v33, %v512_v48  ;;  %v714_v55 = vadd.f32 %v1788_v40, %v643_v41  ;;  %v746_v56 = vadd.f32 %v1788_v40, %v675_v42 }
  0xde   :  { %v717_v53 = vadd.f32 %v1788_v40, %v646_v45  ;;  %v749_v54 = vadd.f32 %v1788_v40, %v678_v46 }
  0xdf   :  { %v715_v57 = vadd.f32 %v1788_v40, %v644_v49  ;;  %v747_v58 = vadd.f32 %v1788_v40, %v676_v50 }
  0xe0   :  { %v1305_v59 = vpack.c.bf16 %v717_v53, %v716_v51  ;;  %v1385_v60 = vpack.c.bf16 %v749_v54, %v748_v52 }
  0xe1   :  { %v1300_v61 = vpack.c.bf16 %v715_v57, %v714_v55  ;;  %v1380_v62 = vpack.c.bf16 %v747_v58, %v746_v56  ;;  %v1529_v63 = vpop.f32.mrb[4].mxu0  ;;  %v1561_v0 = vpop.f32.mrb[4].mxu1 }
  0xe2   :  { %1457 = vst [vmem:[%s2016_s4 + $0x8] sm:$0xff] %v1305_v59   ;;  %1473 = vst [vmem:[%s2016_s4 + $0x88] sm:$0xff] %v1385_v60   ;;  %v649_v1 = vmul.f32 %v1529_v63, %v1781_v33  ;;  %v681_v2 = vmul.f32 %v1561_v0, %v1781_v33  ;;  %v397_v3 = vpop.f32.mrb[5].mxu0  ;;  %v525_v4 = vpop.f32.mrb[5].mxu1 }
  0xe3   :  { %1301 = vst [vmem:[%s2016_s4] sm:$0xff] %v1300_v61   ;;  %1472 = vst [vmem:[%s2016_s4 + $0x80] sm:$0xff] %v1380_v62   ;;  %v647_v5 = vmul.f32 %v1781_v33, %v397_v3  ;;  %v679_v6 = vmul.f32 %v1781_v33, %v525_v4  ;;  %v1530_v7 = vpop.f32.mrb[6].mxu0  ;;  %v1562_v8 = vpop.f32.mrb[6].mxu1 }
  0xe4   :  { %v650_v9 = vmul.f32 %v1530_v7, %v1781_v33  ;;  %v682_v10 = vmul.f32 %v1562_v8, %v1781_v33  ;;  %v400_v11 = vpop.f32.mrb[7].mxu0  ;;  %v528_v12 = vpop.f32.mrb[7].mxu1  ;;  %v720_v15 = vadd.f32 %v1788_v40, %v649_v1  ;;  %v752_v16 = vadd.f32 %v1788_v40, %v681_v2 }
  0xe5   :  { %v648_v13 = vmul.f32 %v1781_v33, %v400_v11  ;;  %v680_v14 = vmul.f32 %v1781_v33, %v528_v12  ;;  %v718_v19 = vadd.f32 %v1788_v40, %v647_v5  ;;  %v750_v20 = vadd.f32 %v1788_v40, %v679_v6 }
  0xe6   :  { %v721_v17 = vadd.f32 %v1788_v40, %v650_v9  ;;  %v753_v18 = vadd.f32 %v1788_v40, %v682_v10 }
  0xe7   :  { %v719_v21 = vadd.f32 %v1788_v40, %v648_v13  ;;  %v751_v22 = vadd.f32 %v1788_v40, %v680_v14 }
  0xe8   :  { %v1315_v23 = vpack.c.bf16 %v721_v17, %v720_v15  ;;  %v1395_v24 = vpack.c.bf16 %v753_v18, %v752_v16 }
  0xe9   :  { %v1310_v25 = vpack.c.bf16 %v719_v21, %v718_v19  ;;  %v1390_v26 = vpack.c.bf16 %v751_v22, %v750_v20  ;;  %v1533_v27 = vpop.f32.mrb[8].mxu0  ;;  %v1565_v28 = vpop.f32.mrb[8].mxu1 }
  0xea   :  { %1459 = vst [vmem:[%s2016_s4 + $0x18] sm:$0xff] %v1315_v23   ;;  %1475 = vst [vmem:[%s2016_s4 + $0x98] sm:$0xff] %v1395_v24   ;;  %v653_v29 = vmul.f32 %v1533_v27, %v1781_v33  ;;  %v685_v30 = vmul.f32 %v1565_v28, %v1781_v33  ;;  %v413_v31 = vpop.f32.mrb[9].mxu0  ;;  %v541_v32 = vpop.f32.mrb[9].mxu1 }
  0xeb   :  { %1458 = vst [vmem:[%s2016_s4 + $0x10] sm:$0xff] %v1310_v25   ;;  %1474 = vst [vmem:[%s2016_s4 + $0x90] sm:$0xff] %v1390_v26   ;;  %v651_v34 = vmul.f32 %v1781_v33, %v413_v31  ;;  %v683_v35 = vmul.f32 %v1781_v33, %v541_v32  ;;  %v1534_v36 = vpop.f32.mrb[10].mxu0  ;;  %v1566_v37 = vpop.f32.mrb[10].mxu1 }
  0xec   :  { %v654_v38 = vmul.f32 %v1534_v36, %v1781_v33  ;;  %v686_v39 = vmul.f32 %v1566_v37, %v1781_v33  ;;  %v416_v41 = vpop.f32.mrb[11].mxu0  ;;  %v544_v42 = vpop.f32.mrb[11].mxu1  ;;  %v724_v45 = vadd.f32 %v1788_v40, %v653_v29  ;;  %v756_v46 = vadd.f32 %v1788_v40, %v685_v30 }
  0xed   :  { %v652_v43 = vmul.f32 %v1781_v33, %v416_v41  ;;  %v684_v44 = vmul.f32 %v1781_v33, %v544_v42  ;;  %v722_v49 = vadd.f32 %v1788_v40, %v651_v34  ;;  %v754_v50 = vadd.f32 %v1788_v40, %v683_v35 }
  0xee   :  { %v725_v47 = vadd.f32 %v1788_v40, %v654_v38  ;;  %v757_v48 = vadd.f32 %v1788_v40, %v686_v39 }
  0xef   :  { %v723_v51 = vadd.f32 %v1788_v40, %v652_v43  ;;  %v755_v52 = vadd.f32 %v1788_v40, %v684_v44 }
  0xf0   :  { %v1325_v53 = vpack.c.bf16 %v725_v47, %v724_v45  ;;  %v1405_v54 = vpack.c.bf16 %v757_v48, %v756_v46 }
  0xf1   :  { %v1320_v55 = vpack.c.bf16 %v723_v51, %v722_v49  ;;  %v1400_v56 = vpack.c.bf16 %v755_v52, %v754_v50  ;;  %v1537_v57 = vpop.f32.mrb[12].mxu0  ;;  %v1569_v58 = vpop.f32.mrb[12].mxu1 }
  0xf2   :  { %1461 = vst [vmem:[%s2016_s4 + $0x28] sm:$0xff] %v1325_v53   ;;  %1477 = vst [vmem:[%s2016_s4 + $0xa8] sm:$0xff] %v1405_v54   ;;  %v657_v59 = vmul.f32 %v1537_v57, %v1781_v33  ;;  %v689_v60 = vmul.f32 %v1569_v58, %v1781_v33  ;;  %v429_v61 = vpop.f32.mrb[13].mxu0  ;;  %v557_v62 = vpop.f32.mrb[13].mxu1 }
  0xf3   :  { %1460 = vst [vmem:[%s2016_s4 + $0x20] sm:$0xff] %v1320_v55   ;;  %1476 = vst [vmem:[%s2016_s4 + $0xa0] sm:$0xff] %v1400_v56   ;;  %v655_v63 = vmul.f32 %v1781_v33, %v429_v61  ;;  %v687_v0 = vmul.f32 %v1781_v33, %v557_v62  ;;  %v1538_v1 = vpop.f32.mrb[14].mxu0  ;;  %v1570_v2 = vpop.f32.mrb[14].mxu1 }
  0xf4   :  { %v658_v3 = vmul.f32 %v1538_v1, %v1781_v33  ;;  %v690_v4 = vmul.f32 %v1570_v2, %v1781_v33  ;;  %v432_v5 = vpop.f32.mrb[15].mxu0  ;;  %v560_v6 = vpop.f32.mrb[15].mxu1  ;;  %v728_v9 = vadd.f32 %v1788_v40, %v657_v59  ;;  %v760_v10 = vadd.f32 %v1788_v40, %v689_v60 }
  0xf5   :  { %v656_v7 = vmul.f32 %v1781_v33, %v432_v5  ;;  %v688_v8 = vmul.f32 %v1781_v33, %v560_v6  ;;  %v726_v13 = vadd.f32 %v1788_v40, %v655_v63  ;;  %v758_v14 = vadd.f32 %v1788_v40, %v687_v0 }
  0xf6   :  { %v729_v11 = vadd.f32 %v1788_v40, %v658_v3  ;;  %v761_v12 = vadd.f32 %v1788_v40, %v690_v4 }
  0xf7   :  { %v727_v15 = vadd.f32 %v1788_v40, %v656_v7  ;;  %v759_v16 = vadd.f32 %v1788_v40, %v688_v8 }
  0xf8   :  { %v1335_v17 = vpack.c.bf16 %v729_v11, %v728_v9  ;;  %v1415_v18 = vpack.c.bf16 %v761_v12, %v760_v10 }
  0xf9   :  { %v1330_v19 = vpack.c.bf16 %v727_v15, %v726_v13  ;;  %v1410_v20 = vpack.c.bf16 %v759_v16, %v758_v14  ;;  %v1541_v21 = vpop.f32.mrb[16].mxu0  ;;  %v1573_v22 = vpop.f32.mrb[16].mxu1 }
  0xfa   :  { %1463 = vst [vmem:[%s2016_s4 + $0x38] sm:$0xff] %v1335_v17   ;;  %1479 = vst [vmem:[%s2016_s4 + $0xb8] sm:$0xff] %v1415_v18   ;;  %v661_v23 = vmul.f32 %v1541_v21, %v1781_v33  ;;  %v693_v24 = vmul.f32 %v1573_v22, %v1781_v33  ;;  %v445_v25 = vpop.f32.mrb[17].mxu0  ;;  %v573_v26 = vpop.f32.mrb[17].mxu1 }
  0xfb   :  { %1462 = vst [vmem:[%s2016_s4 + $0x30] sm:$0xff] %v1330_v19   ;;  %1478 = vst [vmem:[%s2016_s4 + $0xb0] sm:$0xff] %v1410_v20   ;;  %v659_v27 = vmul.f32 %v1781_v33, %v445_v25  ;;  %v691_v28 = vmul.f32 %v1781_v33, %v573_v26  ;;  %v1542_v29 = vpop.f32.mrb[18].mxu0  ;;  %v1574_v30 = vpop.f32.mrb[18].mxu1 }
  0xfc   :  { %v662_v31 = vmul.f32 %v1542_v29, %v1781_v33  ;;  %v694_v32 = vmul.f32 %v1574_v30, %v1781_v33  ;;  %v448_v34 = vpop.f32.mrb[19].mxu0  ;;  %v576_v35 = vpop.f32.mrb[19].mxu1  ;;  %v732_v38 = vadd.f32 %v1788_v40, %v661_v23  ;;  %v764_v39 = vadd.f32 %v1788_v40, %v693_v24 }
  0xfd   :  { %v660_v36 = vmul.f32 %v1781_v33, %v448_v34  ;;  %v692_v37 = vmul.f32 %v1781_v33, %v576_v35  ;;  %v730_v43 = vadd.f32 %v1788_v40, %v659_v27  ;;  %v762_v44 = vadd.f32 %v1788_v40, %v691_v28 }
  0xfe   :  { %v733_v41 = vadd.f32 %v1788_v40, %v662_v31  ;;  %v765_v42 = vadd.f32 %v1788_v40, %v694_v32 }
  0xff   :  { %v731_v45 = vadd.f32 %v1788_v40, %v660_v36  ;;  %v763_v46 = vadd.f32 %v1788_v40, %v692_v37 }
 0x100   :  { %v1345_v47 = vpack.c.bf16 %v733_v41, %v732_v38  ;;  %v1425_v48 = vpack.c.bf16 %v765_v42, %v764_v39 }
 0x101   :  { %v1340_v49 = vpack.c.bf16 %v731_v45, %v730_v43  ;;  %v1420_v50 = vpack.c.bf16 %v763_v46, %v762_v44  ;;  %v1545_v51 = vpop.f32.mrb[20].mxu0  ;;  %v1577_v52 = vpop.f32.mrb[20].mxu1 }
 0x102   :  { %1465 = vst [vmem:[%s2016_s4 + $0x48] sm:$0xff] %v1345_v47   ;;  %1481 = vst [vmem:[%s2016_s4 + $0xc8] sm:$0xff] %v1425_v48   ;;  %v665_v53 = vmul.f32 %v1545_v51, %v1781_v33  ;;  %v697_v54 = vmul.f32 %v1577_v52, %v1781_v33  ;;  %v461_v55 = vpop.f32.mrb[21].mxu0  ;;  %v589_v56 = vpop.f32.mrb[21].mxu1 }
 0x103   :  { %1464 = vst [vmem:[%s2016_s4 + $0x40] sm:$0xff] %v1340_v49   ;;  %1480 = vst [vmem:[%s2016_s4 + $0xc0] sm:$0xff] %v1420_v50   ;;  %v663_v57 = vmul.f32 %v1781_v33, %v461_v55  ;;  %v695_v58 = vmul.f32 %v1781_v33, %v589_v56  ;;  %v1546_v59 = vpop.f32.mrb[22].mxu0  ;;  %v1578_v60 = vpop.f32.mrb[22].mxu1 }
 0x104   :  { %v666_v61 = vmul.f32 %v1546_v59, %v1781_v33  ;;  %v698_v62 = vmul.f32 %v1578_v60, %v1781_v33  ;;  %v464_v63 = vpop.f32.mrb[23].mxu0  ;;  %v592_v0 = vpop.f32.mrb[23].mxu1  ;;  %v736_v3 = vadd.f32 %v1788_v40, %v665_v53  ;;  %v768_v4 = vadd.f32 %v1788_v40, %v697_v54 }
 0x105   :  { %v664_v1 = vmul.f32 %v1781_v33, %v464_v63  ;;  %v696_v2 = vmul.f32 %v1781_v33, %v592_v0  ;;  %v734_v7 = vadd.f32 %v1788_v40, %v663_v57  ;;  %v766_v8 = vadd.f32 %v1788_v40, %v695_v58 }
 0x106   :  { %v737_v5 = vadd.f32 %v1788_v40, %v666_v61  ;;  %v769_v6 = vadd.f32 %v1788_v40, %v698_v62 }
 0x107   :  { %v735_v9 = vadd.f32 %v1788_v40, %v664_v1  ;;  %v767_v10 = vadd.f32 %v1788_v40, %v696_v2 }
 0x108   :  { %v1355_v11 = vpack.c.bf16 %v737_v5, %v736_v3  ;;  %v1435_v12 = vpack.c.bf16 %v769_v6, %v768_v4 }
 0x109   :  { %v1350_v13 = vpack.c.bf16 %v735_v9, %v734_v7  ;;  %v1430_v14 = vpack.c.bf16 %v767_v10, %v766_v8  ;;  %v1549_v15 = vpop.f32.mrb[24].mxu0  ;;  %v1581_v16 = vpop.f32.mrb[24].mxu1 }
 0x10a   :  { %1467 = vst [vmem:[%s2016_s4 + $0x58] sm:$0xff] %v1355_v11   ;;  %1483 = vst [vmem:[%s2016_s4 + $0xd8] sm:$0xff] %v1435_v12   ;;  %v669_v17 = vmul.f32 %v1549_v15, %v1781_v33  ;;  %v701_v18 = vmul.f32 %v1581_v16, %v1781_v33  ;;  %v477_v19 = vpop.f32.mrb[25].mxu0  ;;  %v605_v20 = vpop.f32.mrb[25].mxu1 }
 0x10b   :  { %1466 = vst [vmem:[%s2016_s4 + $0x50] sm:$0xff] %v1350_v13   ;;  %1482 = vst [vmem:[%s2016_s4 + $0xd0] sm:$0xff] %v1430_v14   ;;  %v667_v21 = vmul.f32 %v1781_v33, %v477_v19  ;;  %v699_v22 = vmul.f32 %v1781_v33, %v605_v20  ;;  %v1550_v23 = vpop.f32.mrb[26].mxu0  ;;  %v1582_v24 = vpop.f32.mrb[26].mxu1 }
 0x10c   :  { %v670_v25 = vmul.f32 %v1550_v23, %v1781_v33  ;;  %v702_v26 = vmul.f32 %v1582_v24, %v1781_v33  ;;  %v480_v27 = vpop.f32.mrb[27].mxu0  ;;  %v608_v28 = vpop.f32.mrb[27].mxu1  ;;  %v740_v31 = vadd.f32 %v1788_v40, %v669_v17  ;;  %v772_v32 = vadd.f32 %v1788_v40, %v701_v18 }
 0x10d   :  { %v668_v29 = vmul.f32 %v1781_v33, %v480_v27  ;;  %v700_v30 = vmul.f32 %v1781_v33, %v608_v28  ;;  %v738_v36 = vadd.f32 %v1788_v40, %v667_v21  ;;  %v770_v37 = vadd.f32 %v1788_v40, %v699_v22 }
 0x10e   :  { %v741_v34 = vadd.f32 %v1788_v40, %v670_v25  ;;  %v773_v35 = vadd.f32 %v1788_v40, %v702_v26 }
 0x10f   :  { %v739_v38 = vadd.f32 %v1788_v40, %v668_v29  ;;  %v771_v39 = vadd.f32 %v1788_v40, %v700_v30 }
 0x110   :  { %v1365_v41 = vpack.c.bf16 %v741_v34, %v740_v31  ;;  %v1445_v42 = vpack.c.bf16 %v773_v35, %v772_v32 }
 0x111   :  { %v1360_v43 = vpack.c.bf16 %v739_v38, %v738_v36  ;;  %v1440_v44 = vpack.c.bf16 %v771_v39, %v770_v37  ;;  %v1553_v45 = vpop.f32.mrb[28].mxu0  ;;  %v1585_v46 = vpop.f32.mrb[28].mxu1 }
 0x112   :  { %1469 = vst [vmem:[%s2016_s4 + $0x68] sm:$0xff] %v1365_v41   ;;  %1485 = vst [vmem:[%s2016_s4 + $0xe8] sm:$0xff] %v1445_v42   ;;  %v673_v47 = vmul.f32 %v1553_v45, %v1781_v33  ;;  %v705_v48 = vmul.f32 %v1585_v46, %v1781_v33  ;;  %v493_v49 = vpop.f32.mrb[29].mxu0  ;;  %v621_v50 = vpop.f32.mrb[29].mxu1 }
 0x113   :  { %1468 = vst [vmem:[%s2016_s4 + $0x60] sm:$0xff] %v1360_v43   ;;  %1484 = vst [vmem:[%s2016_s4 + $0xe0] sm:$0xff] %v1440_v44   ;;  %v671_v51 = vmul.f32 %v1781_v33, %v493_v49  ;;  %v703_v52 = vmul.f32 %v1781_v33, %v621_v50  ;;  %v1554_v53 = vpop.f32.mrb[30].mxu0  ;;  %v1586_v54 = vpop.f32.mrb[30].mxu1 }
 0x114   :  { %v674_v55 = vmul.f32 %v1554_v53, %v1781_v33  ;;  %v706_v56 = vmul.f32 %v1586_v54, %v1781_v33  ;;  %v496_v57 = vpop.f32.mrb[31].mxu0  ;;  %v624_v58 = vpop.f32.mrb[31].mxu1  ;;  %v744_v61 = vadd.f32 %v1788_v40, %v673_v47  ;;  %v776_v62 = vadd.f32 %v1788_v40, %v705_v48 }
 0x115   :  { %v672_v59 = vmul.f32 %v1781_v33, %v496_v57  ;;  %v704_v60 = vmul.f32 %v1781_v33, %v624_v58  ;;  %v742_v1 = vadd.f32 %v1788_v40, %v671_v51  ;;  %v774_v2 = vadd.f32 %v1788_v40, %v703_v52 }
 0x116   :  { %v745_v63 = vadd.f32 %v1788_v40, %v674_v55  ;;  %v777_v0 = vadd.f32 %v1788_v40, %v706_v56 }
 0x117   :  { %v743_v3 = vadd.f32 %v1788_v40, %v672_v59  ;;  %v775_v4 = vadd.f32 %v1788_v40, %v704_v60 }
 0x118   :  { %v1375_v5 = vpack.c.bf16 %v745_v63, %v744_v61  ;;  %v1455_v6 = vpack.c.bf16 %v777_v0, %v776_v62 }
 0x119   :  { %v1370_v7 = vpack.c.bf16 %v743_v3, %v742_v1  ;;  %v1450_v33 = vpack.c.bf16 %v775_v4, %v774_v2 }
 0x11a   :  { %1471 = vst [vmem:[%s2016_s4 + $0x78] sm:$0xff] %v1375_v5   ;;  %1487 = vst [vmem:[%s2016_s4 + $0xf8] sm:$0xff] %v1455_v6  }
 0x11b   :  { %1470 = vst [vmem:[%s2016_s4 + $0x70] sm:$0xff] %v1370_v7   ;;  %1486 = vst [vmem:[%s2016_s4 + $0xf0] sm:$0xff] %v1450_v33  }

// kernel: resnet20_forward.29
= control target key start
LH: loop header
LB: loop body
LE: loop exit
PB: predicated region body
PF: predicated region fallthrough
CT: control target
= control target key end

     0   :  { %v1908_v0 = vmov 0   ;;  %vm442_vm0 = vcmask 130048   ;;  %s2419_s1 = inlined_call_operand.vmem [shape: bf16[144,128], index: 1, kind: input, shape index: {}]   ;;  %s2420_s0 = inlined_call_operand.vmem [shape: bf16[512,144], index: 0, kind: input, shape index: {}]   ;;  %s2421_s2 = inlined_call_operand.vmem [shape: f32[1,128], index: 2, kind: input, shape index: {}]   ;;  %s2422_s3 = inlined_call_operand.vmem [shape: f32[1,128], index: 3, kind: input, shape index: {}]   ;;  %s2423_s4 = inlined_call_operand.vmem [shape: bf16[512,128], index: 4, kind: output, shape index: {}]  }
   0x1   :  { %539 = vmatprep.subr.bf16.mxu0 %v1908_v0  ;;  %1784 = vmatprep.subr.bf16.mxu1 %v1908_v0  ;;  %v1803_v1 = vld [vmem:[%s2419_s1] sm:$0xff]   ;;  %v1804_v2 = vld [vmem:[%s2419_s1 + $0x8] sm:$0xff]   ;;  %v1805_v3 = vld [vmem:[%s2419_s1 + $0x10] sm:$0xff]  }
   0x2   :  { %540 = vmatpush1.bf16.msra.mxu0 %v1803_v1  ;;  %1793 = vmatpush1.bf16.msra.mxu1 %v1803_v1  ;;  %v1806_v4 = vld [vmem:[%s2419_s1 + $0x18] sm:$0xff]   ;;  %v1814_v5 = vld [vmem:[%s2420_s0 + $0x4] ss:$8 sps:$4 sm:$0xff]   ;;  %v1809_v9 = vld [vmem:[%s2419_s1 + $0x30] sm:$0xff]  }
   0x3   :  { %541 = vmatprep.subr.bf16.mxu0 %v1908_v0  ;;  %1785 = vmatprep.subr.bf16.mxu1 %v1908_v0  ;;  %v1817_v6 = vld [vmem:[%s2420_s0 + $0x104] ss:$8 sps:$4 sm:$0xff]   ;;  %v1810_v10 = vld [vmem:[%s2419_s1 + $0x38] sm:$0xff]   ;;  %v1812_v12 = vld [vmem:[%s2420_s0] ss:$8 sps:$4 sm:$0xff]  }
   0x4   :  { %1431 = vmatprep.mubr.msk.bf16.mxu0 %vm442_vm0, %v1814_v5  ;;  %1447 = vmatprep.mubr.msk.bf16.mxu1 %vm442_vm0, %v1817_v6  ;;  %v1807_v7 = vld [vmem:[%s2419_s1 + $0x20] sm:$0xff]   ;;  %v1808_v8 = vld [vmem:[%s2419_s1 + $0x28] sm:$0xff]   ;;  %v1818_v14 = vld [vmem:[%s2420_s0 + $0x14] ss:$8 sps:$4 sm:$0xff]  }
   0x5   :  { %v1811_v11 = vld [vmem:[%s2419_s1 + $0x40] sm:$0xff]   ;;  %v1820_v15 = vld [vmem:[%s2420_s0 + $0x114] ss:$8 sps:$4 sm:$0xff]   ;;  %v1822_v16 = vld [vmem:[%s2420_s0 + $0x10] ss:$8 sps:$4 sm:$0xff]  }
   0x6   :  { %542 = vmatpush1.bf16.msra.mxu0 %v1804_v2  ;;  %1794 = vmatpush1.bf16.msra.mxu1 %v1804_v2  ;;  %v1815_v13 = vld [vmem:[%s2420_s0 + $0x100] ss:$8 sps:$4 sm:$0xff]   ;;  %v1823_v17 = vld [vmem:[%s2420_s0 + $0x110] ss:$8 sps:$4 sm:$0xff]   ;;  %v1824_v18 = vld [vmem:[%s2420_s0 + $0x24] ss:$8 sps:$4 sm:$0xff]  }
   0x7   :  { %543 = vmatprep.subr.bf16.mxu0 %v1908_v0  ;;  %1786 = vmatprep.subr.bf16.mxu1 %v1908_v0  ;;  %v1826_v19 = vld [vmem:[%s2420_s0 + $0x124] ss:$8 sps:$4 sm:$0xff]   ;;  %v1828_v20 = vld [vmem:[%s2420_s0 + $0x20] ss:$8 sps:$4 sm:$0xff]   ;;  %v1830_v22 = vld [vmem:[%s2420_s0 + $0x34] ss:$8 sps:$4 sm:$0xff]  }
   0x8   :  { %v1829_v21 = vld [vmem:[%s2420_s0 + $0x120] ss:$8 sps:$4 sm:$0xff]   ;;  %v1832_v23 = vld [vmem:[%s2420_s0 + $0x134] ss:$8 sps:$4 sm:$0xff]   ;;  %v1834_v24 = vld [vmem:[%s2420_s0 + $0x30] ss:$8 sps:$4 sm:$0xff]  }
   0x9   :  { %v1835_v25 = vld [vmem:[%s2420_s0 + $0x130] ss:$8 sps:$4 sm:$0xff]   ;;  %v1836_v26 = vld [vmem:[%s2420_s0 + $0x44] ss:$8 sps:$4 sm:$0xff]   ;;  %v1840_v28 = vld [vmem:[%s2420_s0 + $0x40] ss:$8 sps:$4 sm:$0xff]  }
   0xa   :  { %544 = vmatpush1.bf16.msra.mxu0 %v1805_v3  ;;  %1795 = vmatpush1.bf16.msra.mxu1 %v1805_v3  ;;  %v1838_v27 = vld [vmem:[%s2420_s0 + $0x144] ss:$8 sps:$4 sm:$0xff]   ;;  %v1841_v29 = vld [vmem:[%s2420_s0 + $0x140] ss:$8 sps:$4 sm:$0xff]   ;;  %v1842_v30 = vld [vmem:[%s2420_s0 + $0x54] ss:$8 sps:$4 sm:$0xff]  }
   0xb   :  { %545 = vmatprep.subr.bf16.mxu0 %v1908_v0  ;;  %1787 = vmatprep.subr.bf16.mxu1 %v1908_v0  ;;  %v1844_v31 = vld [vmem:[%s2420_s0 + $0x154] ss:$8 sps:$4 sm:$0xff]   ;;  %v1846_v32 = vld [vmem:[%s2420_s0 + $0x50] ss:$8 sps:$4 sm:$0xff]   ;;  %v1848_v34 = vld [vmem:[%s2420_s0 + $0x64] ss:$8 sps:$4 sm:$0xff]  }
   0xc   :  { %v1847_v33 = vld [vmem:[%s2420_s0 + $0x150] ss:$8 sps:$4 sm:$0xff]   ;;  %v1850_v35 = vld [vmem:[%s2420_s0 + $0x164] ss:$8 sps:$4 sm:$0xff]   ;;  %v1852_v36 = vld [vmem:[%s2420_s0 + $0x60] ss:$8 sps:$4 sm:$0xff]  }
   0xd   :  { %v1853_v37 = vld [vmem:[%s2420_s0 + $0x160] ss:$8 sps:$4 sm:$0xff]   ;;  %v1854_v38 = vld [vmem:[%s2420_s0 + $0x74] ss:$8 sps:$4 sm:$0xff]   ;;  %v1858_v40 = vld [vmem:[%s2420_s0 + $0x70] ss:$8 sps:$4 sm:$0xff]  }
   0xe   :  { %546 = vmatpush1.bf16.msra.mxu0 %v1806_v4  ;;  %1796 = vmatpush1.bf16.msra.mxu1 %v1806_v4  ;;  %v1856_v39 = vld [vmem:[%s2420_s0 + $0x174] ss:$8 sps:$4 sm:$0xff]   ;;  %v1859_v41 = vld [vmem:[%s2420_s0 + $0x170] ss:$8 sps:$4 sm:$0xff]   ;;  %v1860_v42 = vld [vmem:[%s2420_s0 + $0x84] ss:$8 sps:$4 sm:$0xff]  }
   0xf   :  { %547 = vmatprep.subr.bf16.mxu0 %v1908_v0  ;;  %1788 = vmatprep.subr.bf16.mxu1 %v1908_v0  ;;  %v1862_v43 = vld [vmem:[%s2420_s0 + $0x184] ss:$8 sps:$4 sm:$0xff]   ;;  %v1864_v44 = vld [vmem:[%s2420_s0 + $0x80] ss:$8 sps:$4 sm:$0xff]   ;;  %v1866_v46 = vld [vmem:[%s2420_s0 + $0x94] ss:$8 sps:$4 sm:$0xff]  }
  0x10   :  { %v1865_v45 = vld [vmem:[%s2420_s0 + $0x180] ss:$8 sps:$4 sm:$0xff]   ;;  %v1868_v47 = vld [vmem:[%s2420_s0 + $0x194] ss:$8 sps:$4 sm:$0xff]   ;;  %v1870_v48 = vld [vmem:[%s2420_s0 + $0x90] ss:$8 sps:$4 sm:$0xff]  }
  0x11   :  { %v1871_v49 = vld [vmem:[%s2420_s0 + $0x190] ss:$8 sps:$4 sm:$0xff]   ;;  %v1872_v50 = vld [vmem:[%s2420_s0 + $0xa4] ss:$8 sps:$4 sm:$0xff]   ;;  %v1876_v52 = vld [vmem:[%s2420_s0 + $0xa0] ss:$8 sps:$4 sm:$0xff]  }
  0x12   :  { %548 = vmatpush1.bf16.msra.mxu0 %v1807_v7  ;;  %1797 = vmatpush1.bf16.msra.mxu1 %v1807_v7  ;;  %v1874_v51 = vld [vmem:[%s2420_s0 + $0x1a4] ss:$8 sps:$4 sm:$0xff]   ;;  %v1877_v53 = vld [vmem:[%s2420_s0 + $0x1a0] ss:$8 sps:$4 sm:$0xff]   ;;  %v1878_v54 = vld [vmem:[%s2420_s0 + $0xb4] ss:$8 sps:$4 sm:$0xff]  }
  0x13   :  { %549 = vmatprep.subr.bf16.mxu0 %v1908_v0  ;;  %1789 = vmatprep.subr.bf16.mxu1 %v1908_v0  ;;  %v1880_v55 = vld [vmem:[%s2420_s0 + $0x1b4] ss:$8 sps:$4 sm:$0xff]   ;;  %v1882_v56 = vld [vmem:[%s2420_s0 + $0xb0] ss:$8 sps:$4 sm:$0xff]   ;;  %v1884_v58 = vld [vmem:[%s2420_s0 + $0xc4] ss:$8 sps:$4 sm:$0xff]  }
  0x14   :  { %v1883_v57 = vld [vmem:[%s2420_s0 + $0x1b0] ss:$8 sps:$4 sm:$0xff]   ;;  %v1886_v59 = vld [vmem:[%s2420_s0 + $0x1c4] ss:$8 sps:$4 sm:$0xff]   ;;  %v1888_v60 = vld [vmem:[%s2420_s0 + $0xc0] ss:$8 sps:$4 sm:$0xff]  }
  0x15   :  { %v1889_v61 = vld [vmem:[%s2420_s0 + $0x1c0] ss:$8 sps:$4 sm:$0xff]   ;;  %v1890_v62 = vld [vmem:[%s2420_s0 + $0xd4] ss:$8 sps:$4 sm:$0xff]   ;;  %v1895_v1 = vld [vmem:[%s2420_s0 + $0x1d0] ss:$8 sps:$4 sm:$0xff]  }
  0x16   :  { %550 = vmatpush1.bf16.msra.mxu0 %v1808_v8  ;;  %1798 = vmatpush1.bf16.msra.mxu1 %v1808_v8  ;;  %v1892_v63 = vld [vmem:[%s2420_s0 + $0x1d4] ss:$8 sps:$4 sm:$0xff]   ;;  %v1896_v2 = vld [vmem:[%s2420_s0 + $0xe4] ss:$8 sps:$4 sm:$0xff]   ;;  %v1900_v4 = vld [vmem:[%s2420_s0 + $0xe0] ss:$8 sps:$4 sm:$0xff]  }
  0x17   :  { %551 = vmatprep.subr.bf16.mxu0 %v1908_v0  ;;  %1790 = vmatprep.subr.bf16.mxu1 %v1908_v0  ;;  %v1898_v3 = vld [vmem:[%s2420_s0 + $0x1e4] ss:$8 sps:$4 sm:$0xff]   ;;  %v1901_v5 = vld [vmem:[%s2420_s0 + $0x1e0] ss:$8 sps:$4 sm:$0xff]   ;;  %v1902_v6 = vld [vmem:[%s2420_s0 + $0xf4] ss:$8 sps:$4 sm:$0xff]  }
  0x18   :  { %v1904_v7 = vld [vmem:[%s2420_s0 + $0x1f4] ss:$8 sps:$4 sm:$0xff]   ;;  %v1906_v8 = vld [vmem:[%s2420_s0 + $0xf0] ss:$8 sps:$4 sm:$0xff]  }
  0x1a   :  { %552 = vmatpush1.bf16.msra.mxu0 %v1809_v9  ;;  %1799 = vmatpush1.bf16.msra.mxu1 %v1809_v9  ;;  %v1907_v9 = vld [vmem:[%s2420_s0 + $0x1f0] ss:$8 sps:$4 sm:$0xff]  }
  0x1b   :  { %553 = vmatprep.subr.bf16.mxu0 %v1908_v0  ;;  %1791 = vmatprep.subr.bf16.mxu1 %v1908_v0 }
  0x1e   :  { %554 = vmatpush1.bf16.msra.mxu0 %v1810_v10  ;;  %1800 = vmatpush1.bf16.msra.mxu1 %v1810_v10  ;;  %v2188_v10 = vld [vmem:[%s2421_s2] ss:$0 sm:$0xff] }
  0x1f   :  { %555 = vmatprep.subr.bf16.mxu0 %v1908_v0  ;;  %1792 = vmatprep.subr.bf16.mxu1 %v1908_v0  ;;  %v1894_v0 = vld [vmem:[%s2420_s0 + $0xd0] ss:$8 sps:$4 sm:$0xff]  }
  0x22   :  { %556 = vmatpush1.bf16.msra.mxu0 %v1811_v11  ;;  %1801 = vmatpush1.bf16.msra.mxu1 %v1811_v11 }
  0x25   :  { %572 = vmatmul.mubr.bf16.vlgmr.msra.gmra.mrb[0].mxu0 %v1812_v12  ;;  %700 = vmatmul.mubr.bf16.vlgmr.msra.gmra.mrb[0].mxu1 %v1815_v13  ;;  %v2193_v12 = vld [vmem:[%s2422_s3] ss:$0 sm:$0xff] }
  0x26   :  { %1432 = vmatprep.mubr.msk.bf16.mxu0 %vm442_vm0, %v1818_v14  ;;  %1448 = vmatprep.mubr.msk.bf16.mxu1 %vm442_vm0, %v1820_v15 }
  0x2d   :  { %580 = vmatmul.mubr.bf16.gmra.mrb[4].mxu0 %v1822_v16  ;;  %708 = vmatmul.mubr.bf16.gmra.mrb[4].mxu1 %v1823_v17 }
  0x2e   :  { %1433 = vmatprep.mubr.msk.bf16.mxu0 %vm442_vm0, %v1824_v18  ;;  %1449 = vmatprep.mubr.msk.bf16.mxu1 %vm442_vm0, %v1826_v19 }
  0x35   :  { %588 = vmatmul.mubr.bf16.gmra.mrb[8].mxu0 %v1828_v20  ;;  %716 = vmatmul.mubr.bf16.gmra.mrb[8].mxu1 %v1829_v21 }
  0x36   :  { %1434 = vmatprep.mubr.msk.bf16.mxu0 %vm442_vm0, %v1830_v22  ;;  %1450 = vmatprep.mubr.msk.bf16.mxu1 %vm442_vm0, %v1832_v23 }
  0x3d   :  { %596 = vmatmul.mubr.bf16.gmra.mrb[12].mxu0 %v1834_v24  ;;  %724 = vmatmul.mubr.bf16.gmra.mrb[12].mxu1 %v1835_v25 }
  0x3e   :  { %1435 = vmatprep.mubr.msk.bf16.mxu0 %vm442_vm0, %v1836_v26  ;;  %1451 = vmatprep.mubr.msk.bf16.mxu1 %vm442_vm0, %v1838_v27 }
  0x45   :  { %604 = vmatmul.mubr.bf16.gmra.mrb[16].mxu0 %v1840_v28  ;;  %732 = vmatmul.mubr.bf16.gmra.mrb[16].mxu1 %v1841_v29 }
  0x46   :  { %1436 = vmatprep.mubr.msk.bf16.mxu0 %vm442_vm0, %v1842_v30  ;;  %1452 = vmatprep.mubr.msk.bf16.mxu1 %vm442_vm0, %v1844_v31 }
  0x4d   :  { %612 = vmatmul.mubr.bf16.gmra.mrb[20].mxu0 %v1846_v32  ;;  %740 = vmatmul.mubr.bf16.gmra.mrb[20].mxu1 %v1847_v33 }
  0x4e   :  { %1437 = vmatprep.mubr.msk.bf16.mxu0 %vm442_vm0, %v1848_v34  ;;  %1453 = vmatprep.mubr.msk.bf16.mxu1 %vm442_vm0, %v1850_v35 }
  0x55   :  { %620 = vmatmul.mubr.bf16.gmra.mrb[24].mxu0 %v1852_v36  ;;  %748 = vmatmul.mubr.bf16.gmra.mrb[24].mxu1 %v1853_v37 }
  0x56   :  { %1438 = vmatprep.mubr.msk.bf16.mxu0 %vm442_vm0, %v1854_v38  ;;  %1454 = vmatprep.mubr.msk.bf16.mxu1 %vm442_vm0, %v1856_v39 }
  0x5d   :  { %628 = vmatmul.mubr.bf16.gmra.mrb[28].mxu0 %v1858_v40  ;;  %756 = vmatmul.mubr.bf16.gmra.mrb[28].mxu1 %v1859_v41 }
  0x5e   :  { %1439 = vmatprep.mubr.msk.bf16.mxu0 %vm442_vm0, %v1860_v42  ;;  %1455 = vmatprep.mubr.msk.bf16.mxu1 %vm442_vm0, %v1862_v43 }
  0x65   :  { %636 = vmatmul.mubr.bf16.gmra.mrb[32].mxu0 %v1864_v44  ;;  %764 = vmatmul.mubr.bf16.gmra.mrb[32].mxu1 %v1865_v45 }
  0x66   :  { %1440 = vmatprep.mubr.msk.bf16.mxu0 %vm442_vm0, %v1866_v46  ;;  %1456 = vmatprep.mubr.msk.bf16.mxu1 %vm442_vm0, %v1868_v47 }
  0x6d   :  { %644 = vmatmul.mubr.bf16.gmra.mrb[36].mxu0 %v1870_v48  ;;  %772 = vmatmul.mubr.bf16.gmra.mrb[36].mxu1 %v1871_v49 }
  0x6e   :  { %1441 = vmatprep.mubr.msk.bf16.mxu0 %vm442_vm0, %v1872_v50  ;;  %1457 = vmatprep.mubr.msk.bf16.mxu1 %vm442_vm0, %v1874_v51 }
  0x75   :  { %652 = vmatmul.mubr.bf16.gmra.mrb[40].mxu0 %v1876_v52  ;;  %780 = vmatmul.mubr.bf16.gmra.mrb[40].mxu1 %v1877_v53 }
  0x76   :  { %1442 = vmatprep.mubr.msk.bf16.mxu0 %vm442_vm0, %v1878_v54  ;;  %1458 = vmatprep.mubr.msk.bf16.mxu1 %vm442_vm0, %v1880_v55 }
  0x7d   :  { %660 = vmatmul.mubr.bf16.gmra.mrb[44].mxu0 %v1882_v56  ;;  %788 = vmatmul.mubr.bf16.gmra.mrb[44].mxu1 %v1883_v57 }
  0x7e   :  { %1443 = vmatprep.mubr.msk.bf16.mxu0 %vm442_vm0, %v1884_v58  ;;  %1459 = vmatprep.mubr.msk.bf16.mxu1 %vm442_vm0, %v1886_v59 }
  0x85   :  { %668 = vmatmul.mubr.bf16.gmra.mrb[48].mxu0 %v1888_v60  ;;  %796 = vmatmul.mubr.bf16.gmra.mrb[48].mxu1 %v1889_v61 }
  0x86   :  { %1444 = vmatprep.mubr.msk.bf16.mxu0 %vm442_vm0, %v1890_v62  ;;  %1460 = vmatprep.mubr.msk.bf16.mxu1 %vm442_vm0, %v1892_v63 }
  0x8d   :  { %676 = vmatmul.mubr.bf16.gmra.mrb[52].mxu0 %v1894_v0  ;;  %804 = vmatmul.mubr.bf16.gmra.mrb[52].mxu1 %v1895_v1 }
  0x8e   :  { %1445 = vmatprep.mubr.msk.bf16.mxu0 %vm442_vm0, %v1896_v2  ;;  %1461 = vmatprep.mubr.msk.bf16.mxu1 %vm442_vm0, %v1898_v3 }
  0x95   :  { %684 = vmatmul.mubr.bf16.gmra.mrb[56].mxu0 %v1900_v4  ;;  %812 = vmatmul.mubr.bf16.gmra.mrb[56].mxu1 %v1901_v5 }
  0x96   :  { %1446 = vmatprep.mubr.msk.bf16.mxu0 %vm442_vm0, %v1902_v6  ;;  %1462 = vmatprep.mubr.msk.bf16.mxu1 %vm442_vm0, %v1904_v7 }
  0x9d   :  { %692 = vmatmul.mubr.bf16.gmra.mrb[60].mxu0 %v1906_v8  ;;  %820 = vmatmul.mubr.bf16.gmra.mrb[60].mxu1 %v1907_v9 }
  0xf8   :  { %v573_v11 = vpop.f32.mrb[0].mxu0  ;;  %v701_v13 = vpop.f32.mrb[0].mxu1 }
  0xf9   :  { %v835_v14 = vmul.f32 %v2188_v10, %v573_v11  ;;  %v867_v15 = vmul.f32 %v2188_v10, %v701_v13  ;;  %v575_v16 = vpop.f32.mrb[1].mxu0  ;;  %v703_v17 = vpop.f32.mrb[1].mxu1 }
  0xfa   :  { %v576_v18 = vpop.f32.mrb[2].mxu0  ;;  %v704_v19 = vpop.f32.mrb[2].mxu1 }
  0xfb   :  { %v906_v20 = vadd.f32 %v2193_v12, %v835_v14  ;;  %v938_v21 = vadd.f32 %v2193_v12, %v867_v15  ;;  %v836_v22 = vmul.f32 %v2188_v10, %v576_v18  ;;  %v868_v23 = vmul.f32 %v2188_v10, %v704_v19  ;;  %v578_v24 = vpop.f32.mrb[3].mxu0  ;;  %v706_v25 = vpop.f32.mrb[3].mxu1 }
  0xfd   :  { %v907_v26 = vadd.f32 %v2193_v12, %v836_v22  ;;  %v939_v27 = vadd.f32 %v2193_v12, %v868_v23  ;;  %v970_v28 = vmax.f32 %v906_v20, 0.0  ;;  %v1002_v29 = vmax.f32 %v938_v21, 0.0 }
  0xff   :  { %v971_v30 = vmax.f32 %v907_v26, 0.0  ;;  %v1003_v31 = vmax.f32 %v939_v27, 0.0 }
 0x100   :  { %v581_v32 = vpop.f32.mrb[4].mxu0  ;;  %v709_v33 = vpop.f32.mrb[4].mxu1 }
 0x101   :  { %v1596_v34 = vpack.c.bf16 %v971_v30, %v970_v28  ;;  %v1676_v35 = vpack.c.bf16 %v1003_v31, %v1002_v29  ;;  %v837_v36 = vmul.f32 %v2188_v10, %v581_v32  ;;  %v869_v37 = vmul.f32 %v2188_v10, %v709_v33  ;;  %v583_v38 = vpop.f32.mrb[5].mxu0  ;;  %v711_v39 = vpop.f32.mrb[5].mxu1 }
 0x102   :  { %v584_v40 = vpop.f32.mrb[6].mxu0  ;;  %v712_v41 = vpop.f32.mrb[6].mxu1 }
 0x103   :  { %1597 = vst [vmem:[%s2423_s4] sm:$0xff] %v1596_v34   ;;  %1768 = vst [vmem:[%s2423_s4 + $0x80] sm:$0xff] %v1676_v35   ;;  %v908_v42 = vadd.f32 %v2193_v12, %v837_v36  ;;  %v940_v43 = vadd.f32 %v2193_v12, %v869_v37  ;;  %v838_v44 = vmul.f32 %v2188_v10, %v584_v40  ;;  %v586_v46 = vpop.f32.mrb[7].mxu0  ;;  %v714_v47 = vpop.f32.mrb[7].mxu1 }
 0x104   :  { %v870_v45 = vmul.f32 %v2188_v10, %v712_v41 }
 0x105   :  { %v909_v48 = vadd.f32 %v2193_v12, %v838_v44  ;;  %v972_v50 = vmax.f32 %v908_v42, 0.0  ;;  %v1004_v51 = vmax.f32 %v940_v43, 0.0 }
 0x106   :  { %v941_v49 = vadd.f32 %v2193_v12, %v870_v45 }
 0x107   :  { %v973_v52 = vmax.f32 %v909_v48, 0.0 }
 0x108   :  { %v1005_v53 = vmax.f32 %v941_v49, 0.0  ;;  %v589_v54 = vpop.f32.mrb[8].mxu0  ;;  %v717_v55 = vpop.f32.mrb[8].mxu1 }
 0x109   :  { %v1601_v56 = vpack.c.bf16 %v973_v52, %v972_v50  ;;  %v839_v58 = vmul.f32 %v2188_v10, %v589_v54  ;;  %v871_v59 = vmul.f32 %v2188_v10, %v717_v55  ;;  %v591_v60 = vpop.f32.mrb[9].mxu0  ;;  %v719_v61 = vpop.f32.mrb[9].mxu1 }
 0x10a   :  { %v1681_v57 = vpack.c.bf16 %v1005_v53, %v1004_v51  ;;  %v592_v62 = vpop.f32.mrb[10].mxu0  ;;  %v720_v63 = vpop.f32.mrb[10].mxu1 }
 0x10b   :  { %1753 = vst [vmem:[%s2423_s4 + $0x8] sm:$0xff] %v1601_v56   ;;  %v910_v0 = vadd.f32 %v2193_v12, %v839_v58  ;;  %v942_v1 = vadd.f32 %v2193_v12, %v871_v59  ;;  %v840_v2 = vmul.f32 %v2188_v10, %v592_v62  ;;  %v872_v3 = vmul.f32 %v2188_v10, %v720_v63  ;;  %v594_v4 = vpop.f32.mrb[11].mxu0  ;;  %v722_v5 = vpop.f32.mrb[11].mxu1 }
 0x10c   :  { %1769 = vst [vmem:[%s2423_s4 + $0x88] sm:$0xff] %v1681_v57  }
 0x10d   :  { %v911_v6 = vadd.f32 %v2193_v12, %v840_v2  ;;  %v943_v7 = vadd.f32 %v2193_v12, %v872_v3  ;;  %v974_v8 = vmax.f32 %v910_v0, 0.0  ;;  %v1006_v9 = vmax.f32 %v942_v1, 0.0 }
 0x10f   :  { %v975_v11 = vmax.f32 %v911_v6, 0.0  ;;  %v1007_v13 = vmax.f32 %v943_v7, 0.0 }
 0x110   :  { %v597_v14 = vpop.f32.mrb[12].mxu0  ;;  %v725_v15 = vpop.f32.mrb[12].mxu1 }
 0x111   :  { %v1606_v16 = vpack.c.bf16 %v975_v11, %v974_v8  ;;  %v1686_v17 = vpack.c.bf16 %v1007_v13, %v1006_v9  ;;  %v841_v18 = vmul.f32 %v2188_v10, %v597_v14  ;;  %v873_v19 = vmul.f32 %v2188_v10, %v725_v15  ;;  %v599_v20 = vpop.f32.mrb[13].mxu0  ;;  %v727_v21 = vpop.f32.mrb[13].mxu1 }
 0x112   :  { %v600_v22 = vpop.f32.mrb[14].mxu0  ;;  %v728_v23 = vpop.f32.mrb[14].mxu1 }
 0x113   :  { %1754 = vst [vmem:[%s2423_s4 + $0x10] sm:$0xff] %v1606_v16   ;;  %1770 = vst [vmem:[%s2423_s4 + $0x90] sm:$0xff] %v1686_v17   ;;  %v912_v24 = vadd.f32 %v2193_v12, %v841_v18  ;;  %v944_v25 = vadd.f32 %v2193_v12, %v873_v19  ;;  %v842_v26 = vmul.f32 %v2188_v10, %v600_v22  ;;  %v602_v28 = vpop.f32.mrb[15].mxu0  ;;  %v730_v29 = vpop.f32.mrb[15].mxu1 }
 0x114   :  { %v874_v27 = vmul.f32 %v2188_v10, %v728_v23 }
 0x115   :  { %v913_v30 = vadd.f32 %v2193_v12, %v842_v26  ;;  %v976_v32 = vmax.f32 %v912_v24, 0.0  ;;  %v1008_v33 = vmax.f32 %v944_v25, 0.0 }
 0x116   :  { %v945_v31 = vadd.f32 %v2193_v12, %v874_v27 }
 0x117   :  { %v977_v34 = vmax.f32 %v913_v30, 0.0 }
 0x118   :  { %v1009_v35 = vmax.f32 %v945_v31, 0.0  ;;  %v605_v36 = vpop.f32.mrb[16].mxu0  ;;  %v733_v37 = vpop.f32.mrb[16].mxu1 }
 0x119   :  { %v1611_v38 = vpack.c.bf16 %v977_v34, %v976_v32  ;;  %v843_v40 = vmul.f32 %v2188_v10, %v605_v36  ;;  %v875_v41 = vmul.f32 %v2188_v10, %v733_v37  ;;  %v607_v42 = vpop.f32.mrb[17].mxu0  ;;  %v735_v43 = vpop.f32.mrb[17].mxu1 }
 0x11a   :  { %v1691_v39 = vpack.c.bf16 %v1009_v35, %v1008_v33  ;;  %v608_v44 = vpop.f32.mrb[18].mxu0  ;;  %v736_v45 = vpop.f32.mrb[18].mxu1 }
 0x11b   :  { %1755 = vst [vmem:[%s2423_s4 + $0x18] sm:$0xff] %v1611_v38   ;;  %v914_v46 = vadd.f32 %v2193_v12, %v843_v40  ;;  %v946_v47 = vadd.f32 %v2193_v12, %v875_v41  ;;  %v844_v48 = vmul.f32 %v2188_v10, %v608_v44  ;;  %v876_v49 = vmul.f32 %v2188_v10, %v736_v45  ;;  %v610_v50 = vpop.f32.mrb[19].mxu0  ;;  %v738_v51 = vpop.f32.mrb[19].mxu1 }
 0x11c   :  { %1771 = vst [vmem:[%s2423_s4 + $0x98] sm:$0xff] %v1691_v39  }
 0x11d   :  { %v915_v52 = vadd.f32 %v2193_v12, %v844_v48  ;;  %v947_v53 = vadd.f32 %v2193_v12, %v876_v49  ;;  %v978_v54 = vmax.f32 %v914_v46, 0.0  ;;  %v1010_v55 = vmax.f32 %v946_v47, 0.0 }
 0x11f   :  { %v979_v56 = vmax.f32 %v915_v52, 0.0  ;;  %v1011_v57 = vmax.f32 %v947_v53, 0.0 }
 0x120   :  { %v613_v58 = vpop.f32.mrb[20].mxu0  ;;  %v741_v59 = vpop.f32.mrb[20].mxu1 }
 0x121   :  { %v1616_v60 = vpack.c.bf16 %v979_v56, %v978_v54  ;;  %v1696_v61 = vpack.c.bf16 %v1011_v57, %v1010_v55  ;;  %v845_v62 = vmul.f32 %v2188_v10, %v613_v58  ;;  %v877_v63 = vmul.f32 %v2188_v10, %v741_v59  ;;  %v615_v0 = vpop.f32.mrb[21].mxu0  ;;  %v743_v1 = vpop.f32.mrb[21].mxu1 }
 0x122   :  { %v616_v2 = vpop.f32.mrb[22].mxu0  ;;  %v744_v3 = vpop.f32.mrb[22].mxu1 }
 0x123   :  { %1756 = vst [vmem:[%s2423_s4 + $0x20] sm:$0xff] %v1616_v60   ;;  %1772 = vst [vmem:[%s2423_s4 + $0xa0] sm:$0xff] %v1696_v61   ;;  %v916_v4 = vadd.f32 %v2193_v12, %v845_v62  ;;  %v948_v5 = vadd.f32 %v2193_v12, %v877_v63  ;;  %v846_v6 = vmul.f32 %v2188_v10, %v616_v2  ;;  %v618_v8 = vpop.f32.mrb[23].mxu0  ;;  %v746_v9 = vpop.f32.mrb[23].mxu1 }
 0x124   :  { %v878_v7 = vmul.f32 %v2188_v10, %v744_v3 }
 0x125   :  { %v917_v11 = vadd.f32 %v2193_v12, %v846_v6  ;;  %v980_v14 = vmax.f32 %v916_v4, 0.0  ;;  %v1012_v15 = vmax.f32 %v948_v5, 0.0 }
 0x126   :  { %v949_v13 = vadd.f32 %v2193_v12, %v878_v7 }
 0x127   :  { %v981_v16 = vmax.f32 %v917_v11, 0.0 }
 0x128   :  { %v1013_v17 = vmax.f32 %v949_v13, 0.0  ;;  %v621_v18 = vpop.f32.mrb[24].mxu0  ;;  %v749_v19 = vpop.f32.mrb[24].mxu1 }
 0x129   :  { %v1621_v20 = vpack.c.bf16 %v981_v16, %v980_v14  ;;  %v847_v22 = vmul.f32 %v2188_v10, %v621_v18  ;;  %v879_v23 = vmul.f32 %v2188_v10, %v749_v19  ;;  %v623_v24 = vpop.f32.mrb[25].mxu0  ;;  %v751_v25 = vpop.f32.mrb[25].mxu1 }
 0x12a   :  { %v1701_v21 = vpack.c.bf16 %v1013_v17, %v1012_v15  ;;  %v624_v26 = vpop.f32.mrb[26].mxu0  ;;  %v752_v27 = vpop.f32.mrb[26].mxu1 }
 0x12b   :  { %1757 = vst [vmem:[%s2423_s4 + $0x28] sm:$0xff] %v1621_v20   ;;  %v918_v28 = vadd.f32 %v2193_v12, %v847_v22  ;;  %v950_v29 = vadd.f32 %v2193_v12, %v879_v23  ;;  %v848_v30 = vmul.f32 %v2188_v10, %v624_v26  ;;  %v880_v31 = vmul.f32 %v2188_v10, %v752_v27  ;;  %v626_v32 = vpop.f32.mrb[27].mxu0  ;;  %v754_v33 = vpop.f32.mrb[27].mxu1 }
 0x12c   :  { %1773 = vst [vmem:[%s2423_s4 + $0xa8] sm:$0xff] %v1701_v21  }
 0x12d   :  { %v919_v34 = vadd.f32 %v2193_v12, %v848_v30  ;;  %v951_v35 = vadd.f32 %v2193_v12, %v880_v31  ;;  %v982_v36 = vmax.f32 %v918_v28, 0.0  ;;  %v1014_v37 = vmax.f32 %v950_v29, 0.0 }
 0x12f   :  { %v983_v38 = vmax.f32 %v919_v34, 0.0  ;;  %v1015_v39 = vmax.f32 %v951_v35, 0.0 }
 0x130   :  { %v629_v40 = vpop.f32.mrb[28].mxu0  ;;  %v757_v41 = vpop.f32.mrb[28].mxu1 }
 0x131   :  { %v1626_v42 = vpack.c.bf16 %v983_v38, %v982_v36  ;;  %v1706_v43 = vpack.c.bf16 %v1015_v39, %v1014_v37  ;;  %v849_v44 = vmul.f32 %v2188_v10, %v629_v40  ;;  %v881_v45 = vmul.f32 %v2188_v10, %v757_v41  ;;  %v631_v46 = vpop.f32.mrb[29].mxu0  ;;  %v759_v47 = vpop.f32.mrb[29].mxu1 }
 0x132   :  { %v632_v48 = vpop.f32.mrb[30].mxu0  ;;  %v760_v49 = vpop.f32.mrb[30].mxu1 }
 0x133   :  { %1758 = vst [vmem:[%s2423_s4 + $0x30] sm:$0xff] %v1626_v42   ;;  %1774 = vst [vmem:[%s2423_s4 + $0xb0] sm:$0xff] %v1706_v43   ;;  %v920_v50 = vadd.f32 %v2193_v12, %v849_v44  ;;  %v952_v51 = vadd.f32 %v2193_v12, %v881_v45  ;;  %v850_v52 = vmul.f32 %v2188_v10, %v632_v48  ;;  %v634_v54 = vpop.f32.mrb[31].mxu0  ;;  %v762_v55 = vpop.f32.mrb[31].mxu1 }
 0x134   :  { %v882_v53 = vmul.f32 %v2188_v10, %v760_v49 }
 0x135   :  { %v921_v56 = vadd.f32 %v2193_v12, %v850_v52  ;;  %v984_v58 = vmax.f32 %v920_v50, 0.0  ;;  %v1016_v59 = vmax.f32 %v952_v51, 0.0 }
 0x136   :  { %v953_v57 = vadd.f32 %v2193_v12, %v882_v53 }
 0x137   :  { %v985_v60 = vmax.f32 %v921_v56, 0.0 }
 0x138   :  { %v1017_v61 = vmax.f32 %v953_v57, 0.0  ;;  %v637_v62 = vpop.f32.mrb[32].mxu0  ;;  %v765_v63 = vpop.f32.mrb[32].mxu1 }
 0x139   :  { %v1631_v0 = vpack.c.bf16 %v985_v60, %v984_v58  ;;  %v851_v2 = vmul.f32 %v2188_v10, %v637_v62  ;;  %v883_v3 = vmul.f32 %v2188_v10, %v765_v63  ;;  %v639_v4 = vpop.f32.mrb[33].mxu0  ;;  %v767_v5 = vpop.f32.mrb[33].mxu1 }
 0x13a   :  { %v1711_v1 = vpack.c.bf16 %v1017_v61, %v1016_v59  ;;  %v640_v6 = vpop.f32.mrb[34].mxu0  ;;  %v768_v7 = vpop.f32.mrb[34].mxu1 }
 0x13b   :  { %1759 = vst [vmem:[%s2423_s4 + $0x38] sm:$0xff] %v1631_v0   ;;  %v922_v8 = vadd.f32 %v2193_v12, %v851_v2  ;;  %v954_v9 = vadd.f32 %v2193_v12, %v883_v3  ;;  %v852_v11 = vmul.f32 %v2188_v10, %v640_v6  ;;  %v884_v13 = vmul.f32 %v2188_v10, %v768_v7  ;;  %v642_v14 = vpop.f32.mrb[35].mxu0  ;;  %v770_v15 = vpop.f32.mrb[35].mxu1 }
 0x13c   :  { %1775 = vst [vmem:[%s2423_s4 + $0xb8] sm:$0xff] %v1711_v1  }
 0x13d   :  { %v923_v16 = vadd.f32 %v2193_v12, %v852_v11  ;;  %v955_v17 = vadd.f32 %v2193_v12, %v884_v13  ;;  %v986_v18 = vmax.f32 %v922_v8, 0.0  ;;  %v1018_v19 = vmax.f32 %v954_v9, 0.0 }
 0x13f   :  { %v987_v20 = vmax.f32 %v923_v16, 0.0  ;;  %v1019_v21 = vmax.f32 %v955_v17, 0.0 }
 0x140   :  { %v645_v22 = vpop.f32.mrb[36].mxu0  ;;  %v773_v23 = vpop.f32.mrb[36].mxu1 }
 0x141   :  { %v1636_v24 = vpack.c.bf16 %v987_v20, %v986_v18  ;;  %v1716_v25 = vpack.c.bf16 %v1019_v21, %v1018_v19  ;;  %v853_v26 = vmul.f32 %v2188_v10, %v645_v22  ;;  %v885_v27 = vmul.f32 %v2188_v10, %v773_v23  ;;  %v647_v28 = vpop.f32.mrb[37].mxu0  ;;  %v775_v29 = vpop.f32.mrb[37].mxu1 }
 0x142   :  { %v648_v30 = vpop.f32.mrb[38].mxu0  ;;  %v776_v31 = vpop.f32.mrb[38].mxu1 }
 0x143   :  { %1760 = vst [vmem:[%s2423_s4 + $0x40] sm:$0xff] %v1636_v24   ;;  %1776 = vst [vmem:[%s2423_s4 + $0xc0] sm:$0xff] %v1716_v25   ;;  %v924_v32 = vadd.f32 %v2193_v12, %v853_v26  ;;  %v956_v33 = vadd.f32 %v2193_v12, %v885_v27  ;;  %v854_v34 = vmul.f32 %v2188_v10, %v648_v30  ;;  %v650_v36 = vpop.f32.mrb[39].mxu0  ;;  %v778_v37 = vpop.f32.mrb[39].mxu1 }
 0x144   :  { %v886_v35 = vmul.f32 %v2188_v10, %v776_v31 }
 0x145   :  { %v925_v38 = vadd.f32 %v2193_v12, %v854_v34  ;;  %v988_v40 = vmax.f32 %v924_v32, 0.0  ;;  %v1020_v41 = vmax.f32 %v956_v33, 0.0 }
 0x146   :  { %v957_v39 = vadd.f32 %v2193_v12, %v886_v35 }
 0x147   :  { %v989_v42 = vmax.f32 %v925_v38, 0.0 }
 0x148   :  { %v1021_v43 = vmax.f32 %v957_v39, 0.0  ;;  %v653_v44 = vpop.f32.mrb[40].mxu0  ;;  %v781_v45 = vpop.f32.mrb[40].mxu1 }
 0x149   :  { %v1641_v46 = vpack.c.bf16 %v989_v42, %v988_v40  ;;  %v855_v48 = vmul.f32 %v2188_v10, %v653_v44  ;;  %v887_v49 = vmul.f32 %v2188_v10, %v781_v45  ;;  %v655_v50 = vpop.f32.mrb[41].mxu0  ;;  %v783_v51 = vpop.f32.mrb[41].mxu1 }
 0x14a   :  { %v1721_v47 = vpack.c.bf16 %v1021_v43, %v1020_v41  ;;  %v656_v52 = vpop.f32.mrb[42].mxu0  ;;  %v784_v53 = vpop.f32.mrb[42].mxu1 }
 0x14b   :  { %1761 = vst [vmem:[%s2423_s4 + $0x48] sm:$0xff] %v1641_v46   ;;  %v926_v54 = vadd.f32 %v2193_v12, %v855_v48  ;;  %v958_v55 = vadd.f32 %v2193_v12, %v887_v49  ;;  %v856_v56 = vmul.f32 %v2188_v10, %v656_v52  ;;  %v888_v57 = vmul.f32 %v2188_v10, %v784_v53  ;;  %v658_v58 = vpop.f32.mrb[43].mxu0  ;;  %v786_v59 = vpop.f32.mrb[43].mxu1 }
 0x14c   :  { %1777 = vst [vmem:[%s2423_s4 + $0xc8] sm:$0xff] %v1721_v47  }
 0x14d   :  { %v927_v60 = vadd.f32 %v2193_v12, %v856_v56  ;;  %v959_v61 = vadd.f32 %v2193_v12, %v888_v57  ;;  %v990_v62 = vmax.f32 %v926_v54, 0.0  ;;  %v1022_v63 = vmax.f32 %v958_v55, 0.0 }
 0x14f   :  { %v991_v0 = vmax.f32 %v927_v60, 0.0  ;;  %v1023_v1 = vmax.f32 %v959_v61, 0.0 }
 0x150   :  { %v661_v2 = vpop.f32.mrb[44].mxu0  ;;  %v789_v3 = vpop.f32.mrb[44].mxu1 }
 0x151   :  { %v1646_v4 = vpack.c.bf16 %v991_v0, %v990_v62  ;;  %v1726_v5 = vpack.c.bf16 %v1023_v1, %v1022_v63  ;;  %v857_v6 = vmul.f32 %v2188_v10, %v661_v2  ;;  %v889_v7 = vmul.f32 %v2188_v10, %v789_v3  ;;  %v663_v8 = vpop.f32.mrb[45].mxu0  ;;  %v791_v9 = vpop.f32.mrb[45].mxu1 }
 0x152   :  { %v664_v11 = vpop.f32.mrb[46].mxu0  ;;  %v792_v13 = vpop.f32.mrb[46].mxu1 }
 0x153   :  { %1762 = vst [vmem:[%s2423_s4 + $0x50] sm:$0xff] %v1646_v4   ;;  %1778 = vst [vmem:[%s2423_s4 + $0xd0] sm:$0xff] %v1726_v5   ;;  %v928_v14 = vadd.f32 %v2193_v12, %v857_v6  ;;  %v960_v15 = vadd.f32 %v2193_v12, %v889_v7  ;;  %v858_v16 = vmul.f32 %v2188_v10, %v664_v11  ;;  %v666_v18 = vpop.f32.mrb[47].mxu0  ;;  %v794_v19 = vpop.f32.mrb[47].mxu1 }
 0x154   :  { %v890_v17 = vmul.f32 %v2188_v10, %v792_v13 }
 0x155   :  { %v929_v20 = vadd.f32 %v2193_v12, %v858_v16  ;;  %v992_v22 = vmax.f32 %v928_v14, 0.0  ;;  %v1024_v23 = vmax.f32 %v960_v15, 0.0 }
 0x156   :  { %v961_v21 = vadd.f32 %v2193_v12, %v890_v17 }
 0x157   :  { %v993_v24 = vmax.f32 %v929_v20, 0.0 }
 0x158   :  { %v1025_v25 = vmax.f32 %v961_v21, 0.0  ;;  %v669_v26 = vpop.f32.mrb[48].mxu0  ;;  %v797_v27 = vpop.f32.mrb[48].mxu1 }
 0x159   :  { %v1651_v28 = vpack.c.bf16 %v993_v24, %v992_v22  ;;  %v859_v30 = vmul.f32 %v2188_v10, %v669_v26  ;;  %v891_v31 = vmul.f32 %v2188_v10, %v797_v27  ;;  %v671_v32 = vpop.f32.mrb[49].mxu0  ;;  %v799_v33 = vpop.f32.mrb[49].mxu1 }
 0x15a   :  { %v1731_v29 = vpack.c.bf16 %v1025_v25, %v1024_v23  ;;  %v672_v34 = vpop.f32.mrb[50].mxu0  ;;  %v800_v35 = vpop.f32.mrb[50].mxu1 }
 0x15b   :  { %1763 = vst [vmem:[%s2423_s4 + $0x58] sm:$0xff] %v1651_v28   ;;  %v930_v36 = vadd.f32 %v2193_v12, %v859_v30  ;;  %v962_v37 = vadd.f32 %v2193_v12, %v891_v31  ;;  %v860_v38 = vmul.f32 %v2188_v10, %v672_v34  ;;  %v892_v39 = vmul.f32 %v2188_v10, %v800_v35  ;;  %v674_v40 = vpop.f32.mrb[51].mxu0  ;;  %v802_v41 = vpop.f32.mrb[51].mxu1 }
 0x15c   :  { %1779 = vst [vmem:[%s2423_s4 + $0xd8] sm:$0xff] %v1731_v29  }
 0x15d   :  { %v931_v42 = vadd.f32 %v2193_v12, %v860_v38  ;;  %v963_v43 = vadd.f32 %v2193_v12, %v892_v39  ;;  %v994_v44 = vmax.f32 %v930_v36, 0.0  ;;  %v1026_v45 = vmax.f32 %v962_v37, 0.0 }
 0x15f   :  { %v995_v46 = vmax.f32 %v931_v42, 0.0  ;;  %v1027_v47 = vmax.f32 %v963_v43, 0.0 }
 0x160   :  { %v677_v48 = vpop.f32.mrb[52].mxu0  ;;  %v805_v49 = vpop.f32.mrb[52].mxu1 }
 0x161   :  { %v1656_v50 = vpack.c.bf16 %v995_v46, %v994_v44  ;;  %v1736_v51 = vpack.c.bf16 %v1027_v47, %v1026_v45  ;;  %v861_v52 = vmul.f32 %v2188_v10, %v677_v48  ;;  %v893_v53 = vmul.f32 %v2188_v10, %v805_v49  ;;  %v679_v54 = vpop.f32.mrb[53].mxu0  ;;  %v807_v55 = vpop.f32.mrb[53].mxu1 }
 0x162   :  { %v680_v56 = vpop.f32.mrb[54].mxu0  ;;  %v808_v57 = vpop.f32.mrb[54].mxu1 }
 0x163   :  { %1764 = vst [vmem:[%s2423_s4 + $0x60] sm:$0xff] %v1656_v50   ;;  %1780 = vst [vmem:[%s2423_s4 + $0xe0] sm:$0xff] %v1736_v51   ;;  %v932_v58 = vadd.f32 %v2193_v12, %v861_v52  ;;  %v964_v59 = vadd.f32 %v2193_v12, %v893_v53  ;;  %v862_v60 = vmul.f32 %v2188_v10, %v680_v56  ;;  %v682_v62 = vpop.f32.mrb[55].mxu0  ;;  %v810_v63 = vpop.f32.mrb[55].mxu1 }
 0x164   :  { %v894_v61 = vmul.f32 %v2188_v10, %v808_v57 }
 0x165   :  { %v933_v0 = vadd.f32 %v2193_v12, %v862_v60  ;;  %v996_v2 = vmax.f32 %v932_v58, 0.0  ;;  %v1028_v3 = vmax.f32 %v964_v59, 0.0 }
 0x166   :  { %v965_v1 = vadd.f32 %v2193_v12, %v894_v61 }
 0x167   :  { %v997_v4 = vmax.f32 %v933_v0, 0.0 }
 0x168   :  { %v1029_v5 = vmax.f32 %v965_v1, 0.0  ;;  %v685_v6 = vpop.f32.mrb[56].mxu0  ;;  %v813_v7 = vpop.f32.mrb[56].mxu1 }
 0x169   :  { %v1661_v8 = vpack.c.bf16 %v997_v4, %v996_v2  ;;  %v863_v11 = vmul.f32 %v2188_v10, %v685_v6  ;;  %v895_v13 = vmul.f32 %v2188_v10, %v813_v7  ;;  %v687_v14 = vpop.f32.mrb[57].mxu0  ;;  %v815_v15 = vpop.f32.mrb[57].mxu1 }
 0x16a   :  { %v1741_v9 = vpack.c.bf16 %v1029_v5, %v1028_v3  ;;  %v688_v16 = vpop.f32.mrb[58].mxu0  ;;  %v816_v17 = vpop.f32.mrb[58].mxu1 }
 0x16b   :  { %1765 = vst [vmem:[%s2423_s4 + $0x68] sm:$0xff] %v1661_v8   ;;  %v934_v18 = vadd.f32 %v2193_v12, %v863_v11  ;;  %v966_v19 = vadd.f32 %v2193_v12, %v895_v13  ;;  %v864_v20 = vmul.f32 %v2188_v10, %v688_v16  ;;  %v896_v21 = vmul.f32 %v2188_v10, %v816_v17  ;;  %v690_v22 = vpop.f32.mrb[59].mxu0  ;;  %v818_v23 = vpop.f32.mrb[59].mxu1 }
 0x16c   :  { %1781 = vst [vmem:[%s2423_s4 + $0xe8] sm:$0xff] %v1741_v9  }
 0x16d   :  { %v935_v24 = vadd.f32 %v2193_v12, %v864_v20  ;;  %v967_v25 = vadd.f32 %v2193_v12, %v896_v21  ;;  %v998_v26 = vmax.f32 %v934_v18, 0.0  ;;  %v1030_v27 = vmax.f32 %v966_v19, 0.0 }
 0x16f   :  { %v999_v28 = vmax.f32 %v935_v24, 0.0  ;;  %v1031_v29 = vmax.f32 %v967_v25, 0.0 }
 0x170   :  { %v693_v30 = vpop.f32.mrb[60].mxu0  ;;  %v821_v31 = vpop.f32.mrb[60].mxu1 }
 0x171   :  { %v1666_v32 = vpack.c.bf16 %v999_v28, %v998_v26  ;;  %v1746_v33 = vpack.c.bf16 %v1031_v29, %v1030_v27  ;;  %v865_v34 = vmul.f32 %v2188_v10, %v693_v30  ;;  %v897_v35 = vmul.f32 %v2188_v10, %v821_v31  ;;  %v695_v36 = vpop.f32.mrb[61].mxu0  ;;  %v823_v37 = vpop.f32.mrb[61].mxu1 }
 0x172   :  { %v696_v38 = vpop.f32.mrb[62].mxu0  ;;  %v824_v39 = vpop.f32.mrb[62].mxu1 }
 0x173   :  { %1766 = vst [vmem:[%s2423_s4 + $0x70] sm:$0xff] %v1666_v32   ;;  %1782 = vst [vmem:[%s2423_s4 + $0xf0] sm:$0xff] %v1746_v33   ;;  %v936_v40 = vadd.f32 %v2193_v12, %v865_v34  ;;  %v968_v41 = vadd.f32 %v2193_v12, %v897_v35  ;;  %v866_v42 = vmul.f32 %v2188_v10, %v696_v38  ;;  %v698_v44 = vpop.f32.mrb[63].mxu0  ;;  %v826_v45 = vpop.f32.mrb[63].mxu1 }
 0x174   :  { %v898_v43 = vmul.f32 %v2188_v10, %v824_v39 }
 0x175   :  { %v937_v46 = vadd.f32 %v2193_v12, %v866_v42  ;;  %v1000_v48 = vmax.f32 %v936_v40, 0.0  ;;  %v1032_v49 = vmax.f32 %v968_v41, 0.0 }
 0x176   :  { %v969_v47 = vadd.f32 %v2193_v12, %v898_v43 }
 0x177   :  { %v1001_v50 = vmax.f32 %v937_v46, 0.0 }
 0x178   :  { %v1033_v51 = vmax.f32 %v969_v47, 0.0 }
 0x179   :  { %v1671_v52 = vpack.c.bf16 %v1001_v50, %v1000_v48 }
 0x17a   :  { %v1751_v53 = vpack.c.bf16 %v1033_v51, %v1032_v49 }
 0x17b   :  { %1767 = vst [vmem:[%s2423_s4 + $0x78] sm:$0xff] %v1671_v52  }
 0x17c   :  { %1783 = vst [vmem:[%s2423_s4 + $0xf8] sm:$0xff] %v1751_v53  }

// kernel: resnet20_forward.31
= control target key start
LH: loop header
LB: loop body
LE: loop exit
PB: predicated region body
PF: predicated region fallthrough
CT: control target
= control target key end

     0   :  { %v3079_v0 = vmov 0   ;;  %vm773_vm0 = vcmask 261120   ;;  %s4090_s1 = inlined_call_operand.vmem [shape: bf16[288,128], index: 1, kind: input, shape index: {}]   ;;  %s4091_s0 = inlined_call_operand.vmem [shape: bf16[512,288], index: 0, kind: input, shape index: {}]   ;;  %s4092_s2 = inlined_call_operand.vmem [shape: f32[1,128], index: 2, kind: input, shape index: {}]   ;;  %s4093_s4 = inlined_call_operand.vmem [shape: bf16[512,128], index: 4, kind: input, shape index: {}]   ;;  %s4094_s3 = inlined_call_operand.vmem [shape: f32[1,128], index: 3, kind: input, shape index: {}]   ;;  %s4095_s5 = inlined_call_operand.vmem [shape: bf16[512,128], index: 5, kind: output, shape index: {}]  }
   0x1   :  { %870 = vmatprep.subr.bf16.mxu0 %v3079_v0  ;;  %2898 = vmatprep.subr.bf16.mxu1 %v3079_v0  ;;  %v2931_v1 = vld [vmem:[%s4090_s1] sm:$0xff]   ;;  %v2932_v2 = vld [vmem:[%s4090_s1 + $0x8] sm:$0xff]   ;;  %v2933_v3 = vld [vmem:[%s4090_s1 + $0x10] sm:$0xff]  }
   0x2   :  { %871 = vmatpush1.bf16.msra.mxu0 %v2931_v1  ;;  %2914 = vmatpush1.bf16.msra.mxu1 %v2931_v1  ;;  %v2934_v4 = vld [vmem:[%s4090_s1 + $0x18] sm:$0xff]   ;;  %v2935_v5 = vld [vmem:[%s4090_s1 + $0x20] sm:$0xff]   ;;  %v2936_v7 = vld [vmem:[%s4090_s1 + $0x28] sm:$0xff]  }
   0x3   :  { %872 = vmatprep.subr.bf16.mxu0 %v3079_v0  ;;  %2899 = vmatprep.subr.bf16.mxu1 %v3079_v0  ;;  %v2949_v6 = vld [vmem:[%s4091_s0 + $0x4] ss:$12 sps:$4 sm:$0xff]   ;;  %v2938_v10 = vld [vmem:[%s4090_s1 + $0x38] sm:$0xff]   ;;  %v2940_v12 = vld [vmem:[%s4090_s1 + $0x48] sm:$0xff]  }
   0x4   :  { %v2952_v8 = vld [vmem:[%s4091_s0 + $0x244] ss:$12 sps:$4 sm:$0xff]   ;;  %902 = vmatprep.mubr.bf16.mxu0 %v2949_v6  ;;  %v2942_v14 = vld [vmem:[%s4090_s1 + $0x58] sm:$0xff]   ;;  %v2944_v16 = vld [vmem:[%s4090_s1 + $0x68] sm:$0xff]  }
   0x5   :  { %1094 = vmatprep.mubr.bf16.mxu1 %v2952_v8  ;;  %v2937_v9 = vld [vmem:[%s4090_s1 + $0x30] sm:$0xff]   ;;  %v2939_v11 = vld [vmem:[%s4090_s1 + $0x40] sm:$0xff]   ;;  %v2946_v18 = vld [vmem:[%s4090_s1 + $0x78] sm:$0xff]  }
   0x6   :  { %873 = vmatpush1.bf16.msra.mxu0 %v2932_v2  ;;  %2915 = vmatpush1.bf16.msra.mxu1 %v2932_v2  ;;  %v2941_v13 = vld [vmem:[%s4090_s1 + $0x50] sm:$0xff]   ;;  %v2943_v15 = vld [vmem:[%s4090_s1 + $0x60] sm:$0xff]   ;;  %v2954_v22 = vld [vmem:[%s4091_s0 + $0x1c] ss:$12 sps:$4 sm:$0xff]  }
   0x7   :  { %874 = vmatprep.subr.bf16.mxu0 %v3079_v0  ;;  %2900 = vmatprep.subr.bf16.mxu1 %v3079_v0  ;;  %v2945_v17 = vld [vmem:[%s4090_s1 + $0x70] sm:$0xff]   ;;  %v2953_v19 = vld [vmem:[%s4090_s1 + $0x80] sm:$0xff]   ;;  %v2956_v23 = vld [vmem:[%s4091_s0 + $0x25c] ss:$12 sps:$4 sm:$0xff]  }
   0x8   :  { %v2947_v20 = vld [vmem:[%s4091_s0] ss:$12 sps:$4 sm:$0xff]   ;;  %v2958_v25 = vld [vmem:[%s4091_s0 + $0x18] ss:$12 sps:$4 sm:$0xff]   ;;  %v2964_v29 = vld [vmem:[%s4091_s0 + $0x30] ss:$12 sps:$4 sm:$0xff]  }
   0x9   :  { %v2950_v21 = vld [vmem:[%s4091_s0 + $0x240] ss:$12 sps:$4 sm:$0xff]   ;;  %v2959_v26 = vld [vmem:[%s4091_s0 + $0x258] ss:$12 sps:$4 sm:$0xff]   ;;  %v2965_v30 = vld [vmem:[%s4091_s0 + $0x270] ss:$12 sps:$4 sm:$0xff]  }
   0xa   :  { %875 = vmatpush1.bf16.msra.mxu0 %v2933_v3  ;;  %2916 = vmatpush1.bf16.msra.mxu1 %v2933_v3  ;;  %v2978_v24 = vld [vmem:[%s4090_s1 + $0x88] sm:$0xff]   ;;  %v2960_v27 = vld [vmem:[%s4091_s0 + $0x34] ss:$12 sps:$4 sm:$0xff]   ;;  %v2972_v35 = vld [vmem:[%s4091_s0 + $0x64] ss:$12 sps:$4 sm:$0xff]  }
   0xb   :  { %876 = vmatprep.subr.bf16.mxu0 %v3079_v0  ;;  %2901 = vmatprep.subr.bf16.mxu1 %v3079_v0  ;;  %v2962_v28 = vld [vmem:[%s4091_s0 + $0x274] ss:$12 sps:$4 sm:$0xff]   ;;  %v2966_v31 = vld [vmem:[%s4091_s0 + $0x4c] ss:$12 sps:$4 sm:$0xff]   ;;  %v2974_v36 = vld [vmem:[%s4091_s0 + $0x2a4] ss:$12 sps:$4 sm:$0xff]  }
   0xc   :  { %v2968_v32 = vld [vmem:[%s4091_s0 + $0x28c] ss:$12 sps:$4 sm:$0xff]   ;;  %v2970_v33 = vld [vmem:[%s4091_s0 + $0x48] ss:$12 sps:$4 sm:$0xff]   ;;  %v2989_v45 = vld [vmem:[%s4091_s0 + $0x90] ss:$12 sps:$4 sm:$0xff]  }
   0xd   :  { %v2971_v34 = vld [vmem:[%s4091_s0 + $0x288] ss:$12 sps:$4 sm:$0xff]   ;;  %v2976_v37 = vld [vmem:[%s4091_s0 + $0x60] ss:$12 sps:$4 sm:$0xff]   ;;  %v2983_v41 = vld [vmem:[%s4091_s0 + $0x78] ss:$12 sps:$4 sm:$0xff]  }
   0xe   :  { %877 = vmatpush1.bf16.msra.mxu0 %v2934_v4  ;;  %2917 = vmatpush1.bf16.msra.mxu1 %v2934_v4  ;;  %v2977_v38 = vld [vmem:[%s4091_s0 + $0x2a0] ss:$12 sps:$4 sm:$0xff]   ;;  %v2979_v39 = vld [vmem:[%s4091_s0 + $0x7c] ss:$12 sps:$4 sm:$0xff]   ;;  %v2984_v42 = vld [vmem:[%s4091_s0 + $0x2b8] ss:$12 sps:$4 sm:$0xff]  }
   0xf   :  { %878 = vmatprep.subr.bf16.mxu0 %v3079_v0  ;;  %2902 = vmatprep.subr.bf16.mxu1 %v3079_v0  ;;  %v2981_v40 = vld [vmem:[%s4091_s0 + $0x2bc] ss:$12 sps:$4 sm:$0xff]   ;;  %v2985_v43 = vld [vmem:[%s4091_s0 + $0x94] ss:$12 sps:$4 sm:$0xff]   ;;  %v2991_v47 = vld [vmem:[%s4091_s0 + $0xac] ss:$12 sps:$4 sm:$0xff]  }
  0x10   :  { %v2987_v44 = vld [vmem:[%s4091_s0 + $0x2d4] ss:$12 sps:$4 sm:$0xff]   ;;  %v2990_v46 = vld [vmem:[%s4091_s0 + $0x2d0] ss:$12 sps:$4 sm:$0xff]   ;;  %v2993_v48 = vld [vmem:[%s4091_s0 + $0x2ec] ss:$12 sps:$4 sm:$0xff]  }
  0x11   :  { %v2995_v49 = vld [vmem:[%s4091_s0 + $0xa8] ss:$12 sps:$4 sm:$0xff]   ;;  %v2997_v51 = vld [vmem:[%s4091_s0 + $0xc4] ss:$12 sps:$4 sm:$0xff]   ;;  %v3000_v53 = vld [vmem:[%s4091_s0 + $0xc0] ss:$12 sps:$4 sm:$0xff]  }
  0x12   :  { %879 = vmatpush1.bf16.msra.mxu0 %v2935_v5  ;;  %2918 = vmatpush1.bf16.msra.mxu1 %v2935_v5  ;;  %v2996_v50 = vld [vmem:[%s4091_s0 + $0x2e8] ss:$12 sps:$4 sm:$0xff]   ;;  %v3001_v54 = vld [vmem:[%s4091_s0 + $0x20] ss:$12 sps:$4 sm:$0xff]   ;;  %v3004_v56 = vld [vmem:[%s4091_s0 + $0x38] ss:$12 sps:$4 sm:$0xff]  }
  0x13   :  { %880 = vmatprep.subr.bf16.mxu0 %v3079_v0  ;;  %2903 = vmatprep.subr.bf16.mxu1 %v3079_v0  ;;  %v2999_v52 = vld [vmem:[%s4091_s0 + $0x8] ss:$12 sps:$4 sm:$0xff]   ;;  %v3005_v57 = vld [vmem:[%s4091_s0 + $0xd8] ss:$12 sps:$4 sm:$0xff]   ;;  %v3006_v58 = vld [vmem:[%s4091_s0 + $0x50] ss:$12 sps:$4 sm:$0xff]  }
  0x14   :  { %v3002_v55 = vld [vmem:[%s4091_s0 + $0xdc] ss:$12 sps:$4 sm:$0xff]   ;;  %v3007_v59 = vld [vmem:[%s4091_s0 + $0xf4] ss:$12 sps:$4 sm:$0xff]   ;;  %v3012_v63 = vld [vmem:[%s4091_s0 + $0x10c] ss:$12 sps:$4 sm:$0xff]  }
  0x15   :  { %v3009_v60 = vld [vmem:[%s4091_s0 + $0x68] ss:$12 sps:$4 sm:$0xff]   ;;  %v3010_v61 = vld [vmem:[%s4091_s0 + $0xf0] ss:$12 sps:$4 sm:$0xff]   ;;  %v3011_v62 = vld [vmem:[%s4091_s0 + $0x80] ss:$12 sps:$4 sm:$0xff]  }
  0x16   :  { %881 = vmatpush1.bf16.msra.mxu0 %v2936_v7  ;;  %2919 = vmatpush1.bf16.msra.mxu1 %v2936_v7  ;;  %v3015_v1 = vld [vmem:[%s4091_s0 + $0x108] ss:$12 sps:$4 sm:$0xff]   ;;  %v3016_v2 = vld [vmem:[%s4091_s0 + $0xb0] ss:$12 sps:$4 sm:$0xff]   ;;  %v3020_v5 = vld [vmem:[%s4091_s0 + $0x120] ss:$12 sps:$4 sm:$0xff]  }
  0x17   :  { %882 = vmatprep.subr.bf16.mxu0 %v3079_v0  ;;  %2904 = vmatprep.subr.bf16.mxu1 %v3079_v0  ;;  %v3017_v3 = vld [vmem:[%s4091_s0 + $0x124] ss:$12 sps:$4 sm:$0xff]   ;;  %v3019_v4 = vld [vmem:[%s4091_s0 + $0xc8] ss:$12 sps:$4 sm:$0xff]   ;;  %v3021_v6 = vld [vmem:[%s4091_s0 + $0xe0] ss:$12 sps:$4 sm:$0xff]  }
  0x18   :  { %v3022_v7 = vld [vmem:[%s4091_s0 + $0x13c] ss:$12 sps:$4 sm:$0xff]   ;;  %v3024_v8 = vld [vmem:[%s4091_s0 + $0xf8] ss:$12 sps:$4 sm:$0xff]  }
  0x1a   :  { %883 = vmatpush1.bf16.msra.mxu0 %v2937_v9  ;;  %2920 = vmatpush1.bf16.msra.mxu1 %v2937_v9  ;;  %v3025_v9 = vld [vmem:[%s4091_s0 + $0x138] ss:$12 sps:$4 sm:$0xff]  }
  0x1b   :  { %884 = vmatprep.subr.bf16.mxu0 %v3079_v0  ;;  %2905 = vmatprep.subr.bf16.mxu1 %v3079_v0 }
  0x1e   :  { %885 = vmatpush1.bf16.msra.mxu0 %v2938_v10  ;;  %2921 = vmatpush1.bf16.msra.mxu1 %v2938_v10  ;;  %v3026_v10 = vld [vmem:[%s4091_s0 + $0x110] ss:$12 sps:$4 sm:$0xff]  }
  0x1f   :  { %886 = vmatprep.subr.bf16.mxu0 %v3079_v0  ;;  %2906 = vmatprep.subr.bf16.mxu1 %v3079_v0 }
  0x22   :  { %887 = vmatpush1.bf16.msra.mxu0 %v2939_v11  ;;  %2922 = vmatpush1.bf16.msra.mxu1 %v2939_v11  ;;  %v3027_v11 = vld [vmem:[%s4091_s0 + $0x154] ss:$12 sps:$4 sm:$0xff]  }
  0x23   :  { %888 = vmatprep.subr.bf16.mxu0 %v3079_v0  ;;  %2907 = vmatprep.subr.bf16.mxu1 %v3079_v0 }
  0x26   :  { %889 = vmatpush1.bf16.msra.mxu0 %v2940_v12  ;;  %2923 = vmatpush1.bf16.msra.mxu1 %v2940_v12  ;;  %v3029_v12 = vld [vmem:[%s4091_s0 + $0x128] ss:$12 sps:$4 sm:$0xff]  }
  0x27   :  { %890 = vmatprep.subr.bf16.mxu0 %v3079_v0  ;;  %2908 = vmatprep.subr.bf16.mxu1 %v3079_v0 }
  0x2a   :  { %891 = vmatpush1.bf16.msra.mxu0 %v2941_v13  ;;  %2924 = vmatpush1.bf16.msra.mxu1 %v2941_v13  ;;  %v3030_v13 = vld [vmem:[%s4091_s0 + $0x150] ss:$12 sps:$4 sm:$0xff]  }
  0x2b   :  { %892 = vmatprep.subr.bf16.mxu0 %v3079_v0  ;;  %2909 = vmatprep.subr.bf16.mxu1 %v3079_v0 }
  0x2e   :  { %893 = vmatpush1.bf16.msra.mxu0 %v2942_v14  ;;  %2925 = vmatpush1.bf16.msra.mxu1 %v2942_v14  ;;  %v3031_v14 = vld [vmem:[%s4091_s0 + $0x140] ss:$12 sps:$4 sm:$0xff]  }
  0x2f   :  { %894 = vmatprep.subr.bf16.mxu0 %v3079_v0  ;;  %2910 = vmatprep.subr.bf16.mxu1 %v3079_v0 }
  0x32   :  { %895 = vmatpush1.bf16.msra.mxu0 %v2943_v15  ;;  %2926 = vmatpush1.bf16.msra.mxu1 %v2943_v15  ;;  %v3032_v15 = vld [vmem:[%s4091_s0 + $0x16c] ss:$12 sps:$4 sm:$0xff]  }
  0x33   :  { %896 = vmatprep.subr.bf16.mxu0 %v3079_v0  ;;  %2911 = vmatprep.subr.bf16.mxu1 %v3079_v0 }
  0x36   :  { %897 = vmatpush1.bf16.msra.mxu0 %v2944_v16  ;;  %2927 = vmatpush1.bf16.msra.mxu1 %v2944_v16  ;;  %v3034_v16 = vld [vmem:[%s4091_s0 + $0x158] ss:$12 sps:$4 sm:$0xff]  }
  0x37   :  { %898 = vmatprep.subr.bf16.mxu0 %v3079_v0  ;;  %2912 = vmatprep.subr.bf16.mxu1 %v3079_v0 }
  0x3a   :  { %899 = vmatpush1.bf16.msra.mxu0 %v2945_v17  ;;  %2928 = vmatpush1.bf16.msra.mxu1 %v2945_v17  ;;  %v3035_v17 = vld [vmem:[%s4091_s0 + $0x168] ss:$12 sps:$4 sm:$0xff]  }
  0x3b   :  { %900 = vmatprep.subr.bf16.mxu0 %v3079_v0  ;;  %2913 = vmatprep.subr.bf16.mxu1 %v3079_v0  ;;  %v3014_v0 = vld [vmem:[%s4091_s0 + $0x98] ss:$12 sps:$4 sm:$0xff]  }
  0x3e   :  { %901 = vmatpush1.bf16.msra.mxu0 %v2946_v18  ;;  %2929 = vmatpush1.bf16.msra.mxu1 %v2946_v18  ;;  %v3036_v18 = vld [vmem:[%s4091_s0 + $0x170] ss:$12 sps:$4 sm:$0xff]  }
  0x3f   :  { %2830 = vmatprep.subr.bf16.mxu1 %v2953_v19 }
  0x41   :  { %903 = vmatmul.mubr.bf16.vlgmr.msra.gmra.mrb[0].mxu0 %v2947_v20  ;;  %1095 = vmatmul.mubr.bf16.vlgmr.msra.gmra.mrb[0].mxu1 %v2950_v21  ;;  %v3039_v20 = vld [vmem:[%s4091_s0 + $0x188] ss:$12 sps:$4 sm:$0xff]   ;;  %v3040_v21 = vld [vmem:[%s4091_s0 + $0x180] ss:$12 sps:$4 sm:$0xff]  }
  0x42   :  { %2831 = vmatpush3.bf16.msra.mxu1 %v2953_v19  ;;  %910 = vmatprep.mubr.bf16.mxu0 %v2954_v22  ;;  %v3037_v19 = vld [vmem:[%s4091_s0 + $0x184] ss:$12 sps:$4 sm:$0xff]   ;;  %v3041_v22 = vld [vmem:[%s4091_s0 + $0x1a0] ss:$12 sps:$4 sm:$0xff]  }
  0x43   :  { %1102 = vmatprep.mubr.bf16.mxu1 %v2956_v23  ;;  %2832 = vmatprep.subr.bf16.mxu1 %v2978_v24  ;;  %v3042_v23 = vld [vmem:[%s4091_s0 + $0x19c] ss:$12 sps:$4 sm:$0xff]  }
  0x46   :  { %2833 = vmatpush3.bf16.msra.mxu1 %v2978_v24  ;;  %v3044_v24 = vld [vmem:[%s4091_s0 + $0x1b8] ss:$12 sps:$4 sm:$0xff]  }
  0x49   :  { %911 = vmatmul.mubr.bf16.gmra.mrb[4].mxu0 %v2958_v25  ;;  %1103 = vmatmul.mubr.bf16.gmra.mrb[4].mxu1 %v2959_v26  ;;  %v3045_v25 = vld [vmem:[%s4091_s0 + $0x198] ss:$12 sps:$4 sm:$0xff]   ;;  %v3046_v26 = vld [vmem:[%s4091_s0 + $0x1d0] ss:$12 sps:$4 sm:$0xff]  }
  0x4a   :  { %918 = vmatprep.mubr.bf16.mxu0 %v2960_v27  ;;  %1110 = vmatprep.mubr.bf16.mxu1 %v2962_v28  ;;  %v3047_v27 = vld [vmem:[%s4091_s0 + $0x1b4] ss:$12 sps:$4 sm:$0xff]  }
  0x4b   :  { %v3049_v28 = vld [vmem:[%s4091_s0 + $0x1e8] ss:$12 sps:$4 sm:$0xff]  }
  0x51   :  { %919 = vmatmul.mubr.bf16.gmra.mrb[8].mxu0 %v2964_v29  ;;  %1111 = vmatmul.mubr.bf16.gmra.mrb[8].mxu1 %v2965_v30  ;;  %v3050_v29 = vld [vmem:[%s4091_s0 + $0x1b0] ss:$12 sps:$4 sm:$0xff]   ;;  %v3051_v30 = vld [vmem:[%s4091_s0 + $0x200] ss:$12 sps:$4 sm:$0xff]  }
  0x52   :  { %926 = vmatprep.mubr.bf16.mxu0 %v2966_v31  ;;  %1118 = vmatprep.mubr.bf16.mxu1 %v2968_v32  ;;  %v3052_v31 = vld [vmem:[%s4091_s0 + $0x1cc] ss:$12 sps:$4 sm:$0xff]  }
  0x53   :  { %v3054_v32 = vld [vmem:[%s4091_s0 + $0x218] ss:$12 sps:$4 sm:$0xff]  }
  0x59   :  { %927 = vmatmul.mubr.bf16.gmra.mrb[12].mxu0 %v2970_v33  ;;  %1119 = vmatmul.mubr.bf16.gmra.mrb[12].mxu1 %v2971_v34  ;;  %v3055_v33 = vld [vmem:[%s4091_s0 + $0x1c8] ss:$12 sps:$4 sm:$0xff]   ;;  %v3056_v34 = vld [vmem:[%s4091_s0 + $0x230] ss:$12 sps:$4 sm:$0xff]  }
  0x5a   :  { %934 = vmatprep.mubr.bf16.mxu0 %v2972_v35  ;;  %1126 = vmatprep.mubr.bf16.mxu1 %v2974_v36  ;;  %v3057_v35 = vld [vmem:[%s4091_s0 + $0x1e4] ss:$12 sps:$4 sm:$0xff]   ;;  %v3059_v36 = vld [vmem:[%s4091_s0 + $0x248] ss:$12 sps:$4 sm:$0xff]  }
  0x61   :  { %935 = vmatmul.mubr.bf16.gmra.mrb[16].mxu0 %v2976_v37  ;;  %1127 = vmatmul.mubr.bf16.gmra.mrb[16].mxu1 %v2977_v38  ;;  %v3060_v37 = vld [vmem:[%s4091_s0 + $0x1e0] ss:$12 sps:$4 sm:$0xff]  }
  0x62   :  { %942 = vmatprep.mubr.bf16.mxu0 %v2979_v39  ;;  %1134 = vmatprep.mubr.bf16.mxu1 %v2981_v40  ;;  %v3061_v38 = vld [vmem:[%s4091_s0 + $0x260] ss:$12 sps:$4 sm:$0xff]   ;;  %v3062_v39 = vld [vmem:[%s4091_s0 + $0x1fc] ss:$12 sps:$4 sm:$0xff]   ;;  %v3064_v40 = vld [vmem:[%s4091_s0 + $0x278] ss:$12 sps:$4 sm:$0xff]  }
  0x69   :  { %943 = vmatmul.mubr.bf16.gmra.mrb[20].mxu0 %v2983_v41  ;;  %1135 = vmatmul.mubr.bf16.gmra.mrb[20].mxu1 %v2984_v42  ;;  %v3065_v41 = vld [vmem:[%s4091_s0 + $0x1f8] ss:$12 sps:$4 sm:$0xff]   ;;  %v3066_v42 = vld [vmem:[%s4091_s0 + $0x290] ss:$12 sps:$4 sm:$0xff]  }
  0x6a   :  { %950 = vmatprep.mubr.bf16.mxu0 %v2985_v43  ;;  %1142 = vmatprep.mubr.bf16.mxu1 %v2987_v44  ;;  %v3067_v43 = vld [vmem:[%s4091_s0 + $0x214] ss:$12 sps:$4 sm:$0xff]  }
  0x6b   :  { %v3069_v44 = vld [vmem:[%s4091_s0 + $0x2a8] ss:$12 sps:$4 sm:$0xff]  }
  0x71   :  { %951 = vmatmul.mubr.bf16.gmra.mrb[24].mxu0 %v2989_v45  ;;  %1143 = vmatmul.mubr.bf16.gmra.mrb[24].mxu1 %v2990_v46  ;;  %v3070_v45 = vld [vmem:[%s4091_s0 + $0x210] ss:$12 sps:$4 sm:$0xff]   ;;  %v3071_v46 = vld [vmem:[%s4091_s0 + $0x2c0] ss:$12 sps:$4 sm:$0xff]  }
  0x72   :  { %958 = vmatprep.mubr.bf16.mxu0 %v2991_v47  ;;  %1150 = vmatprep.mubr.bf16.mxu1 %v2993_v48  ;;  %v3072_v47 = vld [vmem:[%s4091_s0 + $0x22c] ss:$12 sps:$4 sm:$0xff]  }
  0x73   :  { %v3074_v48 = vld [vmem:[%s4091_s0 + $0x2d8] ss:$12 sps:$4 sm:$0xff]  }
  0x79   :  { %959 = vmatmul.mubr.bf16.gmra.mrb[28].mxu0 %v2995_v49  ;;  %1151 = vmatmul.mubr.bf16.gmra.mrb[28].mxu1 %v2996_v50  ;;  %v3075_v49 = vld [vmem:[%s4091_s0 + $0x228] ss:$12 sps:$4 sm:$0xff]   ;;  %v3076_v50 = vld [vmem:[%s4091_s0 + $0x2f0] ss:$12 sps:$4 sm:$0xff]  }
  0x7a   :  { %966 = vmatprep.mubr.bf16.mxu0 %v2997_v51  ;;  %2834 = vmatprep.mubr.msk.bf16.mxu1 %vm773_vm0, %v2999_v52 }
  0x81   :  { %967 = vmatmul.mubr.bf16.gmra.mrb[32].mxu0 %v3000_v53  ;;  %2835 = vmatmul.mubr.msk.bf16.vlgmr.msra.gmra.mrb[32].mxu1 %vm773_vm0, %v3001_v54 }
  0x82   :  { %974 = vmatprep.mubr.bf16.mxu0 %v3002_v55  ;;  %2838 = vmatprep.mubr.msk.bf16.mxu1 %vm773_vm0, %v3004_v56 }
  0x89   :  { %975 = vmatmul.mubr.bf16.gmra.mrb[36].mxu0 %v3005_v57  ;;  %2839 = vmatmul.mubr.msk.bf16.gmra.mrb[36].mxu1 %vm773_vm0, %v3006_v58 }
  0x8a   :  { %982 = vmatprep.mubr.bf16.mxu0 %v3007_v59  ;;  %2842 = vmatprep.mubr.msk.bf16.mxu1 %vm773_vm0, %v3009_v60 }
  0x91   :  { %983 = vmatmul.mubr.bf16.gmra.mrb[40].mxu0 %v3010_v61  ;;  %2843 = vmatmul.mubr.msk.bf16.gmra.mrb[40].mxu1 %vm773_vm0, %v3011_v62 }
  0x92   :  { %990 = vmatprep.mubr.bf16.mxu0 %v3012_v63  ;;  %2846 = vmatprep.mubr.msk.bf16.mxu1 %vm773_vm0, %v3014_v0 }
  0x99   :  { %991 = vmatmul.mubr.bf16.gmra.mrb[44].mxu0 %v3015_v1  ;;  %2847 = vmatmul.mubr.msk.bf16.gmra.mrb[44].mxu1 %vm773_vm0, %v3016_v2 }
  0x9a   :  { %998 = vmatprep.mubr.bf16.mxu0 %v3017_v3  ;;  %2850 = vmatprep.mubr.msk.bf16.mxu1 %vm773_vm0, %v3019_v4 }
  0xa1   :  { %999 = vmatmul.mubr.bf16.gmra.mrb[48].mxu0 %v3020_v5  ;;  %2851 = vmatmul.mubr.msk.bf16.gmra.mrb[48].mxu1 %vm773_vm0, %v3021_v6 }
  0xa2   :  { %1006 = vmatprep.mubr.bf16.mxu0 %v3022_v7  ;;  %2854 = vmatprep.mubr.msk.bf16.mxu1 %vm773_vm0, %v3024_v8 }
  0xa9   :  { %1007 = vmatmul.mubr.bf16.gmra.mrb[52].mxu0 %v3025_v9  ;;  %2855 = vmatmul.mubr.msk.bf16.gmra.mrb[52].mxu1 %vm773_vm0, %v3026_v10 }
  0xaa   :  { %1014 = vmatprep.mubr.bf16.mxu0 %v3027_v11  ;;  %2858 = vmatprep.mubr.msk.bf16.mxu1 %vm773_vm0, %v3029_v12 }
  0xb1   :  { %1015 = vmatmul.mubr.bf16.gmra.mrb[56].mxu0 %v3030_v13  ;;  %2859 = vmatmul.mubr.msk.bf16.gmra.mrb[56].mxu1 %vm773_vm0, %v3031_v14 }
  0xb2   :  { %1022 = vmatprep.mubr.bf16.mxu0 %v3032_v15  ;;  %2862 = vmatprep.mubr.msk.bf16.mxu1 %vm773_vm0, %v3034_v16 }
  0xb9   :  { %1023 = vmatmul.mubr.bf16.gmra.mrb[60].mxu0 %v3035_v17  ;;  %2863 = vmatmul.mubr.msk.bf16.gmra.mrb[60].mxu1 %vm773_vm0, %v3036_v18 }
  0xba   :  { %1030 = vmatprep.mubr.bf16.mxu0 %v3037_v19  ;;  %2866 = vmatprep.mubr.msk.bf16.mxu1 %vm773_vm0, %v3039_v20 }
  0xc1   :  { %1031 = vmatmul.mubr.bf16.gmra.mrb[64].mxu0 %v3040_v21  ;;  %2867 = vmatmul.mubr.msk.bf16.gmra.mrb[64].mxu1 %vm773_vm0, %v3041_v22 }
  0xc2   :  { %1038 = vmatprep.mubr.bf16.mxu0 %v3042_v23  ;;  %2870 = vmatprep.mubr.msk.bf16.mxu1 %vm773_vm0, %v3044_v24 }
  0xc9   :  { %1039 = vmatmul.mubr.bf16.gmra.mrb[68].mxu0 %v3045_v25  ;;  %2871 = vmatmul.mubr.msk.bf16.gmra.mrb[68].mxu1 %vm773_vm0, %v3046_v26 }
  0xca   :  { %1046 = vmatprep.mubr.bf16.mxu0 %v3047_v27  ;;  %2874 = vmatprep.mubr.msk.bf16.mxu1 %vm773_vm0, %v3049_v28 }
  0xd1   :  { %1047 = vmatmul.mubr.bf16.gmra.mrb[72].mxu0 %v3050_v29  ;;  %2875 = vmatmul.mubr.msk.bf16.gmra.mrb[72].mxu1 %vm773_vm0, %v3051_v30 }
  0xd2   :  { %1054 = vmatprep.mubr.bf16.mxu0 %v3052_v31  ;;  %2878 = vmatprep.mubr.msk.bf16.mxu1 %vm773_vm0, %v3054_v32 }
  0xd9   :  { %1055 = vmatmul.mubr.bf16.gmra.mrb[76].mxu0 %v3055_v33  ;;  %2879 = vmatmul.mubr.msk.bf16.gmra.mrb[76].mxu1 %vm773_vm0, %v3056_v34 }
  0xda   :  { %1062 = vmatprep.mubr.bf16.mxu0 %v3057_v35  ;;  %2882 = vmatprep.mubr.msk.bf16.mxu1 %vm773_vm0, %v3059_v36 }
  0xe1   :  { %1063 = vmatmul.mubr.bf16.gmra.mrb[80].mxu0 %v3060_v37  ;;  %2883 = vmatmul.mubr.msk.bf16.gmra.mrb[80].mxu1 %vm773_vm0, %v3061_v38 }
  0xe2   :  { %1070 = vmatprep.mubr.bf16.mxu0 %v3062_v39  ;;  %2886 = vmatprep.mubr.msk.bf16.mxu1 %vm773_vm0, %v3064_v40 }
  0xe9   :  { %1071 = vmatmul.mubr.bf16.gmra.mrb[84].mxu0 %v3065_v41  ;;  %2887 = vmatmul.mubr.msk.bf16.gmra.mrb[84].mxu1 %vm773_vm0, %v3066_v42 }
  0xea   :  { %1078 = vmatprep.mubr.bf16.mxu0 %v3067_v43  ;;  %2890 = vmatprep.mubr.msk.bf16.mxu1 %vm773_vm0, %v3069_v44 }
  0xf1   :  { %1079 = vmatmul.mubr.bf16.gmra.mrb[88].mxu0 %v3070_v45  ;;  %2891 = vmatmul.mubr.msk.bf16.gmra.mrb[88].mxu1 %vm773_vm0, %v3071_v46 }
  0xf2   :  { %1086 = vmatprep.mubr.bf16.mxu0 %v3072_v47  ;;  %2894 = vmatprep.mubr.msk.bf16.mxu1 %vm773_vm0, %v3074_v48 }
  0xf9   :  { %1087 = vmatmul.mubr.bf16.gmra.mrb[92].mxu0 %v3075_v49  ;;  %2895 = vmatmul.mubr.msk.bf16.gmra.mrb[92].mxu1 %vm773_vm0, %v3076_v50 }
 0x114   :  { %v3516_v51 = vpop.f32.mrb[0].mxu0  ;;  %v3518_v52 = vpop.f32.mrb[0].mxu1 }
 0x115   :  { %v906_v53 = vpop.f32.mrb[1].mxu0  ;;  %v1098_v54 = vpop.f32.mrb[1].mxu1 }
 0x116   :  { %v3520_v55 = vpop.f32.mrb[2].mxu0  ;;  %v3522_v56 = vpop.f32.mrb[2].mxu1 }
 0x117   :  { %v909_v57 = vpop.f32.mrb[3].mxu0  ;;  %v1101_v58 = vpop.f32.mrb[3].mxu1 }
 0x118   :  { %v3585_v57 = vld [vmem:[%s4092_s2] ss:$0 sm:$0xff]  ;;  %v2734_v58 = vld [vmem:[%s4093_s4 + $0x8] sm:$0xff]  }
 0x11c   :  { %v3524_v59 = vpop.f32.mrb[4].mxu0  ;;  %v3526_v60 = vpop.f32.mrb[4].mxu1 }
 0x11d   :  { %v914_v61 = vpop.f32.mrb[5].mxu0  ;;  %v1106_v62 = vpop.f32.mrb[5].mxu1 }
 0x11e   :  { %v3528_v63 = vpop.f32.mrb[6].mxu0  ;;  %v3530_v0 = vpop.f32.mrb[6].mxu1 }
 0x11f   :  { %v917_v1 = vpop.f32.mrb[7].mxu0  ;;  %v1109_v2 = vpop.f32.mrb[7].mxu1 }
 0x120   :  { %v2447_v2 = vld [vmem:[%s4093_s4] sm:$0xff]  }
 0x124   :  { %v3532_v3 = vpop.f32.mrb[8].mxu0  ;;  %v3534_v4 = vpop.f32.mrb[8].mxu1 }
 0x125   :  { %v922_v5 = vpop.f32.mrb[9].mxu0  ;;  %v1114_v6 = vpop.f32.mrb[9].mxu1 }
 0x126   :  { %v3536_v7 = vpop.f32.mrb[10].mxu0  ;;  %v3538_v8 = vpop.f32.mrb[10].mxu1  ;;  %v3597_v5 = vld [vmem:[%s4094_s3] ss:$0 sm:$0xff] }
 0x127   :  { %v925_v9 = vpop.f32.mrb[11].mxu0  ;;  %v1117_v10 = vpop.f32.mrb[11].mxu1 }
 0x12c   :  { %v3540_v11 = vpop.f32.mrb[12].mxu0  ;;  %v3542_v12 = vpop.f32.mrb[12].mxu1 }
 0x12d   :  { %v930_v13 = vpop.f32.mrb[13].mxu0  ;;  %v1122_v14 = vpop.f32.mrb[13].mxu1 }
 0x12e   :  { %v3544_v15 = vpop.f32.mrb[14].mxu0  ;;  %v3546_v16 = vpop.f32.mrb[14].mxu1  ;;  %v2452_v14 = vunpack.c.l.bf16 %v2734_v58 }
 0x12f   :  { %v933_v17 = vpop.f32.mrb[15].mxu0  ;;  %v1125_v18 = vpop.f32.mrb[15].mxu1 }
 0x134   :  { %v3548_v19 = vpop.f32.mrb[16].mxu0  ;;  %v3550_v20 = vpop.f32.mrb[16].mxu1 }
 0x135   :  { %v938_v21 = vpop.f32.mrb[17].mxu0  ;;  %v1130_v22 = vpop.f32.mrb[17].mxu1 }
 0x136   :  { %v3552_v23 = vpop.f32.mrb[18].mxu0  ;;  %v3554_v24 = vpop.f32.mrb[18].mxu1  ;;  %v2448_v22 = vunpack.c.l.bf16 %v2447_v2 }
 0x137   :  { %v941_v25 = vpop.f32.mrb[19].mxu0  ;;  %v1133_v26 = vpop.f32.mrb[19].mxu1 }
 0x13c   :  { %v3556_v27 = vpop.f32.mrb[20].mxu0  ;;  %v3558_v28 = vpop.f32.mrb[20].mxu1 }
 0x13d   :  { %v946_v29 = vpop.f32.mrb[21].mxu0  ;;  %v1138_v30 = vpop.f32.mrb[21].mxu1 }
 0x13e   :  { %v3560_v31 = vpop.f32.mrb[22].mxu0  ;;  %v3562_v32 = vpop.f32.mrb[22].mxu1 }
 0x13f   :  { %v949_v33 = vpop.f32.mrb[23].mxu0  ;;  %v1141_v34 = vpop.f32.mrb[23].mxu1 }
 0x140   :  { %v2449_v34 = vunpack.c.h.bf16 %v2447_v2 }
 0x144   :  { %v3564_v35 = vpop.f32.mrb[24].mxu0  ;;  %v3566_v36 = vpop.f32.mrb[24].mxu1 }
 0x145   :  { %v954_v37 = vpop.f32.mrb[25].mxu0  ;;  %v1146_v38 = vpop.f32.mrb[25].mxu1 }
 0x146   :  { %v3568_v39 = vpop.f32.mrb[26].mxu0  ;;  %v3570_v40 = vpop.f32.mrb[26].mxu1  ;;  %v2736_v38 = vld [vmem:[%s4093_s4 + $0x18] sm:$0xff]  }
 0x147   :  { %v957_v41 = vpop.f32.mrb[27].mxu0  ;;  %v1149_v42 = vpop.f32.mrb[27].mxu1 }
 0x14c   :  { %v3572_v43 = vpop.f32.mrb[28].mxu0  ;;  %v3574_v44 = vpop.f32.mrb[28].mxu1 }
 0x14d   :  { %v962_v45 = vpop.f32.mrb[29].mxu0  ;;  %v1154_v46 = vpop.f32.mrb[29].mxu1 }
 0x14e   :  { %v3576_v47 = vpop.f32.mrb[30].mxu0  ;;  %v3578_v48 = vpop.f32.mrb[30].mxu1 }
 0x14f   :  { %v965_v49 = vpop.f32.mrb[31].mxu0  ;;  %v1157_v50 = vpop.f32.mrb[31].mxu1 }
 0x154   :  { %v3580_v53 = vpop.f32.mrb[32].mxu0  ;;  %v2836_v54 = vpop.f32.mrb[32].mxu1 }
 0x155   :  { %v1202_v61 = vadd.f32 %v2836_v54, %v3524_v59  ;;  %v970_v62 = vpop.f32.mrb[33].mxu0  ;;  %v1193_v1 = vpop.f32.mrb[33].mxu1 }
 0x156   :  { %v1194_v6 = vadd.f32 %v1193_v1, %v3516_v51  ;;  %v3600_v9 = vpop.f32.mrb[34].mxu0  ;;  %v2837_v10 = vpop.f32.mrb[34].mxu1  ;;  %v2453_v51 = vunpack.c.h.bf16 %v2734_v58  ;;  %v2460_v62 = vunpack.c.l.bf16 %v2736_v38 }
 0x157   :  { %v1457_v13 = vmul.f32 %v3585_v57, %v1202_v61  ;;  %v1205_v59 = vadd.f32 %v2837_v10, %v3528_v63  ;;  %v973_v17 = vpop.f32.mrb[35].mxu0  ;;  %v1196_v18 = vpop.f32.mrb[35].mxu1 }
 0x158   :  { %v1455_v21 = vmul.f32 %v3585_v57, %v1194_v6  ;;  %v1197_v25 = vadd.f32 %v1196_v18, %v3520_v55  ;;  %v2735_v55 = vld [vmem:[%s4093_s4 + $0x10] sm:$0xff]  }
 0x159   :  { %v1528_v26 = vadd.f32 %v3597_v5, %v1457_v13  ;;  %v1458_v29 = vmul.f32 %v3585_v57, %v1205_v59  ;;  %v2456_v2 = vunpack.c.l.bf16 %v2735_v55 }
 0x15a   :  { %v1526_v30 = vadd.f32 %v3597_v5, %v1455_v21  ;;  %v1456_v33 = vmul.f32 %v3585_v57, %v1197_v25 }
 0x15b   :  { %v1720_v37 = vadd.f32 %v2452_v14, %v1528_v26  ;;  %v1529_v63 = vadd.f32 %v3597_v5, %v1458_v29 }
 0x15c   :  { %v1718_v41 = vadd.f32 %v2448_v22, %v1526_v30  ;;  %v1527_v42 = vadd.f32 %v3597_v5, %v1456_v33  ;;  %v3618_v45 = vpop.f32.mrb[36].mxu0  ;;  %v2840_v46 = vpop.f32.mrb[36].mxu1  ;;  %v2461_v30 = vunpack.c.h.bf16 %v2736_v38  ;;  %v2737_v38 = vld [vmem:[%s4093_s4 + $0x20] sm:$0xff]  }
 0x15d   :  { %v1721_v49 = vadd.f32 %v2453_v51, %v1529_v63  ;;  %v1218_v50 = vadd.f32 %v2840_v46, %v3540_v11  ;;  %v978_v54 = vpop.f32.mrb[37].mxu0  ;;  %v1209_v58 = vpop.f32.mrb[37].mxu1  ;;  %v1784_v13 = vmax.f32 %v1720_v37, 0.0 }
 0x15e   :  { %v1719_v61 = vadd.f32 %v2449_v34, %v1527_v42  ;;  %v1210_v1 = vadd.f32 %v1209_v58, %v3532_v3  ;;  %v3622_v6 = vpop.f32.mrb[38].mxu0  ;;  %v2841_v10 = vpop.f32.mrb[38].mxu1  ;;  %v1782_v22 = vmax.f32 %v1718_v41, 0.0 }
 0x15f   :  { %v1785_v14 = vmax.f32 %v1721_v49, 0.0  ;;  %v1461_v59 = vmul.f32 %v3585_v57, %v1218_v50  ;;  %v1221_v17 = vadd.f32 %v2841_v10, %v3544_v15  ;;  %v981_v18 = vpop.f32.mrb[39].mxu0  ;;  %v1212_v21 = vpop.f32.mrb[39].mxu1  ;;  %v2457_v15 = vunpack.c.h.bf16 %v2735_v55 }
 0x160   :  { %v1783_v11 = vmax.f32 %v1719_v61, 0.0  ;;  %v1459_v25 = vmul.f32 %v3585_v57, %v1210_v1  ;;  %v1213_v26 = vadd.f32 %v1212_v21, %v3536_v7  ;;  %v2738_v7 = vld [vmem:[%s4093_s4 + $0x28] sm:$0xff]  }
 0x161   :  { %v2582_v29 = vpack.c.bf16 %v1785_v14, %v1784_v13  ;;  %v1532_v3 = vadd.f32 %v3597_v5, %v1461_v59  ;;  %v1462_v51 = vmul.f32 %v3585_v57, %v1221_v17  ;;  %v2468_v1 = vunpack.c.l.bf16 %v2738_v7 }
 0x162   :  { %v2577_v33 = vpack.c.bf16 %v1783_v11, %v1782_v22  ;;  %v1530_v34 = vadd.f32 %v3597_v5, %v1459_v25  ;;  %v1460_v37 = vmul.f32 %v3585_v57, %v1213_v26  ;;  %v2464_v13 = vunpack.c.l.bf16 %v2737_v38 }
 0x163   :  { %2765 = vst [vmem:[%s4095_s5 + $0x8] sm:$0xff] %v2582_v29   ;;  %v1724_v63 = vadd.f32 %v2460_v62, %v1532_v3  ;;  %v1533_v41 = vadd.f32 %v3597_v5, %v1462_v51 }
 0x164   :  { %2578 = vst [vmem:[%s4095_s5] sm:$0xff] %v2577_v33   ;;  %v1722_v55 = vadd.f32 %v2456_v2, %v1530_v34  ;;  %v1531_v42 = vadd.f32 %v3597_v5, %v1460_v37  ;;  %v3646_v46 = vpop.f32.mrb[40].mxu0  ;;  %v2844_v49 = vpop.f32.mrb[40].mxu1 }
 0x165   :  { %v1725_v50 = vadd.f32 %v2461_v30, %v1533_v41  ;;  %v1234_v54 = vadd.f32 %v2844_v49, %v3556_v27  ;;  %v986_v58 = vpop.f32.mrb[41].mxu0  ;;  %v1225_v61 = vpop.f32.mrb[41].mxu1  ;;  %v1788_v17 = vmax.f32 %v1724_v63, 0.0  ;;  %v2469_v30 = vunpack.c.h.bf16 %v2738_v7  ;;  %v2739_v41 = vld [vmem:[%s4093_s4 + $0x30] sm:$0xff]  }
 0x166   :  { %v1723_v62 = vadd.f32 %v2457_v15, %v1531_v42  ;;  %v1226_v10 = vadd.f32 %v1225_v61, %v3548_v19  ;;  %v3650_v14 = vpop.f32.mrb[42].mxu0  ;;  %v2845_v59 = vpop.f32.mrb[42].mxu1  ;;  %v1786_v25 = vmax.f32 %v1722_v55, 0.0 }
 0x167   :  { %v1789_v2 = vmax.f32 %v1725_v50, 0.0  ;;  %v1465_v18 = vmul.f32 %v3585_v57, %v1234_v54  ;;  %v1237_v21 = vadd.f32 %v2845_v59, %v3560_v31  ;;  %v989_v22 = vpop.f32.mrb[43].mxu0  ;;  %v1228_v11 = vpop.f32.mrb[43].mxu1  ;;  %v2465_v31 = vunpack.c.h.bf16 %v2737_v38 }
 0x168   :  { %v1787_v27 = vmax.f32 %v1723_v62, 0.0  ;;  %v1463_v26 = vmul.f32 %v3585_v57, %v1226_v10  ;;  %v1229_v29 = vadd.f32 %v1228_v11, %v3552_v23  ;;  %v2740_v23 = vld [vmem:[%s4093_s4 + $0x38] sm:$0xff]   ;;  %v2472_v10 = vunpack.c.l.bf16 %v2739_v41 }
 0x169   :  { %v2592_v3 = vpack.c.bf16 %v1789_v2, %v1788_v17  ;;  %v1536_v19 = vadd.f32 %v3597_v5, %v1465_v18  ;;  %v1466_v51 = vmul.f32 %v3585_v57, %v1237_v21  ;;  %v2476_v62 = vunpack.c.l.bf16 %v2740_v23 }
 0x16a   :  { %v2587_v33 = vpack.c.bf16 %v1787_v27, %v1786_v25  ;;  %v1534_v34 = vadd.f32 %v3597_v5, %v1463_v26  ;;  %v1464_v37 = vmul.f32 %v3585_v57, %v1229_v29 }
 0x16b   :  { %2767 = vst [vmem:[%s4095_s5 + $0x18] sm:$0xff] %v2592_v3   ;;  %v1728_v15 = vadd.f32 %v2468_v1, %v1536_v19  ;;  %v1537_v63 = vadd.f32 %v3597_v5, %v1466_v51  ;;  %v2477_v19 = vunpack.c.h.bf16 %v2740_v23 }
 0x16c   :  { %2766 = vst [vmem:[%s4095_s5 + $0x10] sm:$0xff] %v2587_v33   ;;  %v1726_v7 = vadd.f32 %v2464_v13, %v1534_v34  ;;  %v1535_v38 = vadd.f32 %v3597_v5, %v1464_v37  ;;  %v3674_v55 = vpop.f32.mrb[44].mxu0  ;;  %v2848_v42 = vpop.f32.mrb[44].mxu1 }
 0x16d   :  { %v1729_v49 = vadd.f32 %v2469_v30, %v1537_v63  ;;  %v1250_v50 = vadd.f32 %v2848_v42, %v3572_v43  ;;  %v994_v54 = vpop.f32.mrb[45].mxu0  ;;  %v1241_v58 = vpop.f32.mrb[45].mxu1  ;;  %v1792_v2 = vmax.f32 %v1728_v15, 0.0 }
 0x16e   :  { %v1727_v61 = vadd.f32 %v2465_v31, %v1535_v38  ;;  %v1242_v1 = vadd.f32 %v1241_v58, %v3564_v35  ;;  %v3678_v59 = vpop.f32.mrb[46].mxu0  ;;  %v2849_v17 = vpop.f32.mrb[46].mxu1  ;;  %v1790_v25 = vmax.f32 %v1726_v7, 0.0  ;;  %v2741_v31 = vld [vmem:[%s4093_s4 + $0x40] sm:$0xff]  }
 0x16f   :  { %v1793_v13 = vmax.f32 %v1729_v49, 0.0  ;;  %v1469_v18 = vmul.f32 %v3585_v57, %v1250_v50  ;;  %v1253_v21 = vadd.f32 %v2849_v17, %v3576_v47  ;;  %v997_v22 = vpop.f32.mrb[47].mxu0  ;;  %v1244_v11 = vpop.f32.mrb[47].mxu1  ;;  %v2473_v47 = vunpack.c.h.bf16 %v2739_v41 }
 0x170   :  { %v1791_v43 = vmax.f32 %v1727_v61, 0.0  ;;  %v1467_v27 = vmul.f32 %v3585_v57, %v1242_v1  ;;  %v1245_v26 = vadd.f32 %v1244_v11, %v3568_v39  ;;  %v2742_v39 = vld [vmem:[%s4093_s4 + $0x48] sm:$0xff]   ;;  %v2480_v61 = vunpack.c.l.bf16 %v2741_v31 }
 0x171   :  { %v2602_v29 = vpack.c.bf16 %v1793_v13, %v1792_v2  ;;  %v1540_v35 = vadd.f32 %v3597_v5, %v1469_v18  ;;  %v1470_v3 = vmul.f32 %v3585_v57, %v1253_v21  ;;  %v2484_v54 = vunpack.c.l.bf16 %v2742_v39 }
 0x172   :  { %v2597_v51 = vpack.c.bf16 %v1791_v43, %v1790_v25  ;;  %v1538_v30 = vadd.f32 %v3597_v5, %v1467_v27  ;;  %v1468_v33 = vmul.f32 %v3585_v57, %v1245_v26  ;;  %v2485_v26 = vunpack.c.h.bf16 %v2742_v39 }
 0x173   :  { %2769 = vst [vmem:[%s4095_s5 + $0x28] sm:$0xff] %v2602_v29   ;;  %v1732_v34 = vadd.f32 %v2476_v62, %v1540_v35  ;;  %v1541_v37 = vadd.f32 %v3597_v5, %v1470_v3 }
 0x174   :  { %2768 = vst [vmem:[%s4095_s5 + $0x20] sm:$0xff] %v2597_v51   ;;  %v1730_v15 = vadd.f32 %v2472_v10, %v1538_v30  ;;  %v1539_v63 = vadd.f32 %v3597_v5, %v1468_v33  ;;  %v3702_v23 = vpop.f32.mrb[48].mxu0  ;;  %v2852_v41 = vpop.f32.mrb[48].mxu1  ;;  %v2743_v30 = vld [vmem:[%s4093_s4 + $0x50] sm:$0xff]  }
 0x175   :  { %v1733_v7 = vadd.f32 %v2477_v19, %v1541_v37  ;;  %v1266_v38 = vadd.f32 %v2852_v41, %v3618_v45  ;;  %v1002_v42 = vpop.f32.mrb[49].mxu0  ;;  %v1257_v49 = vpop.f32.mrb[49].mxu1  ;;  %v1796_v17 = vmax.f32 %v1732_v34, 0.0 }
 0x176   :  { %v1731_v50 = vadd.f32 %v2473_v47, %v1539_v63  ;;  %v1258_v58 = vadd.f32 %v1257_v49, %v3580_v53  ;;  %v3706_v62 = vpop.f32.mrb[50].mxu0  ;;  %v2853_v1 = vpop.f32.mrb[50].mxu1  ;;  %v1794_v22 = vmax.f32 %v1730_v15, 0.0  ;;  %v2488_v42 = vunpack.c.l.bf16 %v2743_v30 }
 0x177   :  { %v1797_v10 = vmax.f32 %v1733_v7, 0.0  ;;  %v1473_v2 = vmul.f32 %v3585_v57, %v1266_v38  ;;  %v1269_v13 = vadd.f32 %v2853_v1, %v3622_v6  ;;  %v1005_v18 = vpop.f32.mrb[51].mxu0  ;;  %v1260_v21 = vpop.f32.mrb[51].mxu1  ;;  %v2481_v6 = vunpack.c.h.bf16 %v2741_v31 }
 0x178   :  { %v1795_v45 = vmax.f32 %v1731_v50, 0.0  ;;  %v1471_v11 = vmul.f32 %v3585_v57, %v1258_v58  ;;  %v1261_v25 = vadd.f32 %v1260_v21, %v3600_v9  ;;  %v2744_v9 = vld [vmem:[%s4093_s4 + $0x58] sm:$0xff]  }
 0x179   :  { %v2612_v43 = vpack.c.bf16 %v1797_v10, %v1796_v17  ;;  %v1544_v53 = vadd.f32 %v3597_v5, %v1473_v2  ;;  %v1474_v27 = vmul.f32 %v3585_v57, %v1269_v13  ;;  %v2492_v7 = vunpack.c.l.bf16 %v2744_v9 }
 0x17a   :  { %v2607_v29 = vpack.c.bf16 %v1795_v45, %v1794_v22  ;;  %v1542_v35 = vadd.f32 %v3597_v5, %v1471_v11  ;;  %v1472_v3 = vmul.f32 %v3585_v57, %v1261_v25  ;;  %v2493_v45 = vunpack.c.h.bf16 %v2744_v9 }
 0x17b   :  { %2771 = vst [vmem:[%s4095_s5 + $0x38] sm:$0xff] %v2612_v43   ;;  %v1736_v19 = vadd.f32 %v2484_v54, %v1544_v53  ;;  %v1545_v51 = vadd.f32 %v3597_v5, %v1474_v27 }
 0x17c   :  { %2770 = vst [vmem:[%s4095_s5 + $0x30] sm:$0xff] %v2607_v29   ;;  %v1734_v33 = vadd.f32 %v2480_v61, %v1542_v35  ;;  %v1543_v47 = vadd.f32 %v3597_v5, %v1472_v3  ;;  %v1008_v34 = vpop.f32.mrb[52].mxu0  ;;  %v2856_v37 = vpop.f32.mrb[52].mxu1 }
 0x17d   :  { %v1737_v39 = vadd.f32 %v2485_v26, %v1545_v51  ;;  %v1282_v31 = vadd.f32 %v2856_v37, %v3674_v55  ;;  %v1010_v15 = vpop.f32.mrb[53].mxu0  ;;  %v1273_v63 = vpop.f32.mrb[53].mxu1  ;;  %v1800_v54 = vmax.f32 %v1736_v19, 0.0  ;;  %v2745_v26 = vld [vmem:[%s4093_s4 + $0x60] sm:$0xff]  }
 0x17e   :  { %v1735_v41 = vadd.f32 %v2481_v6, %v1543_v47  ;;  %v1274_v38 = vadd.f32 %v1273_v63, %v3646_v46  ;;  %v1011_v49 = vpop.f32.mrb[54].mxu0  ;;  %v2857_v50 = vpop.f32.mrb[54].mxu1  ;;  %v1798_v2 = vmax.f32 %v1734_v33, 0.0 }
 0x17f   :  { %v1801_v58 = vmax.f32 %v1737_v39, 0.0  ;;  %v1477_v61 = vmul.f32 %v3585_v57, %v1282_v31  ;;  %v1285_v1 = vadd.f32 %v2857_v50, %v3678_v59  ;;  %v1013_v17 = vpop.f32.mrb[55].mxu0  ;;  %v1276_v10 = vpop.f32.mrb[55].mxu1  ;;  %v2489_v59 = vunpack.c.h.bf16 %v2743_v30 }
 0x180   :  { %v1799_v13 = vmax.f32 %v1735_v41, 0.0  ;;  %v1475_v55 = vmul.f32 %v3585_v57, %v1274_v38  ;;  %v1277_v18 = vadd.f32 %v1276_v10, %v3650_v14  ;;  %v2746_v14 = vld [vmem:[%s4093_s4 + $0x68] sm:$0xff]   ;;  %v2496_v39 = vunpack.c.l.bf16 %v2745_v26 }
 0x181   :  { %v2622_v21 = vpack.c.bf16 %v1801_v58, %v1800_v54  ;;  %v1548_v46 = vadd.f32 %v3597_v5, %v1477_v61  ;;  %v1478_v22 = vmul.f32 %v3585_v57, %v1285_v1  ;;  %v2500_v47 = vunpack.c.l.bf16 %v2746_v14 }
 0x182   :  { %v2617_v11 = vpack.c.bf16 %v1799_v13, %v1798_v2  ;;  %v1546_v25 = vadd.f32 %v3597_v5, %v1475_v55  ;;  %v1476_v43 = vmul.f32 %v3585_v57, %v1277_v18  ;;  %v2501_v10 = vunpack.c.h.bf16 %v2746_v14 }
 0x183   :  { %2773 = vst [vmem:[%s4095_s5 + $0x48] sm:$0xff] %v2622_v21   ;;  %v1740_v53 = vadd.f32 %v2492_v7, %v1548_v46  ;;  %v1549_v27 = vadd.f32 %v3597_v5, %v1478_v22  ;;  %v2747_v46 = vld [vmem:[%s4093_s4 + $0x70] sm:$0xff]  }
 0x184   :  { %2772 = vst [vmem:[%s4095_s5 + $0x40] sm:$0xff] %v2617_v11   ;;  %v1738_v29 = vadd.f32 %v2488_v42, %v1546_v25  ;;  %v1547_v35 = vadd.f32 %v3597_v5, %v1476_v43  ;;  %v1016_v3 = vpop.f32.mrb[56].mxu0  ;;  %v2860_v6 = vpop.f32.mrb[56].mxu1 }
 0x185   :  { %v1741_v19 = vadd.f32 %v2493_v45, %v1549_v27  ;;  %v1298_v51 = vadd.f32 %v2860_v6, %v1008_v34  ;;  %v1018_v9 = vpop.f32.mrb[57].mxu0  ;;  %v1289_v30 = vpop.f32.mrb[57].mxu1  ;;  %v1804_v63 = vmax.f32 %v1740_v53, 0.0 }
 0x186   :  { %v1739_v33 = vadd.f32 %v2489_v59, %v1547_v35  ;;  %v1290_v37 = vadd.f32 %v1289_v30, %v3702_v23  ;;  %v1019_v31 = vpop.f32.mrb[58].mxu0  ;;  %v2861_v15 = vpop.f32.mrb[58].mxu1  ;;  %v1802_v54 = vmax.f32 %v1738_v29, 0.0  ;;  %v2504_v35 = vunpack.c.l.bf16 %v2747_v46 }
 0x187   :  { %v1805_v41 = vmax.f32 %v1741_v19, 0.0  ;;  %v1481_v7 = vmul.f32 %v3585_v57, %v1298_v51  ;;  %v1301_v38 = vadd.f32 %v2861_v15, %v1011_v49  ;;  %v1021_v42 = vpop.f32.mrb[59].mxu0  ;;  %v1292_v50 = vpop.f32.mrb[59].mxu1  ;;  %v2497_v49 = vunpack.c.h.bf16 %v2745_v26 }
 0x188   :  { %v1803_v58 = vmax.f32 %v1739_v33, 0.0  ;;  %v1479_v34 = vmul.f32 %v3585_v57, %v1290_v37  ;;  %v1293_v61 = vadd.f32 %v1292_v50, %v3706_v62  ;;  %v2748_v62 = vld [vmem:[%s4093_s4 + $0x78] sm:$0xff]  }
 0x189   :  { %v2632_v1 = vpack.c.bf16 %v1805_v41, %v1804_v63  ;;  %v1552_v17 = vadd.f32 %v3597_v5, %v1481_v7  ;;  %v1482_v23 = vmul.f32 %v3585_v57, %v1301_v38  ;;  %v2508_v26 = vunpack.c.l.bf16 %v2748_v62 }
 0x18a   :  { %v2627_v2 = vpack.c.bf16 %v1803_v58, %v1802_v54  ;;  %v1550_v13 = vadd.f32 %v3597_v5, %v1479_v34  ;;  %v1480_v55 = vmul.f32 %v3585_v57, %v1293_v61  ;;  %v2509_v42 = vunpack.c.h.bf16 %v2748_v62 }
 0x18b   :  { %2775 = vst [vmem:[%s4095_s5 + $0x58] sm:$0xff] %v2632_v1   ;;  %v1744_v18 = vadd.f32 %v2500_v47, %v1552_v17  ;;  %v1553_v21 = vadd.f32 %v3597_v5, %v1482_v23  ;;  %v2505_v34 = vunpack.c.h.bf16 %v2747_v46 }
 0x18c   :  { %2774 = vst [vmem:[%s4095_s5 + $0x50] sm:$0xff] %v2627_v2   ;;  %v1742_v22 = vadd.f32 %v2496_v39, %v1550_v13  ;;  %v1551_v45 = vadd.f32 %v3597_v5, %v1480_v55  ;;  %v1024_v11 = vpop.f32.mrb[60].mxu0  ;;  %v2864_v25 = vpop.f32.mrb[60].mxu1  ;;  %v2749_v2 = vld [vmem:[%s4093_s4 + $0x80] sm:$0xff]  }
 0x18d   :  { %v1745_v43 = vadd.f32 %v2501_v10, %v1553_v21  ;;  %v1314_v59 = vadd.f32 %v2864_v25, %v1024_v11  ;;  %v1026_v53 = vpop.f32.mrb[61].mxu0  ;;  %v1305_v27 = vpop.f32.mrb[61].mxu1  ;;  %v1808_v51 = vmax.f32 %v1744_v18, 0.0  ;;  %v2512_v11 = vunpack.c.l.bf16 %v2749_v2 }
 0x18e   :  { %v1743_v14 = vadd.f32 %v2497_v49, %v1551_v45  ;;  %v1306_v29 = vadd.f32 %v1305_v27, %v1016_v3  ;;  %v1027_v6 = vpop.f32.mrb[62].mxu0  ;;  %v2865_v19 = vpop.f32.mrb[62].mxu1  ;;  %v1806_v39 = vmax.f32 %v1742_v22, 0.0 }
 0x18f   :  { %v1809_v9 = vmax.f32 %v1745_v43, 0.0  ;;  %v1485_v30 = vmul.f32 %v3585_v57, %v1314_v59  ;;  %v1317_v33 = vadd.f32 %v2865_v19, %v1027_v6  ;;  %v1029_v47 = vpop.f32.mrb[63].mxu0  ;;  %v1308_v37 = vpop.f32.mrb[63].mxu1  ;;  %v2513_v19 = vunpack.c.h.bf16 %v2749_v2  ;;  %v2751_v2 = vld [vmem:[%s4093_s4 + $0x90] sm:$0xff]  }
 0x190   :  { %v1807_v15 = vmax.f32 %v1743_v14, 0.0  ;;  %v1483_v63 = vmul.f32 %v3585_v57, %v1306_v29  ;;  %v1309_v41 = vadd.f32 %v1308_v37, %v1019_v31 }
 0x191   :  { %v2642_v7 = vpack.c.bf16 %v1809_v9, %v1808_v51  ;;  %v1556_v38 = vadd.f32 %v3597_v5, %v1485_v30  ;;  %v1486_v3 = vmul.f32 %v3585_v57, %v1317_v33  ;;  %v2750_v33 = vld [vmem:[%s4093_s4 + $0x88] sm:$0xff]  }
 0x192   :  { %v2637_v50 = vpack.c.bf16 %v1807_v15, %v1806_v39  ;;  %v1554_v54 = vadd.f32 %v3597_v5, %v1483_v63  ;;  %v1484_v58 = vmul.f32 %v3585_v57, %v1309_v41 }
 0x193   :  { %2777 = vst [vmem:[%s4095_s5 + $0x68] sm:$0xff] %v2642_v7   ;;  %v1748_v61 = vadd.f32 %v2508_v26, %v1556_v38  ;;  %v1557_v1 = vadd.f32 %v3597_v5, %v1486_v3  ;;  %v2516_v3 = vunpack.c.l.bf16 %v2750_v33 }
 0x194   :  { %2776 = vst [vmem:[%s4095_s5 + $0x60] sm:$0xff] %v2637_v50   ;;  %v1746_v31 = vadd.f32 %v2504_v35, %v1554_v54  ;;  %v1555_v17 = vadd.f32 %v3597_v5, %v1484_v58  ;;  %v1032_v23 = vpop.f32.mrb[64].mxu0  ;;  %v2868_v10 = vpop.f32.mrb[64].mxu1 }
 0x195   :  { %v1749_v13 = vadd.f32 %v2509_v42, %v1557_v1  ;;  %v1034_v55 = vpop.f32.mrb[65].mxu0  ;;  %v1321_v49 = vpop.f32.mrb[65].mxu1  ;;  %v1812_v22 = vmax.f32 %v1748_v61, 0.0 }
 0x196   :  { %v1747_v18 = vadd.f32 %v2505_v34, %v1555_v17  ;;  %v1322_v21 = vadd.f32 %v1321_v49, %v1032_v23  ;;  %v1035_v62 = vpop.f32.mrb[66].mxu0  ;;  %v2869_v46 = vpop.f32.mrb[66].mxu1  ;;  %v1810_v59 = vmax.f32 %v1746_v31, 0.0  ;;  %v2517_v31 = vunpack.c.h.bf16 %v2750_v33 }
 0x197   :  { %v1813_v45 = vmax.f32 %v1749_v13, 0.0  ;;  %v1037_v25 = vpop.f32.mrb[67].mxu0  ;;  %v1324_v43 = vpop.f32.mrb[67].mxu1 }
 0x198   :  { %v1811_v53 = vmax.f32 %v1747_v18, 0.0  ;;  %v1487_v27 = vmul.f32 %v3585_v57, %v1322_v21  ;;  %v1325_v14 = vadd.f32 %v1324_v43, %v1035_v62 }
 0x199   :  { %v2652_v26 = vpack.c.bf16 %v1813_v45, %v1812_v22 }
 0x19a   :  { %v2647_v29 = vpack.c.bf16 %v1811_v53, %v1810_v59  ;;  %v1558_v35 = vadd.f32 %v3597_v5, %v1487_v27  ;;  %v1488_v6 = vmul.f32 %v3585_v57, %v1325_v14 }
 0x19b   :  { %2779 = vst [vmem:[%s4095_s5 + $0x78] sm:$0xff] %v2652_v26  }
 0x19c   :  { %2778 = vst [vmem:[%s4095_s5 + $0x70] sm:$0xff] %v2647_v29   ;;  %v1750_v51 = vadd.f32 %v2512_v11, %v1558_v35  ;;  %v1559_v9 = vadd.f32 %v3597_v5, %v1488_v6  ;;  %v1040_v30 = vpop.f32.mrb[68].mxu0  ;;  %v2872_v47 = vpop.f32.mrb[68].mxu1  ;;  %v2521_v35 = vunpack.c.h.bf16 %v2751_v2 }
 0x19d   :  { %v1330_v37 = vadd.f32 %v2868_v10, %v1040_v30  ;;  %v1042_v39 = vpop.f32.mrb[69].mxu0  ;;  %v1337_v15 = vpop.f32.mrb[69].mxu1 }
 0x19e   :  { %v1751_v63 = vadd.f32 %v2513_v19, %v1559_v9  ;;  %v1043_v41 = vpop.f32.mrb[70].mxu0  ;;  %v2873_v7 = vpop.f32.mrb[70].mxu1  ;;  %v1814_v58 = vmax.f32 %v1750_v51, 0.0  ;;  %v2752_v51 = vld [vmem:[%s4093_s4 + $0x98] sm:$0xff]  }
 0x19f   :  { %v1489_v38 = vmul.f32 %v3585_v57, %v1330_v37  ;;  %v1333_v42 = vadd.f32 %v2869_v46, %v1043_v41  ;;  %v1045_v50 = vpop.f32.mrb[71].mxu0  ;;  %v1340_v54 = vpop.f32.mrb[71].mxu1  ;;  %v2520_v46 = vunpack.c.l.bf16 %v2751_v2  ;;  %v3846_v41 = vld [vmem:[%s4093_s4 + $0xc8] sm:$0xff]   ;;  %v3868_v2 = vld [vmem:[%s4093_s4 + $0xd8] sm:$0xff]  }
 0x1a0   :  { %v1815_v34 = vmax.f32 %v1751_v63, 0.0  ;;  %v3841_v63 = vld [vmem:[%s4093_s4 + $0xa0] sm:$0xff]  }
 0x1a1   :  { %v1560_v61 = vadd.f32 %v3597_v5, %v1489_v38  ;;  %v1490_v1 = vmul.f32 %v3585_v57, %v1333_v42  ;;  %v2524_v38 = vunpack.c.l.bf16 %v2752_v51 }
 0x1a2   :  { %v2657_v17 = vpack.c.bf16 %v1815_v34, %v1814_v58 }
 0x1a3   :  { %v1752_v23 = vadd.f32 %v2516_v3, %v1560_v61  ;;  %v1561_v10 = vadd.f32 %v3597_v5, %v1490_v1 }
 0x1a4   :  { %2780 = vst [vmem:[%s4095_s5 + $0x80] sm:$0xff] %v2657_v17   ;;  %v1048_v13 = vpop.f32.mrb[72].mxu0  ;;  %v3816_v55 = vpop.f32.mrb[72].mxu1  ;;  %v2525_v17 = vunpack.c.h.bf16 %v2752_v51 }
 0x1a5   :  { %v1753_v49 = vadd.f32 %v2517_v31, %v1561_v10  ;;  %v1338_v18 = vadd.f32 %v1337_v15, %v1048_v13  ;;  %v1050_v21 = vpop.f32.mrb[73].mxu0  ;;  %v3818_v62 = vpop.f32.mrb[73].mxu1  ;;  %v1816_v11 = vmax.f32 %v1752_v23, 0.0  ;;  %v3861_v31 = vld [vmem:[%s4093_s4 + $0xa8] sm:$0xff]   ;;  %v2528_v23 = vunpack.c.l.bf16 %v3841_v63 }
 0x1a6   :  { %v1051_v22 = vpop.f32.mrb[74].mxu0  ;;  %v3820_v45 = vpop.f32.mrb[74].mxu1  ;;  %v2548_v10 = vunpack.c.l.bf16 %v3846_v41  ;;  %v2533_v51 = vunpack.c.h.bf16 %v3861_v31 }
 0x1a7   :  { %v1817_v25 = vmax.f32 %v1753_v49, 0.0  ;;  %v1491_v43 = vmul.f32 %v3585_v57, %v1338_v18  ;;  %v1341_v59 = vadd.f32 %v1340_v54, %v1051_v22  ;;  %v1053_v53 = vpop.f32.mrb[75].mxu0  ;;  %v3823_v27 = vpop.f32.mrb[75].mxu1  ;;  %v2529_v22 = vunpack.c.h.bf16 %v3841_v63 }
 0x1a9   :  { %v2662_v14 = vpack.c.bf16 %v1817_v25, %v1816_v11  ;;  %v1562_v26 = vadd.f32 %v3597_v5, %v1491_v43  ;;  %v1492_v29 = vmul.f32 %v3585_v57, %v1341_v59  ;;  %v2549_v11 = vunpack.c.h.bf16 %v3846_v41  ;;  %v3890_v59 = vld [vmem:[%s4093_s4 + $0xe8] sm:$0xff]  }
 0x1aa   :  { %v2532_v43 = vunpack.c.l.bf16 %v3861_v31 }
 0x1ab   :  { %2781 = vst [vmem:[%s4095_s5 + $0x88] sm:$0xff] %v2662_v14   ;;  %v1754_v6 = vadd.f32 %v2520_v46, %v1562_v26  ;;  %v1563_v19 = vadd.f32 %v3597_v5, %v1492_v29  ;;  %v3881_v46 = vld [vmem:[%s4093_s4 + $0xb0] sm:$0xff]   ;;  %v2556_v26 = vunpack.c.l.bf16 %v3868_v2 }
 0x1ac   :  { %v1056_v9 = vpop.f32.mrb[76].mxu0  ;;  %v3834_v30 = vpop.f32.mrb[76].mxu1 }
 0x1ad   :  { %v1755_v33 = vadd.f32 %v2521_v35, %v1563_v19  ;;  %v1346_v37 = vadd.f32 %v2872_v47, %v1056_v9  ;;  %v1058_v39 = vpop.f32.mrb[77].mxu0  ;;  %v3836_v15 = vpop.f32.mrb[77].mxu1  ;;  %v3853_v47 = vld [vmem:[%s4093_s4 + $0xc0] sm:$0xff]   ;;  %v1818_v50 = vmax.f32 %v1754_v6, 0.0  ;;  %v2557_v9 = vunpack.c.h.bf16 %v3868_v2 }
 0x1ae   :  { %v1059_v3 = vpop.f32.mrb[78].mxu0  ;;  %v3848_v42 = vpop.f32.mrb[78].mxu1  ;;  %v2544_v21 = vunpack.c.l.bf16 %v3853_v47  ;;  %v2545_v25 = vunpack.c.h.bf16 %v3853_v47  ;;  %v3901_v35 = vld [vmem:[%s4093_s4 + $0xe0] sm:$0xff]  }
 0x1af   :  { %v1819_v54 = vmax.f32 %v1755_v33, 0.0  ;;  %v1493_v58 = vmul.f32 %v3585_v57, %v1346_v37  ;;  %v1349_v34 = vadd.f32 %v2873_v7, %v1059_v3  ;;  %v1061_v61 = vpop.f32.mrb[79].mxu0  ;;  %v3856_v1 = vpop.f32.mrb[79].mxu1  ;;  %v3873_v7 = vld [vmem:[%s4093_s4 + $0xd0] sm:$0xff]   ;;  %v2536_v37 = vunpack.c.l.bf16 %v3881_v46  ;;  %v3999_v2 = vld [vmem:[%s4092_s2] ss:$0 sm:$0xff] }
 0x1b0   :  { %v2552_v29 = vunpack.c.l.bf16 %v3873_v7 }
 0x1b1   :  { %v2667_v13 = vpack.c.bf16 %v1819_v54, %v1818_v50  ;;  %v1564_v49 = vadd.f32 %v3597_v5, %v1493_v58  ;;  %v1494_v18 = vmul.f32 %v3585_v57, %v1349_v34  ;;  %v2564_v54 = vunpack.c.l.bf16 %v3890_v59 }
 0x1b3   :  { %2782 = vst [vmem:[%s4095_s5 + $0x90] sm:$0xff] %v2667_v13   ;;  %v1756_v53 = vadd.f32 %v2524_v38, %v1564_v49  ;;  %v1565_v14 = vadd.f32 %v3597_v5, %v1494_v18  ;;  %v2560_v49 = vunpack.c.l.bf16 %v3901_v35 }
 0x1b4   :  { %v1064_v6 = vpop.f32.mrb[80].mxu0  ;;  %v2884_v19 = vpop.f32.mrb[80].mxu1 }
 0x1b5   :  { %v1757_v39 = vadd.f32 %v2525_v17, %v1565_v14  ;;  %v1354_v63 = vadd.f32 %v3818_v62, %v1064_v6  ;;  %v1394_v38 = vadd.f32 %v2884_v19, %v3526_v60  ;;  %v1066_v3 = vpop.f32.mrb[81].mxu0  ;;  %v1385_v50 = vpop.f32.mrb[81].mxu1  ;;  %v1820_v58 = vmax.f32 %v1756_v53, 0.0 }
 0x1b6   :  { %v1386_v34 = vadd.f32 %v1385_v50, %v3518_v52  ;;  %v1067_v61 = vpop.f32.mrb[82].mxu0  ;;  %v2885_v13 = vpop.f32.mrb[82].mxu1 }
 0x1b7   :  { %v1821_v33 = vmax.f32 %v1757_v39, 0.0  ;;  %v1495_v17 = vmul.f32 %v3585_v57, %v1354_v63  ;;  %v1505_v62 = vmul.f32 %v3585_v57, %v1394_v38  ;;  %v1357_v60 = vadd.f32 %v3823_v27, %v1067_v61  ;;  %v1069_v14 = vpop.f32.mrb[83].mxu0  ;;  %v1388_v6 = vpop.f32.mrb[83].mxu1  ;;  %v3923_v39 = vld [vmem:[%s4093_s4 + $0xb8] sm:$0xff]  }
 0x1b8   :  { %v1503_v19 = vmul.f32 %v3585_v57, %v1386_v34  ;;  %v1397_v53 = vadd.f32 %v2885_v13, %v3530_v0  ;;  %v1389_v52 = vadd.f32 %v1388_v6, %v3522_v56  ;;  %v3931_v0 = vld [vmem:[%s4093_s4 + $0xf8] sm:$0xff]  }
 0x1b9   :  { %v2672_v63 = vpack.c.bf16 %v1821_v33, %v1820_v58  ;;  %v1566_v38 = vadd.f32 %v3597_v5, %v1495_v17  ;;  %v1576_v27 = vadd.f32 %v3597_v5, %v1505_v62  ;;  %v1496_v50 = vmul.f32 %v3585_v57, %v1357_v60 }
 0x1ba   :  { %v1574_v56 = vadd.f32 %v3597_v5, %v1503_v19  ;;  %v1506_v34 = vmul.f32 %v3585_v57, %v1397_v53  ;;  %v1504_v61 = vmul.f32 %v3585_v57, %v1389_v52  ;;  %v2540_v62 = vunpack.c.l.bf16 %v3923_v39 }
 0x1bb   :  { %2783 = vst [vmem:[%s4095_s5 + $0x98] sm:$0xff] %v2672_v63   ;;  %v1758_v33 = vadd.f32 %v2528_v23, %v1566_v38  ;;  %v1768_v58 = vadd.f32 %v2548_v10, %v1576_v27  ;;  %v1567_v17 = vadd.f32 %v3597_v5, %v1496_v50  ;;  %v2572_v52 = vunpack.c.l.bf16 %v3931_v0 }
 0x1bc   :  { %v1766_v60 = vadd.f32 %v2544_v21, %v1574_v56  ;;  %v1577_v14 = vadd.f32 %v3597_v5, %v1506_v34  ;;  %v1575_v6 = vadd.f32 %v3597_v5, %v1504_v61  ;;  %v1072_v19 = vpop.f32.mrb[84].mxu0  ;;  %v2888_v53 = vpop.f32.mrb[84].mxu1 }
 0x1bd   :  { %v1822_v13 = vmax.f32 %v1758_v33, 0.0  ;;  %v1832_v3 = vmax.f32 %v1768_v58, 0.0  ;;  %v1759_v18 = vadd.f32 %v2529_v22, %v1567_v17  ;;  %v1362_v63 = vadd.f32 %v3816_v55, %v1072_v19  ;;  %v1074_v23 = vpop.f32.mrb[85].mxu0  ;;  %v1401_v10 = vpop.f32.mrb[85].mxu1 }
 0x1be   :  { %v1830_v38 = vmax.f32 %v1766_v60, 0.0  ;;  %v1769_v27 = vadd.f32 %v2549_v11, %v1577_v14  ;;  %v1767_v21 = vadd.f32 %v2545_v25, %v1575_v6  ;;  %v1410_v50 = vadd.f32 %v2888_v53, %v3542_v12  ;;  %v1075_v56 = vpop.f32.mrb[86].mxu0  ;;  %v2889_v34 = vpop.f32.mrb[86].mxu1 }
 0x1bf   :  { %v1823_v61 = vmax.f32 %v1759_v18, 0.0  ;;  %v1497_v33 = vmul.f32 %v3585_v57, %v1362_v63  ;;  %v1402_v22 = vadd.f32 %v1401_v10, %v3534_v4  ;;  %v1365_v55 = vadd.f32 %v3820_v45, %v1075_v56  ;;  %v1077_v58 = vpop.f32.mrb[87].mxu0  ;;  %v1404_v17 = vpop.f32.mrb[87].mxu1  ;;  %v3962_v4 = vld [vmem:[%s4093_s4 + $0xf0] sm:$0xff]  }
 0x1c0   :  { %v1833_v60 = vmax.f32 %v1769_v27, 0.0  ;;  %v1831_v19 = vmax.f32 %v1767_v21, 0.0  ;;  %v1509_v41 = vmul.f32 %v3585_v57, %v1410_v50  ;;  %v1413_v47 = vadd.f32 %v2889_v34, %v3546_v16 }
 0x1c1   :  { %v2677_v11 = vpack.c.bf16 %v1823_v61, %v1822_v13  ;;  %v1568_v12 = vadd.f32 %v3597_v5, %v1497_v33  ;;  %v1507_v25 = vmul.f32 %v3585_v57, %v1402_v22  ;;  %v1498_v18 = vmul.f32 %v3585_v57, %v1365_v55 }
 0x1c2   :  { %v2702_v45 = vpack.c.bf16 %v1833_v60, %v1832_v3  ;;  %v2697_v14 = vpack.c.bf16 %v1831_v19, %v1830_v38  ;;  %v1580_v6 = vadd.f32 %v3597_v5, %v1509_v41  ;;  %v1510_v53 = vmul.f32 %v3585_v57, %v1413_v47 }
 0x1c3   :  { %2784 = vst [vmem:[%s4095_s5 + $0xa0] sm:$0xff] %v2677_v11   ;;  %v1760_v16 = vadd.f32 %v2532_v43, %v1568_v12  ;;  %v1578_v13 = vadd.f32 %v3597_v5, %v1507_v25  ;;  %v1569_v63 = vadd.f32 %v3597_v5, %v1498_v18  ;;  %v1405_v23 = vadd.f32 %v1404_v17, %v3538_v8 }
 0x1c4   :  { %2789 = vst [vmem:[%s4095_s5 + $0xc8] sm:$0xff] %v2702_v45   ;;  %2788 = vst [vmem:[%s4095_s5 + $0xc0] sm:$0xff] %v2697_v14   ;;  %v1772_v3 = vadd.f32 %v2556_v26, %v1580_v6  ;;  %v1581_v10 = vadd.f32 %v3597_v5, %v1510_v53  ;;  %v1080_v43 = vpop.f32.mrb[88].mxu0  ;;  %v2892_v38 = vpop.f32.mrb[88].mxu1  ;;  %v2568_v27 = vunpack.c.l.bf16 %v3962_v4  ;;  %v2541_v21 = vunpack.c.h.bf16 %v3923_v39  ;;  %v4011_v45 = vld [vmem:[%s4094_s3] ss:$0 sm:$0xff] }
 0x1c5   :  { %v1824_v8 = vmax.f32 %v1760_v16, 0.0  ;;  %v1770_v50 = vadd.f32 %v2552_v29, %v1578_v13  ;;  %v1761_v56 = vadd.f32 %v2533_v51, %v1569_v63  ;;  %v1508_v34 = vmul.f32 %v3585_v57, %v1405_v23  ;;  %v1082_v61 = vpop.f32.mrb[89].mxu0  ;;  %v1417_v33 = vpop.f32.mrb[89].mxu1 }
 0x1c6   :  { %v1836_v26 = vmax.f32 %v1772_v3, 0.0  ;;  %v1773_v22 = vadd.f32 %v2557_v9, %v1581_v10  ;;  %v1370_v55 = vadd.f32 %v3836_v15, %v1080_v43  ;;  %v1426_v58 = vadd.f32 %v2892_v38, %v3558_v28  ;;  %v1083_v17 = vpop.f32.mrb[90].mxu0  ;;  %v2893_v60 = vpop.f32.mrb[90].mxu1 }
 0x1c7   :  { %v1834_v19 = vmax.f32 %v1770_v50, 0.0  ;;  %v1825_v41 = vmax.f32 %v1761_v56, 0.0  ;;  %v1579_v29 = vadd.f32 %v3597_v5, %v1508_v34  ;;  %v1418_v31 = vadd.f32 %v1417_v33, %v3550_v20  ;;  %v1085_v51 = vpop.f32.mrb[91].mxu0  ;;  %v1420_v57 = vpop.f32.mrb[91].mxu1 }
 0x1c8   :  { %v1837_v47 = vmax.f32 %v1773_v22, 0.0  ;;  %v1499_v15 = vmul.f32 %v3999_v2, %v1370_v55  ;;  %v1513_v28 = vmul.f32 %v3999_v2, %v1426_v58  ;;  %v1373_v9 = vadd.f32 %v3856_v1, %v1083_v17 }
 0x1c9   :  { %v2682_v11 = vpack.c.bf16 %v1825_v41, %v1824_v8  ;;  %v4096_v12 = vunpack.c.h.bf16 %v3873_v7  ;;  %v1511_v20 = vmul.f32 %v3999_v2, %v1418_v31  ;;  %v1429_v25 = vadd.f32 %v2893_v60, %v3562_v32 }
 0x1ca   :  { %v2712_v18 = vpack.c.bf16 %v1837_v47, %v1836_v26  ;;  %v1570_v14 = vadd.f32 %v4011_v45, %v1499_v15  ;;  %v1584_v6 = vadd.f32 %v4011_v45, %v1513_v28  ;;  %v1500_v1 = vmul.f32 %v3999_v2, %v1373_v9 }
 0x1cb   :  { %v1771_v5 = vadd.f32 %v4096_v12, %v1579_v29  ;;  %2785 = vst [vmem:[%s4095_s5 + $0xa8] sm:$0xff] %v2682_v11   ;;  %v1582_v53 = vadd.f32 %v4011_v45, %v1511_v20  ;;  %v1514_v32 = vmul.f32 %v3999_v2, %v1429_v25  ;;  %v1421_v16 = vadd.f32 %v1420_v57, %v3554_v24 }
 0x1cc   :  { %2791 = vst [vmem:[%s4095_s5 + $0xd8] sm:$0xff] %v2712_v18   ;;  %v1762_v13 = vadd.f32 %v2536_v37, %v1570_v14  ;;  %v1776_v63 = vadd.f32 %v2564_v54, %v1584_v6  ;;  %v1571_v23 = vadd.f32 %v4011_v45, %v1500_v1  ;;  %v1088_v3 = vpop.f32.mrb[92].mxu0  ;;  %v2896_v10 = vpop.f32.mrb[92].mxu1  ;;  %v2573_v43 = vunpack.c.h.bf16 %v3931_v0 }
 0x1cd   :  { %v1835_v7 = vmax.f32 %v1771_v5, 0.0  ;;  %v1774_v24 = vadd.f32 %v2560_v49, %v1582_v53  ;;  %v1585_v8 = vadd.f32 %v4011_v45, %v1514_v32  ;;  %v1512_v50 = vmul.f32 %v3999_v2, %v1421_v16  ;;  %v1090_v56 = vpop.f32.mrb[93].mxu0  ;;  %v1433_v34 = vpop.f32.mrb[93].mxu1 }
 0x1ce   :  { %v1826_v37 = vmax.f32 %v1762_v13, 0.0  ;;  %v1840_v61 = vmax.f32 %v1776_v63, 0.0  ;;  %v4097_v54 = vunpack.c.h.bf16 %v3881_v46  ;;  %v1378_v26 = vadd.f32 %v3834_v30, %v1088_v3  ;;  %v1091_v22 = vpop.f32.mrb[94].mxu0  ;;  %v2897_v55 = vpop.f32.mrb[94].mxu1 }
 0x1cf   :  { %v2707_v38 = vpack.c.bf16 %v1835_v7, %v1834_v19  ;;  %v1838_v49 = vmax.f32 %v1774_v24, 0.0  ;;  %v4098_v58 = vunpack.c.h.bf16 %v3890_v59  ;;  %v1583_v60 = vadd.f32 %v4011_v45, %v1512_v50  ;;  %v1093_v41 = vpop.f32.mrb[95].mxu0  ;;  %v1436_v29 = vpop.f32.mrb[95].mxu1 }
 0x1d0   :  { %v1763_v33 = vadd.f32 %v4097_v54, %v1571_v23  ;;  %v1442_v19 = vadd.f32 %v2896_v10, %v3574_v44  ;;  %v1501_v31 = vmul.f32 %v3999_v2, %v1378_v26  ;;  %v1434_v30 = vadd.f32 %v1433_v34, %v3566_v36 }
 0x1d1   :  { %2790 = vst [vmem:[%s4095_s5 + $0xd0] sm:$0xff] %v2707_v38   ;;  %v1777_v17 = vadd.f32 %v4098_v58, %v1585_v8  ;;  %v1381_v51 = vadd.f32 %v3848_v42, %v1091_v22  ;;  %v4099_v47 = vunpack.c.h.bf16 %v3901_v35  ;;  %v1445_v28 = vadd.f32 %v2897_v55, %v3578_v48 }
 0x1d2   :  { %v1827_v46 = vmax.f32 %v1763_v33, 0.0  ;;  %v1517_v59 = vmul.f32 %v3999_v2, %v1442_v19  ;;  %v1572_v44 = vadd.f32 %v4011_v45, %v1501_v31  ;;  %v1515_v11 = vmul.f32 %v3999_v2, %v1434_v30 }
 0x1d3   :  { %v1841_v57 = vmax.f32 %v1777_v17, 0.0  ;;  %v1775_v15 = vadd.f32 %v4099_v47, %v1583_v60  ;;  %v1502_v12 = vmul.f32 %v3999_v2, %v1381_v51  ;;  %v1518_v42 = vmul.f32 %v3999_v2, %v1445_v28 }
 0x1d4   :  { %v2687_v9 = vpack.c.bf16 %v1827_v46, %v1826_v37  ;;  %v1588_v36 = vadd.f32 %v4011_v45, %v1517_v59  ;;  %v1764_v48 = vadd.f32 %v2540_v62, %v1572_v44  ;;  %v1586_v35 = vadd.f32 %v4011_v45, %v1515_v11 }
 0x1d5   :  { %v2722_v5 = vpack.c.bf16 %v1841_v57, %v1840_v61  ;;  %v1839_v20 = vmax.f32 %v1775_v15, 0.0  ;;  %v1573_v25 = vadd.f32 %v4011_v45, %v1502_v12  ;;  %v1437_v18 = vadd.f32 %v1436_v29, %v3570_v40 }
 0x1d6   :  { %2786 = vst [vmem:[%s4095_s5 + $0xb0] sm:$0xff] %v2687_v9   ;;  %v1780_v6 = vadd.f32 %v2572_v52, %v1588_v36  ;;  %v1589_v1 = vadd.f32 %v4011_v45, %v1518_v42  ;;  %v2569_v53 = vunpack.c.h.bf16 %v3962_v4  ;;  %v1828_v32 = vmax.f32 %v1764_v48, 0.0 }
 0x1d7   :  { %2793 = vst [vmem:[%s4095_s5 + $0xe8] sm:$0xff] %v2722_v5   ;;  %v2717_v14 = vpack.c.bf16 %v1839_v20, %v1838_v49  ;;  %v1765_v7 = vadd.f32 %v2541_v21, %v1573_v25  ;;  %v1516_v62 = vmul.f32 %v3999_v2, %v1437_v18  ;;  %v1778_v16 = vadd.f32 %v2568_v27, %v1586_v35 }
 0x1d8   :  { %v1781_v40 = vadd.f32 %v2573_v43, %v1589_v1  ;;  %v1844_v13 = vmax.f32 %v1780_v6, 0.0 }
 0x1d9   :  { %2792 = vst [vmem:[%s4095_s5 + $0xe0] sm:$0xff] %v2717_v14   ;;  %v1829_v0 = vmax.f32 %v1765_v7, 0.0  ;;  %v1587_v52 = vadd.f32 %v4011_v45, %v1516_v62  ;;  %v1842_v2 = vmax.f32 %v1778_v16, 0.0 }
 0x1da   :  { %v1845_v63 = vmax.f32 %v1781_v40, 0.0 }
 0x1db   :  { %v2692_v39 = vpack.c.bf16 %v1829_v0, %v1828_v32  ;;  %v1779_v21 = vadd.f32 %v2569_v53, %v1587_v52 }
 0x1dc   :  { %v2732_v23 = vpack.c.bf16 %v1845_v63, %v1844_v13 }
 0x1dd   :  { %2787 = vst [vmem:[%s4095_s5 + $0xb8] sm:$0xff] %v2692_v39   ;;  %v1843_v3 = vmax.f32 %v1779_v21, 0.0 }
 0x1de   :  { %2795 = vst [vmem:[%s4095_s5 + $0xf8] sm:$0xff] %v2732_v23  }
 0x1df   :  { %v2727_v4 = vpack.c.bf16 %v1843_v3, %v1842_v2 }
 0x1e1   :  { %2794 = vst [vmem:[%s4095_s5 + $0xf0] sm:$0xff] %v2727_v4  }

// kernel: resnet20_forward.32
= control target key start
LH: loop header
LB: loop body
LE: loop exit
PB: predicated region body
PF: predicated region fallthrough
CT: control target
= control target key end

     0   :  { %v2723_v0 = vmov 0   ;;  %vm770_vm0 = vcmask 261120   ;;  %s3524_s1 = inlined_call_operand.vmem [shape: bf16[288,128], index: 1, kind: input, shape index: {}]   ;;  %s3525_s0 = inlined_call_operand.vmem [shape: bf16[512,288], index: 0, kind: input, shape index: {}]   ;;  %s3526_s2 = inlined_call_operand.vmem [shape: f32[1,128], index: 2, kind: input, shape index: {}]   ;;  %s3527_s3 = inlined_call_operand.vmem [shape: f32[1,128], index: 3, kind: input, shape index: {}]   ;;  %s3528_s4 = inlined_call_operand.vmem [shape: bf16[512,128], index: 4, kind: output, shape index: {}]  }
   0x1   :  { %867 = vmatprep.subr.bf16.mxu0 %v2723_v0  ;;  %2544 = vmatprep.subr.bf16.mxu1 %v2723_v0  ;;  %v2577_v1 = vld [vmem:[%s3524_s1] sm:$0xff]   ;;  %v2578_v2 = vld [vmem:[%s3524_s1 + $0x8] sm:$0xff]   ;;  %v2579_v3 = vld [vmem:[%s3524_s1 + $0x10] sm:$0xff]  }
   0x2   :  { %868 = vmatpush1.bf16.msra.mxu0 %v2577_v1  ;;  %2560 = vmatpush1.bf16.msra.mxu1 %v2577_v1  ;;  %v2580_v4 = vld [vmem:[%s3524_s1 + $0x18] sm:$0xff]   ;;  %v2581_v5 = vld [vmem:[%s3524_s1 + $0x20] sm:$0xff]   ;;  %v2582_v7 = vld [vmem:[%s3524_s1 + $0x28] sm:$0xff]  }
   0x3   :  { %869 = vmatprep.subr.bf16.mxu0 %v2723_v0  ;;  %2545 = vmatprep.subr.bf16.mxu1 %v2723_v0  ;;  %v2595_v6 = vld [vmem:[%s3525_s0 + $0x4] ss:$12 sps:$4 sm:$0xff]   ;;  %v2584_v10 = vld [vmem:[%s3524_s1 + $0x38] sm:$0xff]   ;;  %v2586_v12 = vld [vmem:[%s3524_s1 + $0x48] sm:$0xff]  }
   0x4   :  { %v2598_v8 = vld [vmem:[%s3525_s0 + $0x244] ss:$12 sps:$4 sm:$0xff]   ;;  %899 = vmatprep.mubr.bf16.mxu0 %v2595_v6  ;;  %v2588_v14 = vld [vmem:[%s3524_s1 + $0x58] sm:$0xff]   ;;  %v2590_v16 = vld [vmem:[%s3524_s1 + $0x68] sm:$0xff]  }
   0x5   :  { %1091 = vmatprep.mubr.bf16.mxu1 %v2598_v8  ;;  %v2583_v9 = vld [vmem:[%s3524_s1 + $0x30] sm:$0xff]   ;;  %v2585_v11 = vld [vmem:[%s3524_s1 + $0x40] sm:$0xff]   ;;  %v2592_v18 = vld [vmem:[%s3524_s1 + $0x78] sm:$0xff]  }
   0x6   :  { %870 = vmatpush1.bf16.msra.mxu0 %v2578_v2  ;;  %2561 = vmatpush1.bf16.msra.mxu1 %v2578_v2  ;;  %v2587_v13 = vld [vmem:[%s3524_s1 + $0x50] sm:$0xff]   ;;  %v2589_v15 = vld [vmem:[%s3524_s1 + $0x60] sm:$0xff]   ;;  %v2600_v22 = vld [vmem:[%s3525_s0 + $0x1c] ss:$12 sps:$4 sm:$0xff]  }
   0x7   :  { %871 = vmatprep.subr.bf16.mxu0 %v2723_v0  ;;  %2546 = vmatprep.subr.bf16.mxu1 %v2723_v0  ;;  %v2591_v17 = vld [vmem:[%s3524_s1 + $0x70] sm:$0xff]   ;;  %v2599_v19 = vld [vmem:[%s3524_s1 + $0x80] sm:$0xff]   ;;  %v2602_v23 = vld [vmem:[%s3525_s0 + $0x25c] ss:$12 sps:$4 sm:$0xff]  }
   0x8   :  { %v2593_v20 = vld [vmem:[%s3525_s0] ss:$12 sps:$4 sm:$0xff]   ;;  %v2604_v25 = vld [vmem:[%s3525_s0 + $0x18] ss:$12 sps:$4 sm:$0xff]   ;;  %v2610_v29 = vld [vmem:[%s3525_s0 + $0x30] ss:$12 sps:$4 sm:$0xff]  }
   0x9   :  { %v2596_v21 = vld [vmem:[%s3525_s0 + $0x240] ss:$12 sps:$4 sm:$0xff]   ;;  %v2605_v26 = vld [vmem:[%s3525_s0 + $0x258] ss:$12 sps:$4 sm:$0xff]   ;;  %v2611_v30 = vld [vmem:[%s3525_s0 + $0x270] ss:$12 sps:$4 sm:$0xff]  }
   0xa   :  { %872 = vmatpush1.bf16.msra.mxu0 %v2579_v3  ;;  %2562 = vmatpush1.bf16.msra.mxu1 %v2579_v3  ;;  %v2624_v24 = vld [vmem:[%s3524_s1 + $0x88] sm:$0xff]   ;;  %v2606_v27 = vld [vmem:[%s3525_s0 + $0x34] ss:$12 sps:$4 sm:$0xff]   ;;  %v2618_v35 = vld [vmem:[%s3525_s0 + $0x64] ss:$12 sps:$4 sm:$0xff]  }
   0xb   :  { %873 = vmatprep.subr.bf16.mxu0 %v2723_v0  ;;  %2547 = vmatprep.subr.bf16.mxu1 %v2723_v0  ;;  %v2608_v28 = vld [vmem:[%s3525_s0 + $0x274] ss:$12 sps:$4 sm:$0xff]   ;;  %v2612_v31 = vld [vmem:[%s3525_s0 + $0x4c] ss:$12 sps:$4 sm:$0xff]   ;;  %v2620_v36 = vld [vmem:[%s3525_s0 + $0x2a4] ss:$12 sps:$4 sm:$0xff]  }
   0xc   :  { %v2614_v32 = vld [vmem:[%s3525_s0 + $0x28c] ss:$12 sps:$4 sm:$0xff]   ;;  %v2616_v33 = vld [vmem:[%s3525_s0 + $0x48] ss:$12 sps:$4 sm:$0xff]   ;;  %v2635_v45 = vld [vmem:[%s3525_s0 + $0x90] ss:$12 sps:$4 sm:$0xff]  }
   0xd   :  { %v2617_v34 = vld [vmem:[%s3525_s0 + $0x288] ss:$12 sps:$4 sm:$0xff]   ;;  %v2622_v37 = vld [vmem:[%s3525_s0 + $0x60] ss:$12 sps:$4 sm:$0xff]   ;;  %v2629_v41 = vld [vmem:[%s3525_s0 + $0x78] ss:$12 sps:$4 sm:$0xff]  }
   0xe   :  { %874 = vmatpush1.bf16.msra.mxu0 %v2580_v4  ;;  %2563 = vmatpush1.bf16.msra.mxu1 %v2580_v4  ;;  %v2623_v38 = vld [vmem:[%s3525_s0 + $0x2a0] ss:$12 sps:$4 sm:$0xff]   ;;  %v2625_v39 = vld [vmem:[%s3525_s0 + $0x7c] ss:$12 sps:$4 sm:$0xff]   ;;  %v2630_v42 = vld [vmem:[%s3525_s0 + $0x2b8] ss:$12 sps:$4 sm:$0xff]  }
   0xf   :  { %875 = vmatprep.subr.bf16.mxu0 %v2723_v0  ;;  %2548 = vmatprep.subr.bf16.mxu1 %v2723_v0  ;;  %v2627_v40 = vld [vmem:[%s3525_s0 + $0x2bc] ss:$12 sps:$4 sm:$0xff]   ;;  %v2631_v43 = vld [vmem:[%s3525_s0 + $0x94] ss:$12 sps:$4 sm:$0xff]   ;;  %v2637_v47 = vld [vmem:[%s3525_s0 + $0xac] ss:$12 sps:$4 sm:$0xff]  }
  0x10   :  { %v2633_v44 = vld [vmem:[%s3525_s0 + $0x2d4] ss:$12 sps:$4 sm:$0xff]   ;;  %v2636_v46 = vld [vmem:[%s3525_s0 + $0x2d0] ss:$12 sps:$4 sm:$0xff]   ;;  %v2639_v48 = vld [vmem:[%s3525_s0 + $0x2ec] ss:$12 sps:$4 sm:$0xff]  }
  0x11   :  { %v2641_v49 = vld [vmem:[%s3525_s0 + $0xa8] ss:$12 sps:$4 sm:$0xff]   ;;  %v2643_v51 = vld [vmem:[%s3525_s0 + $0xc4] ss:$12 sps:$4 sm:$0xff]   ;;  %v2646_v53 = vld [vmem:[%s3525_s0 + $0xc0] ss:$12 sps:$4 sm:$0xff]  }
  0x12   :  { %876 = vmatpush1.bf16.msra.mxu0 %v2581_v5  ;;  %2564 = vmatpush1.bf16.msra.mxu1 %v2581_v5  ;;  %v2642_v50 = vld [vmem:[%s3525_s0 + $0x2e8] ss:$12 sps:$4 sm:$0xff]   ;;  %v2647_v54 = vld [vmem:[%s3525_s0 + $0x20] ss:$12 sps:$4 sm:$0xff]   ;;  %v2650_v56 = vld [vmem:[%s3525_s0 + $0x38] ss:$12 sps:$4 sm:$0xff]  }
  0x13   :  { %877 = vmatprep.subr.bf16.mxu0 %v2723_v0  ;;  %2549 = vmatprep.subr.bf16.mxu1 %v2723_v0  ;;  %v2645_v52 = vld [vmem:[%s3525_s0 + $0x8] ss:$12 sps:$4 sm:$0xff]   ;;  %v2651_v57 = vld [vmem:[%s3525_s0 + $0xd8] ss:$12 sps:$4 sm:$0xff]   ;;  %v2652_v58 = vld [vmem:[%s3525_s0 + $0x50] ss:$12 sps:$4 sm:$0xff]  }
  0x14   :  { %v2648_v55 = vld [vmem:[%s3525_s0 + $0xdc] ss:$12 sps:$4 sm:$0xff]   ;;  %v2653_v59 = vld [vmem:[%s3525_s0 + $0xf4] ss:$12 sps:$4 sm:$0xff]   ;;  %v2658_v63 = vld [vmem:[%s3525_s0 + $0x10c] ss:$12 sps:$4 sm:$0xff]  }
  0x15   :  { %v2655_v60 = vld [vmem:[%s3525_s0 + $0x68] ss:$12 sps:$4 sm:$0xff]   ;;  %v2656_v61 = vld [vmem:[%s3525_s0 + $0xf0] ss:$12 sps:$4 sm:$0xff]   ;;  %v2657_v62 = vld [vmem:[%s3525_s0 + $0x80] ss:$12 sps:$4 sm:$0xff]  }
  0x16   :  { %878 = vmatpush1.bf16.msra.mxu0 %v2582_v7  ;;  %2565 = vmatpush1.bf16.msra.mxu1 %v2582_v7  ;;  %v2661_v1 = vld [vmem:[%s3525_s0 + $0x108] ss:$12 sps:$4 sm:$0xff]   ;;  %v2662_v2 = vld [vmem:[%s3525_s0 + $0xb0] ss:$12 sps:$4 sm:$0xff]   ;;  %v2666_v5 = vld [vmem:[%s3525_s0 + $0x120] ss:$12 sps:$4 sm:$0xff]  }
  0x17   :  { %879 = vmatprep.subr.bf16.mxu0 %v2723_v0  ;;  %2550 = vmatprep.subr.bf16.mxu1 %v2723_v0  ;;  %v2663_v3 = vld [vmem:[%s3525_s0 + $0x124] ss:$12 sps:$4 sm:$0xff]   ;;  %v2665_v4 = vld [vmem:[%s3525_s0 + $0xc8] ss:$12 sps:$4 sm:$0xff]   ;;  %v2667_v6 = vld [vmem:[%s3525_s0 + $0xe0] ss:$12 sps:$4 sm:$0xff]  }
  0x18   :  { %v2668_v7 = vld [vmem:[%s3525_s0 + $0x13c] ss:$12 sps:$4 sm:$0xff]   ;;  %v2670_v8 = vld [vmem:[%s3525_s0 + $0xf8] ss:$12 sps:$4 sm:$0xff]  }
  0x1a   :  { %880 = vmatpush1.bf16.msra.mxu0 %v2583_v9  ;;  %2566 = vmatpush1.bf16.msra.mxu1 %v2583_v9  ;;  %v2671_v9 = vld [vmem:[%s3525_s0 + $0x138] ss:$12 sps:$4 sm:$0xff]  }
  0x1b   :  { %881 = vmatprep.subr.bf16.mxu0 %v2723_v0  ;;  %2551 = vmatprep.subr.bf16.mxu1 %v2723_v0 }
  0x1e   :  { %882 = vmatpush1.bf16.msra.mxu0 %v2584_v10  ;;  %2567 = vmatpush1.bf16.msra.mxu1 %v2584_v10  ;;  %v2672_v10 = vld [vmem:[%s3525_s0 + $0x110] ss:$12 sps:$4 sm:$0xff]  }
  0x1f   :  { %883 = vmatprep.subr.bf16.mxu0 %v2723_v0  ;;  %2552 = vmatprep.subr.bf16.mxu1 %v2723_v0 }
  0x22   :  { %884 = vmatpush1.bf16.msra.mxu0 %v2585_v11  ;;  %2568 = vmatpush1.bf16.msra.mxu1 %v2585_v11  ;;  %v2673_v11 = vld [vmem:[%s3525_s0 + $0x154] ss:$12 sps:$4 sm:$0xff]  }
  0x23   :  { %885 = vmatprep.subr.bf16.mxu0 %v2723_v0  ;;  %2553 = vmatprep.subr.bf16.mxu1 %v2723_v0 }
  0x26   :  { %886 = vmatpush1.bf16.msra.mxu0 %v2586_v12  ;;  %2569 = vmatpush1.bf16.msra.mxu1 %v2586_v12  ;;  %v2675_v12 = vld [vmem:[%s3525_s0 + $0x128] ss:$12 sps:$4 sm:$0xff]  }
  0x27   :  { %887 = vmatprep.subr.bf16.mxu0 %v2723_v0  ;;  %2554 = vmatprep.subr.bf16.mxu1 %v2723_v0 }
  0x2a   :  { %888 = vmatpush1.bf16.msra.mxu0 %v2587_v13  ;;  %2570 = vmatpush1.bf16.msra.mxu1 %v2587_v13  ;;  %v2676_v13 = vld [vmem:[%s3525_s0 + $0x150] ss:$12 sps:$4 sm:$0xff]  }
  0x2b   :  { %889 = vmatprep.subr.bf16.mxu0 %v2723_v0  ;;  %2555 = vmatprep.subr.bf16.mxu1 %v2723_v0 }
  0x2e   :  { %890 = vmatpush1.bf16.msra.mxu0 %v2588_v14  ;;  %2571 = vmatpush1.bf16.msra.mxu1 %v2588_v14  ;;  %v2677_v14 = vld [vmem:[%s3525_s0 + $0x140] ss:$12 sps:$4 sm:$0xff]  }
  0x2f   :  { %891 = vmatprep.subr.bf16.mxu0 %v2723_v0  ;;  %2556 = vmatprep.subr.bf16.mxu1 %v2723_v0 }
  0x32   :  { %892 = vmatpush1.bf16.msra.mxu0 %v2589_v15  ;;  %2572 = vmatpush1.bf16.msra.mxu1 %v2589_v15  ;;  %v2678_v15 = vld [vmem:[%s3525_s0 + $0x16c] ss:$12 sps:$4 sm:$0xff]  }
  0x33   :  { %893 = vmatprep.subr.bf16.mxu0 %v2723_v0  ;;  %2557 = vmatprep.subr.bf16.mxu1 %v2723_v0 }
  0x36   :  { %894 = vmatpush1.bf16.msra.mxu0 %v2590_v16  ;;  %2573 = vmatpush1.bf16.msra.mxu1 %v2590_v16  ;;  %v2680_v16 = vld [vmem:[%s3525_s0 + $0x158] ss:$12 sps:$4 sm:$0xff]  }
  0x37   :  { %895 = vmatprep.subr.bf16.mxu0 %v2723_v0  ;;  %2558 = vmatprep.subr.bf16.mxu1 %v2723_v0 }
  0x3a   :  { %896 = vmatpush1.bf16.msra.mxu0 %v2591_v17  ;;  %2574 = vmatpush1.bf16.msra.mxu1 %v2591_v17  ;;  %v2681_v17 = vld [vmem:[%s3525_s0 + $0x168] ss:$12 sps:$4 sm:$0xff]  }
  0x3b   :  { %897 = vmatprep.subr.bf16.mxu0 %v2723_v0  ;;  %2559 = vmatprep.subr.bf16.mxu1 %v2723_v0  ;;  %v2660_v0 = vld [vmem:[%s3525_s0 + $0x98] ss:$12 sps:$4 sm:$0xff]  }
  0x3e   :  { %898 = vmatpush1.bf16.msra.mxu0 %v2592_v18  ;;  %2575 = vmatpush1.bf16.msra.mxu1 %v2592_v18  ;;  %v2682_v18 = vld [vmem:[%s3525_s0 + $0x170] ss:$12 sps:$4 sm:$0xff]  }
  0x3f   :  { %2476 = vmatprep.subr.bf16.mxu1 %v2599_v19 }
  0x41   :  { %900 = vmatmul.mubr.bf16.vlgmr.msra.gmra.mrb[0].mxu0 %v2593_v20  ;;  %1092 = vmatmul.mubr.bf16.vlgmr.msra.gmra.mrb[0].mxu1 %v2596_v21  ;;  %v2685_v20 = vld [vmem:[%s3525_s0 + $0x188] ss:$12 sps:$4 sm:$0xff]   ;;  %v2686_v21 = vld [vmem:[%s3525_s0 + $0x180] ss:$12 sps:$4 sm:$0xff]  }
  0x42   :  { %2477 = vmatpush3.bf16.msra.mxu1 %v2599_v19  ;;  %907 = vmatprep.mubr.bf16.mxu0 %v2600_v22  ;;  %v2683_v19 = vld [vmem:[%s3525_s0 + $0x184] ss:$12 sps:$4 sm:$0xff]   ;;  %v2687_v22 = vld [vmem:[%s3525_s0 + $0x1a0] ss:$12 sps:$4 sm:$0xff]  }
  0x43   :  { %1099 = vmatprep.mubr.bf16.mxu1 %v2602_v23  ;;  %2478 = vmatprep.subr.bf16.mxu1 %v2624_v24  ;;  %v2688_v23 = vld [vmem:[%s3525_s0 + $0x19c] ss:$12 sps:$4 sm:$0xff]  }
  0x46   :  { %2479 = vmatpush3.bf16.msra.mxu1 %v2624_v24  ;;  %v2690_v24 = vld [vmem:[%s3525_s0 + $0x1b8] ss:$12 sps:$4 sm:$0xff]  }
  0x49   :  { %908 = vmatmul.mubr.bf16.gmra.mrb[4].mxu0 %v2604_v25  ;;  %1100 = vmatmul.mubr.bf16.gmra.mrb[4].mxu1 %v2605_v26  ;;  %v2691_v25 = vld [vmem:[%s3525_s0 + $0x198] ss:$12 sps:$4 sm:$0xff]   ;;  %v2692_v26 = vld [vmem:[%s3525_s0 + $0x1d0] ss:$12 sps:$4 sm:$0xff]  }
  0x4a   :  { %915 = vmatprep.mubr.bf16.mxu0 %v2606_v27  ;;  %1107 = vmatprep.mubr.bf16.mxu1 %v2608_v28  ;;  %v2693_v27 = vld [vmem:[%s3525_s0 + $0x1b4] ss:$12 sps:$4 sm:$0xff]  }
  0x4b   :  { %v2695_v28 = vld [vmem:[%s3525_s0 + $0x1e8] ss:$12 sps:$4 sm:$0xff]  }
  0x51   :  { %916 = vmatmul.mubr.bf16.gmra.mrb[8].mxu0 %v2610_v29  ;;  %1108 = vmatmul.mubr.bf16.gmra.mrb[8].mxu1 %v2611_v30  ;;  %v2696_v29 = vld [vmem:[%s3525_s0 + $0x1b0] ss:$12 sps:$4 sm:$0xff]   ;;  %v2697_v30 = vld [vmem:[%s3525_s0 + $0x200] ss:$12 sps:$4 sm:$0xff]  }
  0x52   :  { %923 = vmatprep.mubr.bf16.mxu0 %v2612_v31  ;;  %1115 = vmatprep.mubr.bf16.mxu1 %v2614_v32  ;;  %v2698_v31 = vld [vmem:[%s3525_s0 + $0x1cc] ss:$12 sps:$4 sm:$0xff]  }
  0x53   :  { %v2700_v32 = vld [vmem:[%s3525_s0 + $0x218] ss:$12 sps:$4 sm:$0xff]  }
  0x59   :  { %924 = vmatmul.mubr.bf16.gmra.mrb[12].mxu0 %v2616_v33  ;;  %1116 = vmatmul.mubr.bf16.gmra.mrb[12].mxu1 %v2617_v34  ;;  %v2701_v33 = vld [vmem:[%s3525_s0 + $0x1c8] ss:$12 sps:$4 sm:$0xff]   ;;  %v2702_v34 = vld [vmem:[%s3525_s0 + $0x230] ss:$12 sps:$4 sm:$0xff]  }
  0x5a   :  { %931 = vmatprep.mubr.bf16.mxu0 %v2618_v35  ;;  %1123 = vmatprep.mubr.bf16.mxu1 %v2620_v36  ;;  %v2703_v35 = vld [vmem:[%s3525_s0 + $0x1e4] ss:$12 sps:$4 sm:$0xff]   ;;  %v2705_v36 = vld [vmem:[%s3525_s0 + $0x248] ss:$12 sps:$4 sm:$0xff]  }
  0x61   :  { %932 = vmatmul.mubr.bf16.gmra.mrb[16].mxu0 %v2622_v37  ;;  %1124 = vmatmul.mubr.bf16.gmra.mrb[16].mxu1 %v2623_v38  ;;  %v2706_v37 = vld [vmem:[%s3525_s0 + $0x1e0] ss:$12 sps:$4 sm:$0xff]  }
  0x62   :  { %939 = vmatprep.mubr.bf16.mxu0 %v2625_v39  ;;  %1131 = vmatprep.mubr.bf16.mxu1 %v2627_v40  ;;  %v2707_v38 = vld [vmem:[%s3525_s0 + $0x260] ss:$12 sps:$4 sm:$0xff]   ;;  %v2708_v39 = vld [vmem:[%s3525_s0 + $0x1fc] ss:$12 sps:$4 sm:$0xff]   ;;  %v2710_v40 = vld [vmem:[%s3525_s0 + $0x278] ss:$12 sps:$4 sm:$0xff]  }
  0x69   :  { %940 = vmatmul.mubr.bf16.gmra.mrb[20].mxu0 %v2629_v41  ;;  %1132 = vmatmul.mubr.bf16.gmra.mrb[20].mxu1 %v2630_v42  ;;  %v2711_v41 = vld [vmem:[%s3525_s0 + $0x1f8] ss:$12 sps:$4 sm:$0xff]   ;;  %v2712_v42 = vld [vmem:[%s3525_s0 + $0x290] ss:$12 sps:$4 sm:$0xff]  }
  0x6a   :  { %947 = vmatprep.mubr.bf16.mxu0 %v2631_v43  ;;  %1139 = vmatprep.mubr.bf16.mxu1 %v2633_v44  ;;  %v2713_v43 = vld [vmem:[%s3525_s0 + $0x214] ss:$12 sps:$4 sm:$0xff]  }
  0x6b   :  { %v2715_v44 = vld [vmem:[%s3525_s0 + $0x2a8] ss:$12 sps:$4 sm:$0xff]  }
  0x71   :  { %948 = vmatmul.mubr.bf16.gmra.mrb[24].mxu0 %v2635_v45  ;;  %1140 = vmatmul.mubr.bf16.gmra.mrb[24].mxu1 %v2636_v46  ;;  %v2716_v45 = vld [vmem:[%s3525_s0 + $0x210] ss:$12 sps:$4 sm:$0xff]   ;;  %v2717_v46 = vld [vmem:[%s3525_s0 + $0x2c0] ss:$12 sps:$4 sm:$0xff]  }
  0x72   :  { %955 = vmatprep.mubr.bf16.mxu0 %v2637_v47  ;;  %1147 = vmatprep.mubr.bf16.mxu1 %v2639_v48  ;;  %v2718_v47 = vld [vmem:[%s3525_s0 + $0x22c] ss:$12 sps:$4 sm:$0xff]  }
  0x73   :  { %v2720_v48 = vld [vmem:[%s3525_s0 + $0x2d8] ss:$12 sps:$4 sm:$0xff]  }
  0x79   :  { %956 = vmatmul.mubr.bf16.gmra.mrb[28].mxu0 %v2641_v49  ;;  %1148 = vmatmul.mubr.bf16.gmra.mrb[28].mxu1 %v2642_v50  ;;  %v2721_v49 = vld [vmem:[%s3525_s0 + $0x228] ss:$12 sps:$4 sm:$0xff]   ;;  %v2722_v50 = vld [vmem:[%s3525_s0 + $0x2f0] ss:$12 sps:$4 sm:$0xff]  }
  0x7a   :  { %963 = vmatprep.mubr.bf16.mxu0 %v2643_v51  ;;  %2480 = vmatprep.mubr.msk.bf16.mxu1 %vm770_vm0, %v2645_v52 }
  0x81   :  { %964 = vmatmul.mubr.bf16.gmra.mrb[32].mxu0 %v2646_v53  ;;  %2481 = vmatmul.mubr.msk.bf16.vlgmr.msra.gmra.mrb[32].mxu1 %vm770_vm0, %v2647_v54 }
  0x82   :  { %971 = vmatprep.mubr.bf16.mxu0 %v2648_v55  ;;  %2484 = vmatprep.mubr.msk.bf16.mxu1 %vm770_vm0, %v2650_v56 }
  0x89   :  { %972 = vmatmul.mubr.bf16.gmra.mrb[36].mxu0 %v2651_v57  ;;  %2485 = vmatmul.mubr.msk.bf16.gmra.mrb[36].mxu1 %vm770_vm0, %v2652_v58 }
  0x8a   :  { %979 = vmatprep.mubr.bf16.mxu0 %v2653_v59  ;;  %2488 = vmatprep.mubr.msk.bf16.mxu1 %vm770_vm0, %v2655_v60 }
  0x91   :  { %980 = vmatmul.mubr.bf16.gmra.mrb[40].mxu0 %v2656_v61  ;;  %2489 = vmatmul.mubr.msk.bf16.gmra.mrb[40].mxu1 %vm770_vm0, %v2657_v62 }
  0x92   :  { %987 = vmatprep.mubr.bf16.mxu0 %v2658_v63  ;;  %2492 = vmatprep.mubr.msk.bf16.mxu1 %vm770_vm0, %v2660_v0 }
  0x99   :  { %988 = vmatmul.mubr.bf16.gmra.mrb[44].mxu0 %v2661_v1  ;;  %2493 = vmatmul.mubr.msk.bf16.gmra.mrb[44].mxu1 %vm770_vm0, %v2662_v2 }
  0x9a   :  { %995 = vmatprep.mubr.bf16.mxu0 %v2663_v3  ;;  %2496 = vmatprep.mubr.msk.bf16.mxu1 %vm770_vm0, %v2665_v4 }
  0xa1   :  { %996 = vmatmul.mubr.bf16.gmra.mrb[48].mxu0 %v2666_v5  ;;  %2497 = vmatmul.mubr.msk.bf16.gmra.mrb[48].mxu1 %vm770_vm0, %v2667_v6 }
  0xa2   :  { %1003 = vmatprep.mubr.bf16.mxu0 %v2668_v7  ;;  %2500 = vmatprep.mubr.msk.bf16.mxu1 %vm770_vm0, %v2670_v8 }
  0xa9   :  { %1004 = vmatmul.mubr.bf16.gmra.mrb[52].mxu0 %v2671_v9  ;;  %2501 = vmatmul.mubr.msk.bf16.gmra.mrb[52].mxu1 %vm770_vm0, %v2672_v10 }
  0xaa   :  { %1011 = vmatprep.mubr.bf16.mxu0 %v2673_v11  ;;  %2504 = vmatprep.mubr.msk.bf16.mxu1 %vm770_vm0, %v2675_v12 }
  0xb1   :  { %1012 = vmatmul.mubr.bf16.gmra.mrb[56].mxu0 %v2676_v13  ;;  %2505 = vmatmul.mubr.msk.bf16.gmra.mrb[56].mxu1 %vm770_vm0, %v2677_v14 }
  0xb2   :  { %1019 = vmatprep.mubr.bf16.mxu0 %v2678_v15  ;;  %2508 = vmatprep.mubr.msk.bf16.mxu1 %vm770_vm0, %v2680_v16 }
  0xb9   :  { %1020 = vmatmul.mubr.bf16.gmra.mrb[60].mxu0 %v2681_v17  ;;  %2509 = vmatmul.mubr.msk.bf16.gmra.mrb[60].mxu1 %vm770_vm0, %v2682_v18 }
  0xba   :  { %1027 = vmatprep.mubr.bf16.mxu0 %v2683_v19  ;;  %2512 = vmatprep.mubr.msk.bf16.mxu1 %vm770_vm0, %v2685_v20 }
  0xc1   :  { %1028 = vmatmul.mubr.bf16.gmra.mrb[64].mxu0 %v2686_v21  ;;  %2513 = vmatmul.mubr.msk.bf16.gmra.mrb[64].mxu1 %vm770_vm0, %v2687_v22 }
  0xc2   :  { %1035 = vmatprep.mubr.bf16.mxu0 %v2688_v23  ;;  %2516 = vmatprep.mubr.msk.bf16.mxu1 %vm770_vm0, %v2690_v24 }
  0xc9   :  { %1036 = vmatmul.mubr.bf16.gmra.mrb[68].mxu0 %v2691_v25  ;;  %2517 = vmatmul.mubr.msk.bf16.gmra.mrb[68].mxu1 %vm770_vm0, %v2692_v26 }
  0xca   :  { %1043 = vmatprep.mubr.bf16.mxu0 %v2693_v27  ;;  %2520 = vmatprep.mubr.msk.bf16.mxu1 %vm770_vm0, %v2695_v28 }
  0xd1   :  { %1044 = vmatmul.mubr.bf16.gmra.mrb[72].mxu0 %v2696_v29  ;;  %2521 = vmatmul.mubr.msk.bf16.gmra.mrb[72].mxu1 %vm770_vm0, %v2697_v30 }
  0xd2   :  { %1051 = vmatprep.mubr.bf16.mxu0 %v2698_v31  ;;  %2524 = vmatprep.mubr.msk.bf16.mxu1 %vm770_vm0, %v2700_v32 }
  0xd9   :  { %1052 = vmatmul.mubr.bf16.gmra.mrb[76].mxu0 %v2701_v33  ;;  %2525 = vmatmul.mubr.msk.bf16.gmra.mrb[76].mxu1 %vm770_vm0, %v2702_v34 }
  0xda   :  { %1059 = vmatprep.mubr.bf16.mxu0 %v2703_v35  ;;  %2528 = vmatprep.mubr.msk.bf16.mxu1 %vm770_vm0, %v2705_v36 }
  0xe1   :  { %1060 = vmatmul.mubr.bf16.gmra.mrb[80].mxu0 %v2706_v37  ;;  %2529 = vmatmul.mubr.msk.bf16.gmra.mrb[80].mxu1 %vm770_vm0, %v2707_v38 }
  0xe2   :  { %1067 = vmatprep.mubr.bf16.mxu0 %v2708_v39  ;;  %2532 = vmatprep.mubr.msk.bf16.mxu1 %vm770_vm0, %v2710_v40 }
  0xe9   :  { %1068 = vmatmul.mubr.bf16.gmra.mrb[84].mxu0 %v2711_v41  ;;  %2533 = vmatmul.mubr.msk.bf16.gmra.mrb[84].mxu1 %vm770_vm0, %v2712_v42 }
  0xea   :  { %1075 = vmatprep.mubr.bf16.mxu0 %v2713_v43  ;;  %2536 = vmatprep.mubr.msk.bf16.mxu1 %vm770_vm0, %v2715_v44 }
  0xf1   :  { %1076 = vmatmul.mubr.bf16.gmra.mrb[88].mxu0 %v2716_v45  ;;  %2537 = vmatmul.mubr.msk.bf16.gmra.mrb[88].mxu1 %vm770_vm0, %v2717_v46 }
  0xf2   :  { %1083 = vmatprep.mubr.bf16.mxu0 %v2718_v47  ;;  %2540 = vmatprep.mubr.msk.bf16.mxu1 %vm770_vm0, %v2720_v48 }
  0xf9   :  { %1084 = vmatmul.mubr.bf16.gmra.mrb[92].mxu0 %v2721_v49  ;;  %2541 = vmatmul.mubr.msk.bf16.gmra.mrb[92].mxu1 %vm770_vm0, %v2722_v50 }
 0x114   :  { %v3155_v51 = vpop.f32.mrb[0].mxu0  ;;  %v3157_v52 = vpop.f32.mrb[0].mxu1 }
 0x115   :  { %v903_v53 = vpop.f32.mrb[1].mxu0  ;;  %v1095_v54 = vpop.f32.mrb[1].mxu1 }
 0x116   :  { %v3159_v55 = vpop.f32.mrb[2].mxu0  ;;  %v3161_v56 = vpop.f32.mrb[2].mxu1 }
 0x117   :  { %v906_v57 = vpop.f32.mrb[3].mxu0  ;;  %v1098_v58 = vpop.f32.mrb[3].mxu1 }
 0x118   :  { %v3222_v57 = vld [vmem:[%s3526_s2] ss:$0 sm:$0xff] }
 0x11c   :  { %v909_v59 = vpop.f32.mrb[4].mxu0  ;;  %v3163_v60 = vpop.f32.mrb[4].mxu1 }
 0x11d   :  { %v911_v61 = vpop.f32.mrb[5].mxu0  ;;  %v1103_v62 = vpop.f32.mrb[5].mxu1 }
 0x11e   :  { %v3165_v63 = vpop.f32.mrb[6].mxu0  ;;  %v3167_v0 = vpop.f32.mrb[6].mxu1 }
 0x11f   :  { %v914_v1 = vpop.f32.mrb[7].mxu0  ;;  %v1106_v2 = vpop.f32.mrb[7].mxu1 }
 0x120   :  { %v3227_v1 = vld [vmem:[%s3527_s3] ss:$0 sm:$0xff] }
 0x124   :  { %v3169_v3 = vpop.f32.mrb[8].mxu0  ;;  %v3171_v4 = vpop.f32.mrb[8].mxu1 }
 0x125   :  { %v919_v5 = vpop.f32.mrb[9].mxu0  ;;  %v1111_v6 = vpop.f32.mrb[9].mxu1 }
 0x126   :  { %v3173_v7 = vpop.f32.mrb[10].mxu0  ;;  %v3175_v8 = vpop.f32.mrb[10].mxu1 }
 0x127   :  { %v922_v9 = vpop.f32.mrb[11].mxu0  ;;  %v1114_v10 = vpop.f32.mrb[11].mxu1 }
 0x12c   :  { %v3177_v11 = vpop.f32.mrb[12].mxu0  ;;  %v3179_v12 = vpop.f32.mrb[12].mxu1 }
 0x12d   :  { %v927_v13 = vpop.f32.mrb[13].mxu0  ;;  %v1119_v14 = vpop.f32.mrb[13].mxu1 }
 0x12e   :  { %v3181_v15 = vpop.f32.mrb[14].mxu0  ;;  %v3183_v16 = vpop.f32.mrb[14].mxu1 }
 0x12f   :  { %v930_v17 = vpop.f32.mrb[15].mxu0  ;;  %v1122_v18 = vpop.f32.mrb[15].mxu1 }
 0x134   :  { %v3185_v19 = vpop.f32.mrb[16].mxu0  ;;  %v3187_v20 = vpop.f32.mrb[16].mxu1 }
 0x135   :  { %v935_v21 = vpop.f32.mrb[17].mxu0  ;;  %v1127_v22 = vpop.f32.mrb[17].mxu1 }
 0x136   :  { %v3189_v23 = vpop.f32.mrb[18].mxu0  ;;  %v3191_v24 = vpop.f32.mrb[18].mxu1 }
 0x137   :  { %v938_v25 = vpop.f32.mrb[19].mxu0  ;;  %v1130_v26 = vpop.f32.mrb[19].mxu1 }
 0x13c   :  { %v3193_v27 = vpop.f32.mrb[20].mxu0  ;;  %v3195_v28 = vpop.f32.mrb[20].mxu1 }
 0x13d   :  { %v943_v29 = vpop.f32.mrb[21].mxu0  ;;  %v1135_v30 = vpop.f32.mrb[21].mxu1 }
 0x13e   :  { %v3197_v31 = vpop.f32.mrb[22].mxu0  ;;  %v3199_v32 = vpop.f32.mrb[22].mxu1 }
 0x13f   :  { %v946_v33 = vpop.f32.mrb[23].mxu0  ;;  %v1138_v34 = vpop.f32.mrb[23].mxu1 }
 0x144   :  { %v3201_v35 = vpop.f32.mrb[24].mxu0  ;;  %v3203_v36 = vpop.f32.mrb[24].mxu1 }
 0x145   :  { %v951_v37 = vpop.f32.mrb[25].mxu0  ;;  %v1143_v38 = vpop.f32.mrb[25].mxu1 }
 0x146   :  { %v3205_v39 = vpop.f32.mrb[26].mxu0  ;;  %v3207_v40 = vpop.f32.mrb[26].mxu1 }
 0x147   :  { %v954_v41 = vpop.f32.mrb[27].mxu0  ;;  %v1146_v42 = vpop.f32.mrb[27].mxu1 }
 0x14c   :  { %v3209_v43 = vpop.f32.mrb[28].mxu0  ;;  %v3211_v44 = vpop.f32.mrb[28].mxu1 }
 0x14d   :  { %v959_v45 = vpop.f32.mrb[29].mxu0  ;;  %v1151_v46 = vpop.f32.mrb[29].mxu1 }
 0x14e   :  { %v3213_v47 = vpop.f32.mrb[30].mxu0  ;;  %v3215_v48 = vpop.f32.mrb[30].mxu1 }
 0x14f   :  { %v962_v49 = vpop.f32.mrb[31].mxu0  ;;  %v1154_v50 = vpop.f32.mrb[31].mxu1 }
 0x154   :  { %v3217_v53 = vpop.f32.mrb[32].mxu0  ;;  %v2482_v54 = vpop.f32.mrb[32].mxu1 }
 0x155   :  { %v1199_v58 = vadd.f32 %v2482_v54, %v909_v59  ;;  %v967_v61 = vpop.f32.mrb[33].mxu0  ;;  %v1190_v62 = vpop.f32.mrb[33].mxu1 }
 0x156   :  { %v1191_v2 = vadd.f32 %v1190_v62, %v3155_v51  ;;  %v3230_v5 = vpop.f32.mrb[34].mxu0  ;;  %v2483_v6 = vpop.f32.mrb[34].mxu1 }
 0x157   :  { %v1454_v9 = vmul.f32 %v3222_v57, %v1199_v58  ;;  %v1202_v10 = vadd.f32 %v2483_v6, %v3165_v63  ;;  %v970_v13 = vpop.f32.mrb[35].mxu0  ;;  %v1193_v14 = vpop.f32.mrb[35].mxu1 }
 0x158   :  { %v1452_v59 = vmul.f32 %v3222_v57, %v1191_v2  ;;  %v1194_v17 = vadd.f32 %v1193_v14, %v3159_v55 }
 0x159   :  { %v1525_v18 = vadd.f32 %v3227_v1, %v1454_v9  ;;  %v1455_v21 = vmul.f32 %v3222_v57, %v1202_v10 }
 0x15a   :  { %v1523_v22 = vadd.f32 %v3227_v1, %v1452_v59  ;;  %v1453_v51 = vmul.f32 %v3222_v57, %v1194_v17 }
 0x15b   :  { %v1526_v25 = vadd.f32 %v3227_v1, %v1455_v21  ;;  %v1589_v30 = vmax.f32 %v1525_v18, 0.0 }
 0x15c   :  { %v1524_v26 = vadd.f32 %v3227_v1, %v1453_v51  ;;  %v3242_v29 = vpop.f32.mrb[36].mxu0  ;;  %v2486_v63 = vpop.f32.mrb[36].mxu1  ;;  %v1587_v38 = vmax.f32 %v1523_v22, 0.0 }
 0x15d   :  { %v1590_v33 = vmax.f32 %v1526_v25, 0.0  ;;  %v1215_v34 = vadd.f32 %v2486_v63, %v3177_v11  ;;  %v975_v55 = vpop.f32.mrb[37].mxu0  ;;  %v1206_v37 = vpop.f32.mrb[37].mxu1 }
 0x15e   :  { %v1588_v41 = vmax.f32 %v1524_v26, 0.0  ;;  %v1207_v42 = vadd.f32 %v1206_v37, %v3169_v3  ;;  %v3246_v45 = vpop.f32.mrb[38].mxu0  ;;  %v2487_v46 = vpop.f32.mrb[38].mxu1 }
 0x15f   :  { %v2259_v49 = vpack.c.bf16 %v1590_v33, %v1589_v30  ;;  %v1458_v50 = vmul.f32 %v3222_v57, %v1215_v34  ;;  %v1218_v54 = vadd.f32 %v2487_v46, %v3181_v15  ;;  %v978_v58 = vpop.f32.mrb[39].mxu0  ;;  %v1209_v61 = vpop.f32.mrb[39].mxu1 }
 0x160   :  { %v2254_v62 = vpack.c.bf16 %v1588_v41, %v1587_v38  ;;  %v1456_v2 = vmul.f32 %v3222_v57, %v1207_v42  ;;  %v1210_v11 = vadd.f32 %v1209_v61, %v3173_v7 }
 0x161   :  { %2411 = vst [vmem:[%s3528_s4 + $0x8] sm:$0xff] %v2259_v49   ;;  %v1529_v3 = vadd.f32 %v3227_v1, %v1458_v50  ;;  %v1459_v6 = vmul.f32 %v3222_v57, %v1218_v54 }
 0x162   :  { %2255 = vst [vmem:[%s3528_s4] sm:$0xff] %v2254_v62   ;;  %v1527_v15 = vadd.f32 %v3227_v1, %v1456_v2  ;;  %v1457_v9 = vmul.f32 %v3222_v57, %v1210_v11 }
 0x163   :  { %v1530_v10 = vadd.f32 %v3227_v1, %v1459_v6  ;;  %v1593_v59 = vmax.f32 %v1529_v3, 0.0 }
 0x164   :  { %v1528_v7 = vadd.f32 %v3227_v1, %v1457_v9  ;;  %v3264_v13 = vpop.f32.mrb[40].mxu0  ;;  %v2490_v14 = vpop.f32.mrb[40].mxu1  ;;  %v1591_v51 = vmax.f32 %v1527_v15, 0.0 }
 0x165   :  { %v1594_v17 = vmax.f32 %v1530_v10, 0.0  ;;  %v1231_v18 = vadd.f32 %v2490_v14, %v3193_v27  ;;  %v983_v21 = vpop.f32.mrb[41].mxu0  ;;  %v1222_v22 = vpop.f32.mrb[41].mxu1 }
 0x166   :  { %v1592_v25 = vmax.f32 %v1528_v7, 0.0  ;;  %v1223_v26 = vadd.f32 %v1222_v22, %v3185_v19  ;;  %v3268_v63 = vpop.f32.mrb[42].mxu0  ;;  %v2491_v30 = vpop.f32.mrb[42].mxu1 }
 0x167   :  { %v2269_v33 = vpack.c.bf16 %v1594_v17, %v1593_v59  ;;  %v1462_v34 = vmul.f32 %v3222_v57, %v1231_v18  ;;  %v1234_v55 = vadd.f32 %v2491_v30, %v3197_v31  ;;  %v986_v37 = vpop.f32.mrb[43].mxu0  ;;  %v1225_v38 = vpop.f32.mrb[43].mxu1 }
 0x168   :  { %v2264_v41 = vpack.c.bf16 %v1592_v25, %v1591_v51  ;;  %v1460_v42 = vmul.f32 %v3222_v57, %v1223_v26  ;;  %v1226_v27 = vadd.f32 %v1225_v38, %v3189_v23 }
 0x169   :  { %2413 = vst [vmem:[%s3528_s4 + $0x18] sm:$0xff] %v2269_v33   ;;  %v1533_v19 = vadd.f32 %v3227_v1, %v1462_v34  ;;  %v1463_v46 = vmul.f32 %v3222_v57, %v1234_v55 }
 0x16a   :  { %2412 = vst [vmem:[%s3528_s4 + $0x10] sm:$0xff] %v2264_v41   ;;  %v1531_v31 = vadd.f32 %v3227_v1, %v1460_v42  ;;  %v1461_v49 = vmul.f32 %v3222_v57, %v1226_v27 }
 0x16b   :  { %v1534_v50 = vadd.f32 %v3227_v1, %v1463_v46  ;;  %v1597_v61 = vmax.f32 %v1533_v19, 0.0 }
 0x16c   :  { %v1532_v23 = vadd.f32 %v3227_v1, %v1461_v49  ;;  %v989_v54 = vpop.f32.mrb[44].mxu0  ;;  %v2494_v58 = vpop.f32.mrb[44].mxu1  ;;  %v1595_v6 = vmax.f32 %v1531_v31, 0.0 }
 0x16d   :  { %v1598_v62 = vmax.f32 %v1534_v50, 0.0  ;;  %v1247_v2 = vadd.f32 %v2494_v58, %v3209_v43  ;;  %v991_v11 = vpop.f32.mrb[45].mxu0  ;;  %v1238_v3 = vpop.f32.mrb[45].mxu1 }
 0x16e   :  { %v1596_v15 = vmax.f32 %v1532_v23, 0.0  ;;  %v1239_v9 = vadd.f32 %v1238_v3, %v3201_v35  ;;  %v992_v10 = vpop.f32.mrb[46].mxu0  ;;  %v2495_v7 = vpop.f32.mrb[46].mxu1 }
 0x16f   :  { %v2279_v14 = vpack.c.bf16 %v1598_v62, %v1597_v61  ;;  %v1466_v59 = vmul.f32 %v3222_v57, %v1247_v2  ;;  %v1250_v17 = vadd.f32 %v2495_v7, %v3213_v47  ;;  %v994_v18 = vpop.f32.mrb[47].mxu0  ;;  %v1241_v21 = vpop.f32.mrb[47].mxu1 }
 0x170   :  { %v2274_v22 = vpack.c.bf16 %v1596_v15, %v1595_v6  ;;  %v1464_v51 = vmul.f32 %v3222_v57, %v1239_v9  ;;  %v1242_v43 = vadd.f32 %v1241_v21, %v3205_v39 }
 0x171   :  { %2415 = vst [vmem:[%s3528_s4 + $0x28] sm:$0xff] %v2279_v14   ;;  %v1537_v35 = vadd.f32 %v3227_v1, %v1466_v59  ;;  %v1467_v25 = vmul.f32 %v3222_v57, %v1250_v17 }
 0x172   :  { %2414 = vst [vmem:[%s3528_s4 + $0x20] sm:$0xff] %v2274_v22   ;;  %v1535_v47 = vadd.f32 %v3227_v1, %v1464_v51  ;;  %v1465_v26 = vmul.f32 %v3222_v57, %v1242_v43 }
 0x173   :  { %v1538_v30 = vadd.f32 %v3227_v1, %v1467_v25  ;;  %v1601_v55 = vmax.f32 %v1537_v35, 0.0 }
 0x174   :  { %v1536_v39 = vadd.f32 %v3227_v1, %v1465_v26  ;;  %v3304_v33 = vpop.f32.mrb[48].mxu0  ;;  %v2498_v34 = vpop.f32.mrb[48].mxu1  ;;  %v1599_v27 = vmax.f32 %v1535_v47, 0.0 }
 0x175   :  { %v1602_v37 = vmax.f32 %v1538_v30, 0.0  ;;  %v1263_v38 = vadd.f32 %v2498_v34, %v3242_v29  ;;  %v999_v41 = vpop.f32.mrb[49].mxu0  ;;  %v1254_v42 = vpop.f32.mrb[49].mxu1 }
 0x176   :  { %v1600_v19 = vmax.f32 %v1536_v39, 0.0  ;;  %v1255_v46 = vadd.f32 %v1254_v42, %v3217_v53  ;;  %v3308_v31 = vpop.f32.mrb[50].mxu0  ;;  %v2499_v49 = vpop.f32.mrb[50].mxu1 }
 0x177   :  { %v2289_v50 = vpack.c.bf16 %v1602_v37, %v1601_v55  ;;  %v1470_v23 = vmul.f32 %v3222_v57, %v1263_v38  ;;  %v1266_v58 = vadd.f32 %v2499_v49, %v3246_v45  ;;  %v1002_v61 = vpop.f32.mrb[51].mxu0  ;;  %v1257_v62 = vpop.f32.mrb[51].mxu1 }
 0x178   :  { %v2284_v2 = vpack.c.bf16 %v1600_v19, %v1599_v27  ;;  %v1468_v11 = vmul.f32 %v3222_v57, %v1255_v46  ;;  %v1258_v29 = vadd.f32 %v1257_v62, %v3230_v5 }
 0x179   :  { %2417 = vst [vmem:[%s3528_s4 + $0x38] sm:$0xff] %v2289_v50   ;;  %v1541_v53 = vadd.f32 %v3227_v1, %v1470_v23  ;;  %v1471_v3 = vmul.f32 %v3222_v57, %v1266_v58 }
 0x17a   :  { %2416 = vst [vmem:[%s3528_s4 + $0x30] sm:$0xff] %v2284_v2   ;;  %v1539_v45 = vadd.f32 %v3227_v1, %v1468_v11  ;;  %v1469_v6 = vmul.f32 %v3222_v57, %v1258_v29 }
 0x17b   :  { %v1542_v15 = vadd.f32 %v3227_v1, %v1471_v3  ;;  %v1605_v14 = vmax.f32 %v1541_v53, 0.0 }
 0x17c   :  { %v1540_v5 = vadd.f32 %v3227_v1, %v1469_v6  ;;  %v1005_v9 = vpop.f32.mrb[52].mxu0  ;;  %v2502_v7 = vpop.f32.mrb[52].mxu1  ;;  %v1603_v22 = vmax.f32 %v1539_v45, 0.0 }
 0x17d   :  { %v1606_v59 = vmax.f32 %v1542_v15, 0.0  ;;  %v1279_v17 = vadd.f32 %v2502_v7, %v989_v54  ;;  %v1007_v18 = vpop.f32.mrb[53].mxu0  ;;  %v1270_v21 = vpop.f32.mrb[53].mxu1 }
 0x17e   :  { %v1604_v51 = vmax.f32 %v1540_v5, 0.0  ;;  %v1271_v43 = vadd.f32 %v1270_v21, %v3264_v13  ;;  %v1008_v35 = vpop.f32.mrb[54].mxu0  ;;  %v2503_v25 = vpop.f32.mrb[54].mxu1 }
 0x17f   :  { %v2299_v47 = vpack.c.bf16 %v1606_v59, %v1605_v14  ;;  %v1474_v26 = vmul.f32 %v3222_v57, %v1279_v17  ;;  %v1282_v30 = vadd.f32 %v2503_v25, %v992_v10  ;;  %v1010_v39 = vpop.f32.mrb[55].mxu0  ;;  %v1273_v34 = vpop.f32.mrb[55].mxu1 }
 0x180   :  { %v2294_v55 = vpack.c.bf16 %v1604_v51, %v1603_v22  ;;  %v1472_v37 = vmul.f32 %v3222_v57, %v1271_v43  ;;  %v1274_v38 = vadd.f32 %v1273_v34, %v3268_v63 }
 0x181   :  { %2419 = vst [vmem:[%s3528_s4 + $0x48] sm:$0xff] %v2299_v47   ;;  %v1545_v54 = vadd.f32 %v3227_v1, %v1474_v26  ;;  %v1475_v13 = vmul.f32 %v3222_v57, %v1282_v30 }
 0x182   :  { %2418 = vst [vmem:[%s3528_s4 + $0x40] sm:$0xff] %v2294_v55   ;;  %v1543_v10 = vadd.f32 %v3227_v1, %v1472_v37  ;;  %v1473_v41 = vmul.f32 %v3222_v57, %v1274_v38 }
 0x183   :  { %v1546_v42 = vadd.f32 %v3227_v1, %v1475_v13  ;;  %v1609_v46 = vmax.f32 %v1545_v54, 0.0 }
 0x184   :  { %v1544_v63 = vadd.f32 %v3227_v1, %v1473_v41  ;;  %v1013_v27 = vpop.f32.mrb[56].mxu0  ;;  %v2506_v19 = vpop.f32.mrb[56].mxu1  ;;  %v1607_v61 = vmax.f32 %v1543_v10, 0.0 }
 0x185   :  { %v1610_v49 = vmax.f32 %v1546_v42, 0.0  ;;  %v1295_v50 = vadd.f32 %v2506_v19, %v1005_v9  ;;  %v1015_v23 = vpop.f32.mrb[57].mxu0  ;;  %v1286_v58 = vpop.f32.mrb[57].mxu1 }
 0x186   :  { %v1608_v62 = vmax.f32 %v1544_v63, 0.0  ;;  %v1287_v2 = vadd.f32 %v1286_v58, %v3304_v33  ;;  %v1016_v11 = vpop.f32.mrb[58].mxu0  ;;  %v2507_v29 = vpop.f32.mrb[58].mxu1 }
 0x187   :  { %v2309_v53 = vpack.c.bf16 %v1610_v49, %v1609_v46  ;;  %v1478_v3 = vmul.f32 %v3222_v57, %v1295_v50  ;;  %v1298_v45 = vadd.f32 %v2507_v29, %v1008_v35  ;;  %v1018_v6 = vpop.f32.mrb[59].mxu0  ;;  %v1289_v15 = vpop.f32.mrb[59].mxu1 }
 0x188   :  { %v2304_v5 = vpack.c.bf16 %v1608_v62, %v1607_v61  ;;  %v1476_v7 = vmul.f32 %v3222_v57, %v1287_v2  ;;  %v1290_v14 = vadd.f32 %v1289_v15, %v3308_v31 }
 0x189   :  { %2421 = vst [vmem:[%s3528_s4 + $0x58] sm:$0xff] %v2309_v53   ;;  %v1549_v9 = vadd.f32 %v3227_v1, %v1478_v3  ;;  %v1479_v33 = vmul.f32 %v3222_v57, %v1298_v45 }
 0x18a   :  { %2420 = vst [vmem:[%s3528_s4 + $0x50] sm:$0xff] %v2304_v5   ;;  %v1547_v59 = vadd.f32 %v3227_v1, %v1476_v7  ;;  %v1477_v17 = vmul.f32 %v3222_v57, %v1290_v14 }
 0x18b   :  { %v1550_v18 = vadd.f32 %v3227_v1, %v1479_v33  ;;  %v1613_v51 = vmax.f32 %v1549_v9, 0.0 }
 0x18c   :  { %v1548_v31 = vadd.f32 %v3227_v1, %v1477_v17  ;;  %v1021_v21 = vpop.f32.mrb[60].mxu0  ;;  %v2510_v22 = vpop.f32.mrb[60].mxu1  ;;  %v1611_v26 = vmax.f32 %v1547_v59, 0.0 }
 0x18d   :  { %v1614_v43 = vmax.f32 %v1550_v18, 0.0  ;;  %v1311_v35 = vadd.f32 %v2510_v22, %v1021_v21  ;;  %v1023_v25 = vpop.f32.mrb[61].mxu0  ;;  %v1302_v47 = vpop.f32.mrb[61].mxu1 }
 0x18e   :  { %v1612_v30 = vmax.f32 %v1548_v31, 0.0  ;;  %v1303_v39 = vadd.f32 %v1302_v47, %v1013_v27  ;;  %v1024_v34 = vpop.f32.mrb[62].mxu0  ;;  %v2511_v55 = vpop.f32.mrb[62].mxu1 }
 0x18f   :  { %v2319_v37 = vpack.c.bf16 %v1614_v43, %v1613_v51  ;;  %v1482_v38 = vmul.f32 %v3222_v57, %v1311_v35  ;;  %v1314_v54 = vadd.f32 %v2511_v55, %v1024_v34  ;;  %v1026_v13 = vpop.f32.mrb[63].mxu0  ;;  %v1305_v10 = vpop.f32.mrb[63].mxu1 }
 0x190   :  { %v2314_v41 = vpack.c.bf16 %v1612_v30, %v1611_v26  ;;  %v1480_v42 = vmul.f32 %v3222_v57, %v1303_v39  ;;  %v1306_v63 = vadd.f32 %v1305_v10, %v1016_v11 }
 0x191   :  { %2423 = vst [vmem:[%s3528_s4 + $0x68] sm:$0xff] %v2319_v37   ;;  %v1553_v19 = vadd.f32 %v3227_v1, %v1482_v38  ;;  %v1483_v27 = vmul.f32 %v3222_v57, %v1314_v54 }
 0x192   :  { %2422 = vst [vmem:[%s3528_s4 + $0x60] sm:$0xff] %v2314_v41   ;;  %v1551_v46 = vadd.f32 %v3227_v1, %v1480_v42  ;;  %v1481_v49 = vmul.f32 %v3222_v57, %v1306_v63 }
 0x193   :  { %v1554_v50 = vadd.f32 %v3227_v1, %v1483_v27  ;;  %v1617_v62 = vmax.f32 %v1553_v19, 0.0 }
 0x194   :  { %v1552_v23 = vadd.f32 %v3227_v1, %v1481_v49  ;;  %v1029_v58 = vpop.f32.mrb[64].mxu0  ;;  %v2514_v61 = vpop.f32.mrb[64].mxu1  ;;  %v1615_v53 = vmax.f32 %v1551_v46, 0.0 }
 0x195   :  { %v1618_v2 = vmax.f32 %v1554_v50, 0.0  ;;  %v1031_v11 = vpop.f32.mrb[65].mxu0  ;;  %v1318_v29 = vpop.f32.mrb[65].mxu1 }
 0x196   :  { %v1616_v3 = vmax.f32 %v1552_v23, 0.0  ;;  %v1319_v45 = vadd.f32 %v1318_v29, %v1029_v58  ;;  %v1032_v6 = vpop.f32.mrb[66].mxu0  ;;  %v2515_v15 = vpop.f32.mrb[66].mxu1 }
 0x197   :  { %v2329_v5 = vpack.c.bf16 %v1618_v2, %v1617_v62  ;;  %v1034_v7 = vpop.f32.mrb[67].mxu0  ;;  %v1321_v14 = vpop.f32.mrb[67].mxu1 }
 0x198   :  { %v2324_v9 = vpack.c.bf16 %v1616_v3, %v1615_v53  ;;  %v1484_v33 = vmul.f32 %v3222_v57, %v1319_v45  ;;  %v1322_v59 = vadd.f32 %v1321_v14, %v1032_v6 }
 0x199   :  { %2425 = vst [vmem:[%s3528_s4 + $0x78] sm:$0xff] %v2329_v5  }
 0x19a   :  { %2424 = vst [vmem:[%s3528_s4 + $0x70] sm:$0xff] %v2324_v9   ;;  %v1555_v17 = vadd.f32 %v3227_v1, %v1484_v33  ;;  %v1485_v18 = vmul.f32 %v3222_v57, %v1322_v59 }
 0x19c   :  { %v1556_v31 = vadd.f32 %v3227_v1, %v1485_v18  ;;  %v1037_v21 = vpop.f32.mrb[68].mxu0  ;;  %v2518_v22 = vpop.f32.mrb[68].mxu1  ;;  %v1619_v25 = vmax.f32 %v1555_v17, 0.0 }
 0x19d   :  { %v1327_v51 = vadd.f32 %v2514_v61, %v1037_v21  ;;  %v1039_v43 = vpop.f32.mrb[69].mxu0  ;;  %v1334_v35 = vpop.f32.mrb[69].mxu1 }
 0x19e   :  { %v1620_v47 = vmax.f32 %v1556_v31, 0.0  ;;  %v1040_v26 = vpop.f32.mrb[70].mxu0  ;;  %v2519_v30 = vpop.f32.mrb[70].mxu1 }
 0x19f   :  { %v1486_v39 = vmul.f32 %v3222_v57, %v1327_v51  ;;  %v1330_v34 = vadd.f32 %v2515_v15, %v1040_v26  ;;  %v1042_v55 = vpop.f32.mrb[71].mxu0  ;;  %v1337_v37 = vpop.f32.mrb[71].mxu1 }
 0x1a0   :  { %v2334_v38 = vpack.c.bf16 %v1620_v47, %v1619_v25 }
 0x1a1   :  { %v1557_v54 = vadd.f32 %v3227_v1, %v1486_v39  ;;  %v1487_v13 = vmul.f32 %v3222_v57, %v1330_v34 }
 0x1a2   :  { %2426 = vst [vmem:[%s3528_s4 + $0x80] sm:$0xff] %v2334_v38  }
 0x1a3   :  { %v1558_v10 = vadd.f32 %v3227_v1, %v1487_v13  ;;  %v1621_v63 = vmax.f32 %v1557_v54, 0.0 }
 0x1a4   :  { %v1045_v41 = vpop.f32.mrb[72].mxu0  ;;  %v3389_v42 = vpop.f32.mrb[72].mxu1 }
 0x1a5   :  { %v1622_v19 = vmax.f32 %v1558_v10, 0.0  ;;  %v1335_v27 = vadd.f32 %v1334_v35, %v1045_v41  ;;  %v1047_v46 = vpop.f32.mrb[73].mxu0  ;;  %v1350_v49 = vpop.f32.mrb[73].mxu1 }
 0x1a6   :  { %v1048_v50 = vpop.f32.mrb[74].mxu0  ;;  %v3391_v23 = vpop.f32.mrb[74].mxu1 }
 0x1a7   :  { %v2339_v58 = vpack.c.bf16 %v1622_v19, %v1621_v63  ;;  %v1488_v61 = vmul.f32 %v3222_v57, %v1335_v27  ;;  %v1338_v62 = vadd.f32 %v1337_v37, %v1048_v50  ;;  %v1050_v2 = vpop.f32.mrb[75].mxu0  ;;  %v1353_v11 = vpop.f32.mrb[75].mxu1 }
 0x1a9   :  { %2427 = vst [vmem:[%s3528_s4 + $0x88] sm:$0xff] %v2339_v58   ;;  %v1559_v29 = vadd.f32 %v3227_v1, %v1488_v61  ;;  %v1489_v53 = vmul.f32 %v3222_v57, %v1338_v62 }
 0x1ab   :  { %v1560_v3 = vadd.f32 %v3227_v1, %v1489_v53  ;;  %v1623_v15 = vmax.f32 %v1559_v29, 0.0 }
 0x1ac   :  { %v1053_v45 = vpop.f32.mrb[76].mxu0  ;;  %v3400_v6 = vpop.f32.mrb[76].mxu1 }
 0x1ad   :  { %v1624_v5 = vmax.f32 %v1560_v3, 0.0  ;;  %v1343_v7 = vadd.f32 %v2518_v22, %v1053_v45  ;;  %v1055_v14 = vpop.f32.mrb[77].mxu0  ;;  %v3402_v9 = vpop.f32.mrb[77].mxu1 }
 0x1ae   :  { %v1056_v33 = vpop.f32.mrb[78].mxu0  ;;  %v3404_v59 = vpop.f32.mrb[78].mxu1 }
 0x1af   :  { %v2344_v17 = vpack.c.bf16 %v1624_v5, %v1623_v15  ;;  %v1490_v18 = vmul.f32 %v3222_v57, %v1343_v7  ;;  %v1346_v31 = vadd.f32 %v2519_v30, %v1056_v33  ;;  %v1058_v21 = vpop.f32.mrb[79].mxu0  ;;  %v3407_v51 = vpop.f32.mrb[79].mxu1 }
 0x1b1   :  { %2428 = vst [vmem:[%s3528_s4 + $0x90] sm:$0xff] %v2344_v17   ;;  %v1561_v43 = vadd.f32 %v3227_v1, %v1490_v18  ;;  %v1491_v22 = vmul.f32 %v3222_v57, %v1346_v31 }
 0x1b3   :  { %v1562_v35 = vadd.f32 %v3227_v1, %v1491_v22  ;;  %v1625_v26 = vmax.f32 %v1561_v43, 0.0 }
 0x1b4   :  { %v1061_v25 = vpop.f32.mrb[80].mxu0  ;;  %v2530_v47 = vpop.f32.mrb[80].mxu1 }
 0x1b5   :  { %v1626_v39 = vmax.f32 %v1562_v35, 0.0  ;;  %v1351_v34 = vadd.f32 %v1350_v49, %v1061_v25  ;;  %v1391_v30 = vadd.f32 %v2530_v47, %v3163_v60  ;;  %v1063_v55 = vpop.f32.mrb[81].mxu0  ;;  %v1382_v37 = vpop.f32.mrb[81].mxu1 }
 0x1b6   :  { %v1383_v38 = vadd.f32 %v1382_v37, %v3157_v52  ;;  %v1064_v54 = vpop.f32.mrb[82].mxu0  ;;  %v2531_v13 = vpop.f32.mrb[82].mxu1 }
 0x1b7   :  { %v2349_v10 = vpack.c.bf16 %v1626_v39, %v1625_v26  ;;  %v1492_v41 = vmul.f32 %v3222_v57, %v1351_v34  ;;  %v1502_v63 = vmul.f32 %v3222_v57, %v1391_v30  ;;  %v1354_v19 = vadd.f32 %v1353_v11, %v1064_v54  ;;  %v1066_v27 = vpop.f32.mrb[83].mxu0  ;;  %v1385_v46 = vpop.f32.mrb[83].mxu1 }
 0x1b8   :  { %v1500_v50 = vmul.f32 %v3222_v57, %v1383_v38  ;;  %v1394_v49 = vadd.f32 %v2531_v13, %v3167_v0  ;;  %v1386_v60 = vadd.f32 %v1385_v46, %v3161_v56 }
 0x1b9   :  { %2429 = vst [vmem:[%s3528_s4 + $0x98] sm:$0xff] %v2349_v10   ;;  %v1563_v52 = vadd.f32 %v3227_v1, %v1492_v41  ;;  %v1573_v58 = vadd.f32 %v3227_v1, %v1502_v63  ;;  %v1493_v61 = vmul.f32 %v3222_v57, %v1354_v19 }
 0x1ba   :  { %v1571_v62 = vadd.f32 %v3227_v1, %v1500_v50  ;;  %v1503_v2 = vmul.f32 %v3222_v57, %v1394_v49  ;;  %v1501_v11 = vmul.f32 %v3222_v57, %v1386_v60 }
 0x1bb   :  { %v1564_v0 = vadd.f32 %v3227_v1, %v1493_v61  ;;  %v1627_v29 = vmax.f32 %v1563_v52, 0.0  ;;  %v1637_v15 = vmax.f32 %v1573_v58, 0.0 }
 0x1bc   :  { %v1574_v56 = vadd.f32 %v3227_v1, %v1503_v2  ;;  %v1572_v53 = vadd.f32 %v3227_v1, %v1501_v11  ;;  %v1069_v3 = vpop.f32.mrb[84].mxu0  ;;  %v2534_v45 = vpop.f32.mrb[84].mxu1  ;;  %v1635_v18 = vmax.f32 %v1571_v62, 0.0 }
 0x1bd   :  { %v1628_v5 = vmax.f32 %v1564_v0, 0.0  ;;  %v1359_v7 = vadd.f32 %v3389_v42, %v1069_v3  ;;  %v1407_v14 = vadd.f32 %v2534_v45, %v3179_v12  ;;  %v1071_v33 = vpop.f32.mrb[85].mxu0  ;;  %v1398_v17 = vpop.f32.mrb[85].mxu1 }
 0x1be   :  { %v1638_v31 = vmax.f32 %v1574_v56, 0.0  ;;  %v1636_v21 = vmax.f32 %v1572_v53, 0.0  ;;  %v1399_v43 = vadd.f32 %v1398_v17, %v3171_v4  ;;  %v1072_v22 = vpop.f32.mrb[86].mxu0  ;;  %v2535_v35 = vpop.f32.mrb[86].mxu1 }
 0x1bf   :  { %v2354_v25 = vpack.c.bf16 %v1628_v5, %v1627_v29  ;;  %v1494_v47 = vmul.f32 %v3222_v57, %v1359_v7  ;;  %v1506_v26 = vmul.f32 %v3222_v57, %v1407_v14  ;;  %v1362_v39 = vadd.f32 %v3391_v23, %v1072_v22  ;;  %v1074_v34 = vpop.f32.mrb[87].mxu0  ;;  %v1401_v42 = vpop.f32.mrb[87].mxu1 }
 0x1c0   :  { %v2379_v30 = vpack.c.bf16 %v1638_v31, %v1637_v15  ;;  %v2374_v12 = vpack.c.bf16 %v1636_v21, %v1635_v18  ;;  %v1504_v55 = vmul.f32 %v3222_v57, %v1399_v43  ;;  %v1410_v37 = vadd.f32 %v2535_v35, %v3183_v16 }
 0x1c1   :  { %2430 = vst [vmem:[%s3528_s4 + $0xa0] sm:$0xff] %v2354_v25   ;;  %v1565_v4 = vadd.f32 %v3227_v1, %v1494_v47  ;;  %v1495_v38 = vmul.f32 %v3222_v57, %v1362_v39  ;;  %v1402_v54 = vadd.f32 %v1401_v42, %v3175_v8  ;;  %v1577_v16 = vadd.f32 %v3227_v1, %v1506_v26 }
 0x1c2   :  { %2435 = vst [vmem:[%s3528_s4 + $0xc8] sm:$0xff] %v2379_v30   ;;  %2434 = vst [vmem:[%s3528_s4 + $0xc0] sm:$0xff] %v2374_v12   ;;  %v1575_v23 = vadd.f32 %v3227_v1, %v1504_v55  ;;  %v1507_v13 = vmul.f32 %v3222_v57, %v1410_v37 }
 0x1c3   :  { %v1566_v10 = vadd.f32 %v3227_v1, %v1495_v38  ;;  %v1505_v41 = vmul.f32 %v3222_v57, %v1402_v54  ;;  %v1629_v63 = vmax.f32 %v1565_v4, 0.0  ;;  %v1641_v61 = vmax.f32 %v1577_v16, 0.0 }
 0x1c4   :  { %v1578_v8 = vadd.f32 %v3227_v1, %v1507_v13  ;;  %v1077_v19 = vpop.f32.mrb[88].mxu0  ;;  %v2538_v27 = vpop.f32.mrb[88].mxu1  ;;  %v1639_v62 = vmax.f32 %v1575_v23, 0.0 }
 0x1c5   :  { %v1630_v46 = vmax.f32 %v1566_v10, 0.0  ;;  %v1576_v50 = vadd.f32 %v3227_v1, %v1505_v41  ;;  %v1367_v49 = vadd.f32 %v3402_v9, %v1077_v19  ;;  %v1423_v60 = vadd.f32 %v2538_v27, %v3195_v28  ;;  %v1079_v52 = vpop.f32.mrb[89].mxu0  ;;  %v1414_v58 = vpop.f32.mrb[89].mxu1 }
 0x1c6   :  { %v1642_v2 = vmax.f32 %v1578_v8, 0.0  ;;  %v1415_v11 = vadd.f32 %v1414_v58, %v3187_v20  ;;  %v1080_v0 = vpop.f32.mrb[90].mxu0  ;;  %v2539_v29 = vpop.f32.mrb[90].mxu1 }
 0x1c7   :  { %v2359_v56 = vpack.c.bf16 %v1630_v46, %v1629_v63  ;;  %v1640_v53 = vmax.f32 %v1576_v50, 0.0  ;;  %v1496_v3 = vmul.f32 %v3222_v57, %v1367_v49  ;;  %v1510_v45 = vmul.f32 %v3222_v57, %v1423_v60  ;;  %v1082_v15 = vpop.f32.mrb[91].mxu0  ;;  %v1417_v5 = vpop.f32.mrb[91].mxu1 }
 0x1c8   :  { %v2389_v9 = vpack.c.bf16 %v1642_v2, %v1641_v61  ;;  %v1508_v28 = vmul.f32 %v3222_v57, %v1415_v11  ;;  %v1370_v7 = vadd.f32 %v3407_v51, %v1080_v0  ;;  %v1426_v14 = vadd.f32 %v2539_v29, %v3199_v32 }
 0x1c9   :  { %2431 = vst [vmem:[%s3528_s4 + $0xa8] sm:$0xff] %v2359_v56   ;;  %v2384_v20 = vpack.c.bf16 %v1640_v53, %v1639_v62  ;;  %v1567_v33 = vadd.f32 %v3227_v1, %v1496_v3  ;;  %v1581_v17 = vadd.f32 %v3227_v1, %v1510_v45  ;;  %v1418_v18 = vadd.f32 %v1417_v5, %v3191_v24 }
 0x1ca   :  { %2437 = vst [vmem:[%s3528_s4 + $0xd8] sm:$0xff] %v2389_v9   ;;  %v1579_v31 = vadd.f32 %v3227_v1, %v1508_v28  ;;  %v1497_v51 = vmul.f32 %v3222_v57, %v1370_v7  ;;  %v1511_v32 = vmul.f32 %v3222_v57, %v1426_v14 }
 0x1cb   :  { %2436 = vst [vmem:[%s3528_s4 + $0xd0] sm:$0xff] %v2384_v20   ;;  %v1509_v21 = vmul.f32 %v3222_v57, %v1418_v18  ;;  %v1631_v43 = vmax.f32 %v1567_v33, 0.0  ;;  %v1645_v47 = vmax.f32 %v1581_v17, 0.0 }
 0x1cc   :  { %v1568_v22 = vadd.f32 %v3227_v1, %v1497_v51  ;;  %v1582_v24 = vadd.f32 %v3227_v1, %v1511_v32  ;;  %v1085_v35 = vpop.f32.mrb[92].mxu0  ;;  %v2542_v25 = vpop.f32.mrb[92].mxu1  ;;  %v1643_v12 = vmax.f32 %v1579_v31, 0.0 }
 0x1cd   :  { %v1580_v26 = vadd.f32 %v3227_v1, %v1509_v21  ;;  %v1375_v39 = vadd.f32 %v3400_v6, %v1085_v35  ;;  %v1439_v34 = vadd.f32 %v2542_v25, %v3211_v44  ;;  %v1087_v42 = vpop.f32.mrb[93].mxu0  ;;  %v1430_v30 = vpop.f32.mrb[93].mxu1 }
 0x1ce   :  { %v1632_v55 = vmax.f32 %v1568_v22, 0.0  ;;  %v1646_v37 = vmax.f32 %v1582_v24, 0.0  ;;  %v1431_v4 = vadd.f32 %v1430_v30, %v3203_v36  ;;  %v1088_v38 = vpop.f32.mrb[94].mxu0  ;;  %v2543_v54 = vpop.f32.mrb[94].mxu1 }
 0x1cf   :  { %v1644_v16 = vmax.f32 %v1580_v26, 0.0  ;;  %v1498_v23 = vmul.f32 %v3222_v57, %v1375_v39  ;;  %v1514_v13 = vmul.f32 %v3222_v57, %v1439_v34  ;;  %v1378_v10 = vadd.f32 %v3404_v59, %v1088_v38  ;;  %v1090_v41 = vpop.f32.mrb[95].mxu0  ;;  %v1433_v6 = vpop.f32.mrb[95].mxu1 }
 0x1d0   :  { %v2364_v63 = vpack.c.bf16 %v1632_v55, %v1631_v43  ;;  %v2399_v44 = vpack.c.bf16 %v1646_v37, %v1645_v47  ;;  %v1512_v8 = vmul.f32 %v3222_v57, %v1431_v4  ;;  %v1442_v19 = vadd.f32 %v2543_v54, %v3215_v48 }
 0x1d1   :  { %v2394_v27 = vpack.c.bf16 %v1644_v16, %v1643_v12  ;;  %v1569_v36 = vadd.f32 %v3227_v1, %v1498_v23  ;;  %v1499_v46 = vmul.f32 %v3222_v57, %v1378_v10  ;;  %v1585_v59 = vadd.f32 %v3227_v1, %v1514_v13 }
 0x1d2   :  { %2432 = vst [vmem:[%s3528_s4 + $0xb0] sm:$0xff] %v2364_v63   ;;  %2439 = vst [vmem:[%s3528_s4 + $0xe8] sm:$0xff] %v2399_v44   ;;  %v1515_v50 = vmul.f32 %v3222_v57, %v1442_v19  ;;  %v1434_v49 = vadd.f32 %v1433_v6, %v3207_v40  ;;  %v1583_v60 = vadd.f32 %v3227_v1, %v1512_v8 }
 0x1d3   :  { %2438 = vst [vmem:[%s3528_s4 + $0xe0] sm:$0xff] %v2394_v27   ;;  %v1570_v48 = vadd.f32 %v3227_v1, %v1499_v46  ;;  %v1633_v61 = vmax.f32 %v1569_v36, 0.0  ;;  %v1649_v2 = vmax.f32 %v1585_v59, 0.0 }
 0x1d4   :  { %v1586_v52 = vadd.f32 %v3227_v1, %v1515_v50  ;;  %v1513_v58 = vmul.f32 %v3222_v57, %v1434_v49  ;;  %v1647_v40 = vmax.f32 %v1583_v60, 0.0 }
 0x1d5   :  { %v1634_v62 = vmax.f32 %v1570_v48, 0.0 }
 0x1d6   :  { %v1650_v11 = vmax.f32 %v1586_v52, 0.0  ;;  %v1584_v0 = vadd.f32 %v3227_v1, %v1513_v58 }
 0x1d7   :  { %v2369_v29 = vpack.c.bf16 %v1634_v62, %v1633_v61 }
 0x1d8   :  { %v2409_v56 = vpack.c.bf16 %v1650_v11, %v1649_v2  ;;  %v1648_v53 = vmax.f32 %v1584_v0, 0.0 }
 0x1d9   :  { %2433 = vst [vmem:[%s3528_s4 + $0xb8] sm:$0xff] %v2369_v29  }
 0x1da   :  { %2441 = vst [vmem:[%s3528_s4 + $0xf8] sm:$0xff] %v2409_v56   ;;  %v2404_v3 = vpack.c.bf16 %v1648_v53, %v1647_v40 }
 0x1dc   :  { %2440 = vst [vmem:[%s3528_s4 + $0xf0] sm:$0xff] %v2404_v3  }

// kernel: resnet20_forward.37
= control target key start
LH: loop header
LB: loop body
LE: loop exit
PB: predicated region body
PF: predicated region fallthrough
CT: control target
= control target key end

     0   :  { %vm90_vm0 = vcmask 261120   ;;  %s578_s1 = inlined_call_operand.vmem [shape: bf16[32,128], index: 1, kind: input, shape index: {}]   ;;  %s579_s0 = inlined_call_operand.vmem [shape: bf16[128,32], index: 0, kind: input, shape index: {}]   ;;  %s580_s2 = inlined_call_operand.vmem [shape: f32[1,128], index: 2, kind: input, shape index: {}]   ;;  %s581_s3 = inlined_call_operand.vmem [shape: f32[1,128], index: 3, kind: input, shape index: {}]   ;;  %s582_s4 = inlined_call_operand.vmem [shape: bf16[128,128], index: 4, kind: output, shape index: {}]  }
   0x1   :  { %v475_v0 = vld [vmem:[%s578_s1] sm:$0xff]   ;;  %v476_v1 = vld [vmem:[%s578_s1 + $0x8] sm:$0xff]   ;;  %v481_v6 = vld [vmem:[%s579_s0 + $0x10] sm:$0xff]  }
   0x2   :  { %451 = vmatprep.subr.bf16.mxu0 %v475_v0  ;;  %471 = vmatprep.subr.bf16.mxu1 %v475_v0  ;;  %v477_v2 = vld [vmem:[%s579_s0] sm:$0xff]   ;;  %v479_v4 = vld [vmem:[%s579_s0 + $0x8] sm:$0xff]   ;;  %v482_v7 = vld [vmem:[%s579_s0 + $0x30] sm:$0xff]  }
   0x3   :  { %452 = vmatpush3.bf16.msra.mxu0 %v475_v0  ;;  %473 = vmatpush3.bf16.msra.mxu1 %v475_v0  ;;  %v478_v3 = vld [vmem:[%s579_s0 + $0x20] sm:$0xff]   ;;  %v480_v5 = vld [vmem:[%s579_s0 + $0x28] sm:$0xff]   ;;  %v483_v8 = vld [vmem:[%s579_s0 + $0x18] sm:$0xff]  }
   0x4   :  { %453 = vmatprep.subr.bf16.mxu0 %v476_v1  ;;  %472 = vmatprep.subr.bf16.mxu1 %v476_v1  ;;  %v484_v9 = vld [vmem:[%s579_s0 + $0x38] sm:$0xff]   ;;  %v360_v10 = vld [vmem:[%s580_s2] ss:$0 sm:$0xff] }
   0x5   :  { %455 = vmatprep.mubr.msk.bf16.mxu0 %vm90_vm0, %v477_v2  ;;  %463 = vmatprep.mubr.msk.bf16.mxu1 %vm90_vm0, %v478_v3  ;;  %v361_v17 = vld [vmem:[%s581_s3] ss:$0 sm:$0xff] }
   0x7   :  { %454 = vmatpush3.bf16.msra.mxu0 %v476_v1  ;;  %474 = vmatpush3.bf16.msra.mxu1 %v476_v1 }
   0xa   :  { %456 = vmatmul.mubr.msk.bf16.vlgmr.msra.gmra.mrb[0].mxu0 %vm90_vm0, %v479_v4  ;;  %464 = vmatmul.mubr.msk.bf16.vlgmr.msra.gmra.mrb[0].mxu1 %vm90_vm0, %v480_v5 }
   0xb   :  { %459 = vmatprep.mubr.msk.bf16.mxu0 %vm90_vm0, %v481_v6  ;;  %467 = vmatprep.mubr.msk.bf16.mxu1 %vm90_vm0, %v482_v7 }
  0x12   :  { %460 = vmatmul.mubr.msk.bf16.gmra.mrb[4].mxu0 %vm90_vm0, %v483_v8  ;;  %468 = vmatmul.mubr.msk.bf16.gmra.mrb[4].mxu1 %vm90_vm0, %v484_v9 }
  0xdd   :  { %v457_v11 = vpop.f32.mrb[0].mxu0  ;;  %v465_v12 = vpop.f32.mrb[0].mxu1 }
  0xde   :  { %v221_v13 = vmul.f32 %v457_v11, %v360_v10  ;;  %v229_v14 = vmul.f32 %v465_v12, %v360_v10  ;;  %v149_v15 = vpop.f32.mrb[1].mxu0  ;;  %v181_v16 = vpop.f32.mrb[1].mxu1 }
  0xdf   :  { %v219_v18 = vmul.f32 %v360_v10, %v149_v15  ;;  %v227_v19 = vmul.f32 %v360_v10, %v181_v16  ;;  %v458_v20 = vpop.f32.mrb[2].mxu0  ;;  %v466_v21 = vpop.f32.mrb[2].mxu1 }
  0xe0   :  { %v222_v22 = vmul.f32 %v458_v20, %v360_v10  ;;  %v230_v23 = vmul.f32 %v466_v21, %v360_v10  ;;  %v152_v24 = vpop.f32.mrb[3].mxu0  ;;  %v184_v25 = vpop.f32.mrb[3].mxu1  ;;  %v244_v28 = vadd.f32 %v361_v17, %v221_v13  ;;  %v252_v29 = vadd.f32 %v361_v17, %v229_v14 }
  0xe1   :  { %v220_v26 = vmul.f32 %v360_v10, %v152_v24  ;;  %v228_v27 = vmul.f32 %v360_v10, %v184_v25  ;;  %v242_v32 = vadd.f32 %v361_v17, %v219_v18  ;;  %v250_v33 = vadd.f32 %v361_v17, %v227_v19 }
  0xe2   :  { %v245_v30 = vadd.f32 %v361_v17, %v222_v22  ;;  %v253_v31 = vadd.f32 %v361_v17, %v230_v23 }
  0xe3   :  { %v243_v34 = vadd.f32 %v361_v17, %v220_v26  ;;  %v251_v35 = vadd.f32 %v361_v17, %v228_v27 }
  0xe4   :  { %v402_v36 = vpack.c.bf16 %v245_v30, %v244_v28  ;;  %v422_v37 = vpack.c.bf16 %v253_v31, %v252_v29 }
  0xe5   :  { %v397_v38 = vpack.c.bf16 %v243_v34, %v242_v32  ;;  %v417_v39 = vpack.c.bf16 %v251_v35, %v250_v33  ;;  %v461_v40 = vpop.f32.mrb[4].mxu0  ;;  %v469_v41 = vpop.f32.mrb[4].mxu1 }
  0xe6   :  { %434 = vst [vmem:[%s582_s4 + $0x8] sm:$0xff] %v402_v36   ;;  %438 = vst [vmem:[%s582_s4 + $0x28] sm:$0xff] %v422_v37   ;;  %v225_v42 = vmul.f32 %v461_v40, %v360_v10  ;;  %v233_v43 = vmul.f32 %v469_v41, %v360_v10  ;;  %v165_v44 = vpop.f32.mrb[5].mxu0  ;;  %v197_v45 = vpop.f32.mrb[5].mxu1 }
  0xe7   :  { %398 = vst [vmem:[%s582_s4] sm:$0xff] %v397_v38   ;;  %437 = vst [vmem:[%s582_s4 + $0x20] sm:$0xff] %v417_v39   ;;  %v223_v46 = vmul.f32 %v360_v10, %v165_v44  ;;  %v231_v47 = vmul.f32 %v360_v10, %v197_v45  ;;  %v462_v48 = vpop.f32.mrb[6].mxu0  ;;  %v470_v49 = vpop.f32.mrb[6].mxu1 }
  0xe8   :  { %v226_v50 = vmul.f32 %v462_v48, %v360_v10  ;;  %v234_v51 = vmul.f32 %v470_v49, %v360_v10  ;;  %v168_v52 = vpop.f32.mrb[7].mxu0  ;;  %v200_v53 = vpop.f32.mrb[7].mxu1  ;;  %v248_v56 = vadd.f32 %v361_v17, %v225_v42  ;;  %v256_v57 = vadd.f32 %v361_v17, %v233_v43 }
  0xe9   :  { %v224_v54 = vmul.f32 %v360_v10, %v168_v52  ;;  %v232_v55 = vmul.f32 %v360_v10, %v200_v53  ;;  %v246_v60 = vadd.f32 %v361_v17, %v223_v46  ;;  %v254_v61 = vadd.f32 %v361_v17, %v231_v47 }
  0xea   :  { %v249_v58 = vadd.f32 %v361_v17, %v226_v50  ;;  %v257_v59 = vadd.f32 %v361_v17, %v234_v51 }
  0xeb   :  { %v247_v62 = vadd.f32 %v361_v17, %v224_v54  ;;  %v255_v63 = vadd.f32 %v361_v17, %v232_v55 }
  0xec   :  { %v412_v0 = vpack.c.bf16 %v249_v58, %v248_v56  ;;  %v432_v1 = vpack.c.bf16 %v257_v59, %v256_v57 }
  0xed   :  { %v407_v2 = vpack.c.bf16 %v247_v62, %v246_v60  ;;  %v427_v3 = vpack.c.bf16 %v255_v63, %v254_v61 }
  0xee   :  { %436 = vst [vmem:[%s582_s4 + $0x18] sm:$0xff] %v412_v0   ;;  %440 = vst [vmem:[%s582_s4 + $0x38] sm:$0xff] %v432_v1  }
  0xef   :  { %435 = vst [vmem:[%s582_s4 + $0x10] sm:$0xff] %v407_v2   ;;  %439 = vst [vmem:[%s582_s4 + $0x30] sm:$0xff] %v427_v3  }

// kernel: resnet20_forward.36
= control target key start
LH: loop header
LB: loop body
LE: loop exit
PB: predicated region body
PF: predicated region fallthrough
CT: control target
= control target key end

     0   :  { %vm314_vm0 = vcmask 261120   ;;  %s1207_s1 = inlined_call_operand.vmem [shape: bf16[288,128], index: 1, kind: input, shape index: {}]   ;;  %s1208_s0 = inlined_call_operand.vmem [shape: bf16[128,288], index: 0, kind: input, shape index: {}]   ;;  %s1209_s2 = inlined_call_operand.vmem [shape: f32[1,128], index: 2, kind: input, shape index: {}]   ;;  %s1210_s3 = inlined_call_operand.vmem [shape: f32[1,128], index: 3, kind: input, shape index: {}]   ;;  %s1211_s4 = inlined_call_operand.vmem [shape: bf16[128,128], index: 4, kind: output, shape index: {}]  }
   0x1   :  { %v920_v0 = vld [vmem:[%s1207_s1 + $0x40] sm:$0xff]   ;;  %v922_v2 = vld [vmem:[%s1207_s1 + $0x48] sm:$0xff]   ;;  %v924_v4 = vld [vmem:[%s1207_s1 + $0x50] sm:$0xff]  }
   0x2   :  { %v921_v1 = vld [vmem:[%s1207_s1] sm:$0xff]   ;;  %810 = vmatprep.subr.bf16.mxu0 %v920_v0  ;;  %904 = vmatprep.subr.bf16.mxu1 %v920_v0  ;;  %v923_v3 = vld [vmem:[%s1207_s1 + $0x8] sm:$0xff]   ;;  %v925_v5 = vld [vmem:[%s1207_s1 + $0x10] sm:$0xff]  }
   0x3   :  { %811 = vmatpush3.bf16.msra.mxu0 %v921_v1  ;;  %912 = vmatpush3.bf16.msra.mxu1 %v921_v1  ;;  %v926_v6 = vld [vmem:[%s1207_s1 + $0x58] sm:$0xff]   ;;  %v928_v8 = vld [vmem:[%s1207_s1 + $0x60] sm:$0xff]   ;;  %v930_v10 = vld [vmem:[%s1207_s1 + $0x68] sm:$0xff]  }
   0x4   :  { %812 = vmatprep.subr.bf16.mxu0 %v922_v2  ;;  %905 = vmatprep.subr.bf16.mxu1 %v922_v2  ;;  %v927_v7 = vld [vmem:[%s1207_s1 + $0x18] sm:$0xff]   ;;  %v929_v9 = vld [vmem:[%s1207_s1 + $0x20] sm:$0xff]   ;;  %v931_v13 = vld [vmem:[%s1207_s1 + $0x28] sm:$0xff]  }
   0x5   :  { %v938_v11 = vld [vmem:[%s1208_s0 + $0x4] ss:$12 sps:$4 sm:$0xff]   ;;  %v941_v12 = vld [vmem:[%s1208_s0 + $0x94] ss:$12 sps:$4 sm:$0xff]   ;;  %v934_v16 = vld [vmem:[%s1207_s1 + $0x78] sm:$0xff]  }
   0x6   :  { %v932_v14 = vld [vmem:[%s1207_s1 + $0x70] sm:$0xff]   ;;  %371 = vmatprep.mubr.bf16.mxu0 %v938_v11  ;;  %419 = vmatprep.mubr.bf16.mxu1 %v941_v12  ;;  %v935_v17 = vld [vmem:[%s1207_s1 + $0x38] sm:$0xff]   ;;  %v936_v18 = vld [vmem:[%s1208_s0] ss:$12 sps:$4 sm:$0xff]  }
   0x7   :  { %813 = vmatpush3.bf16.msra.mxu0 %v923_v3  ;;  %913 = vmatpush3.bf16.msra.mxu1 %v923_v3  ;;  %v933_v15 = vld [vmem:[%s1207_s1 + $0x30] sm:$0xff]   ;;  %v942_v19 = vld [vmem:[%s1207_s1 + $0x80] sm:$0xff]   ;;  %v943_v21 = vld [vmem:[%s1208_s0 + $0x1c] ss:$12 sps:$4 sm:$0xff]  }
   0x8   :  { %814 = vmatprep.subr.bf16.mxu0 %v924_v4  ;;  %906 = vmatprep.subr.bf16.mxu1 %v924_v4  ;;  %v939_v20 = vld [vmem:[%s1208_s0 + $0x90] ss:$12 sps:$4 sm:$0xff]   ;;  %v945_v22 = vld [vmem:[%s1208_s0 + $0xac] ss:$12 sps:$4 sm:$0xff]   ;;  %v948_v25 = vld [vmem:[%s1208_s0 + $0xa8] ss:$12 sps:$4 sm:$0xff]  }
   0x9   :  { %v949_v23 = vld [vmem:[%s1207_s1 + $0x88] sm:$0xff]   ;;  %v947_v24 = vld [vmem:[%s1208_s0 + $0x18] ss:$12 sps:$4 sm:$0xff]   ;;  %v950_v26 = vld [vmem:[%s1208_s0 + $0x34] ss:$12 sps:$4 sm:$0xff]  }
   0xa   :  { %v952_v27 = vld [vmem:[%s1208_s0 + $0x8] ss:$12 sps:$4 sm:$0xff]   ;;  %v953_v28 = vld [vmem:[%s1208_s0 + $0x30] ss:$12 sps:$4 sm:$0xff]   ;;  %v954_v29 = vld [vmem:[%s1208_s0 + $0x20] ss:$12 sps:$4 sm:$0xff]  }
   0xb   :  { %815 = vmatpush3.bf16.msra.mxu0 %v925_v5  ;;  %914 = vmatpush3.bf16.msra.mxu1 %v925_v5  ;;  %v955_v30 = vld [vmem:[%s1208_s0 + $0x4c] ss:$12 sps:$4 sm:$0xff]   ;;  %v958_v32 = vld [vmem:[%s1208_s0 + $0x48] ss:$12 sps:$4 sm:$0xff]   ;;  %v959_v33 = vld [vmem:[%s1208_s0 + $0x50] ss:$12 sps:$4 sm:$0xff]  }
   0xc   :  { %816 = vmatprep.subr.bf16.mxu0 %v926_v6  ;;  %907 = vmatprep.subr.bf16.mxu1 %v926_v6  ;;  %v957_v31 = vld [vmem:[%s1208_s0 + $0x38] ss:$12 sps:$4 sm:$0xff]   ;;  %v962_v35 = vld [vmem:[%s1208_s0 + $0x68] ss:$12 sps:$4 sm:$0xff]   ;;  %v963_v36 = vld [vmem:[%s1208_s0 + $0x60] ss:$12 sps:$4 sm:$0xff]  }
   0xd   :  { %v960_v34 = vld [vmem:[%s1208_s0 + $0x64] ss:$12 sps:$4 sm:$0xff]   ;;  %v964_v37 = vld [vmem:[%s1208_s0 + $0x80] ss:$12 sps:$4 sm:$0xff]   ;;  %v965_v38 = vld [vmem:[%s1208_s0 + $0x7c] ss:$12 sps:$4 sm:$0xff]  }
   0xe   :  { %v967_v39 = vld [vmem:[%s1208_s0 + $0x98] ss:$12 sps:$4 sm:$0xff]   ;;  %v969_v41 = vld [vmem:[%s1208_s0 + $0xb0] ss:$12 sps:$4 sm:$0xff]   ;;  %v1140_v4 = vld [vmem:[%s1209_s2] ss:$0 sm:$0xff] }
   0xf   :  { %817 = vmatpush3.bf16.msra.mxu0 %v927_v7  ;;  %915 = vmatpush3.bf16.msra.mxu1 %v927_v7  ;;  %v968_v40 = vld [vmem:[%s1208_s0 + $0x78] ss:$12 sps:$4 sm:$0xff]  }
  0x10   :  { %818 = vmatprep.subr.bf16.mxu0 %v928_v8  ;;  %908 = vmatprep.subr.bf16.mxu1 %v928_v8  ;;  %v1145_v8 = vld [vmem:[%s1210_s3] ss:$0 sm:$0xff] }
  0x13   :  { %819 = vmatpush3.bf16.msra.mxu0 %v929_v9  ;;  %916 = vmatpush3.bf16.msra.mxu1 %v929_v9 }
  0x14   :  { %820 = vmatprep.subr.bf16.mxu0 %v930_v10  ;;  %909 = vmatprep.subr.bf16.mxu1 %v930_v10 }
  0x17   :  { %821 = vmatpush3.bf16.msra.mxu0 %v931_v13  ;;  %917 = vmatpush3.bf16.msra.mxu1 %v931_v13 }
  0x18   :  { %822 = vmatprep.subr.bf16.mxu0 %v932_v14  ;;  %910 = vmatprep.subr.bf16.mxu1 %v932_v14 }
  0x1b   :  { %823 = vmatpush3.bf16.msra.mxu0 %v933_v15  ;;  %918 = vmatpush3.bf16.msra.mxu1 %v933_v15 }
  0x1c   :  { %824 = vmatprep.subr.bf16.mxu0 %v934_v16  ;;  %911 = vmatprep.subr.bf16.mxu1 %v934_v16 }
  0x1f   :  { %825 = vmatpush3.bf16.msra.mxu0 %v935_v17  ;;  %919 = vmatpush3.bf16.msra.mxu1 %v935_v17 }
  0x20   :  { %884 = vmatprep.subr.bf16.mxu1 %v942_v19 }
  0x22   :  { %372 = vmatmul.mubr.bf16.vlgmr.msra.gmra.mrb[0].mxu0 %v936_v18  ;;  %420 = vmatmul.mubr.bf16.vlgmr.msra.gmra.mrb[0].mxu1 %v939_v20 }
  0x23   :  { %885 = vmatpush3.bf16.msra.mxu1 %v942_v19  ;;  %379 = vmatprep.mubr.bf16.mxu0 %v943_v21 }
  0x24   :  { %427 = vmatprep.mubr.bf16.mxu1 %v945_v22  ;;  %886 = vmatprep.subr.bf16.mxu1 %v949_v23 }
  0x27   :  { %887 = vmatpush3.bf16.msra.mxu1 %v949_v23 }
  0x2a   :  { %380 = vmatmul.mubr.bf16.gmra.mrb[4].mxu0 %v947_v24  ;;  %428 = vmatmul.mubr.bf16.gmra.mrb[4].mxu1 %v948_v25 }
  0x2b   :  { %387 = vmatprep.mubr.bf16.mxu0 %v950_v26  ;;  %888 = vmatprep.mubr.msk.bf16.mxu1 %vm314_vm0, %v952_v27 }
  0x32   :  { %388 = vmatmul.mubr.bf16.gmra.mrb[8].mxu0 %v953_v28  ;;  %889 = vmatmul.mubr.msk.bf16.vlgmr.msra.gmra.mrb[8].mxu1 %vm314_vm0, %v954_v29 }
  0x33   :  { %395 = vmatprep.mubr.bf16.mxu0 %v955_v30  ;;  %892 = vmatprep.mubr.msk.bf16.mxu1 %vm314_vm0, %v957_v31 }
  0x3a   :  { %396 = vmatmul.mubr.bf16.gmra.mrb[12].mxu0 %v958_v32  ;;  %893 = vmatmul.mubr.msk.bf16.gmra.mrb[12].mxu1 %vm314_vm0, %v959_v33 }
  0x3b   :  { %403 = vmatprep.mubr.bf16.mxu0 %v960_v34  ;;  %896 = vmatprep.mubr.msk.bf16.mxu1 %vm314_vm0, %v962_v35 }
  0x42   :  { %404 = vmatmul.mubr.bf16.gmra.mrb[16].mxu0 %v963_v36  ;;  %897 = vmatmul.mubr.msk.bf16.gmra.mrb[16].mxu1 %vm314_vm0, %v964_v37 }
  0x43   :  { %411 = vmatprep.mubr.bf16.mxu0 %v965_v38  ;;  %900 = vmatprep.mubr.msk.bf16.mxu1 %vm314_vm0, %v967_v39 }
  0x4a   :  { %412 = vmatmul.mubr.bf16.gmra.mrb[20].mxu0 %v968_v40  ;;  %901 = vmatmul.mubr.msk.bf16.gmra.mrb[20].mxu1 %vm314_vm0, %v969_v41 }
  0xf5   :  { %v826_v42 = vpop.f32.mrb[0].mxu0  ;;  %v862_v43 = vpop.f32.mrb[0].mxu1 }
  0xf6   :  { %v827_v44 = vpop.f32.mrb[1].mxu0  ;;  %v863_v45 = vpop.f32.mrb[1].mxu1 }
  0xf7   :  { %v828_v46 = vadd.f32 %v827_v44, %v826_v42  ;;  %v1129_v47 = vadd.f32 %v863_v45, %v862_v43  ;;  %v829_v48 = vpop.f32.mrb[2].mxu0  ;;  %v865_v49 = vpop.f32.mrb[2].mxu1 }
  0xf8   :  { %v830_v50 = vpop.f32.mrb[3].mxu0  ;;  %v866_v51 = vpop.f32.mrb[3].mxu1 }
  0xf9   :  { %v831_v52 = vadd.f32 %v830_v50, %v829_v48  ;;  %v1131_v53 = vadd.f32 %v866_v51, %v865_v49 }
  0xfd   :  { %v832_v54 = vpop.f32.mrb[4].mxu0  ;;  %v868_v55 = vpop.f32.mrb[4].mxu1 }
  0xfe   :  { %v833_v56 = vpop.f32.mrb[5].mxu0  ;;  %v869_v57 = vpop.f32.mrb[5].mxu1 }
  0xff   :  { %v834_v58 = vadd.f32 %v833_v56, %v832_v54  ;;  %v1133_v59 = vadd.f32 %v869_v57, %v868_v55  ;;  %v835_v60 = vpop.f32.mrb[6].mxu0  ;;  %v871_v61 = vpop.f32.mrb[6].mxu1 }
 0x100   :  { %v836_v62 = vpop.f32.mrb[7].mxu0  ;;  %v872_v63 = vpop.f32.mrb[7].mxu1 }
 0x101   :  { %v837_v0 = vadd.f32 %v836_v62, %v835_v60  ;;  %v1135_v1 = vadd.f32 %v872_v63, %v871_v61 }
 0x105   :  { %v838_v2 = vpop.f32.mrb[8].mxu0  ;;  %v890_v3 = vpop.f32.mrb[8].mxu1 }
 0x106   :  { %v479_v5 = vadd.f32 %v890_v3, %v834_v58  ;;  %v839_v6 = vpop.f32.mrb[9].mxu0  ;;  %v470_v7 = vpop.f32.mrb[9].mxu1 }
 0x107   :  { %v840_v9 = vadd.f32 %v839_v6, %v838_v2  ;;  %v471_v10 = vadd.f32 %v828_v46, %v470_v7  ;;  %v841_v11 = vpop.f32.mrb[10].mxu0  ;;  %v891_v12 = vpop.f32.mrb[10].mxu1 }
 0x108   :  { %v542_v13 = vmul.f32 %v1140_v4, %v479_v5  ;;  %v482_v14 = vadd.f32 %v891_v12, %v837_v0  ;;  %v842_v15 = vpop.f32.mrb[11].mxu0  ;;  %v473_v16 = vpop.f32.mrb[11].mxu1 }
 0x109   :  { %v540_v17 = vmul.f32 %v1140_v4, %v471_v10  ;;  %v843_v18 = vadd.f32 %v842_v15, %v841_v11  ;;  %v474_v19 = vadd.f32 %v831_v52, %v473_v16 }
 0x10a   :  { %v565_v20 = vadd.f32 %v1145_v8, %v542_v13  ;;  %v543_v21 = vmul.f32 %v1140_v4, %v482_v14 }
 0x10b   :  { %v563_v22 = vadd.f32 %v1145_v8, %v540_v17  ;;  %v541_v23 = vmul.f32 %v1140_v4, %v474_v19 }
 0x10c   :  { %v566_v24 = vadd.f32 %v1145_v8, %v543_v21  ;;  %v581_v28 = vmax.f32 %v565_v20, 0.0 }
 0x10d   :  { %v564_v25 = vadd.f32 %v1145_v8, %v541_v23  ;;  %v844_v26 = vpop.f32.mrb[12].mxu0  ;;  %v894_v27 = vpop.f32.mrb[12].mxu1  ;;  %v579_v32 = vmax.f32 %v563_v22, 0.0 }
 0x10e   :  { %v582_v29 = vmax.f32 %v566_v24, 0.0  ;;  %v845_v30 = vpop.f32.mrb[13].mxu0  ;;  %v486_v31 = vpop.f32.mrb[13].mxu1 }
 0x10f   :  { %v580_v33 = vmax.f32 %v564_v25, 0.0  ;;  %v846_v34 = vadd.f32 %v845_v30, %v844_v26  ;;  %v487_v35 = vadd.f32 %v840_v9, %v486_v31  ;;  %v847_v36 = vpop.f32.mrb[14].mxu0  ;;  %v895_v37 = vpop.f32.mrb[14].mxu1 }
 0x110   :  { %v771_v38 = vpack.c.bf16 %v582_v29, %v581_v28  ;;  %v848_v39 = vpop.f32.mrb[15].mxu0  ;;  %v489_v40 = vpop.f32.mrb[15].mxu1 }
 0x111   :  { %v766_v41 = vpack.c.bf16 %v580_v33, %v579_v32  ;;  %v495_v42 = vadd.f32 %v894_v27, %v846_v34  ;;  %v544_v43 = vmul.f32 %v1140_v4, %v487_v35  ;;  %v849_v44 = vadd.f32 %v848_v39, %v847_v36 }
 0x112   :  { %803 = vst [vmem:[%s1211_s4 + $0x8] sm:$0xff] %v771_v38   ;;  %v490_v45 = vadd.f32 %v843_v18, %v489_v40 }
 0x113   :  { %767 = vst [vmem:[%s1211_s4] sm:$0xff] %v766_v41   ;;  %v546_v46 = vmul.f32 %v1140_v4, %v495_v42  ;;  %v498_v48 = vadd.f32 %v895_v37, %v849_v44  ;;  %v567_v49 = vadd.f32 %v1145_v8, %v544_v43 }
 0x114   :  { %v545_v50 = vmul.f32 %v1140_v4, %v490_v45 }
 0x115   :  { %v569_v51 = vadd.f32 %v1145_v8, %v546_v46  ;;  %v547_v52 = vmul.f32 %v1140_v4, %v498_v48  ;;  %v850_v54 = vpop.f32.mrb[16].mxu0  ;;  %v898_v55 = vpop.f32.mrb[16].mxu1  ;;  %v583_v0 = vmax.f32 %v567_v49, 0.0 }
 0x116   :  { %v568_v56 = vadd.f32 %v1145_v8, %v545_v50  ;;  %v851_v57 = vpop.f32.mrb[17].mxu0  ;;  %v502_v58 = vpop.f32.mrb[17].mxu1 }
 0x117   :  { %v570_v60 = vadd.f32 %v1145_v8, %v547_v52  ;;  %v852_v61 = vadd.f32 %v851_v57, %v850_v54  ;;  %v853_v62 = vpop.f32.mrb[18].mxu0  ;;  %v899_v63 = vpop.f32.mrb[18].mxu1  ;;  %v585_v6 = vmax.f32 %v569_v51, 0.0 }
 0x118   :  { %v584_v2 = vmax.f32 %v568_v56, 0.0  ;;  %v854_v3 = vpop.f32.mrb[19].mxu0  ;;  %v505_v5 = vpop.f32.mrb[19].mxu1 }
 0x119   :  { %v586_v7 = vmax.f32 %v570_v60, 0.0  ;;  %v503_v9 = vadd.f32 %v852_v61, %v502_v58  ;;  %v855_v10 = vadd.f32 %v854_v3, %v853_v62 }
 0x11a   :  { %v776_v11 = vpack.c.bf16 %v584_v2, %v583_v0 }
 0x11b   :  { %v781_v12 = vpack.c.bf16 %v586_v7, %v585_v6  ;;  %v548_v13 = vmul.f32 %v1140_v4, %v503_v9  ;;  %v506_v14 = vadd.f32 %v855_v10, %v505_v5 }
 0x11c   :  { %804 = vst [vmem:[%s1211_s4 + $0x10] sm:$0xff] %v776_v11  }
 0x11d   :  { %805 = vst [vmem:[%s1211_s4 + $0x18] sm:$0xff] %v781_v12   ;;  %v571_v15 = vadd.f32 %v1145_v8, %v548_v13  ;;  %v549_v16 = vmul.f32 %v1140_v4, %v506_v14  ;;  %v856_v17 = vpop.f32.mrb[20].mxu0  ;;  %v902_v18 = vpop.f32.mrb[20].mxu1 }
 0x11e   :  { %v527_v19 = vadd.f32 %v902_v18, %v1133_v59  ;;  %v857_v20 = vpop.f32.mrb[21].mxu0  ;;  %v518_v21 = vpop.f32.mrb[21].mxu1 }
 0x11f   :  { %v572_v22 = vadd.f32 %v1145_v8, %v549_v16  ;;  %v858_v23 = vadd.f32 %v857_v20, %v856_v17  ;;  %v519_v24 = vadd.f32 %v1129_v47, %v518_v21  ;;  %v859_v25 = vpop.f32.mrb[22].mxu0  ;;  %v903_v26 = vpop.f32.mrb[22].mxu1  ;;  %v587_v27 = vmax.f32 %v571_v15, 0.0 }
 0x120   :  { %v554_v28 = vmul.f32 %v1140_v4, %v527_v19  ;;  %v530_v29 = vadd.f32 %v903_v26, %v1135_v1  ;;  %v860_v30 = vpop.f32.mrb[23].mxu0  ;;  %v521_v31 = vpop.f32.mrb[23].mxu1 }
 0x121   :  { %v588_v32 = vmax.f32 %v572_v22, 0.0  ;;  %v511_v33 = vadd.f32 %v898_v55, %v858_v23  ;;  %v552_v59 = vmul.f32 %v1140_v4, %v519_v24  ;;  %v861_v34 = vadd.f32 %v860_v30, %v859_v25 }
 0x122   :  { %v577_v35 = vadd.f32 %v1145_v8, %v554_v28  ;;  %v555_v36 = vmul.f32 %v1140_v4, %v530_v29  ;;  %v522_v47 = vadd.f32 %v1131_v53, %v521_v31 }
 0x123   :  { %v786_v37 = vpack.c.bf16 %v588_v32, %v587_v27  ;;  %v550_v38 = vmul.f32 %v1140_v4, %v511_v33  ;;  %v514_v39 = vadd.f32 %v899_v63, %v861_v34  ;;  %v575_v40 = vadd.f32 %v1145_v8, %v552_v59 }
 0x124   :  { %v578_v1 = vadd.f32 %v1145_v8, %v555_v36  ;;  %v553_v41 = vmul.f32 %v1140_v4, %v522_v47  ;;  %v593_v44 = vmax.f32 %v577_v35, 0.0 }
 0x125   :  { %806 = vst [vmem:[%s1211_s4 + $0x20] sm:$0xff] %v786_v37   ;;  %v573_v42 = vadd.f32 %v1145_v8, %v550_v38  ;;  %v551_v43 = vmul.f32 %v1140_v4, %v514_v39  ;;  %v591_v48 = vmax.f32 %v575_v40, 0.0 }
 0x126   :  { %v594_v53 = vmax.f32 %v578_v1, 0.0  ;;  %v576_v45 = vadd.f32 %v1145_v8, %v553_v41 }
 0x127   :  { %v574_v46 = vadd.f32 %v1145_v8, %v551_v43  ;;  %v589_v51 = vmax.f32 %v573_v42, 0.0 }
 0x128   :  { %v801_v49 = vpack.c.bf16 %v594_v53, %v593_v44  ;;  %v592_v50 = vmax.f32 %v576_v45, 0.0 }
 0x129   :  { %v590_v52 = vmax.f32 %v574_v46, 0.0 }
 0x12a   :  { %809 = vst [vmem:[%s1211_s4 + $0x38] sm:$0xff] %v801_v49   ;;  %v796_v54 = vpack.c.bf16 %v592_v50, %v591_v48 }
 0x12b   :  { %v791_v55 = vpack.c.bf16 %v590_v52, %v589_v51 }
 0x12c   :  { %808 = vst [vmem:[%s1211_s4 + $0x30] sm:$0xff] %v796_v54  }
 0x12d   :  { %807 = vst [vmem:[%s1211_s4 + $0x28] sm:$0xff] %v791_v55  }

// kernel: resnet20_forward.38
= control target key start
LH: loop header
LB: loop body
LE: loop exit
PB: predicated region body
PF: predicated region fallthrough
CT: control target
= control target key end

     0   :  { %vm557_vm0 = vcmask 523264   ;;  %s1976_s1 = inlined_call_operand.vmem [shape: bf16[576,128], index: 1, kind: input, shape index: {}]   ;;  %s1977_s0 = inlined_call_operand.vmem [shape: bf16[128,576], index: 0, kind: input, shape index: {}]   ;;  %s1978_s4 = inlined_call_operand.vmem [shape: bf16[128,128], index: 4, kind: input, shape index: {}]   ;;  %s1979_s2 = inlined_call_operand.vmem [shape: f32[1,128], index: 2, kind: input, shape index: {}]   ;;  %s1980_s3 = inlined_call_operand.vmem [shape: f32[1,128], index: 3, kind: input, shape index: {}]   ;;  %s1981_s5 = inlined_call_operand.vmem [shape: bf16[128,128], index: 5, kind: output, shape index: {}]  }
   0x1   :  { %v1443_v0 = vld [vmem:[%s1976_s1 + $0x40] sm:$0xff]   ;;  %v1447_v4 = vld [vmem:[%s1976_s1 + $0x48] sm:$0xff]   ;;  %v1451_v8 = vld [vmem:[%s1976_s1 + $0x50] sm:$0xff]  }
   0x2   :  { %v1444_v1 = vld [vmem:[%s1976_s1 + $0xc0] sm:$0xff]   ;;  %1271 = vmatprep.subr.bf16.mxu0 %v1443_v0  ;;  %v1448_v5 = vld [vmem:[%s1976_s1 + $0xc8] sm:$0xff]   ;;  %v1452_v9 = vld [vmem:[%s1976_s1 + $0xd0] sm:$0xff]  }
   0x3   :  { %v1445_v2 = vld [vmem:[%s1976_s1] sm:$0xff]   ;;  %1335 = vmatprep.subr.bf16.mxu1 %v1444_v1  ;;  %v1449_v6 = vld [vmem:[%s1976_s1 + $0x8] sm:$0xff]   ;;  %v1453_v10 = vld [vmem:[%s1976_s1 + $0x10] sm:$0xff]  }
   0x4   :  { %v1446_v3 = vld [vmem:[%s1976_s1 + $0x80] sm:$0xff]   ;;  %1272 = vmatpush3.bf16.msra.mxu0 %v1445_v2  ;;  %v1450_v7 = vld [vmem:[%s1976_s1 + $0x88] sm:$0xff]   ;;  %v1454_v11 = vld [vmem:[%s1976_s1 + $0x90] sm:$0xff]  }
   0x5   :  { %1336 = vmatpush3.bf16.msra.mxu1 %v1446_v3  ;;  %1273 = vmatprep.subr.bf16.mxu0 %v1447_v4  ;;  %v1455_v12 = vld [vmem:[%s1976_s1 + $0x58] sm:$0xff]   ;;  %v1459_v16 = vld [vmem:[%s1976_s1 + $0x60] sm:$0xff]   ;;  %v1463_v20 = vld [vmem:[%s1976_s1 + $0x68] sm:$0xff]  }
   0x6   :  { %1337 = vmatprep.subr.bf16.mxu1 %v1448_v5  ;;  %v1456_v13 = vld [vmem:[%s1976_s1 + $0xd8] sm:$0xff]   ;;  %v1460_v17 = vld [vmem:[%s1976_s1 + $0xe0] sm:$0xff]   ;;  %v1464_v21 = vld [vmem:[%s1976_s1 + $0xe8] sm:$0xff]  }
   0x7   :  { %v1457_v14 = vld [vmem:[%s1976_s1 + $0x18] sm:$0xff]   ;;  %v1461_v18 = vld [vmem:[%s1976_s1 + $0x20] sm:$0xff]   ;;  %v1465_v22 = vld [vmem:[%s1976_s1 + $0x28] sm:$0xff]  }
   0x8   :  { %1274 = vmatpush3.bf16.msra.mxu0 %v1449_v6  ;;  %v1458_v15 = vld [vmem:[%s1976_s1 + $0x98] sm:$0xff]   ;;  %v1462_v19 = vld [vmem:[%s1976_s1 + $0xa0] sm:$0xff]   ;;  %v1466_v23 = vld [vmem:[%s1976_s1 + $0xa8] sm:$0xff]  }
   0x9   :  { %1338 = vmatpush3.bf16.msra.mxu1 %v1450_v7  ;;  %1275 = vmatprep.subr.bf16.mxu0 %v1451_v8  ;;  %v1467_v24 = vld [vmem:[%s1976_s1 + $0x70] sm:$0xff]   ;;  %v1471_v28 = vld [vmem:[%s1976_s1 + $0x78] sm:$0xff]   ;;  %v1480_v35 = vld [vmem:[%s1977_s0 + $0xc] ss:$20 sps:$4 sm:$0xff]  }
   0xa   :  { %1339 = vmatprep.subr.bf16.mxu1 %v1452_v9  ;;  %v1468_v25 = vld [vmem:[%s1976_s1 + $0xf0] sm:$0xff]   ;;  %v1472_v29 = vld [vmem:[%s1976_s1 + $0xf8] sm:$0xff]   ;;  %v1481_v36 = vld [vmem:[%s1976_s1 + $0x100] sm:$0xff]   ;;  %711 = vmatprep.mubr.bf16.mxu1 %v1480_v35 }
   0xb   :  { %v1469_v26 = vld [vmem:[%s1976_s1 + $0x30] sm:$0xff]   ;;  %v1473_v30 = vld [vmem:[%s1976_s1 + $0x38] sm:$0xff]   ;;  %v1482_v37 = vld [vmem:[%s1977_s0 + $0x2c] ss:$20 sps:$4 sm:$0xff]  }
   0xc   :  { %1276 = vmatpush3.bf16.msra.mxu0 %v1453_v10  ;;  %v1470_v27 = vld [vmem:[%s1976_s1 + $0xb0] sm:$0xff]   ;;  %v1474_v31 = vld [vmem:[%s1976_s1 + $0xb8] sm:$0xff]   ;;  %v1494_v42 = vld [vmem:[%s1976_s1 + $0x108] sm:$0xff]  }
   0xd   :  { %1340 = vmatpush3.bf16.msra.mxu1 %v1454_v11  ;;  %1277 = vmatprep.subr.bf16.mxu0 %v1455_v12  ;;  %v1475_v32 = vld [vmem:[%s1977_s0] ss:$20 sps:$4 sm:$0xff]   ;;  %v1477_v33 = vld [vmem:[%s1977_s0 + $0x4] ss:$20 sps:$4 sm:$0xff]   ;;  %v1478_v34 = vld [vmem:[%s1977_s0 + $0x8] ss:$20 sps:$4 sm:$0xff]  }
   0xe   :  { %1341 = vmatprep.subr.bf16.mxu1 %v1456_v13  ;;  %614 = vmatprep.mubr.bf16.mxu0 %v1477_v33  ;;  %v1484_v38 = vld [vmem:[%s1977_s0 + $0x34] ss:$20 sps:$4 sm:$0xff]   ;;  %v1487_v40 = vld [vmem:[%s1977_s0 + $0x30] ss:$20 sps:$4 sm:$0xff]   ;;  %v1493_v45 = vld [vmem:[%s1977_s0 + $0x58] ss:$20 sps:$4 sm:$0xff]  }
   0xf   :  { %v1486_v39 = vld [vmem:[%s1977_s0 + $0x28] ss:$20 sps:$4 sm:$0xff]   ;;  %v1492_v44 = vld [vmem:[%s1977_s0 + $0x50] ss:$20 sps:$4 sm:$0xff]   ;;  %v1499_v50 = vld [vmem:[%s1977_s0 + $0x78] ss:$20 sps:$4 sm:$0xff]  }
  0x10   :  { %1278 = vmatpush3.bf16.msra.mxu0 %v1457_v14  ;;  %v1488_v41 = vld [vmem:[%s1977_s0 + $0x54] ss:$20 sps:$4 sm:$0xff]   ;;  %v1490_v43 = vld [vmem:[%s1977_s0 + $0x5c] ss:$20 sps:$4 sm:$0xff]   ;;  %v1497_v48 = vld [vmem:[%s1977_s0 + $0x84] ss:$20 sps:$4 sm:$0xff]  }
  0x11   :  { %1342 = vmatpush3.bf16.msra.mxu1 %v1458_v15  ;;  %1279 = vmatprep.subr.bf16.mxu0 %v1459_v16  ;;  %v1507_v46 = vld [vmem:[%s1976_s1 + $0x110] sm:$0xff]   ;;  %v1520_v49 = vld [vmem:[%s1976_s1 + $0x118] sm:$0xff]   ;;  %v1503_v53 = vld [vmem:[%s1977_s0 + $0xac] ss:$20 sps:$4 sm:$0xff]  }
  0x12   :  { %1343 = vmatprep.subr.bf16.mxu1 %v1460_v17  ;;  %v1495_v47 = vld [vmem:[%s1977_s0 + $0x7c] ss:$20 sps:$4 sm:$0xff]   ;;  %v1500_v51 = vld [vmem:[%s1977_s0 + $0x80] ss:$20 sps:$4 sm:$0xff]   ;;  %v1501_v52 = vld [vmem:[%s1977_s0 + $0xa4] ss:$20 sps:$4 sm:$0xff]  }
  0x13   :  { %v1505_v54 = vld [vmem:[%s1977_s0 + $0xa0] ss:$20 sps:$4 sm:$0xff]   ;;  %v1506_v55 = vld [vmem:[%s1977_s0 + $0xa8] ss:$20 sps:$4 sm:$0xff]   ;;  %v1513_v59 = vld [vmem:[%s1977_s0 + $0xd0] ss:$20 sps:$4 sm:$0xff]  }
  0x14   :  { %1280 = vmatpush3.bf16.msra.mxu0 %v1461_v18  ;;  %v1508_v56 = vld [vmem:[%s1977_s0 + $0xcc] ss:$20 sps:$4 sm:$0xff]   ;;  %v1510_v57 = vld [vmem:[%s1977_s0 + $0xd4] ss:$20 sps:$4 sm:$0xff]   ;;  %v1516_v61 = vld [vmem:[%s1977_s0 + $0xfc] ss:$20 sps:$4 sm:$0xff]  }
  0x15   :  { %1344 = vmatpush3.bf16.msra.mxu1 %v1462_v19  ;;  %1281 = vmatprep.subr.bf16.mxu0 %v1463_v20  ;;  %v1512_v58 = vld [vmem:[%s1977_s0 + $0xc8] ss:$20 sps:$4 sm:$0xff]   ;;  %v1518_v62 = vld [vmem:[%s1977_s0 + $0xf0] ss:$20 sps:$4 sm:$0xff]   ;;  %v1519_v63 = vld [vmem:[%s1977_s0 + $0xf8] ss:$20 sps:$4 sm:$0xff]  }
  0x16   :  { %1345 = vmatprep.subr.bf16.mxu1 %v1464_v21  ;;  %v1514_v60 = vld [vmem:[%s1977_s0 + $0xf4] ss:$20 sps:$4 sm:$0xff]   ;;  %v1521_v0 = vld [vmem:[%s1977_s0 + $0x11c] ss:$20 sps:$4 sm:$0xff]   ;;  %v1523_v1 = vld [vmem:[%s1977_s0 + $0x124] ss:$20 sps:$4 sm:$0xff]  }
  0x17   :  { %v1525_v2 = vld [vmem:[%s1977_s0 + $0x118] ss:$20 sps:$4 sm:$0xff]   ;;  %v1526_v3 = vld [vmem:[%s1977_s0 + $0x120] ss:$20 sps:$4 sm:$0xff]   ;;  %v1527_v4 = vld [vmem:[%s1977_s0 + $0x10] ss:$20 sps:$4 sm:$0xff]  }
  0x18   :  { %1282 = vmatpush3.bf16.msra.mxu0 %v1465_v22  ;;  %v1528_v5 = vld [vmem:[%s1977_s0 + $0xb0] ss:$20 sps:$4 sm:$0xff]   ;;  %v1529_v6 = vld [vmem:[%s1977_s0 + $0x38] ss:$20 sps:$4 sm:$0xff]   ;;  %v1531_v8 = vld [vmem:[%s1977_s0 + $0x60] ss:$20 sps:$4 sm:$0xff]  }
  0x19   :  { %1346 = vmatpush3.bf16.msra.mxu1 %v1466_v23  ;;  %1283 = vmatprep.subr.bf16.mxu0 %v1467_v24  ;;  %v1530_v7 = vld [vmem:[%s1977_s0 + $0xd8] ss:$20 sps:$4 sm:$0xff]   ;;  %v1532_v9 = vld [vmem:[%s1977_s0 + $0x100] ss:$20 sps:$4 sm:$0xff]   ;;  %v1533_v10 = vld [vmem:[%s1977_s0 + $0x88] ss:$20 sps:$4 sm:$0xff]  }
  0x1a   :  { %1347 = vmatprep.subr.bf16.mxu1 %v1468_v25  ;;  %v1534_v11 = vld [vmem:[%s1977_s0 + $0x128] ss:$20 sps:$4 sm:$0xff]  }
  0x1c   :  { %1284 = vmatpush3.bf16.msra.mxu0 %v1469_v26 }
  0x1d   :  { %1348 = vmatpush3.bf16.msra.mxu1 %v1470_v27  ;;  %1285 = vmatprep.subr.bf16.mxu0 %v1471_v28 }
  0x1e   :  { %1349 = vmatprep.subr.bf16.mxu1 %v1472_v29 }
  0x20   :  { %1286 = vmatpush3.bf16.msra.mxu0 %v1473_v30 }
  0x21   :  { %1350 = vmatpush3.bf16.msra.mxu1 %v1474_v31  ;;  %1411 = vmatprep.subr.bf16.mxu0 %v1481_v36 }
  0x22   :  { %1435 = vmatprep.subr.bf16.mxu1 %v1481_v36 }
  0x23   :  { %615 = vmatmul.mubr.bf16.vlgmr.msra.gmra.mrb[0].mxu0 %v1475_v32 }
  0x24   :  { %712 = vmatmul.mubr.bf16.vlgmr.msra.gmra.mrb[0].mxu1 %v1478_v34  ;;  %1412 = vmatpush3.bf16.msra.mxu0 %v1481_v36 }
  0x25   :  { %1439 = vmatpush3.bf16.msra.mxu1 %v1481_v36  ;;  %622 = vmatprep.mubr.bf16.mxu0 %v1482_v37 }
  0x26   :  { %719 = vmatprep.mubr.bf16.mxu1 %v1484_v38  ;;  %1413 = vmatprep.subr.bf16.mxu0 %v1494_v42 }
  0x27   :  { %1436 = vmatprep.subr.bf16.mxu1 %v1494_v42 }
  0x28   :  { %1414 = vmatpush3.bf16.msra.mxu0 %v1494_v42 }
  0x29   :  { %1440 = vmatpush3.bf16.msra.mxu1 %v1494_v42  ;;  %1415 = vmatprep.subr.bf16.mxu0 %v1507_v46 }
  0x2a   :  { %1437 = vmatprep.subr.bf16.mxu1 %v1507_v46 }
  0x2b   :  { %623 = vmatmul.mubr.bf16.gmra.mrb[4].mxu0 %v1486_v39 }
  0x2c   :  { %720 = vmatmul.mubr.bf16.gmra.mrb[4].mxu1 %v1487_v40  ;;  %630 = vmatprep.mubr.bf16.mxu0 %v1488_v41 }
  0x2d   :  { %727 = vmatprep.mubr.bf16.mxu1 %v1490_v43  ;;  %1416 = vmatpush3.bf16.msra.mxu0 %v1507_v46 }
  0x2e   :  { %1441 = vmatpush3.bf16.msra.mxu1 %v1507_v46  ;;  %1417 = vmatprep.subr.bf16.mxu0 %v1520_v49 }
  0x2f   :  { %1438 = vmatprep.subr.bf16.mxu1 %v1520_v49 }
  0x31   :  { %1418 = vmatpush3.bf16.msra.mxu0 %v1520_v49 }
  0x32   :  { %1442 = vmatpush3.bf16.msra.mxu1 %v1520_v49 }
  0x33   :  { %631 = vmatmul.mubr.bf16.gmra.mrb[8].mxu0 %v1492_v44 }
  0x34   :  { %728 = vmatmul.mubr.bf16.gmra.mrb[8].mxu1 %v1493_v45  ;;  %638 = vmatprep.mubr.bf16.mxu0 %v1495_v47 }
  0x35   :  { %735 = vmatprep.mubr.bf16.mxu1 %v1497_v48 }
  0x3b   :  { %639 = vmatmul.mubr.bf16.gmra.mrb[12].mxu0 %v1499_v50 }
  0x3c   :  { %736 = vmatmul.mubr.bf16.gmra.mrb[12].mxu1 %v1500_v51  ;;  %646 = vmatprep.mubr.bf16.mxu0 %v1501_v52 }
  0x3d   :  { %743 = vmatprep.mubr.bf16.mxu1 %v1503_v53 }
  0x43   :  { %647 = vmatmul.mubr.bf16.gmra.mrb[16].mxu0 %v1505_v54 }
  0x44   :  { %744 = vmatmul.mubr.bf16.gmra.mrb[16].mxu1 %v1506_v55  ;;  %654 = vmatprep.mubr.bf16.mxu0 %v1508_v56 }
  0x45   :  { %751 = vmatprep.mubr.bf16.mxu1 %v1510_v57 }
  0x4b   :  { %655 = vmatmul.mubr.bf16.gmra.mrb[20].mxu0 %v1512_v58 }
  0x4c   :  { %752 = vmatmul.mubr.bf16.gmra.mrb[20].mxu1 %v1513_v59  ;;  %662 = vmatprep.mubr.bf16.mxu0 %v1514_v60 }
  0x4d   :  { %759 = vmatprep.mubr.bf16.mxu1 %v1516_v61 }
  0x53   :  { %663 = vmatmul.mubr.bf16.gmra.mrb[24].mxu0 %v1518_v62 }
  0x54   :  { %760 = vmatmul.mubr.bf16.gmra.mrb[24].mxu1 %v1519_v63  ;;  %670 = vmatprep.mubr.bf16.mxu0 %v1521_v0 }
  0x55   :  { %767 = vmatprep.mubr.bf16.mxu1 %v1523_v1 }
  0x5b   :  { %671 = vmatmul.mubr.bf16.gmra.mrb[28].mxu0 %v1525_v2 }
  0x5c   :  { %768 = vmatmul.mubr.bf16.gmra.mrb[28].mxu1 %v1526_v3  ;;  %1419 = vmatprep.mubr.msk.bf16.mxu0 %vm557_vm0, %v1527_v4 }
  0x5d   :  { %1427 = vmatprep.mubr.msk.bf16.mxu1 %vm557_vm0, %v1528_v5 }
  0x63   :  { %1420 = vmatmul.mubr.msk.bf16.vlgmr.msra.gmra.mrb[32].mxu0 %vm557_vm0, %v1529_v6 }
  0x64   :  { %1428 = vmatmul.mubr.msk.bf16.vlgmr.msra.gmra.mrb[32].mxu1 %vm557_vm0, %v1530_v7  ;;  %1423 = vmatprep.mubr.msk.bf16.mxu0 %vm557_vm0, %v1531_v8 }
  0x65   :  { %1431 = vmatprep.mubr.msk.bf16.mxu1 %vm557_vm0, %v1532_v9 }
  0x6b   :  { %1424 = vmatmul.mubr.msk.bf16.gmra.mrb[36].mxu0 %vm557_vm0, %v1533_v10 }
  0x6c   :  { %1432 = vmatmul.mubr.msk.bf16.gmra.mrb[36].mxu1 %vm557_vm0, %v1534_v11 }
  0xf6   :  { %v1287_v12 = vpop.f32.mrb[0].mxu0 }
  0xf7   :  { %v1351_v13 = vpop.f32.mrb[0].mxu1  ;;  %v1288_v14 = vpop.f32.mrb[1].mxu0 }
  0xf8   :  { %v1289_v15 = vadd.f32 %v1288_v14, %v1287_v12  ;;  %v1352_v16 = vpop.f32.mrb[1].mxu1  ;;  %v1290_v17 = vpop.f32.mrb[2].mxu0 }
  0xf9   :  { %v1353_v18 = vadd.f32 %v1352_v16, %v1351_v13  ;;  %v1354_v19 = vpop.f32.mrb[2].mxu1  ;;  %v1291_v20 = vpop.f32.mrb[3].mxu0 }
  0xfa   :  { %v1292_v21 = vadd.f32 %v1291_v20, %v1290_v17  ;;  %v1355_v22 = vpop.f32.mrb[3].mxu1 }
  0xfb   :  { %v1356_v23 = vadd.f32 %v1355_v22, %v1354_v19  ;;  %v1801_v24 = vadd.f32 %v1353_v18, %v1289_v15 }
  0xfd   :  { %v1803_v25 = vadd.f32 %v1356_v23, %v1292_v21 }
  0xfe   :  { %v1293_v26 = vpop.f32.mrb[4].mxu0 }
  0xff   :  { %v1357_v27 = vpop.f32.mrb[4].mxu1  ;;  %v1294_v28 = vpop.f32.mrb[5].mxu0 }
 0x100   :  { %v1295_v29 = vadd.f32 %v1294_v28, %v1293_v26  ;;  %v1358_v30 = vpop.f32.mrb[5].mxu1  ;;  %v1296_v31 = vpop.f32.mrb[6].mxu0 }
 0x101   :  { %v1359_v32 = vadd.f32 %v1358_v30, %v1357_v27  ;;  %v1360_v33 = vpop.f32.mrb[6].mxu1  ;;  %v1297_v34 = vpop.f32.mrb[7].mxu0 }
 0x102   :  { %v1298_v35 = vadd.f32 %v1297_v34, %v1296_v31  ;;  %v1361_v36 = vpop.f32.mrb[7].mxu1 }
 0x103   :  { %v1362_v37 = vadd.f32 %v1361_v36, %v1360_v33  ;;  %v1805_v38 = vadd.f32 %v1359_v32, %v1295_v29 }
 0x105   :  { %v1807_v39 = vadd.f32 %v1362_v37, %v1298_v35 }
 0x106   :  { %v1299_v40 = vpop.f32.mrb[8].mxu0 }
 0x107   :  { %v1363_v41 = vpop.f32.mrb[8].mxu1  ;;  %v1300_v42 = vpop.f32.mrb[9].mxu0 }
 0x108   :  { %v1301_v43 = vadd.f32 %v1300_v42, %v1299_v40  ;;  %v1364_v44 = vpop.f32.mrb[9].mxu1  ;;  %v1302_v45 = vpop.f32.mrb[10].mxu0 }
 0x109   :  { %v1365_v46 = vadd.f32 %v1364_v44, %v1363_v41  ;;  %v1366_v47 = vpop.f32.mrb[10].mxu1  ;;  %v1303_v48 = vpop.f32.mrb[11].mxu0 }
 0x10a   :  { %v1304_v49 = vadd.f32 %v1303_v48, %v1302_v45  ;;  %v1367_v50 = vpop.f32.mrb[11].mxu1 }
 0x10b   :  { %v1368_v51 = vadd.f32 %v1367_v50, %v1366_v47  ;;  %v1809_v52 = vadd.f32 %v1365_v46, %v1301_v43 }
 0x10d   :  { %v1811_v53 = vadd.f32 %v1368_v51, %v1304_v49 }
 0x10e   :  { %v1305_v54 = vpop.f32.mrb[12].mxu0 }
 0x10f   :  { %v1369_v55 = vpop.f32.mrb[12].mxu1  ;;  %v1306_v56 = vpop.f32.mrb[13].mxu0 }
 0x110   :  { %v1307_v57 = vadd.f32 %v1306_v56, %v1305_v54  ;;  %v1370_v58 = vpop.f32.mrb[13].mxu1  ;;  %v1308_v59 = vpop.f32.mrb[14].mxu0 }
 0x111   :  { %v1371_v60 = vadd.f32 %v1370_v58, %v1369_v55  ;;  %v1372_v61 = vpop.f32.mrb[14].mxu1  ;;  %v1309_v62 = vpop.f32.mrb[15].mxu0 }
 0x112   :  { %v1310_v63 = vadd.f32 %v1309_v62, %v1308_v59  ;;  %v1373_v0 = vpop.f32.mrb[15].mxu1 }
 0x113   :  { %v1374_v1 = vadd.f32 %v1373_v0, %v1372_v61  ;;  %v1813_v2 = vadd.f32 %v1371_v60, %v1307_v57  ;;  %v1835_v0 = vld [vmem:[%s1978_s4 + $0x28] sm:$0xff]  }
 0x115   :  { %v1815_v3 = vadd.f32 %v1374_v1, %v1310_v63  ;;  %v1830_v63 = vld [vmem:[%s1978_s4 + $0x8] sm:$0xff]  }
 0x116   :  { %v1311_v4 = vpop.f32.mrb[16].mxu0 }
 0x117   :  { %v1375_v5 = vpop.f32.mrb[16].mxu1  ;;  %v1312_v6 = vpop.f32.mrb[17].mxu0 }
 0x118   :  { %v1313_v7 = vadd.f32 %v1312_v6, %v1311_v4  ;;  %v1376_v8 = vpop.f32.mrb[17].mxu1  ;;  %v1314_v9 = vpop.f32.mrb[18].mxu0  ;;  %v1840_v4 = vld [vmem:[%s1978_s4] sm:$0xff]  }
 0x119   :  { %v1377_v10 = vadd.f32 %v1376_v8, %v1375_v5  ;;  %v1378_v11 = vpop.f32.mrb[18].mxu1  ;;  %v1315_v12 = vpop.f32.mrb[19].mxu0  ;;  %v1845_v5 = vld [vmem:[%s1978_s4 + $0x20] sm:$0xff]   ;;  %v1191_v8 = vunpack.c.l.bf16 %v1830_v63 }
 0x11a   :  { %v1316_v13 = vadd.f32 %v1315_v12, %v1314_v9  ;;  %v1379_v14 = vpop.f32.mrb[19].mxu1  ;;  %v1207_v9 = vunpack.c.l.bf16 %v1835_v0 }
 0x11b   :  { %v1380_v15 = vadd.f32 %v1379_v14, %v1378_v11  ;;  %v1817_v16 = vadd.f32 %v1377_v10, %v1313_v7  ;;  %v1852_v7 = vld [vmem:[%s1978_s4 + $0x18] sm:$0xff]   ;;  %v1864_v11 = vld [vmem:[%s1978_s4 + $0x10] sm:$0xff]   ;;  %v1871_v14 = vld [vmem:[%s1979_s2] ss:$0 sm:$0xff] }
 0x11c   :  { %v1859_v10 = vld [vmem:[%s1978_s4 + $0x38] sm:$0xff]  }
 0x11d   :  { %v1819_v17 = vadd.f32 %v1380_v15, %v1316_v13  ;;  %v1187_v15 = vunpack.c.l.bf16 %v1840_v4 }
 0x11e   :  { %v1317_v18 = vpop.f32.mrb[20].mxu0 }
 0x11f   :  { %v1381_v19 = vpop.f32.mrb[20].mxu1  ;;  %v1318_v20 = vpop.f32.mrb[21].mxu0 }
 0x120   :  { %v1319_v21 = vadd.f32 %v1318_v20, %v1317_v18  ;;  %v1382_v22 = vpop.f32.mrb[21].mxu1  ;;  %v1320_v23 = vpop.f32.mrb[22].mxu0  ;;  %v1203_v18 = vunpack.c.l.bf16 %v1845_v5  ;;  %v1208_v20 = vunpack.c.h.bf16 %v1835_v0 }
 0x121   :  { %v1383_v26 = vadd.f32 %v1382_v22, %v1381_v19  ;;  %v1384_v27 = vpop.f32.mrb[22].mxu1  ;;  %v1321_v28 = vpop.f32.mrb[23].mxu0  ;;  %v1192_v19 = vunpack.c.h.bf16 %v1830_v63 }
 0x122   :  { %v1322_v29 = vadd.f32 %v1321_v28, %v1320_v23  ;;  %v1385_v30 = vpop.f32.mrb[23].mxu1  ;;  %v1204_v28 = vunpack.c.h.bf16 %v1845_v5 }
 0x123   :  { %v1386_v31 = vadd.f32 %v1385_v30, %v1384_v27  ;;  %v754_v32 = vadd.f32 %v1383_v26, %v1319_v21  ;;  %v1880_v21 = vld [vmem:[%s1978_s4 + $0x30] sm:$0xff]   ;;  %v1188_v27 = vunpack.c.h.bf16 %v1840_v4  ;;  %v1889_v30 = vld [vmem:[%s1980_s3] ss:$0 sm:$0xff] }
 0x125   :  { %v1821_v33 = vadd.f32 %v1386_v31, %v1322_v29  ;;  %v1199_v29 = vunpack.c.l.bf16 %v1852_v7 }
 0x126   :  { %v1323_v34 = vpop.f32.mrb[24].mxu0 }
 0x127   :  { %v1387_v35 = vpop.f32.mrb[24].mxu1  ;;  %v1324_v36 = vpop.f32.mrb[25].mxu0 }
 0x128   :  { %v1325_v37 = vadd.f32 %v1324_v36, %v1323_v34  ;;  %v1388_v40 = vpop.f32.mrb[25].mxu1  ;;  %v1326_v41 = vpop.f32.mrb[26].mxu0 }
 0x129   :  { %v1389_v42 = vadd.f32 %v1388_v40, %v1387_v35  ;;  %v1390_v43 = vpop.f32.mrb[26].mxu1  ;;  %v1327_v44 = vpop.f32.mrb[27].mxu0 }
 0x12a   :  { %v1328_v45 = vadd.f32 %v1327_v44, %v1326_v41  ;;  %v1391_v46 = vpop.f32.mrb[27].mxu1 }
 0x12b   :  { %v1392_v47 = vadd.f32 %v1391_v46, %v1390_v43  ;;  %v1823_v48 = vadd.f32 %v1389_v42, %v1325_v37  ;;  %v1195_v37 = vunpack.c.l.bf16 %v1864_v11 }
 0x12d   :  { %v1825_v49 = vadd.f32 %v1392_v47, %v1328_v45  ;;  %v1211_v45 = vunpack.c.l.bf16 %v1880_v21 }
 0x12e   :  { %v1329_v50 = vpop.f32.mrb[28].mxu0 }
 0x12f   :  { %v1393_v51 = vpop.f32.mrb[28].mxu1  ;;  %v1330_v54 = vpop.f32.mrb[29].mxu0 }
 0x130   :  { %v1331_v55 = vadd.f32 %v1330_v54, %v1329_v50  ;;  %v1394_v56 = vpop.f32.mrb[29].mxu1  ;;  %v1332_v57 = vpop.f32.mrb[30].mxu0 }
 0x131   :  { %v1395_v58 = vadd.f32 %v1394_v56, %v1393_v51  ;;  %v1396_v59 = vpop.f32.mrb[30].mxu1  ;;  %v1333_v60 = vpop.f32.mrb[31].mxu0 }
 0x132   :  { %v1334_v61 = vadd.f32 %v1333_v60, %v1332_v57  ;;  %v1397_v62 = vpop.f32.mrb[31].mxu1 }
 0x133   :  { %v1398_v1 = vadd.f32 %v1397_v62, %v1396_v59  ;;  %v1847_v6 = vadd.f32 %v1395_v58, %v1331_v55 }
 0x135   :  { %v1866_v12 = vadd.f32 %v1398_v1, %v1334_v61 }
 0x136   :  { %v1421_v13 = vpop.f32.mrb[32].mxu0 }
 0x137   :  { %v819_v22 = vadd.f32 %v1421_v13, %v1805_v38  ;;  %v1429_v23 = vpop.f32.mrb[32].mxu1  ;;  %v810_v26 = vpop.f32.mrb[33].mxu0  ;;  %v1215_v38 = vunpack.c.l.bf16 %v1859_v10 }
 0x138   :  { %v851_v31 = vadd.f32 %v1429_v23, %v754_v32  ;;  %v811_v34 = vadd.f32 %v810_v26, %v1801_v24  ;;  %v842_v35 = vpop.f32.mrb[33].mxu1  ;;  %v1422_v36 = vpop.f32.mrb[34].mxu0 }
 0x139   :  { %v882_v40 = vmul.f32 %v1871_v14, %v819_v22  ;;  %v843_v41 = vadd.f32 %v842_v35, %v1817_v16  ;;  %v822_v42 = vadd.f32 %v1422_v36, %v1807_v39  ;;  %v1430_v43 = vpop.f32.mrb[34].mxu1  ;;  %v813_v44 = vpop.f32.mrb[35].mxu0 }
 0x13a   :  { %v890_v32 = vmul.f32 %v1871_v14, %v851_v31  ;;  %v880_v24 = vmul.f32 %v1871_v14, %v811_v34  ;;  %v854_v46 = vadd.f32 %v1430_v43, %v1821_v33  ;;  %v814_v47 = vadd.f32 %v813_v44, %v1803_v25  ;;  %v845_v50 = vpop.f32.mrb[35].mxu1 }
 0x13b   :  { %v905_v51 = vadd.f32 %v1889_v30, %v882_v40  ;;  %v888_v54 = vmul.f32 %v1871_v14, %v843_v41  ;;  %v883_v16 = vmul.f32 %v1871_v14, %v822_v42  ;;  %v846_v39 = vadd.f32 %v845_v50, %v1819_v17 }
 0x13c   :  { %v913_v55 = vadd.f32 %v1889_v30, %v890_v32  ;;  %v903_v56 = vadd.f32 %v1889_v30, %v880_v24  ;;  %v891_v57 = vmul.f32 %v1871_v14, %v854_v46  ;;  %v881_v58 = vmul.f32 %v1871_v14, %v814_v47 }
 0x13d   :  { %v953_v33 = vadd.f32 %v1191_v8, %v905_v51  ;;  %v911_v25 = vadd.f32 %v1889_v30, %v888_v54  ;;  %v906_v59 = vadd.f32 %v1889_v30, %v883_v16  ;;  %v889_v60 = vmul.f32 %v1871_v14, %v846_v39 }
 0x13e   :  { %v961_v61 = vadd.f32 %v1207_v9, %v913_v55  ;;  %v951_v62 = vadd.f32 %v1187_v15, %v903_v56  ;;  %v914_v63 = vadd.f32 %v1889_v30, %v891_v57  ;;  %v904_v17 = vadd.f32 %v1889_v30, %v881_v58  ;;  %v1425_v0 = vpop.f32.mrb[36].mxu0 }
 0x13f   :  { %v969_v1 = vmax.f32 %v953_v33, 0.0  ;;  %v959_v4 = vadd.f32 %v1203_v18, %v911_v25  ;;  %v954_v5 = vadd.f32 %v1192_v19, %v906_v59  ;;  %v912_v13 = vadd.f32 %v1889_v30, %v889_v60  ;;  %v1433_v22 = vpop.f32.mrb[36].mxu1  ;;  %v826_v8 = vpop.f32.mrb[37].mxu0 }
 0x140   :  { %v977_v23 = vmax.f32 %v961_v61, 0.0  ;;  %v967_v26 = vmax.f32 %v951_v62, 0.0  ;;  %v962_v31 = vadd.f32 %v1208_v20, %v914_v63  ;;  %v952_v34 = vadd.f32 %v1188_v27, %v904_v17  ;;  %v858_v35 = vpop.f32.mrb[37].mxu1  ;;  %v1426_v36 = vpop.f32.mrb[38].mxu0 }
 0x141   :  { %v975_v9 = vmax.f32 %v959_v4, 0.0  ;;  %v970_v15 = vmax.f32 %v954_v5, 0.0  ;;  %v960_v40 = vadd.f32 %v1204_v28, %v912_v13  ;;  %v835_v41 = vadd.f32 %v1425_v0, %v1813_v2  ;;  %v1434_v42 = vpop.f32.mrb[38].mxu1  ;;  %v829_v43 = vpop.f32.mrb[39].mxu0 }
 0x142   :  { %v978_v44 = vmax.f32 %v962_v31, 0.0  ;;  %v968_v18 = vmax.f32 %v952_v34, 0.0  ;;  %v867_v19 = vadd.f32 %v1433_v22, %v1847_v6  ;;  %v827_v32 = vadd.f32 %v826_v8, %v1809_v52  ;;  %v861_v24 = vpop.f32.mrb[39].mxu1 }
 0x143   :  { %v1225_v46 = vpack.c.bf16 %v970_v15, %v969_v1  ;;  %v976_v47 = vmax.f32 %v960_v40, 0.0  ;;  %v886_v20 = vmul.f32 %v1871_v14, %v835_v41  ;;  %v859_v27 = vadd.f32 %v858_v35, %v1823_v48 }
 0x144   :  { %v1245_v50 = vpack.c.bf16 %v978_v44, %v977_v23  ;;  %v1220_v51 = vpack.c.bf16 %v968_v18, %v967_v26  ;;  %v894_v28 = vmul.f32 %v1871_v14, %v867_v19  ;;  %v884_v2 = vmul.f32 %v1871_v14, %v827_v32 }
 0x145   :  { %1264 = vst [vmem:[%s1981_s5 + $0x8] sm:$0xff] %v1225_v46   ;;  %v1240_v6 = vpack.c.bf16 %v976_v47, %v975_v9  ;;  %v909_v52 = vadd.f32 %v1889_v30, %v886_v20  ;;  %v892_v54 = vmul.f32 %v1871_v14, %v859_v27  ;;  %v838_v16 = vadd.f32 %v1426_v36, %v1815_v3 }
 0x146   :  { %1268 = vst [vmem:[%s1981_s5 + $0x28] sm:$0xff] %v1245_v50   ;;  %1221 = vst [vmem:[%s1981_s5] sm:$0xff] %v1220_v51   ;;  %v917_v48 = vadd.f32 %v1889_v30, %v894_v28  ;;  %v907_v39 = vadd.f32 %v1889_v30, %v884_v2  ;;  %v870_v55 = vadd.f32 %v1434_v42, %v1866_v12  ;;  %v1200_v58 = vunpack.c.h.bf16 %v1852_v7 }
 0x147   :  { %v830_v56 = vadd.f32 %v829_v43, %v1811_v53  ;;  %1267 = vst [vmem:[%s1981_s5 + $0x20] sm:$0xff] %v1240_v6   ;;  %v915_v3 = vadd.f32 %v1889_v30, %v892_v54  ;;  %v887_v57 = vmul.f32 %v1871_v14, %v838_v16  ;;  %v862_v33 = vadd.f32 %v861_v24, %v1825_v49 }
 0x148   :  { %v895_v25 = vmul.f32 %v1871_v14, %v870_v55  ;;  %v1216_v59 = vunpack.c.h.bf16 %v1859_v10  ;;  %v1196_v53 = vunpack.c.h.bf16 %v1864_v11  ;;  %v957_v60 = vadd.f32 %v1199_v29, %v909_v52 }
 0x149   :  { %v885_v12 = vmul.f32 %v1871_v14, %v830_v56  ;;  %v910_v61 = vadd.f32 %v1889_v30, %v887_v57  ;;  %v893_v62 = vmul.f32 %v1871_v14, %v862_v33  ;;  %v1212_v63 = vunpack.c.h.bf16 %v1880_v21 }
 0x14a   :  { %v965_v49 = vadd.f32 %v1215_v38, %v917_v48  ;;  %v955_v17 = vadd.f32 %v1195_v37, %v907_v39  ;;  %v918_v0 = vadd.f32 %v1889_v30, %v895_v25  ;;  %v963_v7 = vadd.f32 %v1211_v45, %v915_v3 }
 0x14b   :  { %v908_v1 = vadd.f32 %v1889_v30, %v885_v12  ;;  %v958_v29 = vadd.f32 %v1200_v58, %v910_v61  ;;  %v916_v4 = vadd.f32 %v1889_v30, %v893_v62  ;;  %v973_v13 = vmax.f32 %v957_v60, 0.0 }
 0x14c   :  { %v966_v5 = vadd.f32 %v1216_v59, %v918_v0  ;;  %v981_v10 = vmax.f32 %v965_v49, 0.0  ;;  %v971_v38 = vmax.f32 %v955_v17, 0.0  ;;  %v979_v37 = vmax.f32 %v963_v7, 0.0 }
 0x14d   :  { %v956_v14 = vadd.f32 %v1196_v53, %v908_v1  ;;  %v974_v22 = vmax.f32 %v958_v29, 0.0  ;;  %v964_v8 = vadd.f32 %v1212_v63, %v916_v4 }
 0x14e   :  { %v982_v23 = vmax.f32 %v966_v5, 0.0 }
 0x14f   :  { %v972_v11 = vmax.f32 %v956_v14, 0.0  ;;  %v1235_v26 = vpack.c.bf16 %v974_v22, %v973_v13  ;;  %v980_v31 = vmax.f32 %v964_v8, 0.0 }
 0x150   :  { %v1255_v34 = vpack.c.bf16 %v982_v23, %v981_v10 }
 0x151   :  { %v1230_v35 = vpack.c.bf16 %v972_v11, %v971_v38  ;;  %1266 = vst [vmem:[%s1981_s5 + $0x18] sm:$0xff] %v1235_v26   ;;  %v1250_v21 = vpack.c.bf16 %v980_v31, %v979_v37 }
 0x152   :  { %1270 = vst [vmem:[%s1981_s5 + $0x38] sm:$0xff] %v1255_v34  }
 0x153   :  { %1265 = vst [vmem:[%s1981_s5 + $0x10] sm:$0xff] %v1230_v35   ;;  %1269 = vst [vmem:[%s1981_s5 + $0x30] sm:$0xff] %v1250_v21  }

// kernel: resnet20_forward.43
= control target key start
LH: loop header
LB: loop body
LE: loop exit
PB: predicated region body
PF: predicated region fallthrough
CT: control target
= control target key end

     0   :  { %v307_v3 = vmov 0.0|0.0   ;;  %vm308_vm0 = vmmov 0   ;;  %v309_v6 = vmov 0.0   ;;  %vm47_vm1 = vcmask 523264   ;;  %s411_s0 = inlined_call_operand.vmem [shape: bf16[2,64,64], index: 0, kind: input, shape index: {}]   ;;  %s412_s1 = inlined_call_operand.vmem [shape: f32[64,128], index: 1, kind: input, shape index: {}]   ;;  %s413_s2 = inlined_call_operand.vmem [shape: f32[1,128], index: 2, kind: input, shape index: {}]   ;;  %s414_s3 = inlined_call_operand.hbm [shape: f32[2,128], index: 3, kind: output, shape index: {}]  }
   0x1   :  { %v92_v0 = vld [vmem:[%s412_s1] sm:$0xff]  ;;  %v93_v1 = vld [vmem:[%s412_s1 + $0x8] sm:$0xff]  ;;  %v94_v2 = vld [vmem:[%s412_s1 + $0x10] sm:$0xff]  ;;  %267 = vmatprep.subr.bf16.mxu0 %v307_v3  ;;  %264 = vmatprep.mubr.msk.f32.mxu0 %vm308_vm0, %v309_v6 }
   0x2   :  { %v268_v4 = vpack.c.bf16 %v93_v1, %v92_v0  ;;  %v95_v5 = vld [vmem:[%s412_s1 + $0x18] sm:$0xff]  ;;  %v201_v7 = vld [vmem:[%s411_s0] sm:$0xff]   ;;  %v97_v10 = vld [vmem:[%s412_s1 + $0x28] sm:$0xff] }
   0x3   :  { %v271_v8 = vpack.c.bf16 %v95_v5, %v94_v2  ;;  %v96_v9 = vld [vmem:[%s412_s1 + $0x20] sm:$0xff]  ;;  %v202_v11 = vunpack.c.l.bf16 %v201_v7  ;;  %v203_v12 = vunpack.c.h.bf16 %v201_v7  ;;  %v232_v13 = vld [vmem:[%s411_s0 + $0x8] sm:$0xff]   ;;  %v233_v15 = vld [vmem:[%s411_s0 + $0x10] sm:$0xff]  }
   0x4   :  { %269 = vmatpush3.bf16.msra.mxu0 %v268_v4  ;;  %v206_v14 = vunpack.c.l.bf16 %v232_v13  ;;  %v235_v16 = vld [vmem:[%s411_s0 + $0x20] sm:$0xff]   ;;  %v236_v17 = vld [vmem:[%s411_s0 + $0x28] sm:$0xff]   ;;  %v207_v18 = vunpack.c.h.bf16 %v232_v13 }
   0x5   :  { %270 = vmatprep.subr.bf16.mxu0 %v307_v3  ;;  %v218_v19 = vunpack.c.l.bf16 %v235_v16 }
   0x6   :  { %8 = vsyncpa [#allocation3], 0  ;;  %v219_v20 = vunpack.c.h.bf16 %v235_v16  ;;  %v222_v21 = vunpack.c.l.bf16 %v236_v17  ;;  %v274_v22 = vpack.c.bf16 %v97_v10, %v96_v9  ;;  %v210_v23 = vunpack.c.l.bf16 %v233_v15  ;;  %v237_v24 = vld [vmem:[%s411_s0 + $0x30] sm:$0xff]   ;;  %v99_v28 = vld [vmem:[%s412_s1 + $0x38] sm:$0xff]  ;;  %s310_s17 = smov [#allocation2]  }
   0x7   :  { %v48_v25 = vsel %vm47_vm1, %v202_v11, 0.0  ;;  %v49_v26 = vsel %vm47_vm1, %v203_v12, 0.0  ;;  %v98_v27 = vld [vmem:[%s412_s1 + $0x30] sm:$0xff]  ;;  %v234_v29 = vld [vmem:[%s411_s0 + $0x18] sm:$0xff]   ;;  %v223_v30 = vunpack.c.h.bf16 %v236_v17  ;;  %v51_v32 = vsel %vm47_vm1, %v206_v14, 0.0  ;;  %s190_s18 = sshll.u32 %s310_s17, 4  ;;  %s191_s18 = int_to_ptr.vmem [resolvable:$true] %s190_s18 }
   0x8   :  { %272 = vmatpush3.bf16.msra.mxu0 %v271_v8  ;;  %v50_v31 = vadd.f32 %v49_v26, %v48_v25  ;;  %v211_v33 = vunpack.c.h.bf16 %v233_v15  ;;  %v53_v34 = vsel %vm47_vm1, %v207_v18, 0.0  ;;  %v69_v35 = vsel %vm47_vm1, %v218_v19, 0.0  ;;  %v238_v42 = vld [vmem:[%s411_s0 + $0x38] sm:$0xff]   ;;  %v198_v19 = vld [vmem:[%s413_s2] ss:$0 sm:$0xff]  ;;  %s283_s19 = scalar_lea.vmem %s191_s18, 32  ;;  %p288_p1 = scmp.lt.s32.totalorder %s191_s18, %s191_s18 }
   0x9   :  { %273 = vmatprep.subr.bf16.mxu0 %v307_v3  ;;  %v226_v36 = vunpack.c.l.bf16 %v237_v24  ;;  %v70_v38 = vsel %vm47_vm1, %v219_v20, 0.0  ;;  %v72_v39 = vsel %vm47_vm1, %v222_v21, 0.0  ;;  %v277_v40 = vpack.c.bf16 %v99_v28, %v98_v27  ;;  %p284_p0 = scmp.ne.s32.totalorder %s191_s18, %s283_s19  ;;  %p289_p2 = scmp.lt.s32.totalorder %s283_s19, %s283_s19 }
   0xa   :  { %v52_v37 = vadd.f32 %v51_v32, %v50_v31  ;;  %v214_v41 = vunpack.c.l.bf16 %v234_v29  ;;  %v55_v43 = vsel %vm47_vm1, %v210_v23, 0.0  ;;  %v71_v44 = vadd.f32 %v70_v38, %v69_v35 }
   0xb   :  { %v227_v45 = vunpack.c.h.bf16 %v237_v24  ;;  %v74_v47 = vsel %vm47_vm1, %v223_v30, 0.0  ;;  %v215_v48 = vunpack.c.h.bf16 %v234_v29  ;;  %v57_v49 = vsel %vm47_vm1, %v211_v33, 0.0  ;;  %p290_p3 = por %p289_p2, %p288_p1 }
   0xc   :  { %275 = vmatpush3.bf16.msra.mxu0 %v274_v22  ;;  %v54_v46 = vadd.f32 %v53_v34, %v52_v37  ;;  %v73_v50 = vadd.f32 %v72_v39, %v71_v44  ;;  %v230_v51 = vunpack.c.l.bf16 %v238_v42  ;;  %v76_v53 = vsel %vm47_vm1, %v226_v36, 0.0 }
   0xd   :  { %276 = vmatprep.subr.bf16.mxu0 %v307_v3  ;;  %v59_v54 = vsel %vm47_vm1, %v214_v41, 0.0  ;;  %v231_v56 = vunpack.c.h.bf16 %v238_v42  ;;  %v78_v58 = vsel %vm47_vm1, %v227_v45, 0.0  ;;  %v61_v59 = vsel %vm47_vm1, %v215_v48, 0.0  ;;  %p291_p4 = pnand %p290_p3, %p284_p0 }
   0xe   :  { %v56_v52 = vadd.f32 %v55_v43, %v54_v46  ;;  %v75_v55 = vadd.f32 %v74_v47, %v73_v50  ;;  %v80_v62 = vsel %vm47_vm1, %v230_v51, 0.0  ;;  %vm109_vm2 = vcmask 1041409  }
   0xf   :  { %v82_v1 = vsel %vm47_vm1, %v231_v56, 0.0 }
  0x10   :  { %278 = vmatpush3.bf16.msra.mxu0 %v277_v40  ;;  %v58_v57 = vadd.f32 %v57_v49, %v56_v52  ;;  %v77_v60 = vadd.f32 %v76_v53, %v75_v55 }
  0x12   :  { %v60_v61 = vadd.f32 %v59_v54, %v58_v57  ;;  %v79_v63 = vadd.f32 %v78_v58, %v77_v60 }
  0x14   :  { %v62_v0 = vadd.f32 %v61_v59, %v60_v61  ;;  %v81_v2 = vadd.f32 %v80_v62, %v79_v63 }
  0x16   :  { %v63_v3 = vrot.slane %v62_v0, 4  ;;  %v83_v4 = vadd.f32 %v82_v1, %v81_v2 }
  0x18   :  { %v64_v5 = vadd.f32 %v63_v3, %v62_v0  ;;  %v84_v6 = vrot.slane %v83_v4, 4 }
  0x1a   :  { %v65_v7 = vrot.slane %v64_v5, 2  ;;  %v85_v8 = vadd.f32 %v84_v6, %v83_v4 }
  0x1c   :  { %v66_v9 = vadd.f32 %v65_v7, %v64_v5  ;;  %v86_v10 = vrot.slane %v85_v8, 2 }
  0x1e   :  { %v67_v11 = vrot.slane %v66_v9, 1  ;;  %v87_v12 = vadd.f32 %v86_v10, %v85_v8 }
  0x20   :  { %v68_v13 = vadd.f32 %v67_v11, %v66_v9  ;;  %v88_v14 = vrot.slane %v87_v12, 1 }
  0x22   :  { %v89_v15 = vadd.f32 %v88_v14, %v87_v12  ;;  %v90_v16 = vmul.f32 0.015625, %v68_v13 }
  0x24   :  { %v91_v17 = vmul.f32 0.015625, %v89_v15 }
  0x26   :  { %v110_v18 = vsel %vm109_vm2, %v91_v17, %v90_v16 }
  0x27   :  { %265 = vmatmul.mubr.msk.f32.vlgmr.msra.gmra.mrb[0].mxu0 %vm47_vm1, %v110_v18 }
  0xfa   :  { %v179_v20 = vpop.f32.mrb[0].mxu0 }
  0xfb   :  { %v180_v21 = vadd.f32 %v198_v19, %v179_v20  ;;  %v266_v22 = vpop.f32.mrb[1].mxu0 }
  0xfd   :  { %183 = vst [vmem:[#allocation2] sm:$0x3] %v180_v21 }
  0xfe   :  { %294 = shalt.err (!%p291_p4)
}
  0xff   :  { %s295_s22 = scalar_lea.hbm %s414_s3, 32 }
 0x100   :  { %p296_p5 = scmp.ne.s32.totalorder %s414_s3, %s295_s22  ;;  %p299_p6 = scmp.lt.u32.totalorder %s295_s22, %s414_s3 }
 0x102   :  { %p301_p7 = pnand %p299_p6, %p296_p5 }
 0x104   :  { %304 = shalt.err (!%p301_p7)
}
 0x105   :  { %193 = dma.vmem_to_hbm [thread:$0]  %s191_s18, 32, %s414_s3, [#allocation3]  }
 0x106   :  { %305 = dma.done.wait [#allocation3], 32  }
 0x107   :  { %306 = vsyncadd [#allocation3], 4294967264 }
 0x108   :  { %197 = vsyncpa [#allocation3], 1 }

// kernel: resnet20_forward.39
= control target key start
LH: loop header
LB: loop body
LE: loop exit
PB: predicated region body
PF: predicated region fallthrough
CT: control target
= control target key end

     0   :  { %vm554_vm0 = vcmask 523264   ;;  %s1808_s1 = inlined_call_operand.vmem [shape: bf16[576,128], index: 1, kind: input, shape index: {}]   ;;  %s1809_s0 = inlined_call_operand.vmem [shape: bf16[128,576], index: 0, kind: input, shape index: {}]   ;;  %s1810_s2 = inlined_call_operand.vmem [shape: f32[1,128], index: 2, kind: input, shape index: {}]   ;;  %s1811_s3 = inlined_call_operand.vmem [shape: f32[1,128], index: 3, kind: input, shape index: {}]   ;;  %s1812_s4 = inlined_call_operand.vmem [shape: bf16[128,128], index: 4, kind: output, shape index: {}]  }
   0x1   :  { %v1353_v0 = vld [vmem:[%s1808_s1 + $0x40] sm:$0xff]   ;;  %v1357_v4 = vld [vmem:[%s1808_s1 + $0x48] sm:$0xff]   ;;  %v1361_v8 = vld [vmem:[%s1808_s1 + $0x50] sm:$0xff]  }
   0x2   :  { %v1354_v1 = vld [vmem:[%s1808_s1 + $0xc0] sm:$0xff]   ;;  %1181 = vmatprep.subr.bf16.mxu0 %v1353_v0  ;;  %v1358_v5 = vld [vmem:[%s1808_s1 + $0xc8] sm:$0xff]   ;;  %v1362_v9 = vld [vmem:[%s1808_s1 + $0xd0] sm:$0xff]  }
   0x3   :  { %v1355_v2 = vld [vmem:[%s1808_s1] sm:$0xff]   ;;  %1245 = vmatprep.subr.bf16.mxu1 %v1354_v1  ;;  %v1359_v6 = vld [vmem:[%s1808_s1 + $0x8] sm:$0xff]   ;;  %v1363_v10 = vld [vmem:[%s1808_s1 + $0x10] sm:$0xff]  }
   0x4   :  { %v1356_v3 = vld [vmem:[%s1808_s1 + $0x80] sm:$0xff]   ;;  %1182 = vmatpush3.bf16.msra.mxu0 %v1355_v2  ;;  %v1360_v7 = vld [vmem:[%s1808_s1 + $0x88] sm:$0xff]   ;;  %v1364_v11 = vld [vmem:[%s1808_s1 + $0x90] sm:$0xff]  }
   0x5   :  { %1246 = vmatpush3.bf16.msra.mxu1 %v1356_v3  ;;  %1183 = vmatprep.subr.bf16.mxu0 %v1357_v4  ;;  %v1365_v12 = vld [vmem:[%s1808_s1 + $0x58] sm:$0xff]   ;;  %v1369_v16 = vld [vmem:[%s1808_s1 + $0x60] sm:$0xff]   ;;  %v1373_v20 = vld [vmem:[%s1808_s1 + $0x68] sm:$0xff]  }
   0x6   :  { %1247 = vmatprep.subr.bf16.mxu1 %v1358_v5  ;;  %v1366_v13 = vld [vmem:[%s1808_s1 + $0xd8] sm:$0xff]   ;;  %v1370_v17 = vld [vmem:[%s1808_s1 + $0xe0] sm:$0xff]   ;;  %v1374_v21 = vld [vmem:[%s1808_s1 + $0xe8] sm:$0xff]  }
   0x7   :  { %v1367_v14 = vld [vmem:[%s1808_s1 + $0x18] sm:$0xff]   ;;  %v1371_v18 = vld [vmem:[%s1808_s1 + $0x20] sm:$0xff]   ;;  %v1375_v22 = vld [vmem:[%s1808_s1 + $0x28] sm:$0xff]  }
   0x8   :  { %1184 = vmatpush3.bf16.msra.mxu0 %v1359_v6  ;;  %v1368_v15 = vld [vmem:[%s1808_s1 + $0x98] sm:$0xff]   ;;  %v1372_v19 = vld [vmem:[%s1808_s1 + $0xa0] sm:$0xff]   ;;  %v1376_v23 = vld [vmem:[%s1808_s1 + $0xa8] sm:$0xff]  }
   0x9   :  { %1248 = vmatpush3.bf16.msra.mxu1 %v1360_v7  ;;  %1185 = vmatprep.subr.bf16.mxu0 %v1361_v8  ;;  %v1377_v24 = vld [vmem:[%s1808_s1 + $0x70] sm:$0xff]   ;;  %v1381_v28 = vld [vmem:[%s1808_s1 + $0x78] sm:$0xff]   ;;  %v1390_v35 = vld [vmem:[%s1809_s0 + $0xc] ss:$20 sps:$4 sm:$0xff]  }
   0xa   :  { %1249 = vmatprep.subr.bf16.mxu1 %v1362_v9  ;;  %v1378_v25 = vld [vmem:[%s1808_s1 + $0xf0] sm:$0xff]   ;;  %v1382_v29 = vld [vmem:[%s1808_s1 + $0xf8] sm:$0xff]   ;;  %v1391_v36 = vld [vmem:[%s1808_s1 + $0x100] sm:$0xff]   ;;  %708 = vmatprep.mubr.bf16.mxu1 %v1390_v35 }
   0xb   :  { %v1379_v26 = vld [vmem:[%s1808_s1 + $0x30] sm:$0xff]   ;;  %v1383_v30 = vld [vmem:[%s1808_s1 + $0x38] sm:$0xff]   ;;  %v1392_v37 = vld [vmem:[%s1809_s0 + $0x2c] ss:$20 sps:$4 sm:$0xff]  }
   0xc   :  { %1186 = vmatpush3.bf16.msra.mxu0 %v1363_v10  ;;  %v1380_v27 = vld [vmem:[%s1808_s1 + $0xb0] sm:$0xff]   ;;  %v1384_v31 = vld [vmem:[%s1808_s1 + $0xb8] sm:$0xff]   ;;  %v1404_v42 = vld [vmem:[%s1808_s1 + $0x108] sm:$0xff]  }
   0xd   :  { %1250 = vmatpush3.bf16.msra.mxu1 %v1364_v11  ;;  %1187 = vmatprep.subr.bf16.mxu0 %v1365_v12  ;;  %v1385_v32 = vld [vmem:[%s1809_s0] ss:$20 sps:$4 sm:$0xff]   ;;  %v1387_v33 = vld [vmem:[%s1809_s0 + $0x4] ss:$20 sps:$4 sm:$0xff]   ;;  %v1388_v34 = vld [vmem:[%s1809_s0 + $0x8] ss:$20 sps:$4 sm:$0xff]  }
   0xe   :  { %1251 = vmatprep.subr.bf16.mxu1 %v1366_v13  ;;  %611 = vmatprep.mubr.bf16.mxu0 %v1387_v33  ;;  %v1394_v38 = vld [vmem:[%s1809_s0 + $0x34] ss:$20 sps:$4 sm:$0xff]   ;;  %v1397_v40 = vld [vmem:[%s1809_s0 + $0x30] ss:$20 sps:$4 sm:$0xff]   ;;  %v1403_v45 = vld [vmem:[%s1809_s0 + $0x58] ss:$20 sps:$4 sm:$0xff]  }
   0xf   :  { %v1396_v39 = vld [vmem:[%s1809_s0 + $0x28] ss:$20 sps:$4 sm:$0xff]   ;;  %v1402_v44 = vld [vmem:[%s1809_s0 + $0x50] ss:$20 sps:$4 sm:$0xff]   ;;  %v1409_v50 = vld [vmem:[%s1809_s0 + $0x78] ss:$20 sps:$4 sm:$0xff]  }
  0x10   :  { %1188 = vmatpush3.bf16.msra.mxu0 %v1367_v14  ;;  %v1398_v41 = vld [vmem:[%s1809_s0 + $0x54] ss:$20 sps:$4 sm:$0xff]   ;;  %v1400_v43 = vld [vmem:[%s1809_s0 + $0x5c] ss:$20 sps:$4 sm:$0xff]   ;;  %v1407_v48 = vld [vmem:[%s1809_s0 + $0x84] ss:$20 sps:$4 sm:$0xff]  }
  0x11   :  { %1252 = vmatpush3.bf16.msra.mxu1 %v1368_v15  ;;  %1189 = vmatprep.subr.bf16.mxu0 %v1369_v16  ;;  %v1417_v46 = vld [vmem:[%s1808_s1 + $0x110] sm:$0xff]   ;;  %v1430_v49 = vld [vmem:[%s1808_s1 + $0x118] sm:$0xff]   ;;  %v1413_v53 = vld [vmem:[%s1809_s0 + $0xac] ss:$20 sps:$4 sm:$0xff]  }
  0x12   :  { %1253 = vmatprep.subr.bf16.mxu1 %v1370_v17  ;;  %v1405_v47 = vld [vmem:[%s1809_s0 + $0x7c] ss:$20 sps:$4 sm:$0xff]   ;;  %v1410_v51 = vld [vmem:[%s1809_s0 + $0x80] ss:$20 sps:$4 sm:$0xff]   ;;  %v1411_v52 = vld [vmem:[%s1809_s0 + $0xa4] ss:$20 sps:$4 sm:$0xff]  }
  0x13   :  { %v1415_v54 = vld [vmem:[%s1809_s0 + $0xa0] ss:$20 sps:$4 sm:$0xff]   ;;  %v1416_v55 = vld [vmem:[%s1809_s0 + $0xa8] ss:$20 sps:$4 sm:$0xff]   ;;  %v1423_v59 = vld [vmem:[%s1809_s0 + $0xd0] ss:$20 sps:$4 sm:$0xff]  }
  0x14   :  { %1190 = vmatpush3.bf16.msra.mxu0 %v1371_v18  ;;  %v1418_v56 = vld [vmem:[%s1809_s0 + $0xcc] ss:$20 sps:$4 sm:$0xff]   ;;  %v1420_v57 = vld [vmem:[%s1809_s0 + $0xd4] ss:$20 sps:$4 sm:$0xff]   ;;  %v1426_v61 = vld [vmem:[%s1809_s0 + $0xfc] ss:$20 sps:$4 sm:$0xff]  }
  0x15   :  { %1254 = vmatpush3.bf16.msra.mxu1 %v1372_v19  ;;  %1191 = vmatprep.subr.bf16.mxu0 %v1373_v20  ;;  %v1422_v58 = vld [vmem:[%s1809_s0 + $0xc8] ss:$20 sps:$4 sm:$0xff]   ;;  %v1428_v62 = vld [vmem:[%s1809_s0 + $0xf0] ss:$20 sps:$4 sm:$0xff]   ;;  %v1429_v63 = vld [vmem:[%s1809_s0 + $0xf8] ss:$20 sps:$4 sm:$0xff]  }
  0x16   :  { %1255 = vmatprep.subr.bf16.mxu1 %v1374_v21  ;;  %v1424_v60 = vld [vmem:[%s1809_s0 + $0xf4] ss:$20 sps:$4 sm:$0xff]   ;;  %v1431_v0 = vld [vmem:[%s1809_s0 + $0x11c] ss:$20 sps:$4 sm:$0xff]   ;;  %v1433_v1 = vld [vmem:[%s1809_s0 + $0x124] ss:$20 sps:$4 sm:$0xff]  }
  0x17   :  { %v1435_v2 = vld [vmem:[%s1809_s0 + $0x118] ss:$20 sps:$4 sm:$0xff]   ;;  %v1436_v3 = vld [vmem:[%s1809_s0 + $0x120] ss:$20 sps:$4 sm:$0xff]   ;;  %v1437_v4 = vld [vmem:[%s1809_s0 + $0x10] ss:$20 sps:$4 sm:$0xff]  }
  0x18   :  { %1192 = vmatpush3.bf16.msra.mxu0 %v1375_v22  ;;  %v1438_v5 = vld [vmem:[%s1809_s0 + $0xb0] ss:$20 sps:$4 sm:$0xff]   ;;  %v1439_v6 = vld [vmem:[%s1809_s0 + $0x38] ss:$20 sps:$4 sm:$0xff]   ;;  %v1441_v8 = vld [vmem:[%s1809_s0 + $0x60] ss:$20 sps:$4 sm:$0xff]  }
  0x19   :  { %1256 = vmatpush3.bf16.msra.mxu1 %v1376_v23  ;;  %1193 = vmatprep.subr.bf16.mxu0 %v1377_v24  ;;  %v1440_v7 = vld [vmem:[%s1809_s0 + $0xd8] ss:$20 sps:$4 sm:$0xff]   ;;  %v1442_v9 = vld [vmem:[%s1809_s0 + $0x100] ss:$20 sps:$4 sm:$0xff]   ;;  %v1443_v10 = vld [vmem:[%s1809_s0 + $0x88] ss:$20 sps:$4 sm:$0xff]  }
  0x1a   :  { %1257 = vmatprep.subr.bf16.mxu1 %v1378_v25  ;;  %v1444_v11 = vld [vmem:[%s1809_s0 + $0x128] ss:$20 sps:$4 sm:$0xff]  }
  0x1c   :  { %1194 = vmatpush3.bf16.msra.mxu0 %v1379_v26 }
  0x1d   :  { %1258 = vmatpush3.bf16.msra.mxu1 %v1380_v27  ;;  %1195 = vmatprep.subr.bf16.mxu0 %v1381_v28 }
  0x1e   :  { %1259 = vmatprep.subr.bf16.mxu1 %v1382_v29 }
  0x20   :  { %1196 = vmatpush3.bf16.msra.mxu0 %v1383_v30 }
  0x21   :  { %1260 = vmatpush3.bf16.msra.mxu1 %v1384_v31  ;;  %1321 = vmatprep.subr.bf16.mxu0 %v1391_v36 }
  0x22   :  { %1345 = vmatprep.subr.bf16.mxu1 %v1391_v36 }
  0x23   :  { %612 = vmatmul.mubr.bf16.vlgmr.msra.gmra.mrb[0].mxu0 %v1385_v32 }
  0x24   :  { %709 = vmatmul.mubr.bf16.vlgmr.msra.gmra.mrb[0].mxu1 %v1388_v34  ;;  %1322 = vmatpush3.bf16.msra.mxu0 %v1391_v36 }
  0x25   :  { %1349 = vmatpush3.bf16.msra.mxu1 %v1391_v36  ;;  %619 = vmatprep.mubr.bf16.mxu0 %v1392_v37 }
  0x26   :  { %716 = vmatprep.mubr.bf16.mxu1 %v1394_v38  ;;  %1323 = vmatprep.subr.bf16.mxu0 %v1404_v42 }
  0x27   :  { %1346 = vmatprep.subr.bf16.mxu1 %v1404_v42 }
  0x28   :  { %1324 = vmatpush3.bf16.msra.mxu0 %v1404_v42 }
  0x29   :  { %1350 = vmatpush3.bf16.msra.mxu1 %v1404_v42  ;;  %1325 = vmatprep.subr.bf16.mxu0 %v1417_v46 }
  0x2a   :  { %1347 = vmatprep.subr.bf16.mxu1 %v1417_v46 }
  0x2b   :  { %620 = vmatmul.mubr.bf16.gmra.mrb[4].mxu0 %v1396_v39 }
  0x2c   :  { %717 = vmatmul.mubr.bf16.gmra.mrb[4].mxu1 %v1397_v40  ;;  %627 = vmatprep.mubr.bf16.mxu0 %v1398_v41 }
  0x2d   :  { %724 = vmatprep.mubr.bf16.mxu1 %v1400_v43  ;;  %1326 = vmatpush3.bf16.msra.mxu0 %v1417_v46 }
  0x2e   :  { %1351 = vmatpush3.bf16.msra.mxu1 %v1417_v46  ;;  %1327 = vmatprep.subr.bf16.mxu0 %v1430_v49 }
  0x2f   :  { %1348 = vmatprep.subr.bf16.mxu1 %v1430_v49 }
  0x31   :  { %1328 = vmatpush3.bf16.msra.mxu0 %v1430_v49 }
  0x32   :  { %1352 = vmatpush3.bf16.msra.mxu1 %v1430_v49 }
  0x33   :  { %628 = vmatmul.mubr.bf16.gmra.mrb[8].mxu0 %v1402_v44 }
  0x34   :  { %725 = vmatmul.mubr.bf16.gmra.mrb[8].mxu1 %v1403_v45  ;;  %635 = vmatprep.mubr.bf16.mxu0 %v1405_v47 }
  0x35   :  { %732 = vmatprep.mubr.bf16.mxu1 %v1407_v48 }
  0x3b   :  { %636 = vmatmul.mubr.bf16.gmra.mrb[12].mxu0 %v1409_v50 }
  0x3c   :  { %733 = vmatmul.mubr.bf16.gmra.mrb[12].mxu1 %v1410_v51  ;;  %643 = vmatprep.mubr.bf16.mxu0 %v1411_v52 }
  0x3d   :  { %740 = vmatprep.mubr.bf16.mxu1 %v1413_v53 }
  0x43   :  { %644 = vmatmul.mubr.bf16.gmra.mrb[16].mxu0 %v1415_v54 }
  0x44   :  { %741 = vmatmul.mubr.bf16.gmra.mrb[16].mxu1 %v1416_v55  ;;  %651 = vmatprep.mubr.bf16.mxu0 %v1418_v56 }
  0x45   :  { %748 = vmatprep.mubr.bf16.mxu1 %v1420_v57 }
  0x4b   :  { %652 = vmatmul.mubr.bf16.gmra.mrb[20].mxu0 %v1422_v58 }
  0x4c   :  { %749 = vmatmul.mubr.bf16.gmra.mrb[20].mxu1 %v1423_v59  ;;  %659 = vmatprep.mubr.bf16.mxu0 %v1424_v60 }
  0x4d   :  { %756 = vmatprep.mubr.bf16.mxu1 %v1426_v61 }
  0x53   :  { %660 = vmatmul.mubr.bf16.gmra.mrb[24].mxu0 %v1428_v62 }
  0x54   :  { %757 = vmatmul.mubr.bf16.gmra.mrb[24].mxu1 %v1429_v63  ;;  %667 = vmatprep.mubr.bf16.mxu0 %v1431_v0 }
  0x55   :  { %764 = vmatprep.mubr.bf16.mxu1 %v1433_v1 }
  0x5b   :  { %668 = vmatmul.mubr.bf16.gmra.mrb[28].mxu0 %v1435_v2 }
  0x5c   :  { %765 = vmatmul.mubr.bf16.gmra.mrb[28].mxu1 %v1436_v3  ;;  %1329 = vmatprep.mubr.msk.bf16.mxu0 %vm554_vm0, %v1437_v4 }
  0x5d   :  { %1337 = vmatprep.mubr.msk.bf16.mxu1 %vm554_vm0, %v1438_v5 }
  0x63   :  { %1330 = vmatmul.mubr.msk.bf16.vlgmr.msra.gmra.mrb[32].mxu0 %vm554_vm0, %v1439_v6 }
  0x64   :  { %1338 = vmatmul.mubr.msk.bf16.vlgmr.msra.gmra.mrb[32].mxu1 %vm554_vm0, %v1440_v7  ;;  %1333 = vmatprep.mubr.msk.bf16.mxu0 %vm554_vm0, %v1441_v8 }
  0x65   :  { %1341 = vmatprep.mubr.msk.bf16.mxu1 %vm554_vm0, %v1442_v9 }
  0x6b   :  { %1334 = vmatmul.mubr.msk.bf16.gmra.mrb[36].mxu0 %vm554_vm0, %v1443_v10 }
  0x6c   :  { %1342 = vmatmul.mubr.msk.bf16.gmra.mrb[36].mxu1 %vm554_vm0, %v1444_v11 }
  0xf6   :  { %v1197_v12 = vpop.f32.mrb[0].mxu0 }
  0xf7   :  { %v1261_v13 = vpop.f32.mrb[0].mxu1  ;;  %v1198_v14 = vpop.f32.mrb[1].mxu0 }
  0xf8   :  { %v1199_v15 = vadd.f32 %v1198_v14, %v1197_v12  ;;  %v1262_v16 = vpop.f32.mrb[1].mxu1  ;;  %v1200_v17 = vpop.f32.mrb[2].mxu0 }
  0xf9   :  { %v1263_v18 = vadd.f32 %v1262_v16, %v1261_v13  ;;  %v1264_v19 = vpop.f32.mrb[2].mxu1  ;;  %v1201_v20 = vpop.f32.mrb[3].mxu0 }
  0xfa   :  { %v1202_v21 = vadd.f32 %v1201_v20, %v1200_v17  ;;  %v1265_v22 = vpop.f32.mrb[3].mxu1 }
  0xfb   :  { %v1266_v23 = vadd.f32 %v1265_v22, %v1264_v19  ;;  %v1706_v24 = vadd.f32 %v1263_v18, %v1199_v15 }
  0xfd   :  { %v1708_v25 = vadd.f32 %v1266_v23, %v1202_v21 }
  0xfe   :  { %v1203_v26 = vpop.f32.mrb[4].mxu0 }
  0xff   :  { %v1267_v27 = vpop.f32.mrb[4].mxu1  ;;  %v1204_v28 = vpop.f32.mrb[5].mxu0 }
 0x100   :  { %v1205_v29 = vadd.f32 %v1204_v28, %v1203_v26  ;;  %v1268_v30 = vpop.f32.mrb[5].mxu1  ;;  %v1206_v31 = vpop.f32.mrb[6].mxu0 }
 0x101   :  { %v1269_v32 = vadd.f32 %v1268_v30, %v1267_v27  ;;  %v1270_v33 = vpop.f32.mrb[6].mxu1  ;;  %v1207_v34 = vpop.f32.mrb[7].mxu0 }
 0x102   :  { %v1208_v35 = vadd.f32 %v1207_v34, %v1206_v31  ;;  %v1271_v36 = vpop.f32.mrb[7].mxu1 }
 0x103   :  { %v1272_v37 = vadd.f32 %v1271_v36, %v1270_v33  ;;  %v1710_v38 = vadd.f32 %v1269_v32, %v1205_v29 }
 0x105   :  { %v1712_v39 = vadd.f32 %v1272_v37, %v1208_v35 }
 0x106   :  { %v1209_v40 = vpop.f32.mrb[8].mxu0 }
 0x107   :  { %v1273_v41 = vpop.f32.mrb[8].mxu1  ;;  %v1210_v42 = vpop.f32.mrb[9].mxu0 }
 0x108   :  { %v1211_v43 = vadd.f32 %v1210_v42, %v1209_v40  ;;  %v1274_v44 = vpop.f32.mrb[9].mxu1  ;;  %v1212_v45 = vpop.f32.mrb[10].mxu0 }
 0x109   :  { %v1275_v46 = vadd.f32 %v1274_v44, %v1273_v41  ;;  %v1276_v47 = vpop.f32.mrb[10].mxu1  ;;  %v1213_v48 = vpop.f32.mrb[11].mxu0 }
 0x10a   :  { %v1214_v49 = vadd.f32 %v1213_v48, %v1212_v45  ;;  %v1277_v50 = vpop.f32.mrb[11].mxu1 }
 0x10b   :  { %v1278_v51 = vadd.f32 %v1277_v50, %v1276_v47  ;;  %v1714_v52 = vadd.f32 %v1275_v46, %v1211_v43 }
 0x10d   :  { %v1716_v53 = vadd.f32 %v1278_v51, %v1214_v49 }
 0x10e   :  { %v1215_v54 = vpop.f32.mrb[12].mxu0 }
 0x10f   :  { %v1279_v55 = vpop.f32.mrb[12].mxu1  ;;  %v1216_v56 = vpop.f32.mrb[13].mxu0 }
 0x110   :  { %v1217_v57 = vadd.f32 %v1216_v56, %v1215_v54  ;;  %v1280_v58 = vpop.f32.mrb[13].mxu1  ;;  %v1218_v59 = vpop.f32.mrb[14].mxu0 }
 0x111   :  { %v1281_v60 = vadd.f32 %v1280_v58, %v1279_v55  ;;  %v1282_v61 = vpop.f32.mrb[14].mxu1  ;;  %v1219_v62 = vpop.f32.mrb[15].mxu0 }
 0x112   :  { %v1220_v63 = vadd.f32 %v1219_v62, %v1218_v59  ;;  %v1283_v0 = vpop.f32.mrb[15].mxu1 }
 0x113   :  { %v1284_v1 = vadd.f32 %v1283_v0, %v1282_v61  ;;  %v1718_v2 = vadd.f32 %v1281_v60, %v1217_v57 }
 0x115   :  { %v1720_v3 = vadd.f32 %v1284_v1, %v1220_v63 }
 0x116   :  { %v1221_v4 = vpop.f32.mrb[16].mxu0 }
 0x117   :  { %v1285_v5 = vpop.f32.mrb[16].mxu1  ;;  %v1222_v6 = vpop.f32.mrb[17].mxu0 }
 0x118   :  { %v1223_v7 = vadd.f32 %v1222_v6, %v1221_v4  ;;  %v1286_v8 = vpop.f32.mrb[17].mxu1  ;;  %v1224_v9 = vpop.f32.mrb[18].mxu0 }
 0x119   :  { %v1287_v10 = vadd.f32 %v1286_v8, %v1285_v5  ;;  %v1288_v11 = vpop.f32.mrb[18].mxu1  ;;  %v1225_v12 = vpop.f32.mrb[19].mxu0  ;;  %v1733_v5 = vld [vmem:[%s1810_s2] ss:$0 sm:$0xff] }
 0x11a   :  { %v1226_v13 = vadd.f32 %v1225_v12, %v1224_v9  ;;  %v1289_v14 = vpop.f32.mrb[19].mxu1  ;;  %v1739_v9 = vld [vmem:[%s1811_s3] ss:$0 sm:$0xff] }
 0x11b   :  { %v1290_v15 = vadd.f32 %v1289_v14, %v1288_v11  ;;  %v743_v16 = vadd.f32 %v1287_v10, %v1223_v7 }
 0x11d   :  { %v1722_v17 = vadd.f32 %v1290_v15, %v1226_v13 }
 0x11e   :  { %v1227_v18 = vpop.f32.mrb[20].mxu0 }
 0x11f   :  { %v1291_v19 = vpop.f32.mrb[20].mxu1  ;;  %v1228_v20 = vpop.f32.mrb[21].mxu0 }
 0x120   :  { %v1229_v21 = vadd.f32 %v1228_v20, %v1227_v18  ;;  %v1292_v22 = vpop.f32.mrb[21].mxu1  ;;  %v1230_v23 = vpop.f32.mrb[22].mxu0 }
 0x121   :  { %v1293_v26 = vadd.f32 %v1292_v22, %v1291_v19  ;;  %v1294_v27 = vpop.f32.mrb[22].mxu1  ;;  %v1231_v28 = vpop.f32.mrb[23].mxu0 }
 0x122   :  { %v1232_v29 = vadd.f32 %v1231_v28, %v1230_v23  ;;  %v1295_v30 = vpop.f32.mrb[23].mxu1 }
 0x123   :  { %v1296_v31 = vadd.f32 %v1295_v30, %v1294_v27  ;;  %v751_v32 = vadd.f32 %v1293_v26, %v1229_v21 }
 0x125   :  { %v754_v33 = vadd.f32 %v1296_v31, %v1232_v29 }
 0x126   :  { %v1233_v34 = vpop.f32.mrb[24].mxu0 }
 0x127   :  { %v1297_v35 = vpop.f32.mrb[24].mxu1  ;;  %v1234_v36 = vpop.f32.mrb[25].mxu0 }
 0x128   :  { %v1235_v37 = vadd.f32 %v1234_v36, %v1233_v34  ;;  %v1298_v40 = vpop.f32.mrb[25].mxu1  ;;  %v1236_v41 = vpop.f32.mrb[26].mxu0 }
 0x129   :  { %v1299_v42 = vadd.f32 %v1298_v40, %v1297_v35  ;;  %v1300_v43 = vpop.f32.mrb[26].mxu1  ;;  %v1237_v44 = vpop.f32.mrb[27].mxu0 }
 0x12a   :  { %v1238_v45 = vadd.f32 %v1237_v44, %v1236_v41  ;;  %v1301_v46 = vpop.f32.mrb[27].mxu1 }
 0x12b   :  { %v1302_v47 = vadd.f32 %v1301_v46, %v1300_v43  ;;  %v1724_v48 = vadd.f32 %v1299_v42, %v1235_v37 }
 0x12d   :  { %v1726_v49 = vadd.f32 %v1302_v47, %v1238_v45 }
 0x12e   :  { %v1239_v50 = vpop.f32.mrb[28].mxu0 }
 0x12f   :  { %v1303_v51 = vpop.f32.mrb[28].mxu1  ;;  %v1240_v54 = vpop.f32.mrb[29].mxu0 }
 0x130   :  { %v1241_v55 = vadd.f32 %v1240_v54, %v1239_v50  ;;  %v1304_v56 = vpop.f32.mrb[29].mxu1  ;;  %v1242_v57 = vpop.f32.mrb[30].mxu0 }
 0x131   :  { %v1305_v58 = vadd.f32 %v1304_v56, %v1303_v51  ;;  %v1306_v59 = vpop.f32.mrb[30].mxu1  ;;  %v1243_v60 = vpop.f32.mrb[31].mxu0 }
 0x132   :  { %v1244_v61 = vadd.f32 %v1243_v60, %v1242_v57  ;;  %v1307_v62 = vpop.f32.mrb[31].mxu1 }
 0x133   :  { %v1308_v63 = vadd.f32 %v1307_v62, %v1306_v59  ;;  %v767_v0 = vadd.f32 %v1305_v58, %v1241_v55 }
 0x135   :  { %v1728_v1 = vadd.f32 %v1308_v63, %v1244_v61 }
 0x136   :  { %v1331_v4 = vpop.f32.mrb[32].mxu0 }
 0x137   :  { %v816_v6 = vadd.f32 %v1331_v4, %v1710_v38  ;;  %v1339_v7 = vpop.f32.mrb[32].mxu1  ;;  %v807_v8 = vpop.f32.mrb[33].mxu0 }
 0x138   :  { %v848_v10 = vadd.f32 %v1339_v7, %v751_v32  ;;  %v808_v11 = vadd.f32 %v807_v8, %v1706_v24  ;;  %v839_v12 = vpop.f32.mrb[33].mxu1  ;;  %v1332_v13 = vpop.f32.mrb[34].mxu0 }
 0x139   :  { %v879_v14 = vmul.f32 %v1733_v5, %v816_v6  ;;  %v840_v15 = vadd.f32 %v839_v12, %v743_v16  ;;  %v819_v18 = vadd.f32 %v1332_v13, %v1712_v39  ;;  %v1340_v19 = vpop.f32.mrb[34].mxu1  ;;  %v810_v20 = vpop.f32.mrb[35].mxu0 }
 0x13a   :  { %v887_v38 = vmul.f32 %v1733_v5, %v848_v10  ;;  %v877_v21 = vmul.f32 %v1733_v5, %v808_v11  ;;  %v851_v22 = vadd.f32 %v1340_v19, %v754_v33  ;;  %v811_v23 = vadd.f32 %v810_v20, %v1708_v25  ;;  %v842_v26 = vpop.f32.mrb[35].mxu1 }
 0x13b   :  { %v902_v27 = vadd.f32 %v1739_v9, %v879_v14  ;;  %v885_v24 = vmul.f32 %v1733_v5, %v840_v15  ;;  %v880_v28 = vmul.f32 %v1733_v5, %v819_v18  ;;  %v843_v16 = vadd.f32 %v842_v26, %v1722_v17 }
 0x13c   :  { %v910_v39 = vadd.f32 %v1739_v9, %v887_v38  ;;  %v900_v29 = vadd.f32 %v1739_v9, %v877_v21  ;;  %v888_v30 = vmul.f32 %v1733_v5, %v851_v22  ;;  %v878_v31 = vmul.f32 %v1733_v5, %v811_v23 }
 0x13d   :  { %v918_v32 = vmax.f32 %v902_v27, 0.0  ;;  %v908_v25 = vadd.f32 %v1739_v9, %v885_v24  ;;  %v903_v33 = vadd.f32 %v1739_v9, %v880_v28  ;;  %v886_v34 = vmul.f32 %v1733_v5, %v843_v16 }
 0x13e   :  { %v926_v35 = vmax.f32 %v910_v39, 0.0  ;;  %v916_v36 = vmax.f32 %v900_v29, 0.0  ;;  %v911_v37 = vadd.f32 %v1739_v9, %v888_v30  ;;  %v901_v17 = vadd.f32 %v1739_v9, %v878_v31  ;;  %v1335_v40 = vpop.f32.mrb[36].mxu0 }
 0x13f   :  { %v924_v41 = vmax.f32 %v908_v25, 0.0  ;;  %v919_v42 = vmax.f32 %v903_v33, 0.0  ;;  %v909_v43 = vadd.f32 %v1739_v9, %v886_v34  ;;  %v832_v44 = vadd.f32 %v1335_v40, %v1718_v2  ;;  %v1343_v45 = vpop.f32.mrb[36].mxu1  ;;  %v823_v46 = vpop.f32.mrb[37].mxu0 }
 0x140   :  { %v927_v47 = vmax.f32 %v911_v37, 0.0  ;;  %v917_v50 = vmax.f32 %v901_v17, 0.0  ;;  %v864_v51 = vadd.f32 %v1343_v45, %v767_v0  ;;  %v824_v54 = vadd.f32 %v823_v46, %v1714_v52  ;;  %v855_v55 = vpop.f32.mrb[37].mxu1  ;;  %v1336_v56 = vpop.f32.mrb[38].mxu0 }
 0x141   :  { %v1142_v57 = vpack.c.bf16 %v919_v42, %v918_v32  ;;  %v925_v58 = vmax.f32 %v909_v43, 0.0  ;;  %v883_v59 = vmul.f32 %v1733_v5, %v832_v44  ;;  %v856_v60 = vadd.f32 %v855_v55, %v1724_v48  ;;  %v1344_v61 = vpop.f32.mrb[38].mxu1  ;;  %v826_v62 = vpop.f32.mrb[39].mxu0 }
 0x142   :  { %v1162_v63 = vpack.c.bf16 %v927_v47, %v926_v35  ;;  %v1137_v4 = vpack.c.bf16 %v917_v50, %v916_v36  ;;  %v891_v2 = vmul.f32 %v1733_v5, %v864_v51  ;;  %v881_v6 = vmul.f32 %v1733_v5, %v824_v54  ;;  %v858_v7 = vpop.f32.mrb[39].mxu1 }
 0x143   :  { %1174 = vst [vmem:[%s1812_s4 + $0x8] sm:$0xff] %v1142_v57   ;;  %v1157_v52 = vpack.c.bf16 %v925_v58, %v924_v41  ;;  %v889_v0 = vmul.f32 %v1733_v5, %v856_v60  ;;  %v835_v8 = vadd.f32 %v1336_v56, %v1720_v3  ;;  %v867_v48 = vadd.f32 %v1344_v61, %v1728_v1 }
 0x144   :  { %1178 = vst [vmem:[%s1812_s4 + $0x28] sm:$0xff] %v1162_v63   ;;  %1138 = vst [vmem:[%s1812_s4] sm:$0xff] %v1137_v4   ;;  %v827_v10 = vadd.f32 %v826_v62, %v1716_v53  ;;  %v906_v11 = vadd.f32 %v1739_v9, %v883_v59  ;;  %v859_v12 = vadd.f32 %v858_v7, %v1726_v49 }
 0x145   :  { %1177 = vst [vmem:[%s1812_s4 + $0x20] sm:$0xff] %v1157_v52   ;;  %v884_v3 = vmul.f32 %v1733_v5, %v835_v8  ;;  %v914_v13 = vadd.f32 %v1739_v9, %v891_v2  ;;  %v904_v14 = vadd.f32 %v1739_v9, %v881_v6  ;;  %v892_v15 = vmul.f32 %v1733_v5, %v867_v48 }
 0x146   :  { %v882_v1 = vmul.f32 %v1733_v5, %v827_v10  ;;  %v912_v53 = vadd.f32 %v1739_v9, %v889_v0  ;;  %v890_v19 = vmul.f32 %v1733_v5, %v859_v12  ;;  %v922_v21 = vmax.f32 %v906_v11, 0.0 }
 0x147   :  { %v907_v18 = vadd.f32 %v1739_v9, %v884_v3  ;;  %v915_v20 = vadd.f32 %v1739_v9, %v892_v15  ;;  %v930_v23 = vmax.f32 %v914_v13, 0.0  ;;  %v920_v26 = vmax.f32 %v904_v14, 0.0 }
 0x148   :  { %v905_v38 = vadd.f32 %v1739_v9, %v882_v1  ;;  %v913_v22 = vadd.f32 %v1739_v9, %v890_v19  ;;  %v928_v28 = vmax.f32 %v912_v53, 0.0 }
 0x149   :  { %v923_v49 = vmax.f32 %v907_v18, 0.0  ;;  %v931_v27 = vmax.f32 %v915_v20, 0.0 }
 0x14a   :  { %v921_v24 = vmax.f32 %v905_v38, 0.0  ;;  %v929_v39 = vmax.f32 %v913_v22, 0.0 }
 0x14b   :  { %v1152_v16 = vpack.c.bf16 %v923_v49, %v922_v21  ;;  %v1172_v29 = vpack.c.bf16 %v931_v27, %v930_v23 }
 0x14c   :  { %v1147_v30 = vpack.c.bf16 %v921_v24, %v920_v26  ;;  %v1167_v5 = vpack.c.bf16 %v929_v39, %v928_v28 }
 0x14d   :  { %1176 = vst [vmem:[%s1812_s4 + $0x18] sm:$0xff] %v1152_v16   ;;  %1180 = vst [vmem:[%s1812_s4 + $0x38] sm:$0xff] %v1172_v29  }
 0x14e   :  { %1175 = vst [vmem:[%s1812_s4 + $0x10] sm:$0xff] %v1147_v30   ;;  %1179 = vst [vmem:[%s1812_s4 + $0x30] sm:$0xff] %v1167_v5  }

</bundles_post_ra>
